<compile_context>
chip_gen: v7x
topology: tpu7x:2x2x1
jax: 0.10.0
libtpu: 0.0.40
codegen_flags: <defaults>
</compile_context>

<pallas_src>
import functools

import jax
import jax.numpy as jnp
from jax.experimental import pallas as pl
from jax.experimental.pallas import tpu as pltpu

_BN_EPS = 1e-5
_LANE = 128
_W1_CHUNK = 512          # K-chunk rows of W1 streamed per manual DMA


def _round_up(n, m=_LANE):
    return ((n + m - 1) // m) * m


# ----------------------------- Pallas kernel ------------------------------- #

def _fused_mlp_softmax_kernel(
    x_ref,
    w0_ref, sc0_ref, sh0_ref,
    w1_hbm, sc1_ref, sh1_ref,
    w2_ref, sc2_ref, sh2_ref,
    w3_ref, sc3_ref, sh3_ref,
    wcl_ref, bcl_ref,
    o_ref,
    w1_buf, w1_sem,
    *, w1_chunk, w1_nchunks,
):
    """Fused 4x(Linear+BN+ReLU) + Linear + softmax.

    Hidden weights are int8 (BN folded, per-output-column quantized); they are
    dequantized by an int8->bf16 cast and the per-column quant scale is applied
    once on the f32 accumulator together with the BN/bias shift.
    """

    def w1_copy(chunk_idx, slot):
        return pltpu.make_async_copy(
            w1_hbm.at[pl.ds(chunk_idx * w1_chunk, w1_chunk), :],
            w1_buf.at[slot],
            w1_sem.at[slot],
        )

    # Kick off the first W1 chunk so it streams while layer 0 computes.
    w1_copy(0, 0).start()

    def hidden(h, w_i8, scale, shift):
        y = jnp.dot(h, w_i8.astype(jnp.bfloat16),
                    preferred_element_type=jnp.float32)
        return jnp.maximum(y * scale + shift, 0.0).astype(jnp.bfloat16)

    # ---- layer 0 (auto-DMA'd int8 weight) ----
    h = hidden(x_ref[...].astype(jnp.bfloat16),
               w0_ref[...], sc0_ref[...], sh0_ref[...])

    # ---- layer 1: manual double-buffered K-chunk stream of W1 ----
    n1 = sc1_ref.shape[-1]
    acc = jnp.zeros((h.shape[0], n1), jnp.float32)
    for c in range(w1_nchunks):                      # unrolled (6 chunks)
        slot = c & 1
        if c + 1 < w1_nchunks:
            w1_copy(c + 1, 1 - slot).start()         # prefetch next chunk
        w1_copy(c, slot).wait()
        h_chunk = h[:, c * w1_chunk:(c + 1) * w1_chunk]
        acc = acc + jnp.dot(h_chunk, w1_buf[slot].astype(jnp.bfloat16),
                            preferred_element_type=jnp.float32)
    h = jnp.maximum(acc * sc1_ref[...] + sh1_ref[...], 0.0).astype(jnp.bfloat16)

    # ---- layers 2 and 3 ----
    h = hidden(h, w2_ref[...], sc2_ref[...], sh2_ref[...])
    h = hidden(h, w3_ref[...], sc3_ref[...], sh3_ref[...])

    # ---- classifier + softmax over 128 lane-padded logits ----
    logits = jnp.dot(h, wcl_ref[...], preferred_element_type=jnp.float32)
    logits = logits + bcl_ref[...]        # padded lanes carry a -1e30 bias
    m = jnp.max(logits, axis=-1, keepdims=True)
    e = jnp.exp(logits - m)               # padded lanes -> exactly 0
    o_ref[...] = (e / jnp.sum(e, axis=-1, keepdims=True)).astype(o_ref.dtype)


def net_classify_pallas(x, layers, w_cl, b_cl):
    """x:[B,K] f32; layers: 4x (w int8 [Kp,Np], scale f32 [1,Np], shift f32 [1,Np]);
    w_cl: bf16 [Pp,128]; b_cl: f32 [1,128] (-1e30 in padded lanes).
    Returns [B,128] softmax; only the first 2 lanes are real."""
    B = x.shape[0]
    (w0, sc0, sh0), (w1, sc1, sh1), (w2, sc2, sh2), (w3, sc3, sh3) = layers
    n_cl = w_cl.shape[1]

    k1 = w1.shape[0]
    assert k1 % _W1_CHUNK == 0
    n_chunks = k1 // _W1_CHUNK

    def full_spec(a):
        return pl.BlockSpec(a.shape, lambda i: (0,) * a.ndim)

    args = (x, w0, sc0, sh0, w1, sc1, sh1, w2, sc2, sh2, w3, sc3, sh3, w_cl, b_cl)
    in_specs = [
        full_spec(x),
        full_spec(w0), full_spec(sc0), full_spec(sh0),
        pl.BlockSpec(memory_space=pl.ANY),            # W1 streamed manually
        full_spec(sc1), full_spec(sh1),
        full_spec(w2), full_spec(sc2), full_spec(sh2),
        full_spec(w3), full_spec(sc3), full_spec(sh3),
        full_spec(w_cl), full_spec(b_cl),
    ]

    kernel = functools.partial(_fused_mlp_softmax_kernel,
                               w1_chunk=_W1_CHUNK, w1_nchunks=n_chunks)

    return pl.pallas_call(
        kernel,
        out_shape=jax.ShapeDtypeStruct((B, n_cl), jnp.float32),
        grid=(1,),
        in_specs=in_specs,
        out_specs=pl.BlockSpec((B, n_cl), lambda i: (0, 0)),
        scratch_shapes=[
            pltpu.VMEM((2, _W1_CHUNK, w1.shape[1]), jnp.int8),   # W1 double buffer
            pltpu.SemaphoreType.DMA((2,)),
        ],
        compiler_params=pltpu.CompilerParams(
            vmem_limit_bytes=32 << 20,                # valid on v5e/v6e/v7x
            dimension_semantics=("arbitrary",),
        ),
    )(*args)


# --------------------------- parameter utilities ---------------------------- #

def _init_linear(key, fan_in, fan_out):
    """PyTorch-style nn.Linear init: U(-1/sqrt(fan_in), 1/sqrt(fan_in))."""
    kw, kb = jax.random.split(key)
    bound = 1.0 / jnp.sqrt(jnp.float32(fan_in))
    w = jax.random.uniform(kw, (fan_in, fan_out), jnp.float32, -bound, bound)
    b = jax.random.uniform(kb, (fan_out,), jnp.float32, -bound, bound)
    return w, b


def _init_bn(key, num_features):
    """BatchNorm1d params with slight deterministic perturbation of defaults."""
    kg, kb, km, kv = jax.random.split(key, 4)
    gamma = 1.0 + 0.05 * jax.random.normal(kg, (num_features,), jnp.float32)
    beta = 0.05 * jax.random.normal(kb, (num_features,), jnp.float32)
    running_mean = 0.05 * jax.random.normal(km, (num_features,), jnp.float32)
    running_var = 1.0 + 0.05 * jax.random.uniform(kv, (num_features,), jnp.float32)
    return gamma, beta, running_mean, running_var


def _quantize_per_col(w):
    """Symmetric per-output-column int8 quantization."""
    amax = jnp.max(jnp.abs(w), axis=0)
    scale = jnp.where(amax > 0.0, amax / 127.0, 1.0)   # zero cols -> scale 1
    q = jnp.clip(jnp.round(w / scale[None, :]), -127.0, 127.0).astype(jnp.int8)
    return q, scale.astype(jnp.float32)


def _fold_pad_quant_layer(w, b, gamma, beta, mean, var, in_pad, out_pad):
    """Fold eval-mode BN into the weight, zero-pad, then int8-quantize."""
    bn_scale = gamma / jnp.sqrt(var + _BN_EPS)
    w_folded = w * bn_scale[None, :]
    shift = (b - mean) * bn_scale + beta
    fi, fo = w.shape
    w_p = jnp.zeros((in_pad, out_pad), jnp.float32).at[:fi, :fo].set(w_folded)
    q, qscale = _quantize_per_col(w_p)
    sc = qscale.reshape(1, out_pad)
    # padded cols keep shift == 0 so ReLU pins them to exactly 0 downstream
    sh = jnp.zeros((1, out_pad), jnp.float32).at[0, :fo].set(shift)
    return q, sc, sh


def init_net_classify(key, input_num, prefinal_num):
    dims = [(input_num, 3000), (3000, 1000), (1000, 500), (500, prefinal_num)]
    out_pads = [_round_up(fo) for _, fo in dims]       # 3072, 1024, 512, 128
    in_pads = [input_num] + out_pads[:-1]              # x itself stays unpadded

    keys = jax.random.split(key, 2 * len(dims) + 1)
    layers = []
    for i, (fi, fo) in enumerate(dims):
        w, b = _init_linear(keys[2 * i], fi, fo)
        g, bt, m, v = _init_bn(keys[2 * i + 1], fo)
        layers.append(_fold_pad_quant_layer(w, b, g, bt, m, v,
                                            in_pads[i], out_pads[i]))

    # classifier: pad prefinal->128 rows and 2->128 output lanes; padded
    # logits get a -1e30 bias so softmax over 128 lanes == softmax over 2.
    w_cl, b_cl = _init_linear(keys[-1], prefinal_num, 2)
    p_pad, n_pad = out_pads[-1], _LANE
    w_cl_p = jnp.zeros((p_pad, n_pad), jnp.float32).at[:prefinal_num, :2].set(w_cl)
    b_cl_p = jnp.full((1, n_pad), -1e30, jnp.float32).at[0, :2].set(b_cl)
    return {
        "layers": layers,
        "w_cl": w_cl_p.astype(jnp.bfloat16),
        "b_cl": b_cl_p,
    }


# -------------------------------- forward ----------------------------------- #

@jax.jit
def net_classify_forward(params, x):
    y_full = net_classify_pallas(x, params["layers"],
                                 params["w_cl"], params["b_cl"])
    return y_full[:, :2]      # drop padded softmax lanes (exactly zero)


# pure-JAX reference using the same folded / padded / quantized parameters
def net_classify_ref(params, x):
    h = x.astype(jnp.bfloat16)
    for w_q, sc, sh in params["layers"]:
        y = jnp.dot(h, w_q.astype(jnp.bfloat16),
                    preferred_element_type=jnp.float32)
        h = jnp.maximum(y * sc + sh, 0.0).astype(jnp.bfloat16)
    logits = jnp.dot(h, params["w_cl"], preferred_element_type=jnp.float32)
    logits = logits + params["b_cl"]
    m = jnp.max(logits, axis=-1, keepdims=True)
    e = jnp.exp(logits - m)
    return (e / jnp.sum(e, axis=-1, keepdims=True))[:, :2]


if __name__ == "__main__":
    INPUT_NUM = 64      # constructor arg `input_num`
    PREFINAL_NUM = 32   # constructor arg `prefinal_num`
    BATCH = 8

    key = jax.random.PRNGKey(0)
    k_params, k_x = jax.random.split(key)

    params = init_net_classify(k_params, INPUT_NUM, PREFINAL_NUM)
    x = jax.random.normal(k_x, (BATCH, INPUT_NUM), jnp.float32)

    y = net_classify_forward(params, x)
    y = jax.block_until_ready(y)

    y_ref = net_classify_ref(params, x)
    assert y.shape == (BATCH, 2)
    assert jnp.allclose(jnp.sum(y, axis=1), 1.0, atol=1e-5)
    assert jnp.allclose(y, y_ref, atol=2e-3, rtol=2e-3)

    print("KERNEL_OK")
</pallas_src>

<mosaic_0001>
module attributes {stable_mosaic.version = 11 : i64} {
  func.func @_fused_mlp_softmax_kernel(%arg0: i32, %arg1: memref<8x64xf32, #tpu.memory_space<vmem>>, %arg2: memref<64x3072xi8, #tpu.memory_space<vmem>>, %arg3: memref<1x3072xf32, #tpu.memory_space<vmem>>, %arg4: memref<1x3072xf32, #tpu.memory_space<vmem>>, %arg5: memref<3072x1024xi8, #tpu.memory_space<any>>, %arg6: memref<1x1024xf32, #tpu.memory_space<vmem>>, %arg7: memref<1x1024xf32, #tpu.memory_space<vmem>>, %arg8: memref<1024x512xi8, #tpu.memory_space<vmem>>, %arg9: memref<1x512xf32, #tpu.memory_space<vmem>>, %arg10: memref<1x512xf32, #tpu.memory_space<vmem>>, %arg11: memref<512x128xi8, #tpu.memory_space<vmem>>, %arg12: memref<1x128xf32, #tpu.memory_space<vmem>>, %arg13: memref<1x128xf32, #tpu.memory_space<vmem>>, %arg14: memref<128x128xbf16, #tpu.memory_space<vmem>>, %arg15: memref<1x128xf32, #tpu.memory_space<vmem>>, %arg16: memref<8x128xf32, #tpu.memory_space<vmem>>, %arg17: memref<2x512x1024xi8, #tpu.memory_space<vmem>>, %arg18: memref<2x!tpu.dma_semaphore, #tpu.memory_space<semaphore_mem>>) attributes {dimension_semantics = [#tpu.dimension_semantics<arbitrary>], iteration_bounds = array<i64: 1>, scalar_prefetch = 0 : i64, scratch_operands = 2 : i64, tpu.core_type = #tpu.core_type<tc>, window_params = [{pipeline_mode = #tpu.pipeline_mode<synchronous>, transform_indices = @transform_0, window_bounds = array<i64: 8, 64>}, {pipeline_mode = #tpu.pipeline_mode<synchronous>, transform_indices = @transform_1, window_bounds = array<i64: 64, 3072>}, {pipeline_mode = #tpu.pipeline_mode<synchronous>, transform_indices = @transform_2, window_bounds = array<i64: 1, 3072>}, {pipeline_mode = #tpu.pipeline_mode<synchronous>, transform_indices = @transform_3, window_bounds = array<i64: 1, 3072>}, {}, {pipeline_mode = #tpu.pipeline_mode<synchronous>, transform_indices = @transform_5, window_bounds = array<i64: 1, 1024>}, {pipeline_mode = #tpu.pipeline_mode<synchronous>, transform_indices = @transform_6, window_bounds = array<i64: 1, 1024>}, {pipeline_mode = #tpu.pipeline_mode<synchronous>, transform_indices = @transform_7, window_bounds = array<i64: 1024, 512>}, {pipeline_mode = #tpu.pipeline_mode<synchronous>, transform_indices = @transform_8, window_bounds = array<i64: 1, 512>}, {pipeline_mode = #tpu.pipeline_mode<synchronous>, transform_indices = @transform_9, window_bounds = array<i64: 1, 512>}, {pipeline_mode = #tpu.pipeline_mode<synchronous>, transform_indices = @transform_10, window_bounds = array<i64: 512, 128>}, {pipeline_mode = #tpu.pipeline_mode<synchronous>, transform_indices = @transform_11, window_bounds = array<i64: 1, 128>}, {pipeline_mode = #tpu.pipeline_mode<synchronous>, transform_indices = @transform_12, window_bounds = array<i64: 1, 128>}, {pipeline_mode = #tpu.pipeline_mode<synchronous>, transform_indices = @transform_13, window_bounds = array<i64: 128, 128>}, {pipeline_mode = #tpu.pipeline_mode<synchronous>, transform_indices = @transform_14, window_bounds = array<i64: 1, 128>}, {pipeline_mode = #tpu.pipeline_mode<synchronous>, transform_indices = @transform_15, window_bounds = array<i64: 8, 128>}]} {
    %c0_i32 = arith.constant 0 : i32
    %c0_i32_0 = arith.constant 0 : i32
    %c0_i32_1 = arith.constant 0 : i32
    %c0_i32_2 = arith.constant 0 : i32
    %0 = tpu.memref_slice %arg5[%c0_i32_1, %c0_i32_2] : memref<3072x1024xi8, #tpu.memory_space<any>> -> memref<512x1024xi8, #tpu.memory_space<any>>
    %c0_i32_3 = arith.constant 0 : i32
    %c0_i32_4 = arith.constant 0 : i32
    %1 = tpu.memref_slice %arg17[%c0_i32, %c0_i32_3, %c0_i32_4] : memref<2x512x1024xi8, #tpu.memory_space<vmem>> -> memref<1x512x1024xi8, #tpu.memory_space<vmem>>
    %2 = tpu.memref_squeeze %1 : memref<1x512x1024xi8, #tpu.memory_space<vmem>> -> memref<512x1024xi8, #tpu.memory_space<vmem>>
    %3 = tpu.memref_slice %arg18[%c0_i32_0] : memref<2x!tpu.dma_semaphore, #tpu.memory_space<semaphore_mem>> -> memref<1x!tpu.dma_semaphore, #tpu.memory_space<semaphore_mem>>
    %4 = tpu.memref_squeeze %3 : memref<1x!tpu.dma_semaphore, #tpu.memory_space<semaphore_mem>> -> memref<!tpu.dma_semaphore, #tpu.memory_space<semaphore_mem>>
    tpu.enqueue_dma source(%0 : memref<512x1024xi8, #tpu.memory_space<any>>) target(%2 : memref<512x1024xi8, #tpu.memory_space<vmem>>) target_semaphore(%4 : memref<!tpu.dma_semaphore, #tpu.memory_space<semaphore_mem>>)
    %c0 = arith.constant 0 : index
    %c0_5 = arith.constant 0 : index
    %5 = vector.load %arg1[%c0, %c0_5] : memref<8x64xf32, #tpu.memory_space<vmem>>, vector<8x64xf32>
    %6 = arith.truncf %5 : vector<8x64xf32> to vector<8x64xbf16>
    %c0_6 = arith.constant 0 : index
    %c0_7 = arith.constant 0 : index
    %7 = vector.load %arg2[%c0_6, %c0_7] : memref<64x3072xi8, #tpu.memory_space<vmem>>, vector<64x3072xi8>
    %c0_8 = arith.constant 0 : index
    %c0_9 = arith.constant 0 : index
    %8 = vector.load %arg3[%c0_8, %c0_9] : memref<1x3072xf32, #tpu.memory_space<vmem>>, vector<1x3072xf32>
    %c0_10 = arith.constant 0 : index
    %c0_11 = arith.constant 0 : index
    %9 = vector.load %arg4[%c0_10, %c0_11] : memref<1x3072xf32, #tpu.memory_space<vmem>>, vector<1x3072xf32>
    %10 = arith.sitofp %7 : vector<64x3072xi8> to vector<64x3072xbf16>
    %cst = arith.constant dense<0.000000e+00> : vector<8x3072xf32>
    %11 = tpu.matmul %6, %10, %cst {dimension_numbers = #tpu.dot_dimension_numbers<[1], [0], [0], [1], [0, 0, 1, 1], [], []>} : vector<8x64xbf16>, vector<64x3072xbf16>, vector<8x3072xf32> -> vector<8x3072xf32>
    %12 = vector.broadcast %8 : vector<1x3072xf32> to vector<8x3072xf32>
    %13 = arith.mulf %11, %12 : vector<8x3072xf32>
    %14 = vector.broadcast %9 : vector<1x3072xf32> to vector<8x3072xf32>
    %15 = arith.addf %13, %14 : vector<8x3072xf32>
    %cst_12 = arith.constant 0.000000e+00 : f32
    %16 = vector.broadcast %cst_12 : f32 to vector<8x3072xf32>
    %17 = arith.maximumf %15, %16 : vector<8x3072xf32>
    %18 = arith.truncf %17 : vector<8x3072xf32> to vector<8x3072xbf16>
    %cst_13 = arith.constant 0.000000e+00 : f32
    %19 = vector.broadcast %cst_13 : f32 to vector<8x1024xf32>
    %c1_i32 = arith.constant 1 : i32
    %c1_i32_14 = arith.constant 1 : i32
    %c512_i32 = arith.constant 512 : i32
    %c0_i32_15 = arith.constant 0 : i32
    %20 = tpu.memref_slice %arg5[%c512_i32, %c0_i32_15] : memref<3072x1024xi8, #tpu.memory_space<any>> -> memref<512x1024xi8, #tpu.memory_space<any>>
    %c0_i32_16 = arith.constant 0 : i32
    %c0_i32_17 = arith.constant 0 : i32
    %21 = tpu.memref_slice %arg17[%c1_i32, %c0_i32_16, %c0_i32_17] : memref<2x512x1024xi8, #tpu.memory_space<vmem>> -> memref<1x512x1024xi8, #tpu.memory_space<vmem>>
    %22 = tpu.memref_squeeze %21 : memref<1x512x1024xi8, #tpu.memory_space<vmem>> -> memref<512x1024xi8, #tpu.memory_space<vmem>>
    %23 = tpu.memref_slice %arg18[%c1_i32_14] : memref<2x!tpu.dma_semaphore, #tpu.memory_space<semaphore_mem>> -> memref<1x!tpu.dma_semaphore, #tpu.memory_space<semaphore_mem>>
    %24 = tpu.memref_squeeze %23 : memref<1x!tpu.dma_semaphore, #tpu.memory_space<semaphore_mem>> -> memref<!tpu.dma_semaphore, #tpu.memory_space<semaphore_mem>>
    tpu.enqueue_dma source(%20 : memref<512x1024xi8, #tpu.memory_space<any>>) target(%22 : memref<512x1024xi8, #tpu.memory_space<vmem>>) target_semaphore(%24 : memref<!tpu.dma_semaphore, #tpu.memory_space<semaphore_mem>>)
    %c0_i32_18 = arith.constant 0 : i32
    %c0_i32_19 = arith.constant 0 : i32
    %c0_i32_20 = arith.constant 0 : i32
    %c0_i32_21 = arith.constant 0 : i32
    %25 = tpu.memref_slice %arg5[%c0_i32_20, %c0_i32_21] : memref<3072x1024xi8, #tpu.memory_space<any>> -> memref<512x1024xi8, #tpu.memory_space<any>>
    %c0_i32_22 = arith.constant 0 : i32
    %c0_i32_23 = arith.constant 0 : i32
    %26 = tpu.memref_slice %arg17[%c0_i32_18, %c0_i32_22, %c0_i32_23] : memref<2x512x1024xi8, #tpu.memory_space<vmem>> -> memref<1x512x1024xi8, #tpu.memory_space<vmem>>
    %27 = tpu.memref_squeeze %26 : memref<1x512x1024xi8, #tpu.memory_space<vmem>> -> memref<512x1024xi8, #tpu.memory_space<vmem>>
    %28 = tpu.memref_slice %arg18[%c0_i32_19] : memref<2x!tpu.dma_semaphore, #tpu.memory_space<semaphore_mem>> -> memref<1x!tpu.dma_semaphore, #tpu.memory_space<semaphore_mem>>
    %29 = tpu.memref_squeeze %28 : memref<1x!tpu.dma_semaphore, #tpu.memory_space<semaphore_mem>> -> memref<!tpu.dma_semaphore, #tpu.memory_space<semaphore_mem>>
    tpu.wait_dma2 semaphore(%29 : memref<!tpu.dma_semaphore, #tpu.memory_space<semaphore_mem>>) src(%25 : memref<512x1024xi8, #tpu.memory_space<any>>) dst(%27 : memref<512x1024xi8, #tpu.memory_space<vmem>>)
    %30 = vector.extract_strided_slice %18 {offsets = [0, 0], sizes = [8, 512], strides = [1, 1]} : vector<8x3072xbf16> to vector<8x512xbf16>
    %c0_24 = arith.constant 0 : index
    %c0_25 = arith.constant 0 : index
    %c0_26 = arith.constant 0 : index
    %31 = vector.load %arg17[%c0_24, %c0_25, %c0_26] : memref<2x512x1024xi8, #tpu.memory_space<vmem>>, vector<1x512x1024xi8>
    %32 = vector.shape_cast %31 : vector<1x512x1024xi8> to vector<512x1024xi8>
    %33 = arith.sitofp %32 : vector<512x1024xi8> to vector<512x1024xbf16>
    %cst_27 = arith.constant dense<0.000000e+00> : vector<8x1024xf32>
    %34 = tpu.matmul %30, %33, %cst_27 {dimension_numbers = #tpu.dot_dimension_numbers<[1], [0], [0], [1], [0, 0, 1, 1], [], []>} : vector<8x512xbf16>, vector<512x1024xbf16>, vector<8x1024xf32> -> vector<8x1024xf32>
    %35 = arith.addf %19, %34 : vector<8x1024xf32>
    %c0_i32_28 = arith.constant 0 : i32
    %c0_i32_29 = arith.constant 0 : i32
    %c1024_i32 = arith.constant 1024 : i32
    %c0_i32_30 = arith.constant 0 : i32
    %36 = tpu.memref_slice %arg5[%c1024_i32, %c0_i32_30] : memref<3072x1024xi8, #tpu.memory_space<any>> -> memref<512x1024xi8, #tpu.memory_space<any>>
    %c0_i32_31 = arith.constant 0 : i32
    %c0_i32_32 = arith.constant 0 : i32
    %37 = tpu.memref_slice %arg17[%c0_i32_28, %c0_i32_31, %c0_i32_32] : memref<2x512x1024xi8, #tpu.memory_space<vmem>> -> memref<1x512x1024xi8, #tpu.memory_space<vmem>>
    %38 = tpu.memref_squeeze %37 : memref<1x512x1024xi8, #tpu.memory_space<vmem>> -> memref<512x1024xi8, #tpu.memory_space<vmem>>
    %39 = tpu.memref_slice %arg18[%c0_i32_29] : memref<2x!tpu.dma_semaphore, #tpu.memory_space<semaphore_mem>> -> memref<1x!tpu.dma_semaphore, #tpu.memory_space<semaphore_mem>>
    %40 = tpu.memref_squeeze %39 : memref<1x!tpu.dma_semaphore, #tpu.memory_space<semaphore_mem>> -> memref<!tpu.dma_semaphore, #tpu.memory_space<semaphore_mem>>
    tpu.enqueue_dma source(%36 : memref<512x1024xi8, #tpu.memory_space<any>>) target(%38 : memref<512x1024xi8, #tpu.memory_space<vmem>>) target_semaphore(%40 : memref<!tpu.dma_semaphore, #tpu.memory_space<semaphore_mem>>)
    %c1_i32_33 = arith.constant 1 : i32
    %c1_i32_34 = arith.constant 1 : i32
    %c512_i32_35 = arith.constant 512 : i32
    %c0_i32_36 = arith.constant 0 : i32
    %41 = tpu.memref_slice %arg5[%c512_i32_35, %c0_i32_36] : memref<3072x1024xi8, #tpu.memory_space<any>> -> memref<512x1024xi8, #tpu.memory_space<any>>
    %c0_i32_37 = arith.constant 0 : i32
    %c0_i32_38 = arith.constant 0 : i32
    %42 = tpu.memref_slice %arg17[%c1_i32_33, %c0_i32_37, %c0_i32_38] : memref<2x512x1024xi8, #tpu.memory_space<vmem>> -> memref<1x512x1024xi8, #tpu.memory_space<vmem>>
    %43 = tpu.memref_squeeze %42 : memref<1x512x1024xi8, #tpu.memory_space<vmem>> -> memref<512x1024xi8, #tpu.memory_space<vmem>>
    %44 = tpu.memref_slice %arg18[%c1_i32_34] : memref<2x!tpu.dma_semaphore, #tpu.memory_space<semaphore_mem>> -> memref<1x!tpu.dma_semaphore, #tpu.memory_space<semaphore_mem>>
    %45 = tpu.memref_squeeze %44 : memref<1x!tpu.dma_semaphore, #tpu.memory_space<semaphore_mem>> -> memref<!tpu.dma_semaphore, #tpu.memory_space<semaphore_mem>>
    tpu.wait_dma2 semaphore(%45 : memref<!tpu.dma_semaphore, #tpu.memory_space<semaphore_mem>>) src(%41 : memref<512x1024xi8, #tpu.memory_space<any>>) dst(%43 : memref<512x1024xi8, #tpu.memory_space<vmem>>)
    %46 = vector.extract_strided_slice %18 {offsets = [0, 512], sizes = [8, 512], strides = [1, 1]} : vector<8x3072xbf16> to vector<8x512xbf16>
    %c1 = arith.constant 1 : index
    %c0_39 = arith.constant 0 : index
    %c0_40 = arith.constant 0 : index
    %47 = vector.load %arg17[%c1, %c0_39, %c0_40] : memref<2x512x1024xi8, #tpu.memory_space<vmem>>, vector<1x512x1024xi8>
    %48 = vector.shape_cast %47 : vector<1x512x1024xi8> to vector<512x1024xi8>
    %49 = arith.sitofp %48 : vector<512x1024xi8> to vector<512x1024xbf16>
    %cst_41 = arith.constant dense<0.000000e+00> : vector<8x1024xf32>
    %50 = tpu.matmul %46, %49, %cst_41 {dimension_numbers = #tpu.dot_dimension_numbers<[1], [0], [0], [1], [0, 0, 1, 1], [], []>} : vector<8x512xbf16>, vector<512x1024xbf16>, vector<8x1024xf32> -> vector<8x1024xf32>
    %51 = arith.addf %35, %50 : vector<8x1024xf32>
    %c1_i32_42 = arith.constant 1 : i32
    %c1_i32_43 = arith.constant 1 : i32
    %c1536_i32 = arith.constant 1536 : i32
    %c0_i32_44 = arith.constant 0 : i32
    %52 = tpu.memref_slice %arg5[%c1536_i32, %c0_i32_44] : memref<3072x1024xi8, #tpu.memory_space<any>> -> memref<512x1024xi8, #tpu.memory_space<any>>
    %c0_i32_45 = arith.constant 0 : i32
    %c0_i32_46 = arith.constant 0 : i32
    %53 = tpu.memref_slice %arg17[%c1_i32_42, %c0_i32_45, %c0_i32_46] : memref<2x512x1024xi8, #tpu.memory_space<vmem>> -> memref<1x512x1024xi8, #tpu.memory_space<vmem>>
    %54 = tpu.memref_squeeze %53 : memref<1x512x1024xi8, #tpu.memory_space<vmem>> -> memref<512x1024xi8, #tpu.memory_space<vmem>>
    %55 = tpu.memref_slice %arg18[%c1_i32_43] : memref<2x!tpu.dma_semaphore, #tpu.memory_space<semaphore_mem>> -> memref<1x!tpu.dma_semaphore, #tpu.memory_space<semaphore_mem>>
    %56 = tpu.memref_squeeze %55 : memref<1x!tpu.dma_semaphore, #tpu.memory_space<semaphore_mem>> -> memref<!tpu.dma_semaphore, #tpu.memory_space<semaphore_mem>>
    tpu.enqueue_dma source(%52 : memref<512x1024xi8, #tpu.memory_space<any>>) target(%54 : memref<512x1024xi8, #tpu.memory_space<vmem>>) target_semaphore(%56 : memref<!tpu.dma_semaphore, #tpu.memory_space<semaphore_mem>>)
    %c0_i32_47 = arith.constant 0 : i32
    %c0_i32_48 = arith.constant 0 : i32
    %c1024_i32_49 = arith.constant 1024 : i32
    %c0_i32_50 = arith.constant 0 : i32
    %57 = tpu.memref_slice %arg5[%c1024_i32_49, %c0_i32_50] : memref<3072x1024xi8, #tpu.memory_space<any>> -> memref<512x1024xi8, #tpu.memory_space<any>>
    %c0_i32_51 = arith.constant 0 : i32
    %c0_i32_52 = arith.constant 0 : i32
    %58 = tpu.memref_slice %arg17[%c0_i32_47, %c0_i32_51, %c0_i32_52] : memref<2x512x1024xi8, #tpu.memory_space<vmem>> -> memref<1x512x1024xi8, #tpu.memory_space<vmem>>
    %59 = tpu.memref_squeeze %58 : memref<1x512x1024xi8, #tpu.memory_space<vmem>> -> memref<512x1024xi8, #tpu.memory_space<vmem>>
    %60 = tpu.memref_slice %arg18[%c0_i32_48] : memref<2x!tpu.dma_semaphore, #tpu.memory_space<semaphore_mem>> -> memref<1x!tpu.dma_semaphore, #tpu.memory_space<semaphore_mem>>
    %61 = tpu.memref_squeeze %60 : memref<1x!tpu.dma_semaphore, #tpu.memory_space<semaphore_mem>> -> memref<!tpu.dma_semaphore, #tpu.memory_space<semaphore_mem>>
    tpu.wait_dma2 semaphore(%61 : memref<!tpu.dma_semaphore, #tpu.memory_space<semaphore_mem>>) src(%57 : memref<512x1024xi8, #tpu.memory_space<any>>) dst(%59 : memref<512x1024xi8, #tpu.memory_space<vmem>>)
    %62 = vector.extract_strided_slice %18 {offsets = [0, 1024], sizes = [8, 512], strides = [1, 1]} : vector<8x3072xbf16> to vector<8x512xbf16>
    %c0_53 = arith.constant 0 : index
    %c0_54 = arith.constant 0 : index
    %c0_55 = arith.constant 0 : index
    %63 = vector.load %arg17[%c0_53, %c0_54, %c0_55] : memref<2x512x1024xi8, #tpu.memory_space<vmem>>, vector<1x512x1024xi8>
    %64 = vector.shape_cast %63 : vector<1x512x1024xi8> to vector<512x1024xi8>
    %65 = arith.sitofp %64 : vector<512x1024xi8> to vector<512x1024xbf16>
    %cst_56 = arith.constant dense<0.000000e+00> : vector<8x1024xf32>
    %66 = tpu.matmul %62, %65, %cst_56 {dimension_numbers = #tpu.dot_dimension_numbers<[1], [0], [0], [1], [0, 0, 1, 1], [], []>} : vector<8x512xbf16>, vector<512x1024xbf16>, vector<8x1024xf32> -> vector<8x1024xf32>
    %67 = arith.addf %51, %66 : vector<8x1024xf32>
    %c0_i32_57 = arith.constant 0 : i32
    %c0_i32_58 = arith.constant 0 : i32
    %c2048_i32 = arith.constant 2048 : i32
    %c0_i32_59 = arith.constant 0 : i32
    %68 = tpu.memref_slice %arg5[%c2048_i32, %c0_i32_59] : memref<3072x1024xi8, #tpu.memory_space<any>> -> memref<512x1024xi8, #tpu.memory_space<any>>
    %c0_i32_60 = arith.constant 0 : i32
    %c0_i32_61 = arith.constant 0 : i32
    %69 = tpu.memref_slice %arg17[%c0_i32_57, %c0_i32_60, %c0_i32_61] : memref<2x512x1024xi8, #tpu.memory_space<vmem>> -> memref<1x512x1024xi8, #tpu.memory_space<vmem>>
    %70 = tpu.memref_squeeze %69 : memref<1x512x1024xi8, #tpu.memory_space<vmem>> -> memref<512x1024xi8, #tpu.memory_space<vmem>>
    %71 = tpu.memref_slice %arg18[%c0_i32_58] : memref<2x!tpu.dma_semaphore, #tpu.memory_space<semaphore_mem>> -> memref<1x!tpu.dma_semaphore, #tpu.memory_space<semaphore_mem>>
    %72 = tpu.memref_squeeze %71 : memref<1x!tpu.dma_semaphore, #tpu.memory_space<semaphore_mem>> -> memref<!tpu.dma_semaphore, #tpu.memory_space<semaphore_mem>>
    tpu.enqueue_dma source(%68 : memref<512x1024xi8, #tpu.memory_space<any>>) target(%70 : memref<512x1024xi8, #tpu.memory_space<vmem>>) target_semaphore(%72 : memref<!tpu.dma_semaphore, #tpu.memory_space<semaphore_mem>>)
    %c1_i32_62 = arith.constant 1 : i32
    %c1_i32_63 = arith.constant 1 : i32
    %c1536_i32_64 = arith.constant 1536 : i32
    %c0_i32_65 = arith.constant 0 : i32
    %73 = tpu.memref_slice %arg5[%c1536_i32_64, %c0_i32_65] : memref<3072x1024xi8, #tpu.memory_space<any>> -> memref<512x1024xi8, #tpu.memory_space<any>>
    %c0_i32_66 = arith.constant 0 : i32
    %c0_i32_67 = arith.constant 0 : i32
    %74 = tpu.memref_slice %arg17[%c1_i32_62, %c0_i32_66, %c0_i32_67] : memref<2x512x1024xi8, #tpu.memory_space<vmem>> -> memref<1x512x1024xi8, #tpu.memory_space<vmem>>
    %75 = tpu.memref_squeeze %74 : memref<1x512x1024xi8, #tpu.memory_space<vmem>> -> memref<512x1024xi8, #tpu.memory_space<vmem>>
    %76 = tpu.memref_slice %arg18[%c1_i32_63] : memref<2x!tpu.dma_semaphore, #tpu.memory_space<semaphore_mem>> -> memref<1x!tpu.dma_semaphore, #tpu.memory_space<semaphore_mem>>
    %77 = tpu.memref_squeeze %76 : memref<1x!tpu.dma_semaphore, #tpu.memory_space<semaphore_mem>> -> memref<!tpu.dma_semaphore, #tpu.memory_space<semaphore_mem>>
    tpu.wait_dma2 semaphore(%77 : memref<!tpu.dma_semaphore, #tpu.memory_space<semaphore_mem>>) src(%73 : memref<512x1024xi8, #tpu.memory_space<any>>) dst(%75 : memref<512x1024xi8, #tpu.memory_space<vmem>>)
    %78 = vector.extract_strided_slice %18 {offsets = [0, 1536], sizes = [8, 512], strides = [1, 1]} : vector<8x3072xbf16> to vector<8x512xbf16>
    %c1_68 = arith.constant 1 : index
    %c0_69 = arith.constant 0 : index
    %c0_70 = arith.constant 0 : index
    %79 = vector.load %arg17[%c1_68, %c0_69, %c0_70] : memref<2x512x1024xi8, #tpu.memory_space<vmem>>, vector<1x512x1024xi8>
    %80 = vector.shape_cast %79 : vector<1x512x1024xi8> to vector<512x1024xi8>
    %81 = arith.sitofp %80 : vector<512x1024xi8> to vector<512x1024xbf16>
    %cst_71 = arith.constant dense<0.000000e+00> : vector<8x1024xf32>
    %82 = tpu.matmul %78, %81, %cst_71 {dimension_numbers = #tpu.dot_dimension_numbers<[1], [0], [0], [1], [0, 0, 1, 1], [], []>} : vector<8x512xbf16>, vector<512x1024xbf16>, vector<8x1024xf32> -> vector<8x1024xf32>
    %83 = arith.addf %67, %82 : vector<8x1024xf32>
    %c1_i32_72 = arith.constant 1 : i32
    %c1_i32_73 = arith.constant 1 : i32
    %c2560_i32 = arith.constant 2560 : i32
    %c0_i32_74 = arith.constant 0 : i32
    %84 = tpu.memref_slice %arg5[%c2560_i32, %c0_i32_74] : memref<3072x1024xi8, #tpu.memory_space<any>> -> memref<512x1024xi8, #tpu.memory_space<any>>
    %c0_i32_75 = arith.constant 0 : i32
    %c0_i32_76 = arith.constant 0 : i32
    %85 = tpu.memref_slice %arg17[%c1_i32_72, %c0_i32_75, %c0_i32_76] : memref<2x512x1024xi8, #tpu.memory_space<vmem>> -> memref<1x512x1024xi8, #tpu.memory_space<vmem>>
    %86 = tpu.memref_squeeze %85 : memref<1x512x1024xi8, #tpu.memory_space<vmem>> -> memref<512x1024xi8, #tpu.memory_space<vmem>>
    %87 = tpu.memref_slice %arg18[%c1_i32_73] : memref<2x!tpu.dma_semaphore, #tpu.memory_space<semaphore_mem>> -> memref<1x!tpu.dma_semaphore, #tpu.memory_space<semaphore_mem>>
    %88 = tpu.memref_squeeze %87 : memref<1x!tpu.dma_semaphore, #tpu.memory_space<semaphore_mem>> -> memref<!tpu.dma_semaphore, #tpu.memory_space<semaphore_mem>>
    tpu.enqueue_dma source(%84 : memref<512x1024xi8, #tpu.memory_space<any>>) target(%86 : memref<512x1024xi8, #tpu.memory_space<vmem>>) target_semaphore(%88 : memref<!tpu.dma_semaphore, #tpu.memory_space<semaphore_mem>>)
    %c0_i32_77 = arith.constant 0 : i32
    %c0_i32_78 = arith.constant 0 : i32
    %c2048_i32_79 = arith.constant 2048 : i32
    %c0_i32_80 = arith.constant 0 : i32
    %89 = tpu.memref_slice %arg5[%c2048_i32_79, %c0_i32_80] : memref<3072x1024xi8, #tpu.memory_space<any>> -> memref<512x1024xi8, #tpu.memory_space<any>>
    %c0_i32_81 = arith.constant 0 : i32
    %c0_i32_82 = arith.constant 0 : i32
    %90 = tpu.memref_slice %arg17[%c0_i32_77, %c0_i32_81, %c0_i32_82] : memref<2x512x1024xi8, #tpu.memory_space<vmem>> -> memref<1x512x1024xi8, #tpu.memory_space<vmem>>
    %91 = tpu.memref_squeeze %90 : memref<1x512x1024xi8, #tpu.memory_space<vmem>> -> memref<512x1024xi8, #tpu.memory_space<vmem>>
    %92 = tpu.memref_slice %arg18[%c0_i32_78] : memref<2x!tpu.dma_semaphore, #tpu.memory_space<semaphore_mem>> -> memref<1x!tpu.dma_semaphore, #tpu.memory_space<semaphore_mem>>
    %93 = tpu.memref_squeeze %92 : memref<1x!tpu.dma_semaphore, #tpu.memory_space<semaphore_mem>> -> memref<!tpu.dma_semaphore, #tpu.memory_space<semaphore_mem>>
    tpu.wait_dma2 semaphore(%93 : memref<!tpu.dma_semaphore, #tpu.memory_space<semaphore_mem>>) src(%89 : memref<512x1024xi8, #tpu.memory_space<any>>) dst(%91 : memref<512x1024xi8, #tpu.memory_space<vmem>>)
    %94 = vector.extract_strided_slice %18 {offsets = [0, 2048], sizes = [8, 512], strides = [1, 1]} : vector<8x3072xbf16> to vector<8x512xbf16>
    %c0_83 = arith.constant 0 : index
    %c0_84 = arith.constant 0 : index
    %c0_85 = arith.constant 0 : index
    %95 = vector.load %arg17[%c0_83, %c0_84, %c0_85] : memref<2x512x1024xi8, #tpu.memory_space<vmem>>, vector<1x512x1024xi8>
    %96 = vector.shape_cast %95 : vector<1x512x1024xi8> to vector<512x1024xi8>
    %97 = arith.sitofp %96 : vector<512x1024xi8> to vector<512x1024xbf16>
    %cst_86 = arith.constant dense<0.000000e+00> : vector<8x1024xf32>
    %98 = tpu.matmul %94, %97, %cst_86 {dimension_numbers = #tpu.dot_dimension_numbers<[1], [0], [0], [1], [0, 0, 1, 1], [], []>} : vector<8x512xbf16>, vector<512x1024xbf16>, vector<8x1024xf32> -> vector<8x1024xf32>
    %99 = arith.addf %83, %98 : vector<8x1024xf32>
    %c1_i32_87 = arith.constant 1 : i32
    %c1_i32_88 = arith.constant 1 : i32
    %c2560_i32_89 = arith.constant 2560 : i32
    %c0_i32_90 = arith.constant 0 : i32
    %100 = tpu.memref_slice %arg5[%c2560_i32_89, %c0_i32_90] : memref<3072x1024xi8, #tpu.memory_space<any>> -> memref<512x1024xi8, #tpu.memory_space<any>>
    %c0_i32_91 = arith.constant 0 : i32
    %c0_i32_92 = arith.constant 0 : i32
    %101 = tpu.memref_slice %arg17[%c1_i32_87, %c0_i32_91, %c0_i32_92] : memref<2x512x1024xi8, #tpu.memory_space<vmem>> -> memref<1x512x1024xi8, #tpu.memory_space<vmem>>
    %102 = tpu.memref_squeeze %101 : memref<1x512x1024xi8, #tpu.memory_space<vmem>> -> memref<512x1024xi8, #tpu.memory_space<vmem>>
    %103 = tpu.memref_slice %arg18[%c1_i32_88] : memref<2x!tpu.dma_semaphore, #tpu.memory_space<semaphore_mem>> -> memref<1x!tpu.dma_semaphore, #tpu.memory_space<semaphore_mem>>
    %104 = tpu.memref_squeeze %103 : memref<1x!tpu.dma_semaphore, #tpu.memory_space<semaphore_mem>> -> memref<!tpu.dma_semaphore, #tpu.memory_space<semaphore_mem>>
    tpu.wait_dma2 semaphore(%104 : memref<!tpu.dma_semaphore, #tpu.memory_space<semaphore_mem>>) src(%100 : memref<512x1024xi8, #tpu.memory_space<any>>) dst(%102 : memref<512x1024xi8, #tpu.memory_space<vmem>>)
    %105 = vector.extract_strided_slice %18 {offsets = [0, 2560], sizes = [8, 512], strides = [1, 1]} : vector<8x3072xbf16> to vector<8x512xbf16>
    %c1_93 = arith.constant 1 : index
    %c0_94 = arith.constant 0 : index
    %c0_95 = arith.constant 0 : index
    %106 = vector.load %arg17[%c1_93, %c0_94, %c0_95] : memref<2x512x1024xi8, #tpu.memory_space<vmem>>, vector<1x512x1024xi8>
    %107 = vector.shape_cast %106 : vector<1x512x1024xi8> to vector<512x1024xi8>
    %108 = arith.sitofp %107 : vector<512x1024xi8> to vector<512x1024xbf16>
    %cst_96 = arith.constant dense<0.000000e+00> : vector<8x1024xf32>
    %109 = tpu.matmul %105, %108, %cst_96 {dimension_numbers = #tpu.dot_dimension_numbers<[1], [0], [0], [1], [0, 0, 1, 1], [], []>} : vector<8x512xbf16>, vector<512x1024xbf16>, vector<8x1024xf32> -> vector<8x1024xf32>
    %110 = arith.addf %99, %109 : vector<8x1024xf32>
    %c0_97 = arith.constant 0 : index
    %c0_98 = arith.constant 0 : index
    %111 = vector.load %arg6[%c0_97, %c0_98] : memref<1x1024xf32, #tpu.memory_space<vmem>>, vector<1x1024xf32>
    %112 = vector.broadcast %111 : vector<1x1024xf32> to vector<8x1024xf32>
    %113 = arith.mulf %110, %112 : vector<8x1024xf32>
    %c0_99 = arith.constant 0 : index
    %c0_100 = arith.constant 0 : index
    %114 = vector.load %arg7[%c0_99, %c0_100] : memref<1x1024xf32, #tpu.memory_space<vmem>>, vector<1x1024xf32>
    %115 = vector.broadcast %114 : vector<1x1024xf32> to vector<8x1024xf32>
    %116 = arith.addf %113, %115 : vector<8x1024xf32>
    %cst_101 = arith.constant 0.000000e+00 : f32
    %117 = vector.broadcast %cst_101 : f32 to vector<8x1024xf32>
    %118 = arith.maximumf %116, %117 : vector<8x1024xf32>
    %119 = arith.truncf %118 : vector<8x1024xf32> to vector<8x1024xbf16>
    %c0_102 = arith.constant 0 : index
    %c0_103 = arith.constant 0 : index
    %120 = vector.load %arg8[%c0_102, %c0_103] : memref<1024x512xi8, #tpu.memory_space<vmem>>, vector<1024x512xi8>
    %c0_104 = arith.constant 0 : index
    %c0_105 = arith.constant 0 : index
    %121 = vector.load %arg9[%c0_104, %c0_105] : memref<1x512xf32, #tpu.memory_space<vmem>>, vector<1x512xf32>
    %c0_106 = arith.constant 0 : index
    %c0_107 = arith.constant 0 : index
    %122 = vector.load %arg10[%c0_106, %c0_107] : memref<1x512xf32, #tpu.memory_space<vmem>>, vector<1x512xf32>
    %123 = arith.sitofp %120 : vector<1024x512xi8> to vector<1024x512xbf16>
    %cst_108 = arith.constant dense<0.000000e+00> : vector<8x512xf32>
    %124 = tpu.matmul %119, %123, %cst_108 {dimension_numbers = #tpu.dot_dimension_numbers<[1], [0], [0], [1], [0, 0, 1, 1], [], []>} : vector<8x1024xbf16>, vector<1024x512xbf16>, vector<8x512xf32> -> vector<8x512xf32>
    %125 = vector.broadcast %121 : vector<1x512xf32> to vector<8x512xf32>
    %126 = arith.mulf %124, %125 : vector<8x512xf32>
    %127 = vector.broadcast %122 : vector<1x512xf32> to vector<8x512xf32>
    %128 = arith.addf %126, %127 : vector<8x512xf32>
    %cst_109 = arith.constant 0.000000e+00 : f32
    %129 = vector.broadcast %cst_109 : f32 to vector<8x512xf32>
    %130 = arith.maximumf %128, %129 : vector<8x512xf32>
    %131 = arith.truncf %130 : vector<8x512xf32> to vector<8x512xbf16>
    %c0_110 = arith.constant 0 : index
    %c0_111 = arith.constant 0 : index
    %132 = vector.load %arg11[%c0_110, %c0_111] : memref<512x128xi8, #tpu.memory_space<vmem>>, vector<512x128xi8>
    %c0_112 = arith.constant 0 : index
    %c0_113 = arith.constant 0 : index
    %133 = vector.load %arg12[%c0_112, %c0_113] : memref<1x128xf32, #tpu.memory_space<vmem>>, vector<1x128xf32>
    %c0_114 = arith.constant 0 : index
    %c0_115 = arith.constant 0 : index
    %134 = vector.load %arg13[%c0_114, %c0_115] : memref<1x128xf32, #tpu.memory_space<vmem>>, vector<1x128xf32>
    %135 = arith.sitofp %132 : vector<512x128xi8> to vector<512x128xbf16>
    %cst_116 = arith.constant dense<0.000000e+00> : vector<8x128xf32>
    %136 = tpu.matmul %131, %135, %cst_116 {dimension_numbers = #tpu.dot_dimension_numbers<[1], [0], [0], [1], [0, 0, 1, 1], [], []>} : vector<8x512xbf16>, vector<512x128xbf16>, vector<8x128xf32> -> vector<8x128xf32>
    %137 = vector.broadcast %133 : vector<1x128xf32> to vector<8x128xf32>
    %138 = arith.mulf %136, %137 : vector<8x128xf32>
    %139 = vector.broadcast %134 : vector<1x128xf32> to vector<8x128xf32>
    %140 = arith.addf %138, %139 : vector<8x128xf32>
    %cst_117 = arith.constant 0.000000e+00 : f32
    %141 = vector.broadcast %cst_117 : f32 to vector<8x128xf32>
    %142 = arith.maximumf %140, %141 : vector<8x128xf32>
    %143 = arith.truncf %142 : vector<8x128xf32> to vector<8x128xbf16>
    %c0_118 = arith.constant 0 : index
    %c0_119 = arith.constant 0 : index
    %144 = vector.load %arg14[%c0_118, %c0_119] : memref<128x128xbf16, #tpu.memory_space<vmem>>, vector<128x128xbf16>
    %cst_120 = arith.constant dense<0.000000e+00> : vector<8x128xf32>
    %145 = tpu.matmul %143, %144, %cst_120 {dimension_numbers = #tpu.dot_dimension_numbers<[1], [0], [0], [1], [0, 0, 1, 1], [], []>} : vector<8x128xbf16>, vector<128x128xbf16>, vector<8x128xf32> -> vector<8x128xf32>
    %c0_121 = arith.constant 0 : index
    %c0_122 = arith.constant 0 : index
    %146 = vector.load %arg15[%c0_121, %c0_122] : memref<1x128xf32, #tpu.memory_space<vmem>>, vector<1x128xf32>
    %147 = vector.broadcast %146 : vector<1x128xf32> to vector<8x128xf32>
    %148 = arith.addf %145, %147 : vector<8x128xf32>
    %cst_123 = arith.constant dense<0xFF800000> : vector<8xf32>
    %149 = vector.multi_reduction <maximumf>, %148, %cst_123 [1] : vector<8x128xf32> to vector<8xf32>
    %150 = vector.shape_cast %149 : vector<8xf32> to vector<8x1xf32>
    %151 = vector.broadcast %150 : vector<8x1xf32> to vector<8x128xf32>
    %152 = arith.subf %148, %151 : vector<8x128xf32>
    %153 = math.exp %152 : vector<8x128xf32>
    %cst_124 = arith.constant dense<0.000000e+00> : vector<8xf32>
    %154 = vector.multi_reduction <add>, %153, %cst_124 [1] : vector<8x128xf32> to vector<8xf32>
    %155 = vector.shape_cast %154 : vector<8xf32> to vector<8x1xf32>
    %156 = vector.broadcast %155 : vector<8x1xf32> to vector<8x128xf32>
    %157 = arith.divf %153, %156 : vector<8x128xf32>
    %c0_125 = arith.constant 0 : index
    %c0_126 = arith.constant 0 : index
    %158 = vector.load %arg16[%c0_125, %c0_126] : memref<8x128xf32, #tpu.memory_space<vmem>>, vector<8x128xf32>
    tpu.vector_store %arg16[%c0_125, %c0_126], %157 {strides = array<i32>} : memref<8x128xf32, #tpu.memory_space<vmem>>, vector<8x128xf32>,
    return
  }
  func.func @transform_0(%arg0: i32) -> (i32, i32) {
    %c0_i32 = arith.constant 0 : i32
    %c0_i32_0 = arith.constant 0 : i32
    %c0_i32_1 = arith.constant 0 : i32
    return %c0_i32, %c0_i32_0 : i32, i32
  }
  func.func @transform_1(%arg0: i32) -> (i32, i32) {
    %c0_i32 = arith.constant 0 : i32
    %c0_i32_0 = arith.constant 0 : i32
    %c0_i32_1 = arith.constant 0 : i32
    return %c0_i32, %c0_i32_0 : i32, i32
  }
  func.func @transform_2(%arg0: i32) -> (i32, i32) {
    %c0_i32 = arith.constant 0 : i32
    %c0_i32_0 = arith.constant 0 : i32
    %c0_i32_1 = arith.constant 0 : i32
    return %c0_i32, %c0_i32_0 : i32, i32
  }
  func.func @transform_3(%arg0: i32) -> (i32, i32) {
    %c0_i32 = arith.constant 0 : i32
    %c0_i32_0 = arith.constant 0 : i32
    %c0_i32_1 = arith.constant 0 : i32
    return %c0_i32, %c0_i32_0 : i32, i32
  }
  func.func @transform_5(%arg0: i32) -> (i32, i32) {
    %c0_i32 = arith.constant 0 : i32
    %c0_i32_0 = arith.constant 0 : i32
    %c0_i32_1 = arith.constant 0 : i32
    return %c0_i32, %c0_i32_0 : i32, i32
  }
  func.func @transform_6(%arg0: i32) -> (i32, i32) {
    %c0_i32 = arith.constant 0 : i32
    %c0_i32_0 = arith.constant 0 : i32
    %c0_i32_1 = arith.constant 0 : i32
    return %c0_i32, %c0_i32_0 : i32, i32
  }
  func.func @transform_7(%arg0: i32) -> (i32, i32) {
    %c0_i32 = arith.constant 0 : i32
    %c0_i32_0 = arith.constant 0 : i32
    %c0_i32_1 = arith.constant 0 : i32
    return %c0_i32, %c0_i32_0 : i32, i32
  }
  func.func @transform_8(%arg0: i32) -> (i32, i32) {
    %c0_i32 = arith.constant 0 : i32
    %c0_i32_0 = arith.constant 0 : i32
    %c0_i32_1 = arith.constant 0 : i32
    return %c0_i32, %c0_i32_0 : i32, i32
  }
  func.func @transform_9(%arg0: i32) -> (i32, i32) {
    %c0_i32 = arith.constant 0 : i32
    %c0_i32_0 = arith.constant 0 : i32
    %c0_i32_1 = arith.constant 0 : i32
    return %c0_i32, %c0_i32_0 : i32, i32
  }
  func.func @transform_10(%arg0: i32) -> (i32, i32) {
    %c0_i32 = arith.constant 0 : i32
    %c0_i32_0 = arith.constant 0 : i32
    %c0_i32_1 = arith.constant 0 : i32
    return %c0_i32, %c0_i32_0 : i32, i32
  }
  func.func @transform_11(%arg0: i32) -> (i32, i32) {
    %c0_i32 = arith.constant 0 : i32
    %c0_i32_0 = arith.constant 0 : i32
    %c0_i32_1 = arith.constant 0 : i32
    return %c0_i32, %c0_i32_0 : i32, i32
  }
  func.func @transform_12(%arg0: i32) -> (i32, i32) {
    %c0_i32 = arith.constant 0 : i32
    %c0_i32_0 = arith.constant 0 : i32
    %c0_i32_1 = arith.constant 0 : i32
    return %c0_i32, %c0_i32_0 : i32, i32
  }
  func.func @transform_13(%arg0: i32) -> (i32, i32) {
    %c0_i32 = arith.constant 0 : i32
    %c0_i32_0 = arith.constant 0 : i32
    %c0_i32_1 = arith.constant 0 : i32
    return %c0_i32, %c0_i32_0 : i32, i32
  }
  func.func @transform_14(%arg0: i32) -> (i32, i32) {
    %c0_i32 = arith.constant 0 : i32
    %c0_i32_0 = arith.constant 0 : i32
    %c0_i32_1 = arith.constant 0 : i32
    return %c0_i32, %c0_i32_0 : i32, i32
  }
  func.func @transform_15(%arg0: i32) -> (i32, i32) {
    %c0_i32 = arith.constant 0 : i32
    %c0_i32_0 = arith.constant 0 : i32
    %c0_i32_1 = arith.constant 0 : i32
    return %c0_i32, %c0_i32_0 : i32, i32
  }
}

</mosaic_0001>

<bundles_post_ra>
// kernel: net_classify_forward.1
= control target key start
LH: loop header
LB: loop body
LE: loop exit
PB: predicated region body
PF: predicated region fallthrough
CT: control target
= control target key end

     0   :  { %s9952_s0 = inlined_call_operand.hbm [shape: f32[8,64], index: 0, kind: input, shape index: {}]   ;;  %s9953_s1 = inlined_call_operand.hbm [shape: s8[64,3072], index: 1, kind: input, shape index: {}]   ;;  %s9954_s2 = inlined_call_operand.hbm [shape: f32[1,3072], index: 2, kind: input, shape index: {}]   ;;  %s9955_s3 = inlined_call_operand.hbm [shape: f32[1,3072], index: 3, kind: input, shape index: {}]   ;;  %s9956_s4 = inlined_call_operand.hbm [shape: s8[3072,1024], index: 4, kind: input, shape index: {}]   ;;  %s9957_s5 = inlined_call_operand.hbm [shape: f32[1,1024], index: 5, kind: input, shape index: {}]   ;;  %s9958_s6 = inlined_call_operand.hbm [shape: f32[1,1024], index: 6, kind: input, shape index: {}]   ;;  %s9959_s7 = inlined_call_operand.hbm [shape: s8[1024,512], index: 7, kind: input, shape index: {}]   ;;  %s9960_s8 = inlined_call_operand.hbm [shape: f32[1,512], index: 8, kind: input, shape index: {}]   ;;  %s9961_s9 = inlined_call_operand.hbm [shape: f32[1,512], index: 9, kind: input, shape index: {}]   ;;  %s9962_s10 = inlined_call_operand.hbm [shape: s8[512,128], index: 10, kind: input, shape index: {}]   ;;  %s9963_s11 = inlined_call_operand.hbm [shape: f32[1,128], index: 11, kind: input, shape index: {}]   ;;  %s9964_s12 = inlined_call_operand.hbm [shape: f32[1,128], index: 12, kind: input, shape index: {}]   ;;  %s9965_s13 = inlined_call_operand.hbm [shape: bf16[128,128], index: 13, kind: input, shape index: {}]   ;;  %s9966_s14 = inlined_call_operand.hbm [shape: f32[1,128], index: 14, kind: input, shape index: {}]   ;;  %s9967_s15 = inlined_call_operand.vmem [shape: f32[8,128], index: 15, kind: output, shape index: {}]  }
   0x1   :  { %10200 = sst [smem:[#allocation170_spill]] %s9967_s15 }
   0x2   :  { %20 = vsyncpa [#allocation5], 0 }
   0x3   :  { %21 = vsyncpa [#allocation7], 0 }
   0x4   :  { %22 = vsyncpa [#allocation10], 0 }
   0x5   :  { %23 = vsyncpa [#allocation13], 0 }
   0x6   :  { %24 = vsyncpa [#allocation16], 0 }
   0x7   :  { %25 = vsyncpa [#allocation19], 0 }
   0x8   :  { %26 = vsyncpa [#allocation22], 0 }
   0x9   :  { %27 = vsyncpa [#allocation25], 0  ;;  %s7602_s18 = smov [#allocation6]   ;;  %s7119_s22 = scalar_lea.hbm %s9953_s1, 6144 }
   0xa   :  { %s43_s19 = sshll.u32 %s7602_s18, 4  ;;  %p7120_p0 = scmp.ne.s32.totalorder %s9953_s1, %s7119_s22  ;;  %s44_s19 = int_to_ptr.vmem [resolvable:$true] %s43_s19 }
   0xb   :  { %p7123_p1 = scmp.lt.u32.totalorder %s7119_s22, %s9953_s1 }
   0xd   :  { %p7125_p2 = pnand %p7123_p1, %p7120_p0 }
   0xf   :  { %7128 = shalt.err (!%p7125_p2)
}
  0x10   :  { %s7129_s27 = scalar_lea.vmem %s44_s19, 6144  ;;  %p7134_p4 = scmp.lt.s32.totalorder %s44_s19, %s44_s19 }
  0x11   :  { %p7130_p3 = scmp.ne.s32.totalorder %s44_s19, %s7129_s27  ;;  %p7135_p5 = scmp.lt.s32.totalorder %s7129_s27, %s7129_s27 }
  0x13   :  { %p7136_p6 = por %p7135_p5, %p7134_p4 }
  0x15   :  { %p7137_p7 = pnand %p7136_p6, %p7130_p3 }
  0x17   :  { %7140 = shalt.err (!%p7137_p7)
}
  0x18   :  { %s7603_s28 = smov 3072   ;;  %s7604_s29 = smov 192  }
  0x19   :  { %49 = dma.hbm_to_vmem [thread:$0]  %s9953_s1, 6144, %s44_s19, [#allocation7], %s7603_s28, %s7603_s28, %s7604_s29  }
  0x1a   :  { %s7605_s17 = smov [#allocation9]   ;;  %s7606_s20 = smov [#allocation12]  }
  0x1b   :  { %s66_s18 = sshll.u32 %s7605_s17, 4  ;;  %s86_s21 = sshll.u32 %s7606_s20, 4  ;;  %s67_s18 = int_to_ptr.vmem [resolvable:$true] %s66_s18  ;;  %s87_s21 = int_to_ptr.vmem [resolvable:$true] %s86_s21 }
  0x1c   :  { %s7141_s24 = scalar_lea.hbm %s9955_s3, 384 }
  0x1d   :  { %p7142_p8 = scmp.ne.s32.totalorder %s9955_s3, %s7141_s24  ;;  %p7145_p9 = scmp.lt.u32.totalorder %s7141_s24, %s9955_s3 }
  0x1f   :  { %p7147_p10 = pnand %p7145_p9, %p7142_p8 }
  0x21   :  { %7150 = shalt.err (!%p7147_p10)
}
  0x22   :  { %s7151_s1 = scalar_lea.vmem %s67_s18, 384  ;;  %p7156_p12 = scmp.lt.s32.totalorder %s67_s18, %s67_s18 }
  0x23   :  { %p7152_p11 = scmp.ne.s32.totalorder %s67_s18, %s7151_s1  ;;  %p7157_p13 = scmp.lt.s32.totalorder %s7151_s1, %s7151_s1 }
  0x25   :  { %p7158_p0 = por %p7157_p13, %p7156_p12 }
  0x27   :  { %p7159_p1 = pnand %p7158_p0, %p7152_p11 }
  0x29   :  { %7162 = shalt.err (!%p7159_p1)
}
  0x2a   :  { %69 = dma.hbm_to_vmem [thread:$0]  %s9955_s3, 384, %s67_s18, [#allocation10]  }
  0x2b   :  { %s7163_s16 = scalar_lea.hbm %s9958_s6, 128 }
  0x2c   :  { %p7164_p2 = scmp.ne.s32.totalorder %s9958_s6, %s7163_s16  ;;  %p7167_p3 = scmp.lt.u32.totalorder %s7163_s16, %s9958_s6 }
  0x2e   :  { %p7169_p4 = pnand %p7167_p3, %p7164_p2 }
  0x30   :  { %7172 = shalt.err (!%p7169_p4)
}
  0x31   :  { %s7173_s23 = scalar_lea.vmem %s87_s21, 128  ;;  %p7178_p6 = scmp.lt.s32.totalorder %s87_s21, %s87_s21 }
  0x32   :  { %p7174_p5 = scmp.ne.s32.totalorder %s87_s21, %s7173_s23  ;;  %p7179_p7 = scmp.lt.s32.totalorder %s7173_s23, %s7173_s23 }
  0x34   :  { %p7180_p8 = por %p7179_p7, %p7178_p6 }
  0x36   :  { %p7181_p9 = pnand %p7180_p8, %p7174_p5 }
  0x38   :  { %7184 = shalt.err (!%p7181_p9)
}
  0x39   :  { %89 = dma.hbm_to_vmem [thread:$0]  %s9958_s6, 128, %s87_s21, [#allocation13]  }
  0x3a   :  { %s7607_s24 = smov [#allocation15]   ;;  %s7608_s26 = smov [#allocation18]  }
  0x3b   :  { %s108_s25 = sshll.u32 %s7607_s24, 4  ;;  %s127_s27 = sshll.u32 %s7608_s26, 4  ;;  %s109_s25 = int_to_ptr.vmem [resolvable:$true] %s108_s25  ;;  %s128_s27 = int_to_ptr.vmem [resolvable:$true] %s127_s27 }
  0x3c   :  { %s7185_s28 = scalar_lea.hbm %s9960_s8, 64 }
  0x3d   :  { %p7186_p10 = scmp.ne.s32.totalorder %s9960_s8, %s7185_s28  ;;  %p7189_p11 = scmp.lt.u32.totalorder %s7185_s28, %s9960_s8 }
  0x3f   :  { %p7191_p12 = pnand %p7189_p11, %p7186_p10 }
  0x41   :  { %7194 = shalt.err (!%p7191_p12)
}
  0x42   :  { %s7195_s6 = scalar_lea.vmem %s109_s25, 64  ;;  %p7200_p0 = scmp.lt.s32.totalorder %s109_s25, %s109_s25 }
  0x43   :  { %p7196_p13 = scmp.ne.s32.totalorder %s109_s25, %s7195_s6  ;;  %p7201_p1 = scmp.lt.s32.totalorder %s7195_s6, %s7195_s6 }
  0x45   :  { %p7202_p2 = por %p7201_p1, %p7200_p0 }
  0x47   :  { %p7203_p3 = pnand %p7202_p2, %p7196_p13 }
  0x49   :  { %7206 = shalt.err (!%p7203_p3)
}
  0x4a   :  { %111 = dma.hbm_to_vmem [thread:$0]  %s9960_s8, 64, %s109_s25, [#allocation16]  }
  0x4b   :  { %s7207_s23 = scalar_lea.hbm %s9962_s10, 2048 }
  0x4c   :  { %p7208_p4 = scmp.ne.s32.totalorder %s9962_s10, %s7207_s23  ;;  %p7211_p5 = scmp.lt.u32.totalorder %s7207_s23, %s9962_s10 }
  0x4e   :  { %p7213_p6 = pnand %p7211_p5, %p7208_p4 }
  0x50   :  { %7216 = shalt.err (!%p7213_p6)
}
  0x51   :  { %s7217_s1 = scalar_lea.vmem %s128_s27, 2048  ;;  %p7222_p8 = scmp.lt.s32.totalorder %s128_s27, %s128_s27 }
  0x52   :  { %p7218_p7 = scmp.ne.s32.totalorder %s128_s27, %s7217_s1  ;;  %p7223_p9 = scmp.lt.s32.totalorder %s7217_s1, %s7217_s1 }
  0x54   :  { %p7224_p10 = por %p7223_p9, %p7222_p8 }
  0x56   :  { %p7225_p11 = pnand %p7224_p10, %p7218_p7 }
  0x58   :  { %7228 = shalt.err (!%p7225_p11)
}
  0x59   :  { %s7609_s8 = smov 128   ;;  %s7610_s25 = smov 8  }
  0x5a   :  { %133 = dma.hbm_to_vmem [thread:$0]  %s9962_s10, 2048, %s128_s27, [#allocation19], %s7609_s8, %s7609_s8, %s7610_s25  }
  0x5b   :  { %s7611_s29 = smov [#allocation21]   ;;  %s7612_s16 = smov [#allocation4]  }
  0x5c   :  { %s150_s30 = sshll.u32 %s7611_s29, 4  ;;  %s34_s15 = sshll.u32 %s7612_s16, 4  ;;  %s151_s30 = int_to_ptr.vmem [resolvable:$true] %s150_s30  ;;  %s35_s15 = int_to_ptr.vmem [resolvable:$true] %s34_s15 }
  0x5d   :  { %s7229_s17 = scalar_lea.hbm %s9964_s12, 16 }
  0x5e   :  { %p7230_p12 = scmp.ne.s32.totalorder %s9964_s12, %s7229_s17  ;;  %p7233_p13 = scmp.lt.u32.totalorder %s7229_s17, %s9964_s12 }
  0x60   :  { %p7235_p0 = pnand %p7233_p13, %p7230_p12 }
  0x62   :  { %7238 = shalt.err (!%p7235_p0)
}
  0x63   :  { %s7239_s10 = scalar_lea.vmem %s151_s30, 16  ;;  %s7243_s27 = scalar_lea.vmem %s151_s30, 32 }
  0x64   :  { %p7240_p1 = scmp.ne.s32.totalorder %s151_s30, %s7239_s10  ;;  %p7244_p2 = scmp.lt.s32.totalorder %s151_s30, %s151_s30 }
  0x65   :  { %p7245_p3 = scmp.lt.s32.totalorder %s7243_s27, %s7239_s10 }
  0x67   :  { %p7246_p4 = por %p7245_p3, %p7244_p2 }
  0x69   :  { %p7247_p5 = pnand %p7246_p4, %p7240_p1 }
  0x6b   :  { %7250 = shalt.err (!%p7247_p5)
}
  0x6c   :  { %153 = dma.hbm_to_vmem [thread:$0]  %s9964_s12, 16, %s151_s30, [#allocation22]  }
  0x6d   :  { %s7251_s8 = scalar_lea.hbm %s9952_s0, 128 }
  0x6e   :  { %p7252_p6 = scmp.ne.s32.totalorder %s9952_s0, %s7251_s8  ;;  %p7255_p7 = scmp.lt.u32.totalorder %s7251_s8, %s9952_s0 }
  0x70   :  { %p7257_p8 = pnand %p7255_p7, %p7252_p6 }
  0x72   :  { %7260 = shalt.err (!%p7257_p8)
}
  0x73   :  { %s7261_s16 = scalar_lea.vmem %s35_s15, 128  ;;  %p7266_p10 = scmp.lt.s32.totalorder %s35_s15, %s35_s15 }
  0x74   :  { %p7262_p9 = scmp.ne.s32.totalorder %s35_s15, %s7261_s16  ;;  %p7267_p11 = scmp.lt.s32.totalorder %s7261_s16, %s7261_s16 }
  0x76   :  { %p7268_p12 = por %p7267_p11, %p7266_p10 }
  0x78   :  { %p7269_p13 = pnand %p7268_p12, %p7262_p9 }
  0x7a   :  { %7272 = shalt.err (!%p7269_p13)
}
  0x7b   :  { %37 = dma.hbm_to_vmem [thread:$0]  %s9952_s0, 128, %s35_s15, [#allocation5]  }
  0x7c   :  { %s7613_s6 = smov [#allocation8]   ;;  %s7614_s17 = smov [#allocation11]  }
  0x7d   :  { %s56_s21 = sshll.u32 %s7613_s6, 4  ;;  %s76_s20 = sshll.u32 %s7614_s17, 4  ;;  %s57_s21 = int_to_ptr.vmem [resolvable:$true] %s56_s21  ;;  %s77_s20 = int_to_ptr.vmem [resolvable:$true] %s76_s20 }
  0x7e   :  { %s7273_s3 = scalar_lea.hbm %s9954_s2, 384 }
  0x7f   :  { %p7274_p0 = scmp.ne.s32.totalorder %s9954_s2, %s7273_s3  ;;  %p7277_p1 = scmp.lt.u32.totalorder %s7273_s3, %s9954_s2 }
  0x81   :  { %p7279_p2 = pnand %p7277_p1, %p7274_p0 }
  0x83   :  { %7282 = shalt.err (!%p7279_p2)
}
  0x84   :  { %s7283_s0 = scalar_lea.vmem %s57_s21, 384  ;;  %p7288_p4 = scmp.lt.s32.totalorder %s57_s21, %s57_s21 }
  0x85   :  { %p7284_p3 = scmp.ne.s32.totalorder %s57_s21, %s7283_s0  ;;  %p7289_p5 = scmp.lt.s32.totalorder %s7283_s0, %s7283_s0 }
  0x87   :  { %p7290_p6 = por %p7289_p5, %p7288_p4 }
  0x89   :  { %p7291_p7 = pnand %p7290_p6, %p7284_p3 }
  0x8b   :  { %7294 = shalt.err (!%p7291_p7)
}
  0x8c   :  { %59 = dma.hbm_to_vmem [thread:$0]  %s9954_s2, 384, %s57_s21, [#allocation7]  }
  0x8d   :  { %s7295_s25 = scalar_lea.hbm %s9957_s5, 128 }
  0x8e   :  { %p7296_p8 = scmp.ne.s32.totalorder %s9957_s5, %s7295_s25  ;;  %p7299_p9 = scmp.lt.u32.totalorder %s7295_s25, %s9957_s5 }
  0x90   :  { %p7301_p10 = pnand %p7299_p9, %p7296_p8 }
  0x92   :  { %7304 = shalt.err (!%p7301_p10)
}
  0x93   :  { %s7305_s12 = scalar_lea.vmem %s77_s20, 128  ;;  %p7310_p12 = scmp.lt.s32.totalorder %s77_s20, %s77_s20 }
  0x94   :  { %p7306_p11 = scmp.ne.s32.totalorder %s77_s20, %s7305_s12  ;;  %p7311_p13 = scmp.lt.s32.totalorder %s7305_s12, %s7305_s12 }
  0x96   :  { %p7312_p0 = por %p7311_p13, %p7310_p12 }
  0x98   :  { %p7313_p1 = pnand %p7312_p0, %p7306_p11 }
  0x9a   :  { %7316 = shalt.err (!%p7313_p1)
}
  0x9b   :  { %79 = dma.hbm_to_vmem [thread:$0]  %s9957_s5, 128, %s77_s20, [#allocation10]  }
  0x9c   :  { %s7615_s6 = smov [#allocation14]   ;;  %s7317_s23 = scalar_lea.hbm %s9959_s7, 16384 }
  0x9d   :  { %s95_s21 = sshll.u32 %s7615_s6, 4  ;;  %p7318_p2 = scmp.ne.s32.totalorder %s9959_s7, %s7317_s23  ;;  %s96_s21 = int_to_ptr.vmem [resolvable:$true] %s95_s21 }
  0x9e   :  { %p7321_p3 = scmp.lt.u32.totalorder %s7317_s23, %s9959_s7 }
  0xa0   :  { %p7323_p4 = pnand %p7321_p3, %p7318_p2 }
  0xa2   :  { %7326 = shalt.err (!%p7323_p4)
}
  0xa3   :  { %s7327_s24 = scalar_lea.vmem %s96_s21, 16384  ;;  %p7332_p6 = scmp.lt.s32.totalorder %s96_s21, %s96_s21 }
  0xa4   :  { %p7328_p5 = scmp.ne.s32.totalorder %s96_s21, %s7327_s24  ;;  %p7333_p7 = scmp.lt.s32.totalorder %s7327_s24, %s7327_s24 }
  0xa6   :  { %p7334_p8 = por %p7333_p7, %p7332_p6 }
  0xa8   :  { %p7335_p9 = pnand %p7334_p8, %p7328_p5 }
  0xaa   :  { %7338 = shalt.err (!%p7335_p9)
}
  0xab   :  { %s7616_s5 = smov 512   ;;  %s7617_s20 = smov 32  }
  0xac   :  { %101 = dma.hbm_to_vmem [thread:$0]  %s9959_s7, 16384, %s96_s21, [#allocation13], %s7616_s5, %s7616_s5, %s7617_s20  }
  0xad   :  { %s7618_s26 = smov [#allocation17]   ;;  %s7619_s8 = smov [#allocation20]  }
  0xae   :  { %s118_s1 = sshll.u32 %s7618_s26, 4  ;;  %s140_s25 = sshll.u32 %s7619_s8, 4  ;;  %s119_s1 = int_to_ptr.vmem [resolvable:$true] %s118_s1  ;;  %s141_s25 = int_to_ptr.vmem [resolvable:$true] %s140_s25 }
  0xaf   :  { %s7339_s29 = scalar_lea.hbm %s9961_s9, 64 }
  0xb0   :  { %p7340_p10 = scmp.ne.s32.totalorder %s9961_s9, %s7339_s29  ;;  %p7343_p11 = scmp.lt.u32.totalorder %s7339_s29, %s9961_s9 }
  0xb2   :  { %p7345_p12 = pnand %p7343_p11, %p7340_p10 }
  0xb4   :  { %7348 = shalt.err (!%p7345_p12)
}
  0xb5   :  { %s7349_s7 = scalar_lea.vmem %s119_s1, 64  ;;  %p7354_p0 = scmp.lt.s32.totalorder %s119_s1, %s119_s1 }
  0xb6   :  { %p7350_p13 = scmp.ne.s32.totalorder %s119_s1, %s7349_s7  ;;  %p7355_p1 = scmp.lt.s32.totalorder %s7349_s7, %s7349_s7 }
  0xb8   :  { %p7356_p2 = por %p7355_p1, %p7354_p0 }
  0xba   :  { %p7357_p3 = pnand %p7356_p2, %p7350_p13 }
  0xbc   :  { %7360 = shalt.err (!%p7357_p3)
}
  0xbd   :  { %121 = dma.hbm_to_vmem [thread:$0]  %s9961_s9, 64, %s119_s1, [#allocation16]  }
  0xbe   :  { %s7361_s23 = scalar_lea.hbm %s9963_s11, 16 }
  0xbf   :  { %p7362_p4 = scmp.ne.s32.totalorder %s9963_s11, %s7361_s23  ;;  %p7365_p5 = scmp.lt.u32.totalorder %s7361_s23, %s9963_s11 }
  0xc1   :  { %p7367_p6 = pnand %p7365_p5, %p7362_p4 }
  0xc3   :  { %7370 = shalt.err (!%p7367_p6)
}
  0xc4   :  { %s7371_s24 = scalar_lea.vmem %s141_s25, 16  ;;  %s7375_s5 = scalar_lea.vmem %s141_s25, 32 }
  0xc5   :  { %p7372_p7 = scmp.ne.s32.totalorder %s141_s25, %s7371_s24  ;;  %p7376_p8 = scmp.lt.s32.totalorder %s141_s25, %s141_s25 }
  0xc6   :  { %p7377_p9 = scmp.lt.s32.totalorder %s7375_s5, %s7371_s24 }
  0xc8   :  { %p7378_p10 = por %p7377_p9, %p7376_p8 }
  0xca   :  { %p7379_p11 = pnand %p7378_p10, %p7372_p7 }
  0xcc   :  { %7382 = shalt.err (!%p7379_p11)
}
  0xcd   :  { %143 = dma.hbm_to_vmem [thread:$0]  %s9963_s11, 16, %s141_s25, [#allocation19]  }
  0xce   :  { %s7620_s0 = smov [#allocation23]   ;;  %s7383_s8 = scalar_lea.hbm %s9965_s13, 1024 }
  0xcf   :  { %s159_s15 = sshll.u32 %s7620_s0, 4  ;;  %p7384_p12 = scmp.ne.s32.totalorder %s9965_s13, %s7383_s8  ;;  %s160_s15 = int_to_ptr.vmem [resolvable:$true] %s159_s15 }
  0xd0   :  { %p7387_p13 = scmp.lt.u32.totalorder %s7383_s8, %s9965_s13 }
  0xd2   :  { %p7389_p0 = pnand %p7387_p13, %p7384_p12 }
  0xd4   :  { %7392 = shalt.err (!%p7389_p0)
}
  0xd5   :  { %s7393_s12 = scalar_lea.vmem %s160_s15, 1024  ;;  %p7398_p2 = scmp.lt.s32.totalorder %s160_s15, %s160_s15 }
  0xd6   :  { %p7394_p1 = scmp.ne.s32.totalorder %s160_s15, %s7393_s12  ;;  %p7399_p3 = scmp.lt.s32.totalorder %s7393_s12, %s7393_s12 }
  0xd8   :  { %p7400_p4 = por %p7399_p3, %p7398_p2 }
  0xda   :  { %p7401_p5 = pnand %p7400_p4, %p7394_p1 }
  0xdc   :  { %7404 = shalt.err (!%p7401_p5)
}
  0xdd   :  { %s7621_s11 = smov 64   ;;  %s7622_s25 = smov 4  }
  0xde   :  { %165 = dma.hbm_to_vmem [thread:$0]  %s9965_s13, 1024, %s160_s15, [#allocation22], %s7621_s11, %s7621_s11, %s7622_s25  }
  0xdf   :  { %s7623_s7 = smov [#allocation24]   ;;  %s7405_s22 = scalar_lea.hbm %s9966_s14, 16 }
  0xe0   :  { %s172_s6 = sshll.u32 %s7623_s7, 4  ;;  %p7406_p6 = scmp.ne.s32.totalorder %s9966_s14, %s7405_s22  ;;  %s173_s6 = int_to_ptr.vmem [resolvable:$true] %s172_s6 }
  0xe1   :  { %p7409_p7 = scmp.lt.u32.totalorder %s7405_s22, %s9966_s14 }
  0xe3   :  { %p7411_p8 = pnand %p7409_p7, %p7406_p6 }
  0xe5   :  { %7414 = shalt.err (!%p7411_p8)
}
  0xe6   :  { %s7415_s18 = scalar_lea.vmem %s173_s6, 16  ;;  %s7419_s13 = scalar_lea.vmem %s173_s6, 32 }
  0xe7   :  { %p7416_p9 = scmp.ne.s32.totalorder %s173_s6, %s7415_s18  ;;  %p7420_p10 = scmp.lt.s32.totalorder %s173_s6, %s173_s6 }
  0xe8   :  { %p7421_p11 = scmp.lt.s32.totalorder %s7419_s13, %s7415_s18 }
  0xea   :  { %p7422_p12 = por %p7421_p11, %p7420_p10 }
  0xec   :  { %p7423_p13 = pnand %p7422_p12, %p7416_p9 }
  0xee   :  { %7426 = shalt.err (!%p7423_p13)
}
  0xef   :  { %175 = dma.hbm_to_vmem [thread:$0]  %s9966_s14, 16, %s173_s6, [#allocation25]  }
  0xf0   :  { %7574 = dma.done.wait [#allocation5], 128  }
  0xf1   :  { %7575 = vsyncadd [#allocation5], 4294967168 }
  0xf2   :  { %7576 = dma.done.wait [#allocation7], 6528  }
  0xf3   :  { %7577 = vsyncadd [#allocation7], 4294960768 }
  0xf4   :  { %7578 = dma.done.wait [#allocation10], 512  }
  0xf5   :  { %7579 = vsyncadd [#allocation10], 4294966784 }
  0xf6   :  { %7580 = dma.done.wait [#allocation13], 16512  }
  0xf7   :  { %7581 = vsyncadd [#allocation13], 4294950784 }
  0xf8   :  { %7582 = dma.done.wait [#allocation16], 128  }
  0xf9   :  { %7583 = vsyncadd [#allocation16], 4294967168 }
  0xfa   :  { %7584 = dma.done.wait [#allocation19], 2064  }
  0xfb   :  { %7585 = vsyncadd [#allocation19], 4294965232 }
  0xfc   :  { %7586 = dma.done.wait [#allocation22], 1040  }
  0xfd   :  { %7587 = vsyncadd [#allocation22], 4294966256 }
  0xfe   :  { %7588 = dma.done.wait [#allocation25], 16  }
  0xff   :  { %7589 = vsyncadd [#allocation25], 4294967280  ;;  %v7624_v0 = vmov 0   ;;  %v233_v1 = vld [vmem:[#allocation6 + $0x8] sm:$0xff]  ;;  %v232_v2 = vld [vmem:[#allocation6] sm:$0xff]  ;;  %vm382_vm0 = vcmask 523264  }
 0x100   :  { %418 = vmatprep.mubr.bf16.mxu1 %v7624_v0  ;;  %500 = vmatprep.mubr.bf16.mxu0 %v7624_v0  ;;  %v287_v3 = vunpack.c.l.s8.bf16 %v233_v1  ;;  %v311_v4 = vunpack.c.h.s8.bf16 %v233_v1  ;;  %v286_v5 = vunpack.c.l.s8.bf16 %v232_v2  ;;  %v257_v6 = vld [vmem:[#allocation6 + $0xc8] sm:$0xff]  ;;  %v236_v8 = vld [vmem:[#allocation6 + $0x20] sm:$0xff]  ;;  %v310_v9 = vunpack.c.h.s8.bf16 %v232_v2  ;;  %v235_v21 = vld [vmem:[#allocation6 + $0x18] sm:$0xff]  ;;  %s7625_s14 = smov [#allocation2]   ;;  %s7626_s20 = smov [#allocation2 + $0x400]  }
 0x101   :  { %v237_v7 = vld [vmem:[#allocation6 + $0x28] sm:$0xff]  ;;  %v335_v10 = vunpack.c.l.s8.bf16 %v257_v6  ;;  %v256_v11 = vld [vmem:[#allocation6 + $0xc0] sm:$0xff]  ;;  %v290_v14 = vunpack.c.l.s8.bf16 %v236_v8  ;;  %v314_v17 = vunpack.c.h.s8.bf16 %v236_v8  ;;  %v359_v18 = vunpack.c.h.s8.bf16 %v257_v6  ;;  %v230_v23 = vld [vmem:[#allocation4] sm:$0xff]  ;;  %s226_s9 = sshll.u32 %s7625_s14, 4  ;;  %s1230_s0 = sshll.u32 %s7626_s20, 4  ;;  %s7915_s9 = int_to_ptr.vmem [resolvable:$true] %s226_s9  ;;  %s7957_s0 = int_to_ptr.vmem [resolvable:$true] %s1230_s0 }
 0x102   :  { %386 = vmatprep.subr.bf16.mxu1 %v287_v3  ;;  %v291_v12 = vunpack.c.l.s8.bf16 %v237_v7  ;;  %v315_v13 = vunpack.c.h.s8.bf16 %v237_v7  ;;  %v261_v15 = vld [vmem:[#allocation6 + $0xe8] sm:$0xff]  ;;  %v334_v16 = vunpack.c.l.s8.bf16 %v256_v11  ;;  %v260_v20 = vld [vmem:[#allocation6 + $0xe0] sm:$0xff]  ;;  %v358_v22 = vunpack.c.h.s8.bf16 %v256_v11  ;;  %v234_v26 = vld [vmem:[#allocation6 + $0x10] sm:$0xff]  ;;  %s7920_s1 = scalar_lea.hbm %s9956_s4, 16384  ;;  %s7929_s16 = scalar_lea.hbm %s9956_s4, 98304 }
 0x103   :  { %387 = vmatpush1.bf16.msra.mxu1 %v286_v5  ;;  %v339_v19 = vunpack.c.l.s8.bf16 %v261_v15  ;;  %v338_v24 = vunpack.c.l.s8.bf16 %v260_v20  ;;  %v289_v25 = vunpack.c.l.s8.bf16 %v235_v21  ;;  %v363_v27 = vunpack.c.h.s8.bf16 %v261_v15  ;;  %v241_v29 = vld [vmem:[#allocation6 + $0x48] sm:$0xff]  ;;  %v259_v33 = vld [vmem:[#allocation6 + $0xd8] sm:$0xff]  ;;  %v240_v35 = vld [vmem:[#allocation6 + $0x40] sm:$0xff]  ;;  %p7428_p0 = scmp.ne.s32.totalorder %s9956_s4, %s7920_s1  ;;  %p7430_p1 = scmp.lt.u32.totalorder %s7929_s16, %s7920_s1 }
 0x104   :  { %388 = vmatprep.subr.bf16.mxu1 %v311_v4  ;;  %468 = vmatprep.subr.bf16.mxu0 %v291_v12  ;;  %v7879_v28 = vpack.c.bf16 %v230_v23, %v230_v23  ;;  %v288_v30 = vunpack.c.l.s8.bf16 %v234_v26  ;;  %v313_v31 = vunpack.c.h.s8.bf16 %v235_v21  ;;  %v362_v32 = vunpack.c.h.s8.bf16 %v260_v20  ;;  %v258_v38 = vld [vmem:[#allocation6 + $0xd0] sm:$0xff]  ;;  %v265_v41 = vld [vmem:[#allocation6 + $0x108] sm:$0xff]  ;;  %v239_v45 = vld [vmem:[#allocation6 + $0x38] sm:$0xff]  ;;  %p7431_p2 = scmp.lt.u32.totalorder %s7920_s1, %s9956_s4 }
 0x105   :  { %469 = vmatpush1.bf16.msra.mxu0 %v290_v14  ;;  %v295_v34 = vunpack.c.l.s8.bf16 %v241_v29  ;;  %v312_v36 = vunpack.c.h.s8.bf16 %v234_v26  ;;  %v337_v37 = vunpack.c.l.s8.bf16 %v259_v33  ;;  %v294_v39 = vunpack.c.l.s8.bf16 %v240_v35  ;;  %v264_v47 = vld [vmem:[#allocation6 + $0x100] sm:$0xff]  ;;  %v238_v50 = vld [vmem:[#allocation6 + $0x30] sm:$0xff]  ;;  %v245_v53 = vld [vmem:[#allocation6 + $0x68] sm:$0xff] }
 0x106   :  { %470 = vmatprep.subr.bf16.mxu0 %v315_v13  ;;  %v319_v40 = vunpack.c.h.s8.bf16 %v241_v29  ;;  %v336_v42 = vunpack.c.l.s8.bf16 %v258_v38  ;;  %v361_v43 = vunpack.c.h.s8.bf16 %v259_v33  ;;  %v318_v44 = vunpack.c.h.s8.bf16 %v240_v35  ;;  %v263_v57 = vld [vmem:[#allocation6 + $0xf8] sm:$0xff]  ;;  %v244_v59 = vld [vmem:[#allocation6 + $0x60] sm:$0xff]  ;;  %v262_v62 = vld [vmem:[#allocation6 + $0xf0] sm:$0xff]  ;;  %p7432_p3 = por %p7431_p2, %p7430_p1 }
 0x107   :  { %389 = vmatpush1.bf16.msra.mxu1 %v310_v9  ;;  %v343_v46 = vunpack.c.l.s8.bf16 %v265_v41  ;;  %v360_v48 = vunpack.c.h.s8.bf16 %v258_v38  ;;  %v293_v49 = vunpack.c.l.s8.bf16 %v239_v45  ;;  %v342_v51 = vunpack.c.l.s8.bf16 %v264_v47  ;;  %v269_v2 = vld [vmem:[#allocation6 + $0x128] sm:$0xff]  ;;  %v243_v6 = vld [vmem:[#allocation6 + $0x58] sm:$0xff]  ;;  %v268_v8 = vld [vmem:[#allocation6 + $0x120] sm:$0xff] }
 0x108   :  { %390 = vmatprep.subr.bf16.mxu1 %v335_v10  ;;  %v367_v52 = vunpack.c.h.s8.bf16 %v265_v41  ;;  %v292_v54 = vunpack.c.l.s8.bf16 %v238_v50  ;;  %v317_v55 = vunpack.c.h.s8.bf16 %v239_v45  ;;  %v366_v56 = vunpack.c.h.s8.bf16 %v264_v47  ;;  %v242_v11 = vld [vmem:[#allocation6 + $0x50] sm:$0xff]  ;;  %v249_v14 = vld [vmem:[#allocation6 + $0x88] sm:$0xff]  ;;  %v248_v20 = vld [vmem:[#allocation6 + $0x80] sm:$0xff]  ;;  %p7433_p4 = pnand %p7432_p3, %p7428_p0 }
 0x109   :  { %471 = vmatpush1.bf16.msra.mxu0 %v314_v17  ;;  %v299_v58 = vunpack.c.l.s8.bf16 %v245_v53  ;;  %v316_v60 = vunpack.c.h.s8.bf16 %v238_v50  ;;  %v341_v61 = vunpack.c.l.s8.bf16 %v263_v57  ;;  %v298_v63 = vunpack.c.l.s8.bf16 %v244_v59  ;;  %v266_v23 = vld [vmem:[#allocation6 + $0x110] sm:$0xff]  ;;  %v273_v26 = vld [vmem:[#allocation6 + $0x148] sm:$0xff]  ;;  %v272_v33 = vld [vmem:[#allocation6 + $0x140] sm:$0xff] }
 0x10a   :  { %472 = vmatprep.subr.bf16.mxu0 %v339_v19  ;;  %v323_v1 = vunpack.c.h.s8.bf16 %v245_v53  ;;  %v340_v3 = vunpack.c.l.s8.bf16 %v262_v62  ;;  %v365_v4 = vunpack.c.h.s8.bf16 %v263_v57  ;;  %v322_v5 = vunpack.c.h.s8.bf16 %v244_v59  ;;  %v252_v45 = vld [vmem:[#allocation6 + $0xa0] sm:$0xff] }
 0x10b   :  { %391 = vmatpush1.bf16.msra.mxu1 %v334_v16  ;;  %v347_v7 = vunpack.c.l.s8.bf16 %v269_v2  ;;  %v364_v9 = vunpack.c.h.s8.bf16 %v262_v62  ;;  %v297_v10 = vunpack.c.l.s8.bf16 %v243_v6  ;;  %v346_v12 = vunpack.c.l.s8.bf16 %v268_v8  ;;  %v276_v57 = vld [vmem:[#allocation6 + $0x160] sm:$0xff] }
 0x10c   :  { %392 = vmatprep.subr.bf16.mxu1 %v359_v18  ;;  %v371_v13 = vunpack.c.h.s8.bf16 %v269_v2  ;;  %v296_v15 = vunpack.c.l.s8.bf16 %v242_v11  ;;  %v321_v16 = vunpack.c.h.s8.bf16 %v243_v6  ;;  %v370_v17 = vunpack.c.h.s8.bf16 %v268_v8  ;;  %v267_v18 = vld [vmem:[#allocation6 + $0x118] sm:$0xff]  ;;  %v274_v6 = vld [vmem:[#allocation6 + $0x150] sm:$0xff] }
 0x10d   :  { %473 = vmatpush1.bf16.msra.mxu0 %v338_v24  ;;  %v303_v19 = vunpack.c.l.s8.bf16 %v249_v14  ;;  %v320_v21 = vunpack.c.h.s8.bf16 %v242_v11  ;;  %v302_v24 = vunpack.c.l.s8.bf16 %v248_v20  ;;  %v369_v29 = vunpack.c.h.s8.bf16 %v267_v18 }
 0x10e   :  { %474 = vmatprep.subr.bf16.mxu0 %v363_v27  ;;  %v344_v27 = vunpack.c.l.s8.bf16 %v266_v23  ;;  %v375_v38 = vunpack.c.h.s8.bf16 %v273_v26  ;;  %v378_v2 = vunpack.c.h.s8.bf16 %v276_v57 }
 0x10f   :  { %393 = vmatpush1.bf16.msra.mxu1 %v358_v22  ;;  %v345_v22 = vunpack.c.l.s8.bf16 %v267_v18  ;;  %v278_v18 = vld [vmem:[#allocation6 + $0x170] sm:$0xff] }
 0x110   :  { %427 = vmatprep.subr.bf16.mxu1 %v289_v25  ;;  %v327_v25 = vunpack.c.h.s8.bf16 %v249_v14 }
 0x111   :  { %475 = vmatpush1.bf16.msra.mxu0 %v362_v32  ;;  %v351_v32 = vunpack.c.l.s8.bf16 %v273_v26 }
 0x112   :  { %6780 = vmatmul.mubr.msk.bf16.vlgmr.msra.gmra.mrb[0].mxu1 %vm382_vm0, %v7879_v28  ;;  %550 = vmatprep.subr.bf16.mxu0 %v295_v34  ;;  %v368_v34 = vunpack.c.h.s8.bf16 %v266_v23 }
 0x113   :  { %428 = vmatpush1.bf16.msra.mxu1 %v288_v30  ;;  %459 = vmatprep.mubr.bf16.mxu1 %v7624_v0  ;;  %v326_v30 = vunpack.c.h.s8.bf16 %v248_v20 }
 0x114   :  { %429 = vmatprep.subr.bf16.mxu1 %v313_v31  ;;  %6782 = vmatmul.mubr.msk.bf16.vlgmr.msra.gmra.mrb[0].mxu0 %vm382_vm0, %v7879_v28  ;;  %v247_v31 = vld [vmem:[#allocation6 + $0x78] sm:$0xff] }
 0x115   :  { %551 = vmatpush1.bf16.msra.mxu0 %v294_v39  ;;  %582 = vmatprep.mubr.bf16.mxu0 %v7624_v0  ;;  %v301_v35 = vunpack.c.l.s8.bf16 %v247_v31  ;;  %v253_v39 = vld [vmem:[#allocation6 + $0xa8] sm:$0xff]  ;;  %v325_v41 = vunpack.c.h.s8.bf16 %v247_v31 }
 0x116   :  { %552 = vmatprep.subr.bf16.mxu0 %v319_v40  ;;  %v331_v50 = vunpack.c.h.s8.bf16 %v253_v39 }
 0x117   :  { %430 = vmatpush1.bf16.msra.mxu1 %v312_v36  ;;  %v246_v36 = vld [vmem:[#allocation6 + $0x70] sm:$0xff] }
 0x118   :  { %431 = vmatprep.subr.bf16.mxu1 %v337_v37  ;;  %v350_v37 = vunpack.c.l.s8.bf16 %v272_v33  ;;  %v300_v40 = vunpack.c.l.s8.bf16 %v246_v36 }
 0x119   :  { %553 = vmatpush1.bf16.msra.mxu0 %v318_v44  ;;  %v307_v44 = vunpack.c.l.s8.bf16 %v253_v39 }
 0x11a   :  { %554 = vmatprep.subr.bf16.mxu0 %v343_v46  ;;  %v324_v46 = vunpack.c.h.s8.bf16 %v246_v36 }
 0x11b   :  { %432 = vmatpush1.bf16.msra.mxu1 %v336_v42  ;;  %v374_v42 = vunpack.c.h.s8.bf16 %v272_v33 }
 0x11c   :  { %433 = vmatprep.subr.bf16.mxu1 %v361_v43  ;;  %v271_v43 = vld [vmem:[#allocation6 + $0x138] sm:$0xff] }
 0x11d   :  { %555 = vmatpush1.bf16.msra.mxu0 %v342_v51  ;;  %v349_v47 = vunpack.c.l.s8.bf16 %v271_v43  ;;  %v277_v51 = vld [vmem:[#allocation6 + $0x168] sm:$0xff]  ;;  %v373_v53 = vunpack.c.h.s8.bf16 %v271_v43 }
 0x11e   :  { %556 = vmatprep.subr.bf16.mxu0 %v367_v52  ;;  %v379_v62 = vunpack.c.h.s8.bf16 %v277_v51 }
 0x11f   :  { %434 = vmatpush1.bf16.msra.mxu1 %v360_v48  ;;  %v270_v48 = vld [vmem:[#allocation6 + $0x130] sm:$0xff] }
 0x120   :  { %509 = vmatprep.subr.bf16.mxu1 %v293_v49  ;;  %v306_v49 = vunpack.c.l.s8.bf16 %v252_v45  ;;  %v348_v52 = vunpack.c.l.s8.bf16 %v270_v48 }
 0x121   :  { %557 = vmatpush1.bf16.msra.mxu0 %v366_v56  ;;  %v355_v56 = vunpack.c.l.s8.bf16 %v277_v51 }
 0x122   :  { %6781 = vmatmul.mubr.msk.bf16.vlgmr.msra.gmra.mrb[4].mxu1 %vm382_vm0, %v7879_v28  ;;  %632 = vmatprep.subr.bf16.mxu0 %v299_v58  ;;  %v372_v58 = vunpack.c.h.s8.bf16 %v270_v48 }
 0x123   :  { %510 = vmatpush1.bf16.msra.mxu1 %v292_v54  ;;  %541 = vmatprep.mubr.bf16.mxu1 %v7624_v0  ;;  %v330_v54 = vunpack.c.h.s8.bf16 %v252_v45 }
 0x124   :  { %511 = vmatprep.subr.bf16.mxu1 %v317_v55  ;;  %6784 = vmatmul.mubr.msk.bf16.vlgmr.msra.gmra.mrb[4].mxu0 %vm382_vm0, %v7879_v28  ;;  %v251_v55 = vld [vmem:[#allocation6 + $0x98] sm:$0xff] }
 0x125   :  { %633 = vmatpush1.bf16.msra.mxu0 %v298_v63  ;;  %664 = vmatprep.mubr.bf16.mxu0 %v7624_v0  ;;  %v305_v59 = vunpack.c.l.s8.bf16 %v251_v55 }
 0x126   :  { %634 = vmatprep.subr.bf16.mxu0 %v323_v1  ;;  %v329_v1 = vunpack.c.h.s8.bf16 %v251_v55 }
 0x127   :  { %512 = vmatpush1.bf16.msra.mxu1 %v316_v60  ;;  %v250_v60 = vld [vmem:[#allocation6 + $0x90] sm:$0xff] }
 0x128   :  { %513 = vmatprep.subr.bf16.mxu1 %v341_v61  ;;  %v354_v61 = vunpack.c.l.s8.bf16 %v276_v57  ;;  %v304_v63 = vunpack.c.l.s8.bf16 %v250_v60 }
 0x129   :  { %635 = vmatpush1.bf16.msra.mxu0 %v322_v5 }
 0x12a   :  { %636 = vmatprep.subr.bf16.mxu0 %v347_v7  ;;  %v352_v7 = vunpack.c.l.s8.bf16 %v274_v6 }
 0x12b   :  { %514 = vmatpush1.bf16.msra.mxu1 %v340_v3  ;;  %v275_v3 = vld [vmem:[#allocation6 + $0x158] sm:$0xff] }
 0x12c   :  { %515 = vmatprep.subr.bf16.mxu1 %v365_v4  ;;  %v328_v4 = vunpack.c.h.s8.bf16 %v250_v60  ;;  %v353_v5 = vunpack.c.l.s8.bf16 %v275_v3  ;;  %v377_v8 = vunpack.c.h.s8.bf16 %v275_v3 }
 0x12d   :  { %637 = vmatpush1.bf16.msra.mxu0 %v346_v12  ;;  %v254_v12 = vld [vmem:[#allocation6 + $0xb0] sm:$0xff] }
 0x12e   :  { %638 = vmatprep.subr.bf16.mxu0 %v371_v13  ;;  %v308_v13 = vunpack.c.l.s8.bf16 %v254_v12 }
 0x12f   :  { %516 = vmatpush1.bf16.msra.mxu1 %v364_v9  ;;  %v255_v9 = vld [vmem:[#allocation6 + $0xb8] sm:$0xff] }
 0x130   :  { %591 = vmatprep.subr.bf16.mxu1 %v297_v10  ;;  %v376_v10 = vunpack.c.h.s8.bf16 %v274_v6  ;;  %v309_v11 = vunpack.c.l.s8.bf16 %v255_v9  ;;  %v333_v14 = vunpack.c.h.s8.bf16 %v255_v9 }
 0x131   :  { %639 = vmatpush1.bf16.msra.mxu0 %v370_v17 }
 0x132   :  { %6783 = vmatmul.mubr.msk.bf16.vlgmr.msra.gmra.mrb[8].mxu1 %vm382_vm0, %v7879_v28  ;;  %714 = vmatprep.subr.bf16.mxu0 %v303_v19  ;;  %v356_v19 = vunpack.c.l.s8.bf16 %v278_v18 }
 0x133   :  { %592 = vmatpush1.bf16.msra.mxu1 %v296_v15  ;;  %623 = vmatprep.mubr.bf16.mxu1 %v7624_v0  ;;  %v279_v15 = vld [vmem:[#allocation6 + $0x178] sm:$0xff] }
 0x134   :  { %593 = vmatprep.subr.bf16.mxu1 %v321_v16  ;;  %6786 = vmatmul.mubr.msk.bf16.vlgmr.msra.gmra.mrb[8].mxu0 %vm382_vm0, %v7879_v28  ;;  %v332_v16 = vunpack.c.h.s8.bf16 %v254_v12  ;;  %v357_v17 = vunpack.c.l.s8.bf16 %v279_v15  ;;  %v381_v20 = vunpack.c.h.s8.bf16 %v279_v15 }
 0x135   :  { %715 = vmatpush1.bf16.msra.mxu0 %v302_v24  ;;  %746 = vmatprep.mubr.bf16.mxu0 %v7624_v0 }
 0x136   :  { %716 = vmatprep.subr.bf16.mxu0 %v327_v25 }
 0x137   :  { %594 = vmatpush1.bf16.msra.mxu1 %v320_v21  ;;  %v380_v21 = vunpack.c.h.s8.bf16 %v278_v18 }
 0x138   :  { %595 = vmatprep.subr.bf16.mxu1 %v345_v22 }
 0x139   :  { %717 = vmatpush1.bf16.msra.mxu0 %v326_v30 }
 0x13a   :  { %718 = vmatprep.subr.bf16.mxu0 %v351_v32 }
 0x13b   :  { %596 = vmatpush1.bf16.msra.mxu1 %v344_v27 }
 0x13c   :  { %597 = vmatprep.subr.bf16.mxu1 %v369_v29 }
 0x13d   :  { %719 = vmatpush1.bf16.msra.mxu0 %v350_v37 }
 0x13e   :  { %720 = vmatprep.subr.bf16.mxu0 %v375_v38 }
 0x13f   :  { %598 = vmatpush1.bf16.msra.mxu1 %v368_v34 }
 0x140   :  { %673 = vmatprep.subr.bf16.mxu1 %v301_v35 }
 0x141   :  { %721 = vmatpush1.bf16.msra.mxu0 %v374_v42 }
 0x142   :  { %6785 = vmatmul.mubr.msk.bf16.vlgmr.msra.gmra.mrb[12].mxu1 %vm382_vm0, %v7879_v28  ;;  %796 = vmatprep.subr.bf16.mxu0 %v307_v44 }
 0x143   :  { %674 = vmatpush1.bf16.msra.mxu1 %v300_v40  ;;  %705 = vmatprep.mubr.bf16.mxu1 %v7624_v0 }
 0x144   :  { %675 = vmatprep.subr.bf16.mxu1 %v325_v41  ;;  %6788 = vmatmul.mubr.msk.bf16.vlgmr.msra.gmra.mrb[12].mxu0 %vm382_vm0, %v7879_v28 }
 0x145   :  { %797 = vmatpush1.bf16.msra.mxu0 %v306_v49  ;;  %828 = vmatprep.mubr.bf16.mxu0 %v7624_v0 }
 0x146   :  { %798 = vmatprep.subr.bf16.mxu0 %v331_v50 }
 0x147   :  { %676 = vmatpush1.bf16.msra.mxu1 %v324_v46 }
 0x148   :  { %677 = vmatprep.subr.bf16.mxu1 %v349_v47 }
 0x149   :  { %799 = vmatpush1.bf16.msra.mxu0 %v330_v54 }
 0x14a   :  { %800 = vmatprep.subr.bf16.mxu0 %v355_v56 }
 0x14b   :  { %678 = vmatpush1.bf16.msra.mxu1 %v348_v52 }
 0x14c   :  { %679 = vmatprep.subr.bf16.mxu1 %v373_v53 }
 0x14d   :  { %801 = vmatpush1.bf16.msra.mxu0 %v354_v61 }
 0x14e   :  { %802 = vmatprep.subr.bf16.mxu0 %v379_v62 }
 0x14f   :  { %680 = vmatpush1.bf16.msra.mxu1 %v372_v58 }
 0x150   :  { %755 = vmatprep.subr.bf16.mxu1 %v305_v59 }
 0x151   :  { %803 = vmatpush1.bf16.msra.mxu0 %v378_v2 }
 0x152   :  { %6787 = vmatmul.mubr.msk.bf16.vlgmr.msra.gmra.mrb[16].mxu1 %vm382_vm0, %v7879_v28 }
 0x153   :  { %756 = vmatpush1.bf16.msra.mxu1 %v304_v63  ;;  %787 = vmatprep.mubr.bf16.mxu1 %v7624_v0 }
 0x154   :  { %757 = vmatprep.subr.bf16.mxu1 %v329_v1  ;;  %6790 = vmatmul.mubr.msk.bf16.vlgmr.msra.gmra.mrb[16].mxu0 %vm382_vm0, %v7879_v28 }
 0x157   :  { %758 = vmatpush1.bf16.msra.mxu1 %v328_v4 }
 0x158   :  { %759 = vmatprep.subr.bf16.mxu1 %v353_v5 }
 0x15b   :  { %760 = vmatpush1.bf16.msra.mxu1 %v352_v7 }
 0x15c   :  { %761 = vmatprep.subr.bf16.mxu1 %v377_v8 }
 0x15f   :  { %762 = vmatpush1.bf16.msra.mxu1 %v376_v10 }
 0x160   :  { %837 = vmatprep.subr.bf16.mxu1 %v309_v11 }
 0x162   :  { %6789 = vmatmul.mubr.msk.bf16.vlgmr.msra.gmra.mrb[20].mxu1 %vm382_vm0, %v7879_v28 }
 0x163   :  { %838 = vmatpush1.bf16.msra.mxu1 %v308_v13  ;;  %869 = vmatprep.mubr.bf16.mxu1 %v7624_v0 }
 0x164   :  { %839 = vmatprep.subr.bf16.mxu1 %v333_v14 }
 0x167   :  { %840 = vmatpush1.bf16.msra.mxu1 %v332_v16 }
 0x168   :  { %841 = vmatprep.subr.bf16.mxu1 %v357_v17 }
 0x16b   :  { %842 = vmatpush1.bf16.msra.mxu1 %v356_v19 }
 0x16c   :  { %843 = vmatprep.subr.bf16.mxu1 %v381_v20 }
 0x16f   :  { %844 = vmatpush1.bf16.msra.mxu1 %v380_v21 }
 0x172   :  { %6791 = vmatmul.mubr.msk.bf16.vlgmr.msra.gmra.mrb[24].mxu1 %vm382_vm0, %v7879_v28 }
 0x173   :  { %7436 = shalt.err (!%p7433_p4)  }
 0x174   :  { %s7437_s30 = scalar_lea.vmem %s7915_s9, 16384  ;;  %s7441_s7 = scalar_lea.vmem %s7915_s9, 32768 }
 0x175   :  { %p7438_p5 = scmp.ne.s32.totalorder %s7915_s9, %s7437_s30  ;;  %p7442_p6 = scmp.lt.s32.totalorder %s7915_s9, %s7915_s9 }
 0x176   :  { %p7443_p7 = scmp.lt.s32.totalorder %s7441_s7, %s7437_s30 }
 0x178   :  { %p7444_p8 = por %p7443_p7, %p7442_p6 }
 0x17a   :  { %p7947_p9 = pnand %p7444_p8, %p7438_p5 }
 0x17c   :  { %7448 = shalt.err (!%p7947_p9)  }
 0x17d   :  { %229 = dma.hbm_to_vmem [thread:$0]  %s9956_s4, 16384, %s7915_s9, [#allocation3] }
 0x17e   :  { %s7962_s3 = scalar_lea.hbm %s9956_s4, 32768 }
 0x17f   :  { %p7450_p10 = scmp.ne.s32.totalorder %s7920_s1, %s7962_s3  ;;  %p7453_p11 = scmp.lt.u32.totalorder %s7929_s16, %s7962_s3 }
 0x180   :  { %p7455_p13 = scmp.lt.u32.totalorder %s7962_s3, %s7920_s1 }
 0x181   :  { %p7454_p12 = por %p7453_p11, %p7431_p2 }
 0x183   :  { %p7456_p0 = por %p7455_p13, %p7454_p12 }
 0x185   :  { %p7457_p1 = pnand %p7456_p0, %p7450_p10 }
 0x187   :  { %7460 = shalt.err (!%p7457_p1)  }
 0x188   :  { %s7461_s18 = scalar_lea.vmem %s7957_s0, 16384  ;;  %p7466_p4 = scmp.lt.s32.totalorder %s7957_s0, %s7915_s9 }
 0x189   :  { %p7462_p3 = scmp.ne.s32.totalorder %s7957_s0, %s7461_s18  ;;  %p7467_p5 = scmp.lt.s32.totalorder %s7441_s7, %s7461_s18 }
 0x18b   :  { %p7468_p6 = por %p7467_p5, %p7466_p4 }
 0x18d   :  { %p7979_p7 = pnand %p7468_p6, %p7462_p3 }
 0x18f   :  { %7472 = shalt.err (!%p7979_p7)  }
 0x190   :  { %1233 = dma.hbm_to_vmem [thread:$0]  %s7920_s1, 16384, %s7957_s0, [#allocation3 + $0x1]  ;;  %v881_v0 = vlaneseq  ;;  %v7992_v23 = vld [vmem:[#allocation8] sm:$0xff]  ;;  %v7997_v25 = vld [vmem:[#allocation9] sm:$0xff]  ;;  %v8041_v3 = vld [vmem:[#allocation8 + $0x8] sm:$0xff] }
 0x191   :  { %v8045_v8 = vld [vmem:[#allocation9 + $0x8] sm:$0xff] }
 0x192   :  { %v7987_v28 = vshrl.u32 %v881_v0, 7 }
 0x194   :  { %v7990_v22 = vsub.s32 0, %v7987_v28  ;;  %v7995_v24 = vsub.s32 1, %v7987_v28  ;;  %v8004_v29 = vsub.s32 4, %v7987_v28  ;;  %v8009_v31 = vsub.s32 5, %v7987_v28 }
 0x195   :  { %v8026_v56 = vsub.s32 2, %v7987_v28  ;;  %v8029_v58 = vsub.s32 3, %v7987_v28 }
 0x196   :  { %10203 = vst [vmem:[#allocation54_spill] sm:$0xff] %v7990_v22  ;;  %10204 = vst [vmem:[#allocation55_spill] sm:$0xff] %v7995_v24  ;;  %v884_v26 = vrot.slane %v7992_v23, %v7990_v22  ;;  %v888_v27 = vrot.slane %v7992_v23, %v7995_v24  ;;  %v1031_v30 = vrot.slane %v7997_v25, %v7990_v22 }
 0x197   :  { %10205 = vst [vmem:[#allocation56_spill] sm:$0xff] %v8004_v29  ;;  %10206 = vst [vmem:[#allocation57_spill] sm:$0xff] %v8009_v31  ;;  %v1035_v33 = vrot.slane %v7997_v25, %v7995_v24  ;;  %v900_v38 = vrot.slane %v7992_v23, %v8004_v29  ;;  %v904_v41 = vrot.slane %v7992_v23, %v8009_v31 }
 0x198   :  { %v1047_v43 = vrot.slane %v7997_v25, %v8004_v29  ;;  %v1051_v46 = vrot.slane %v7997_v25, %v8009_v31  ;;  %10209 = vst [vmem:[#allocation60_spill] sm:$0xff] %v8026_v56  ;;  %10210 = vst [vmem:[#allocation61_spill] sm:$0xff] %v8029_v58  ;;  %v892_v62 = vrot.slane %v7992_v23, %v8026_v56 }
 0x199   :  { %v896_v1 = vrot.slane %v7992_v23, %v8029_v58  ;;  %v1039_v2 = vrot.slane %v7997_v25, %v8026_v56  ;;  %v1043_v5 = vrot.slane %v7997_v25, %v8029_v58  ;;  %v916_v11 = vrot.slane %v8041_v3, %v7990_v22 }
 0x19a   :  { %v920_v14 = vrot.slane %v8041_v3, %v7995_v24  ;;  %v1063_v16 = vrot.slane %v8045_v8, %v7990_v22  ;;  %v1067_v19 = vrot.slane %v8045_v8, %v7995_v24 }
 0x1e5   :  { %v420_v32 = vpop.f32.mrb[0].mxu1 }
 0x1e6   :  { %v1001_v34 = vmul.f32 %v884_v26, %v420_v32  ;;  %v422_v35 = vpop.f32.mrb[1].mxu1 }
 0x1e7   :  { %v1002_v36 = vmul.f32 %v888_v27, %v422_v35  ;;  %v424_v37 = vpop.f32.mrb[2].mxu1  ;;  %v502_v45 = vpop.f32.mrb[0].mxu0  ;;  %v8060_v35 = vsub.s32 6, %v7987_v28 }
 0x1e8   :  { %v1148_v39 = vadd.f32 %v1031_v30, %v1001_v34  ;;  %v425_v40 = vpop.f32.mrb[3].mxu1  ;;  %v1005_v48 = vmul.f32 %v900_v38, %v502_v45  ;;  %v504_v49 = vpop.f32.mrb[1].mxu0  ;;  %v8063_v37 = vsub.s32 7, %v7987_v28 }
 0x1e9   :  { %v1149_v42 = vadd.f32 %v1035_v33, %v1002_v36  ;;  %v1006_v51 = vmul.f32 %v904_v41, %v504_v49  ;;  %v506_v52 = vpop.f32.mrb[2].mxu0  ;;  %10213 = vst [vmem:[#allocation64_spill] sm:$0xff] %v8060_v35  ;;  %v908_v41 = vrot.slane %v7992_v23, %v8060_v35 }
 0x1ea   :  { %v1172_v44 = vmax.f32 %v1148_v39, 0.0  ;;  %v1152_v54 = vadd.f32 %v1047_v43, %v1005_v48  ;;  %v507_v55 = vpop.f32.mrb[3].mxu0  ;;  %10214 = vst [vmem:[#allocation65_spill] sm:$0xff] %v8063_v37  ;;  %v912_v43 = vrot.slane %v7992_v23, %v8063_v37  ;;  %v1059_v28 = vrot.slane %v7997_v25, %v8063_v37 }
 0x1eb   :  { %v1173_v47 = vmax.f32 %v1149_v42, 0.0  ;;  %v1153_v57 = vadd.f32 %v1051_v46, %v1006_v51  ;;  %v932_v51 = vrot.slane %v8041_v3, %v8004_v29  ;;  %v936_v55 = vrot.slane %v8041_v3, %v8009_v31 }
 0x1ec   :  { %v8021_v50 = vpack.c.bf16 %v1172_v44, %v1172_v44  ;;  %v1176_v59 = vmax.f32 %v1152_v54, 0.0  ;;  %v1055_v44 = vrot.slane %v7997_v25, %v8060_v35  ;;  %v1083_v25 = vrot.slane %v8045_v8, %v8009_v31 }
 0x1ed   :  { %v8023_v53 = vpack.c.bf16 %v1173_v47, %v1173_v47  ;;  %v1177_v60 = vmax.f32 %v1153_v57, 0.0  ;;  %v1079_v57 = vrot.slane %v8045_v8, %v8004_v29 }
 0x1ee   :  { %10207 = vst [vmem:[#allocation58_spill] sm:$0xff] %v8021_v50  ;;  %v8031_v61 = vpack.c.bf16 %v1176_v59, %v1176_v59 }
 0x1ef   :  { %10208 = vst [vmem:[#allocation59_spill] sm:$0xff] %v8023_v53  ;;  %v8035_v63 = vpack.c.bf16 %v1177_v60, %v1177_v60 }
 0x1f5   :  { %v461_v4 = vpop.f32.mrb[4].mxu1 }
 0x1f6   :  { %v1003_v6 = vmul.f32 %v892_v62, %v461_v4  ;;  %v463_v7 = vpop.f32.mrb[5].mxu1 }
 0x1f7   :  { %v1004_v9 = vmul.f32 %v896_v1, %v463_v7  ;;  %v465_v10 = vpop.f32.mrb[6].mxu1  ;;  %v584_v18 = vpop.f32.mrb[4].mxu0 }
 0x1f8   :  { %v1150_v12 = vadd.f32 %v1039_v2, %v1003_v6  ;;  %v466_v13 = vpop.f32.mrb[7].mxu1  ;;  %v1009_v21 = vmul.f32 %v916_v11, %v584_v18  ;;  %v586_v0 = vpop.f32.mrb[5].mxu0  ;;  %v1071_v18 = vrot.slane %v8045_v8, %v8026_v56 }
 0x1f9   :  { %v1151_v15 = vadd.f32 %v1043_v5, %v1004_v9  ;;  %v1010_v27 = vmul.f32 %v920_v14, %v586_v0  ;;  %v588_v30 = vpop.f32.mrb[6].mxu0 }
 0x1fa   :  { %v1174_v17 = vmax.f32 %v1150_v12, 0.0  ;;  %v1156_v33 = vadd.f32 %v1063_v16, %v1009_v21  ;;  %v589_v34 = vpop.f32.mrb[7].mxu0  ;;  %v1075_v21 = vrot.slane %v8045_v8, %v8029_v58  ;;  %v8103_v30 = vld [vmem:[#allocation9 + $0x10] sm:$0xff] }
 0x1fb   :  { %v1175_v20 = vmax.f32 %v1151_v15, 0.0  ;;  %v1157_v36 = vadd.f32 %v1067_v19, %v1010_v27  ;;  %v924_v15 = vrot.slane %v8041_v3, %v8026_v56  ;;  %v8099_v19 = vld [vmem:[#allocation8 + $0x10] sm:$0xff] }
 0x1fc   :  { %v8055_v26 = vpack.c.bf16 %v1174_v17, %v1174_v17  ;;  %v1180_v38 = vmax.f32 %v1156_v33, 0.0  ;;  %v928_v17 = vrot.slane %v8041_v3, %v8029_v58 }
 0x1fd   :  { %v8057_v32 = vpack.c.bf16 %v1175_v20, %v1175_v20  ;;  %v1181_v39 = vmax.f32 %v1157_v36, 0.0  ;;  %v948_v36 = vrot.slane %v8099_v19, %v7990_v22 }
 0x1fe   :  { %10211 = vst [vmem:[#allocation62_spill] sm:$0xff] %v8055_v26  ;;  %v8065_v40 = vpack.c.bf16 %v1180_v38, %v1180_v38 }
 0x1ff   :  { %10212 = vst [vmem:[#allocation63_spill] sm:$0xff] %v8057_v32  ;;  %v8069_v42 = vpack.c.bf16 %v1181_v39, %v1181_v39 }
 0x200   :  { %10215 = vst [vmem:[#allocation66_spill] sm:$0xff] %v8065_v40 }
 0x201   :  { %10216 = vst [vmem:[#allocation67_spill] sm:$0xff] %v8069_v42 }
 0x205   :  { %v543_v45 = vpop.f32.mrb[8].mxu1 }
 0x206   :  { %v1007_v46 = vmul.f32 %v908_v41, %v543_v45  ;;  %v545_v47 = vpop.f32.mrb[9].mxu1  ;;  %v952_v41 = vrot.slane %v8099_v19, %v7995_v24 }
 0x207   :  { %v1008_v48 = vmul.f32 %v912_v43, %v545_v47  ;;  %v547_v49 = vpop.f32.mrb[10].mxu1  ;;  %v666_v60 = vpop.f32.mrb[8].mxu0 }
 0x208   :  { %v1154_v52 = vadd.f32 %v1055_v44, %v1007_v46  ;;  %v548_v54 = vpop.f32.mrb[11].mxu1  ;;  %v1013_v1 = vmul.f32 %v932_v51, %v666_v60  ;;  %v668_v2 = vpop.f32.mrb[9].mxu0  ;;  %v1095_v44 = vrot.slane %v8103_v30, %v7990_v22  ;;  %v1099_v46 = vrot.slane %v8103_v30, %v7995_v24 }
 0x209   :  { %v1155_v23 = vadd.f32 %v1059_v28, %v1008_v48  ;;  %v1014_v5 = vmul.f32 %v936_v55, %v668_v2  ;;  %v670_v6 = vpop.f32.mrb[10].mxu0 }
 0x20a   :  { %v1178_v59 = vmax.f32 %v1154_v52, 0.0  ;;  %v1160_v9 = vadd.f32 %v1079_v57, %v1013_v1  ;;  %v671_v10 = vpop.f32.mrb[11].mxu0  ;;  %v940_v1 = vrot.slane %v8041_v3, %v8060_v35  ;;  %v1087_v6 = vrot.slane %v8045_v8, %v8060_v35 }
 0x20b   :  { %v1179_v62 = vmax.f32 %v1155_v23, 0.0  ;;  %v1161_v11 = vadd.f32 %v1083_v25, %v1014_v5  ;;  %v944_v5 = vrot.slane %v8041_v3, %v8063_v37  ;;  %v1091_v10 = vrot.slane %v8045_v8, %v8063_v37 }
 0x20c   :  { %v8085_v4 = vpack.c.bf16 %v1178_v59, %v1178_v59  ;;  %v1184_v12 = vmax.f32 %v1160_v9, 0.0  ;;  %v1115_v8 = vrot.slane %v8103_v30, %v8009_v31 }
 0x20d   :  { %v8087_v7 = vpack.c.bf16 %v1179_v62, %v1179_v62  ;;  %v1185_v13 = vmax.f32 %v1161_v11, 0.0 }
 0x20e   :  { %v8089_v14 = vpack.c.bf16 %v1184_v12, %v1184_v12 }
 0x20f   :  { %v8093_v16 = vpack.c.bf16 %v1185_v13, %v1185_v13 }
 0x210   :  { %10217 = vst [vmem:[#allocation68_spill] sm:$0xff] %v8089_v14 }
 0x211   :  { %10218 = vst [vmem:[#allocation69_spill] sm:$0xff] %v8093_v16 }
 0x215   :  { %v625_v20 = vpop.f32.mrb[12].mxu1 }
 0x216   :  { %v1011_v0 = vmul.f32 %v924_v15, %v625_v20  ;;  %v627_v27 = vpop.f32.mrb[13].mxu1 }
 0x217   :  { %v1012_v33 = vmul.f32 %v928_v17, %v627_v27  ;;  %v629_v34 = vpop.f32.mrb[14].mxu1  ;;  %v748_v28 = vpop.f32.mrb[12].mxu0  ;;  %v964_v17 = vrot.slane %v8099_v19, %v8004_v29 }
 0x218   :  { %v1158_v38 = vadd.f32 %v1071_v18, %v1011_v0  ;;  %v630_v39 = vpop.f32.mrb[15].mxu1  ;;  %v1017_v48 = vmul.f32 %v948_v36, %v748_v28  ;;  %v750_v49 = vpop.f32.mrb[13].mxu0  ;;  %v1111_v0 = vrot.slane %v8103_v30, %v8004_v29 }
 0x219   :  { %v1159_v43 = vadd.f32 %v1075_v21, %v1012_v33  ;;  %v1018_v52 = vmul.f32 %v952_v41, %v750_v49  ;;  %v752_v54 = vpop.f32.mrb[14].mxu0  ;;  %v968_v21 = vrot.slane %v8099_v19, %v8009_v31 }
 0x21a   :  { %v1182_v45 = vmax.f32 %v1158_v38, 0.0  ;;  %v1164_v23 = vadd.f32 %v1095_v44, %v1017_v48  ;;  %v753_v57 = vpop.f32.mrb[15].mxu0 }
 0x21b   :  { %v1183_v47 = vmax.f32 %v1159_v43, 0.0  ;;  %v1165_v59 = vadd.f32 %v1099_v46, %v1018_v52  ;;  %v956_v52 = vrot.slane %v8099_v19, %v8026_v56  ;;  %v1103_v57 = vrot.slane %v8103_v30, %v8026_v56 }
 0x21c   :  { %v8113_v51 = vpack.c.bf16 %v1182_v45, %v1182_v45  ;;  %v1188_v60 = vmax.f32 %v1164_v23, 0.0  ;;  %v960_v23 = vrot.slane %v8099_v19, %v8029_v58 }
 0x21d   :  { %v8115_v55 = vpack.c.bf16 %v1183_v47, %v1183_v47  ;;  %v1189_v25 = vmax.f32 %v1165_v59, 0.0 }
 0x21e   :  { %10219 = vst [vmem:[#allocation70_spill] sm:$0xff] %v8113_v51  ;;  %v8117_v62 = vpack.c.bf16 %v1188_v60, %v1188_v60  ;;  %v1107_v60 = vrot.slane %v8103_v30, %v8029_v58 }
 0x21f   :  { %10220 = vst [vmem:[#allocation71_spill] sm:$0xff] %v8115_v55  ;;  %v8121_v2 = vpack.c.bf16 %v1189_v25, %v1189_v25 }
 0x220   :  { %10221 = vst [vmem:[#allocation72_spill] sm:$0xff] %v8117_v62 }
 0x221   :  { %10222 = vst [vmem:[#allocation73_spill] sm:$0xff] %v8121_v2 }
 0x225   :  { %v707_v9 = vpop.f32.mrb[16].mxu1 }
 0x226   :  { %v1015_v11 = vmul.f32 %v940_v1, %v707_v9  ;;  %v709_v12 = vpop.f32.mrb[17].mxu1 }
 0x227   :  { %v1016_v13 = vmul.f32 %v944_v5, %v709_v12  ;;  %v711_v15 = vpop.f32.mrb[18].mxu1  ;;  %v830_v33 = vpop.f32.mrb[16].mxu0 }
 0x228   :  { %v1162_v18 = vadd.f32 %v1087_v6, %v1015_v11  ;;  %v712_v20 = vpop.f32.mrb[19].mxu1  ;;  %v1021_v36 = vmul.f32 %v964_v17, %v830_v33  ;;  %v832_v38 = vpop.f32.mrb[17].mxu0 }
 0x229   :  { %v1163_v3 = vadd.f32 %v1091_v10, %v1016_v13  ;;  %v1022_v41 = vmul.f32 %v968_v21, %v832_v38  ;;  %v834_v43 = vpop.f32.mrb[18].mxu0  ;;  %v976_v20 = vrot.slane %v8099_v19, %v8063_v37  ;;  %v1119_v21 = vrot.slane %v8103_v30, %v8060_v35 }
 0x22a   :  { %v1186_v27 = vmax.f32 %v1162_v18, 0.0  ;;  %v1168_v45 = vadd.f32 %v1111_v0, %v1021_v36  ;;  %v835_v28 = vpop.f32.mrb[19].mxu0  ;;  %v972_v18 = vrot.slane %v8099_v19, %v8060_v35  ;;  %v1123_v0 = vrot.slane %v8103_v30, %v8063_v37 }
 0x22b   :  { %v1187_v34 = vmax.f32 %v1163_v3, 0.0  ;;  %v1169_v46 = vadd.f32 %v1115_v8, %v1022_v41 }
 0x22c   :  { %v8137_v39 = vpack.c.bf16 %v1186_v27, %v1186_v27  ;;  %v1192_v47 = vmax.f32 %v1168_v45, 0.0 }
 0x22d   :  { %v8139_v44 = vpack.c.bf16 %v1187_v34, %v1187_v34  ;;  %v1193_v48 = vmax.f32 %v1169_v46, 0.0 }
 0x22e   :  { %10223 = vst [vmem:[#allocation74_spill] sm:$0xff] %v8137_v39  ;;  %v8141_v49 = vpack.c.bf16 %v1192_v47, %v1192_v47 }
 0x22f   :  { %10224 = vst [vmem:[#allocation75_spill] sm:$0xff] %v8139_v44  ;;  %v8145_v54 = vpack.c.bf16 %v1193_v48, %v1193_v48 }
 0x230   :  { %10225 = vst [vmem:[#allocation76_spill] sm:$0xff] %v8141_v49 }
 0x231   :  { %10226 = vst [vmem:[#allocation77_spill] sm:$0xff] %v8145_v54 }
 0x235   :  { %v789_v59 = vpop.f32.mrb[20].mxu1 }
 0x236   :  { %v1019_v25 = vmul.f32 %v956_v52, %v789_v59  ;;  %v791_v1 = vpop.f32.mrb[21].mxu1 }
 0x237   :  { %v1020_v5 = vmul.f32 %v960_v23, %v791_v1  ;;  %v793_v6 = vpop.f32.mrb[22].mxu1 }
 0x238   :  { %v1166_v9 = vadd.f32 %v1103_v57, %v1019_v25  ;;  %v794_v10 = vpop.f32.mrb[23].mxu1 }
 0x239   :  { %v1167_v11 = vadd.f32 %v1107_v60, %v1020_v5 }
 0x23a   :  { %v1190_v12 = vmax.f32 %v1166_v9, 0.0 }
 0x23b   :  { %v1191_v13 = vmax.f32 %v1167_v11, 0.0 }
 0x23c   :  { %v8153_v15 = vpack.c.bf16 %v1190_v12, %v1190_v12 }
 0x23d   :  { %v8155_v17 = vpack.c.bf16 %v1191_v13, %v1191_v13 }
 0x23e   :  { %10227 = vst [vmem:[#allocation78_spill] sm:$0xff] %v8153_v15 }
 0x23f   :  { %10228 = vst [vmem:[#allocation79_spill] sm:$0xff] %v8155_v17 }
 0x245   :  { %v871_v3 = vpop.f32.mrb[24].mxu1 }
 0x246   :  { %v1023_v27 = vmul.f32 %v972_v18, %v871_v3  ;;  %v873_v33 = vpop.f32.mrb[25].mxu1 }
 0x247   :  { %v1024_v8 = vmul.f32 %v976_v20, %v873_v33  ;;  %v875_v34 = vpop.f32.mrb[26].mxu1 }
 0x248   :  { %v1170_v36 = vadd.f32 %v1119_v21, %v1023_v27  ;;  %v876_v38 = vpop.f32.mrb[27].mxu1 }
 0x249   :  { %v1171_v41 = vadd.f32 %v1123_v0, %v1024_v8 }
 0x24a   :  { %v1194_v43 = vmax.f32 %v1170_v36, 0.0 }
 0x24b   :  { %v1195_v45 = vmax.f32 %v1171_v41, 0.0 }
 0x24c   :  { %v8165_v28 = vpack.c.bf16 %v1194_v43, %v1194_v43 }
 0x24d   :  { %v8167_v46 = vpack.c.bf16 %v1195_v45, %v1195_v45 }
 0x24e   :  { %10229 = vst [vmem:[#allocation80_spill] sm:$0xff] %v8165_v28 }
 0x24f   :  { %10230 = vst [vmem:[#allocation81_spill] sm:$0xff] %v8167_v46 }
 0x250   :  { %7590 = dma.done.wait [#allocation3], 16384 }
 0x251   :  { %7591 = vsyncadd [#allocation3], 4294950912  ;;  %v8169_v19 = vld [vmem:[#allocation2] sm:$0xff]  ;;  %v8171_v47 = vld [vmem:[#allocation2 + $0x8] sm:$0xff]  ;;  %s8600_s14 = scalar_lea.hbm %s9956_s4, 49152  ;;  %p7477_p8 = scmp.lt.u32.totalorder %s7962_s3, %s9956_s4 }
 0x252   :  { %10231 = vst [vmem:[#allocation82_spill] sm:$0xff] %v8169_v19  ;;  %v8173_v30 = vld [vmem:[#allocation2 + $0x10] sm:$0xff]  ;;  %v8175_v48 = vld [vmem:[#allocation2 + $0x18] sm:$0xff]  ;;  %v8177_v52 = vld [vmem:[#allocation2 + $0x20] sm:$0xff]  ;;  %p7475_p2 = scmp.ne.s32.totalorder %s7962_s3, %s8600_s14  ;;  %p7478_p10 = scmp.lt.u32.totalorder %s7929_s16, %s8600_s14 }
 0x253   :  { %10232 = vst [vmem:[#allocation83_spill] sm:$0xff] %v8173_v30  ;;  %10233 = vst [vmem:[#allocation84_spill] sm:$0xff] %v8177_v52  ;;  %v8179_v23 = vld [vmem:[#allocation2 + $0x28] sm:$0xff]  ;;  %v8185_v1 = vld [vmem:[#allocation2 + $0x30] sm:$0xff]  ;;  %p7480_p12 = scmp.lt.u32.totalorder %s8600_s14, %s7962_s3 }
 0x254   :  { %10234 = vst [vmem:[#allocation85_spill] sm:$0xff] %v8179_v23  ;;  %10235 = vst [vmem:[#allocation86_spill] sm:$0xff] %v8185_v1  ;;  %v8187_v5 = vld [vmem:[#allocation2 + $0x38] sm:$0xff]  ;;  %v8189_v6 = vld [vmem:[#allocation2 + $0x40] sm:$0xff]  ;;  %p7479_p11 = por %p7478_p10, %p7477_p8 }
 0x255   :  { %10236 = vst [vmem:[#allocation87_spill] sm:$0xff] %v8187_v5  ;;  %10237 = vst [vmem:[#allocation88_spill] sm:$0xff] %v8189_v6  ;;  %v8195_v13 = vld [vmem:[#allocation2 + $0x48] sm:$0xff]  ;;  %v8197_v18 = vld [vmem:[#allocation2 + $0x50] sm:$0xff] }
 0x256   :  { %10238 = vst [vmem:[#allocation89_spill] sm:$0xff] %v8195_v13  ;;  %10239 = vst [vmem:[#allocation90_spill] sm:$0xff] %v8197_v18  ;;  %v8199_v20 = vld [vmem:[#allocation2 + $0x58] sm:$0xff]  ;;  %v8205_v33 = vld [vmem:[#allocation2 + $0x60] sm:$0xff]  ;;  %p7481_p13 = por %p7480_p12, %p7479_p11 }
 0x257   :  { %10240 = vst [vmem:[#allocation91_spill] sm:$0xff] %v8199_v20  ;;  %10241 = vst [vmem:[#allocation92_spill] sm:$0xff] %v8205_v33  ;;  %v8207_v8 = vld [vmem:[#allocation2 + $0x68] sm:$0xff]  ;;  %v8209_v34 = vld [vmem:[#allocation2 + $0x70] sm:$0xff] }
 0x258   :  { %10242 = vst [vmem:[#allocation93_spill] sm:$0xff] %v8207_v8  ;;  %10243 = vst [vmem:[#allocation94_spill] sm:$0xff] %v8209_v34  ;;  %v8215_v45 = vld [vmem:[#allocation2 + $0x78] sm:$0xff]  ;;  %v8217_v21 = vld [vmem:[#allocation2 + $0x80] sm:$0xff]  ;;  %p7482_p0 = pnand %p7481_p13, %p7475_p2 }
 0x259   :  { %10244 = vst [vmem:[#allocation95_spill] sm:$0xff] %v8215_v45  ;;  %10245 = vst [vmem:[#allocation96_spill] sm:$0xff] %v8217_v21  ;;  %v8219_v10 = vld [vmem:[#allocation2 + $0x88] sm:$0xff]  ;;  %v8225_v25 = vld [vmem:[#allocation2 + $0x90] sm:$0xff] }
 0x25a   :  { %10246 = vst [vmem:[#allocation97_spill] sm:$0xff] %v8219_v10  ;;  %10247 = vst [vmem:[#allocation98_spill] sm:$0xff] %v8225_v25  ;;  %v8227_v38 = vld [vmem:[#allocation2 + $0x98] sm:$0xff]  ;;  %v8229_v41 = vld [vmem:[#allocation2 + $0xa0] sm:$0xff] }
 0x25b   :  { %10248 = vst [vmem:[#allocation99_spill] sm:$0xff] %v8227_v38  ;;  %10249 = vst [vmem:[#allocation100_spill] sm:$0xff] %v8229_v41  ;;  %v8235_v60 = vld [vmem:[#allocation2 + $0xa8] sm:$0xff]  ;;  %v8237_v11 = vld [vmem:[#allocation2 + $0xb0] sm:$0xff] }
 0x25c   :  { %10250 = vst [vmem:[#allocation101_spill] sm:$0xff] %v8235_v60  ;;  %10251 = vst [vmem:[#allocation102_spill] sm:$0xff] %v8237_v11  ;;  %v8239_v0 = vld [vmem:[#allocation2 + $0xb8] sm:$0xff]  ;;  %v8249_v35 = vld [vmem:[#allocation2 + $0xc0] sm:$0xff] }
 0x25d   :  { %10252 = vst [vmem:[#allocation103_spill] sm:$0xff] %v8239_v0  ;;  %10253 = vst [vmem:[#allocation104_spill] sm:$0xff] %v8249_v35  ;;  %v8251_v37 = vld [vmem:[#allocation2 + $0xc8] sm:$0xff]  ;;  %v8257_v31 = vld [vmem:[#allocation2 + $0xd0] sm:$0xff] }
 0x25e   :  { %10254 = vst [vmem:[#allocation105_spill] sm:$0xff] %v8251_v37  ;;  %10255 = vst [vmem:[#allocation106_spill] sm:$0xff] %v8257_v31  ;;  %v8259_v27 = vld [vmem:[#allocation2 + $0xd8] sm:$0xff]  ;;  %v8261_v12 = vld [vmem:[#allocation2 + $0xe0] sm:$0xff] }
 0x25f   :  { %10256 = vst [vmem:[#allocation107_spill] sm:$0xff] %v8259_v27  ;;  %10257 = vst [vmem:[#allocation108_spill] sm:$0xff] %v8261_v12  ;;  %v8267_v56 = vld [vmem:[#allocation2 + $0xe8] sm:$0xff]  ;;  %v8269_v57 = vld [vmem:[#allocation2 + $0xf0] sm:$0xff] }
 0x260   :  { %10258 = vst [vmem:[#allocation109_spill] sm:$0xff] %v8267_v56  ;;  %10259 = vst [vmem:[#allocation110_spill] sm:$0xff] %v8269_v57  ;;  %v8271_v9 = vld [vmem:[#allocation2 + $0xf8] sm:$0xff]  ;;  %v8281_v28 = vld [vmem:[#allocation2 + $0x100] sm:$0xff] }
 0x261   :  { %10260 = vst [vmem:[#allocation111_spill] sm:$0xff] %v8271_v9  ;;  %10261 = vst [vmem:[#allocation112_spill] sm:$0xff] %v8281_v28  ;;  %v8283_v46 = vld [vmem:[#allocation2 + $0x108] sm:$0xff]  ;;  %v8289_v49 = vld [vmem:[#allocation2 + $0x110] sm:$0xff] }
 0x262   :  { %10262 = vst [vmem:[#allocation113_spill] sm:$0xff] %v8283_v46  ;;  %10263 = vst [vmem:[#allocation114_spill] sm:$0xff] %v8289_v49  ;;  %v8291_v59 = vld [vmem:[#allocation2 + $0x118] sm:$0xff]  ;;  %v8293_v29 = vld [vmem:[#allocation2 + $0x120] sm:$0xff] }
 0x263   :  { %10264 = vst [vmem:[#allocation115_spill] sm:$0xff] %v8291_v59  ;;  %10265 = vst [vmem:[#allocation116_spill] sm:$0xff] %v8293_v29  ;;  %v8299_v15 = vld [vmem:[#allocation2 + $0x128] sm:$0xff]  ;;  %v8301_v58 = vld [vmem:[#allocation2 + $0x130] sm:$0xff] }
 0x264   :  { %10266 = vst [vmem:[#allocation117_spill] sm:$0xff] %v8299_v15  ;;  %10267 = vst [vmem:[#allocation118_spill] sm:$0xff] %v8301_v58  ;;  %v8303_v24 = vld [vmem:[#allocation2 + $0x138] sm:$0xff]  ;;  %v8313_v39 = vld [vmem:[#allocation2 + $0x140] sm:$0xff] }
 0x265   :  { %10268 = vst [vmem:[#allocation119_spill] sm:$0xff] %v8303_v24  ;;  %10269 = vst [vmem:[#allocation120_spill] sm:$0xff] %v8313_v39  ;;  %v8315_v44 = vld [vmem:[#allocation2 + $0x148] sm:$0xff]  ;;  %v8321_v14 = vld [vmem:[#allocation2 + $0x150] sm:$0xff] }
 0x266   :  { %10270 = vst [vmem:[#allocation121_spill] sm:$0xff] %v8315_v44  ;;  %10271 = vst [vmem:[#allocation122_spill] sm:$0xff] %v8321_v14  ;;  %v8323_v22 = vld [vmem:[#allocation2 + $0x158] sm:$0xff]  ;;  %v8325_v54 = vld [vmem:[#allocation2 + $0x160] sm:$0xff] }
 0x267   :  { %10272 = vst [vmem:[#allocation123_spill] sm:$0xff] %v8323_v22  ;;  %10273 = vst [vmem:[#allocation124_spill] sm:$0xff] %v8325_v54  ;;  %v8331_v51 = vld [vmem:[#allocation2 + $0x168] sm:$0xff]  ;;  %v8333_v17 = vld [vmem:[#allocation2 + $0x170] sm:$0xff] }
 0x268   :  { %10274 = vst [vmem:[#allocation125_spill] sm:$0xff] %v8331_v51  ;;  %10275 = vst [vmem:[#allocation126_spill] sm:$0xff] %v8333_v17  ;;  %v8335_v62 = vld [vmem:[#allocation2 + $0x178] sm:$0xff]  ;;  %v8345_v57 = vld [vmem:[#allocation2 + $0x180] sm:$0xff] }
 0x269   :  { %10276 = vst [vmem:[#allocation127_spill] sm:$0xff] %v8335_v62  ;;  %10277 = vst [vmem:[#allocation128_spill] sm:$0xff] %v8345_v57  ;;  %v8347_v12 = vld [vmem:[#allocation2 + $0x188] sm:$0xff]  ;;  %v8353_v9 = vld [vmem:[#allocation2 + $0x190] sm:$0xff] }
 0x26a   :  { %10278 = vst [vmem:[#allocation129_spill] sm:$0xff] %v8347_v12  ;;  %10279 = vst [vmem:[#allocation130_spill] sm:$0xff] %v8353_v9  ;;  %v8355_v2 = vld [vmem:[#allocation2 + $0x198] sm:$0xff]  ;;  %v8357_v16 = vld [vmem:[#allocation2 + $0x1a0] sm:$0xff] }
 0x26b   :  { %10280 = vst [vmem:[#allocation131_spill] sm:$0xff] %v8355_v2  ;;  %10281 = vst [vmem:[#allocation132_spill] sm:$0xff] %v8357_v16  ;;  %v8363_v29 = vld [vmem:[#allocation2 + $0x1a8] sm:$0xff]  ;;  %v8365_v55 = vld [vmem:[#allocation2 + $0x1b0] sm:$0xff] }
 0x26c   :  { %10282 = vst [vmem:[#allocation133_spill] sm:$0xff] %v8363_v29  ;;  %10283 = vst [vmem:[#allocation134_spill] sm:$0xff] %v8365_v55  ;;  %v8367_v40 = vld [vmem:[#allocation2 + $0x1b8] sm:$0xff]  ;;  %v8377_v11 = vld [vmem:[#allocation2 + $0x1c0] sm:$0xff] }
 0x26d   :  { %10284 = vst [vmem:[#allocation135_spill] sm:$0xff] %v8367_v40  ;;  %10285 = vst [vmem:[#allocation136_spill] sm:$0xff] %v8377_v11  ;;  %v8379_v41 = vld [vmem:[#allocation2 + $0x1c8] sm:$0xff]  ;;  %v8385_v0 = vld [vmem:[#allocation2 + $0x1d0] sm:$0xff] }
 0x26e   :  { %10286 = vst [vmem:[#allocation137_spill] sm:$0xff] %v8379_v41  ;;  %10287 = vst [vmem:[#allocation138_spill] sm:$0xff] %v8385_v0  ;;  %v8387_v42 = vld [vmem:[#allocation2 + $0x1d8] sm:$0xff]  ;;  %v8389_v58 = vld [vmem:[#allocation2 + $0x1e0] sm:$0xff] }
 0x26f   :  { %10288 = vst [vmem:[#allocation139_spill] sm:$0xff] %v8387_v42  ;;  %10289 = vst [vmem:[#allocation140_spill] sm:$0xff] %v8389_v58  ;;  %v8395_v54 = vld [vmem:[#allocation2 + $0x1e8] sm:$0xff]  ;;  %v8397_v24 = vld [vmem:[#allocation2 + $0x1f0] sm:$0xff] }
 0x270   :  { %10290 = vst [vmem:[#allocation141_spill] sm:$0xff] %v8395_v54  ;;  %10291 = vst [vmem:[#allocation142_spill] sm:$0xff] %v8397_v24  ;;  %v8399_v15 = vld [vmem:[#allocation2 + $0x1f8] sm:$0xff]  ;;  %v8409_v34 = vld [vmem:[#allocation2 + $0x200] sm:$0xff] }
 0x271   :  { %10292 = vst [vmem:[#allocation143_spill] sm:$0xff] %v8399_v15  ;;  %10293 = vst [vmem:[#allocation144_spill] sm:$0xff] %v8409_v34  ;;  %v8411_v33 = vld [vmem:[#allocation2 + $0x208] sm:$0xff]  ;;  %v8417_v45 = vld [vmem:[#allocation2 + $0x210] sm:$0xff] }
 0x272   :  { %10294 = vst [vmem:[#allocation145_spill] sm:$0xff] %v8411_v33  ;;  %10295 = vst [vmem:[#allocation146_spill] sm:$0xff] %v8417_v45  ;;  %v8419_v56 = vld [vmem:[#allocation2 + $0x218] sm:$0xff]  ;;  %v8421_v17 = vld [vmem:[#allocation2 + $0x220] sm:$0xff] }
 0x273   :  { %10296 = vst [vmem:[#allocation147_spill] sm:$0xff] %v8419_v56  ;;  %10297 = vst [vmem:[#allocation148_spill] sm:$0xff] %v8421_v17  ;;  %v8427_v16 = vld [vmem:[#allocation2 + $0x228] sm:$0xff]  ;;  %v8429_v62 = vld [vmem:[#allocation2 + $0x230] sm:$0xff] }
 0x274   :  { %10298 = vst [vmem:[#allocation149_spill] sm:$0xff] %v8427_v16  ;;  %10299 = vst [vmem:[#allocation150_spill] sm:$0xff] %v8429_v62  ;;  %v8431_v51 = vld [vmem:[#allocation2 + $0x238] sm:$0xff]  ;;  %v8441_v1 = vld [vmem:[#allocation2 + $0x240] sm:$0xff] }
 0x275   :  { %10300 = vst [vmem:[#allocation151_spill] sm:$0xff] %v8431_v51  ;;  %10301 = vst [vmem:[#allocation152_spill] sm:$0xff] %v8441_v1  ;;  %v8443_v52 = vld [vmem:[#allocation2 + $0x248] sm:$0xff]  ;;  %v8449_v26 = vld [vmem:[#allocation2 + $0x250] sm:$0xff] }
 0x276   :  { %10302 = vst [vmem:[#allocation153_spill] sm:$0xff] %v8449_v26  ;;  %v8451_v60 = vld [vmem:[#allocation2 + $0x258] sm:$0xff]  ;;  %v8453_v55 = vld [vmem:[#allocation2 + $0x260] sm:$0xff]  ;;  %v8459_v58 = vld [vmem:[#allocation2 + $0x268] sm:$0xff] }
 0x277   :  { %10303 = vst [vmem:[#allocation154_spill] sm:$0xff] %v8453_v55  ;;  %10304 = vst [vmem:[#allocation155_spill] sm:$0xff] %v8459_v58  ;;  %v8461_v40 = vld [vmem:[#allocation2 + $0x270] sm:$0xff]  ;;  %v8463_v29 = vld [vmem:[#allocation2 + $0x278] sm:$0xff] }
 0x278   :  { %10305 = vst [vmem:[#allocation156_spill] sm:$0xff] %v8461_v40  ;;  %10306 = vst [vmem:[#allocation157_spill] sm:$0xff] %v8463_v29  ;;  %v8469_v5 = vld [vmem:[#allocation2 + $0x280] sm:$0xff]  ;;  %v8471_v8 = vld [vmem:[#allocation2 + $0x288] sm:$0xff] }
 0x279   :  { %10307 = vst [vmem:[#allocation158_spill] sm:$0xff] %v8469_v5  ;;  %v8473_v24 = vld [vmem:[#allocation2 + $0x290] sm:$0xff]  ;;  %v8475_v36 = vld [vmem:[#allocation2 + $0x298] sm:$0xff]  ;;  %v8481_v34 = vld [vmem:[#allocation2 + $0x2a0] sm:$0xff] }
 0x27a   :  { %10308 = vst [vmem:[#allocation159_spill] sm:$0xff] %v8473_v24  ;;  %v8483_v54 = vld [vmem:[#allocation2 + $0x2a8] sm:$0xff]  ;;  %v8485_v3 = vld [vmem:[#allocation2 + $0x2b0] sm:$0xff]  ;;  %v8487_v45 = vld [vmem:[#allocation2 + $0x2b8] sm:$0xff] }
 0x27b   :  { %v8493_v17 = vld [vmem:[#allocation2 + $0x2c0] sm:$0xff]  ;;  %v8495_v43 = vld [vmem:[#allocation2 + $0x2c8] sm:$0xff]  ;;  %v8497_v15 = vld [vmem:[#allocation2 + $0x2d0] sm:$0xff] }
 0x27c   :  { %v8499_v62 = vld [vmem:[#allocation2 + $0x2d8] sm:$0xff]  ;;  %v8501_v51 = vld [vmem:[#allocation2 + $0x2e0] sm:$0xff]  ;;  %v8503_v16 = vld [vmem:[#allocation2 + $0x2e8] sm:$0xff] }
 0x27d   :  { %v8505_v33 = vld [vmem:[#allocation2 + $0x2f0] sm:$0xff]  ;;  %v8507_v50 = vld [vmem:[#allocation2 + $0x2f8] sm:$0xff]  ;;  %v8509_v56 = vld [vmem:[#allocation2 + $0x300] sm:$0xff] }
 0x27e   :  { %v8511_v23 = vld [vmem:[#allocation2 + $0x308] sm:$0xff]  ;;  %v8513_v32 = vld [vmem:[#allocation2 + $0x310] sm:$0xff]  ;;  %v8515_v0 = vld [vmem:[#allocation2 + $0x318] sm:$0xff] }
 0x27f   :  { %v8517_v11 = vld [vmem:[#allocation2 + $0x320] sm:$0xff]  ;;  %v8519_v42 = vld [vmem:[#allocation2 + $0x328] sm:$0xff]  ;;  %v8521_v41 = vld [vmem:[#allocation2 + $0x330] sm:$0xff] }
 0x280   :  { %v8523_v9 = vld [vmem:[#allocation2 + $0x338] sm:$0xff]  ;;  %v8525_v57 = vld [vmem:[#allocation2 + $0x340] sm:$0xff]  ;;  %v8527_v2 = vld [vmem:[#allocation2 + $0x348] sm:$0xff] }
 0x281   :  { %v8529_v12 = vld [vmem:[#allocation2 + $0x350] sm:$0xff]  ;;  %v8531_v14 = vld [vmem:[#allocation2 + $0x358] sm:$0xff]  ;;  %v8533_v39 = vld [vmem:[#allocation2 + $0x360] sm:$0xff] }
 0x282   :  { %10309 = vst [vmem:[#allocation160_spill] sm:$0xff] %v8533_v39  ;;  %v8535_v22 = vld [vmem:[#allocation2 + $0x368] sm:$0xff]  ;;  %v8537_v44 = vld [vmem:[#allocation2 + $0x370] sm:$0xff]  ;;  %v8539_v49 = vld [vmem:[#allocation2 + $0x378] sm:$0xff] }
 0x283   :  { %10310 = vst [vmem:[#allocation161_spill] sm:$0xff] %v8537_v44  ;;  %v8541_v28 = vld [vmem:[#allocation2 + $0x380] sm:$0xff]  ;;  %v8543_v59 = vld [vmem:[#allocation2 + $0x388] sm:$0xff]  ;;  %v8545_v46 = vld [vmem:[#allocation2 + $0x390] sm:$0xff] }
 0x284   :  { %v8547_v31 = vld [vmem:[#allocation2 + $0x398] sm:$0xff]  ;;  %v8549_v35 = vld [vmem:[#allocation2 + $0x3a0] sm:$0xff]  ;;  %v8555_v38 = vld [vmem:[#allocation2 + $0x3a8] sm:$0xff] }
 0x285   :  { %10311 = vst [vmem:[#allocation162_spill] sm:$0xff] %v8549_v35  ;;  %10312 = vst [vmem:[#allocation163_spill] sm:$0xff] %v8555_v38  ;;  %v8557_v10 = vld [vmem:[#allocation2 + $0x3b0] sm:$0xff]  ;;  %v8559_v18 = vld [vmem:[#allocation2 + $0x3b8] sm:$0xff] }
 0x286   :  { %10313 = vst [vmem:[#allocation164_spill] sm:$0xff] %v8557_v10  ;;  %10314 = vst [vmem:[#allocation165_spill] sm:$0xff] %v8559_v18  ;;  %v8565_v53 = vld [vmem:[#allocation2 + $0x3c0] sm:$0xff]  ;;  %v8567_v37 = vld [vmem:[#allocation2 + $0x3c8] sm:$0xff] }
 0x287   :  { %v8569_v25 = vld [vmem:[#allocation2 + $0x3d0] sm:$0xff]  ;;  %v8575_v1 = vld [vmem:[#allocation2 + $0x3d8] sm:$0xff]  ;;  %v8577_v20 = vld [vmem:[#allocation2 + $0x3e0] sm:$0xff] }
 0x288   :  { %10315 = vst [vmem:[#allocation166_spill] sm:$0xff] %v8577_v20  ;;  %v8579_v13 = vld [vmem:[#allocation2 + $0x3e8] sm:$0xff]  ;;  %v8585_v19 = vld [vmem:[#allocation2 + $0x3f0] sm:$0xff]  ;;  %v8587_v6 = vld [vmem:[#allocation2 + $0x3f8] sm:$0xff] }
 0x289   :  { %10316 = vst [vmem:[#allocation167_spill] sm:$0xff] %v8579_v13  ;;  %10317 = vst [vmem:[#allocation168_spill] sm:$0xff] %v8585_v19 }
 0x28a   :  { %10318 = vst [vmem:[#allocation169_spill] sm:$0xff] %v8587_v6 }
 0x28b   :  { %7485 = shalt.err (!%p7482_p0)  }
 0x28c   :  { %7497 = shalt.err (!%p7947_p9)  }
 0x28d   :  { %1633 = dma.hbm_to_vmem [thread:$0]  %s7962_s3, 16384, %s7915_s9, [#allocation3] }
 0x28e   :  { %7592 = dma.done.wait [#allocation3 + $0x1], 16384 }
 0x28f   :  { %7593 = vsyncadd [#allocation3 + $0x1], 4294950912  ;;  %2052 = vmatprep.mubr.bf16.mxu0 %v8035_v63  ;;  %2134 = vmatprep.mubr.bf16.mxu1 %v8035_v63  ;;  %v1637_v21 = vld [vmem:[#allocation2 + $0x408] sm:$0xff]  ;;  %v1639_v26 = vld [vmem:[#allocation2 + $0x418] sm:$0xff]  ;;  %s8987_s8 = scalar_lea.hbm %s9956_s4, 65536  ;;  %p7502_p3 = scmp.lt.u32.totalorder %s8600_s14, %s9956_s4 }
 0x290   :  { %v1636_v30 = vld [vmem:[#allocation2 + $0x400] sm:$0xff]  ;;  %v1765_v24 = vunpack.c.l.s8.bf16 %v1637_v21  ;;  %v1767_v58 = vunpack.c.l.s8.bf16 %v1639_v26  ;;  %v1638_v10 = vld [vmem:[#allocation2 + $0x410] sm:$0xff]  ;;  %v1773_v29 = vunpack.c.h.s8.bf16 %v1637_v21  ;;  %v1775_v40 = vunpack.c.h.s8.bf16 %v1639_v26  ;;  %v1645_v13 = vld [vmem:[#allocation2 + $0x448] sm:$0xff]  ;;  %p7500_p1 = scmp.ne.s32.totalorder %s8600_s14, %s8987_s8  ;;  %p7503_p4 = scmp.lt.u32.totalorder %s7929_s16, %s8987_s8 }
 0x291   :  { %v1764_v5 = vunpack.c.l.s8.bf16 %v1636_v30  ;;  %v1766_v20 = vunpack.c.l.s8.bf16 %v1638_v10  ;;  %v1647_v27 = vld [vmem:[#allocation2 + $0x458] sm:$0xff]  ;;  %v1772_v55 = vunpack.c.h.s8.bf16 %v1636_v30  ;;  %v1774_v19 = vunpack.c.h.s8.bf16 %v1638_v10  ;;  %v1644_v18 = vld [vmem:[#allocation2 + $0x440] sm:$0xff]  ;;  %v1646_v38 = vld [vmem:[#allocation2 + $0x450] sm:$0xff]  ;;  %p7505_p6 = scmp.lt.u32.totalorder %s8987_s8, %s8600_s14 }
 0x292   :  { %2020 = vmatprep.subr.bf16.mxu0 %v1765_v24  ;;  %2102 = vmatprep.subr.bf16.mxu1 %v1767_v58  ;;  %v1781_v6 = vunpack.c.l.s8.bf16 %v1645_v13  ;;  %v1783_v35 = vunpack.c.l.s8.bf16 %v1647_v27  ;;  %v1780_v44 = vunpack.c.l.s8.bf16 %v1644_v18  ;;  %v1782_v21 = vunpack.c.l.s8.bf16 %v1646_v38  ;;  %v1653_v24 = vld [vmem:[#allocation2 + $0x488] sm:$0xff]  ;;  %v1655_v58 = vld [vmem:[#allocation2 + $0x498] sm:$0xff]  ;;  %v1652_v10 = vld [vmem:[#allocation2 + $0x480] sm:$0xff]  ;;  %p7504_p5 = por %p7503_p4, %p7502_p3 }
 0x293   :  { %2021 = vmatpush1.bf16.msra.mxu0 %v1764_v5  ;;  %2103 = vmatpush1.bf16.msra.mxu1 %v1766_v20  ;;  %v1789_v26 = vunpack.c.h.s8.bf16 %v1645_v13  ;;  %v1791_v39 = vunpack.c.h.s8.bf16 %v1647_v27  ;;  %v1788_v30 = vunpack.c.h.s8.bf16 %v1644_v18  ;;  %v1790_v5 = vunpack.c.h.s8.bf16 %v1646_v38  ;;  %v1654_v20 = vld [vmem:[#allocation2 + $0x490] sm:$0xff]  ;;  %v1661_v13 = vld [vmem:[#allocation2 + $0x4c8] sm:$0xff]  ;;  %v1663_v27 = vld [vmem:[#allocation2 + $0x4d8] sm:$0xff] }
 0x294   :  { %2022 = vmatprep.subr.bf16.mxu0 %v1773_v29  ;;  %2104 = vmatprep.subr.bf16.mxu1 %v1775_v40  ;;  %v1797_v29 = vunpack.c.l.s8.bf16 %v1653_v24  ;;  %v1799_v40 = vunpack.c.l.s8.bf16 %v1655_v58  ;;  %v1806_v18 = vunpack.c.h.s8.bf16 %v1654_v20  ;;  %v1815_v38 = vunpack.c.l.s8.bf16 %v1663_v27  ;;  %p7506_p2 = por %p7505_p6, %p7504_p5 }
 0x296   :  { %p7507_p8 = pnand %p7506_p2, %p7500_p1 }
 0x297   :  { %2023 = vmatpush1.bf16.msra.mxu0 %v1772_v55  ;;  %2105 = vmatpush1.bf16.msra.mxu1 %v1774_v19  ;;  %v1796_v55 = vunpack.c.l.s8.bf16 %v1652_v10  ;;  %v1798_v19 = vunpack.c.l.s8.bf16 %v1654_v20 }
 0x298   :  { %2024 = vmatprep.subr.bf16.mxu0 %v1781_v6  ;;  %2106 = vmatprep.subr.bf16.mxu1 %v1783_v35  ;;  %v1805_v35 = vunpack.c.h.s8.bf16 %v1653_v24  ;;  %v1807_v6 = vunpack.c.h.s8.bf16 %v1655_v58  ;;  %v1821_v24 = vunpack.c.h.s8.bf16 %v1661_v13  ;;  %v1823_v58 = vunpack.c.h.s8.bf16 %v1663_v27 }
 0x29b   :  { %2025 = vmatpush1.bf16.msra.mxu0 %v1780_v44  ;;  %2107 = vmatpush1.bf16.msra.mxu1 %v1782_v21  ;;  %v1804_v44 = vunpack.c.h.s8.bf16 %v1652_v10  ;;  %v1660_v21 = vld [vmem:[#allocation2 + $0x4c0] sm:$0xff] }
 0x29c   :  { %2026 = vmatprep.subr.bf16.mxu0 %v1789_v26  ;;  %2108 = vmatprep.subr.bf16.mxu1 %v1791_v39  ;;  %v1813_v39 = vunpack.c.l.s8.bf16 %v1661_v13  ;;  %v1662_v26 = vld [vmem:[#allocation2 + $0x4d0] sm:$0xff]  ;;  %v1820_v10 = vunpack.c.h.s8.bf16 %v1660_v21 }
 0x29d   :  { %v1822_v20 = vunpack.c.h.s8.bf16 %v1662_v26 }
 0x29f   :  { %2027 = vmatpush1.bf16.msra.mxu0 %v1788_v30  ;;  %2109 = vmatpush1.bf16.msra.mxu1 %v1790_v5  ;;  %v1812_v30 = vunpack.c.l.s8.bf16 %v1660_v21  ;;  %v1814_v5 = vunpack.c.l.s8.bf16 %v1662_v26 }
 0x2a0   :  { %2028 = vmatprep.subr.bf16.mxu0 %v1797_v29  ;;  %2110 = vmatprep.subr.bf16.mxu1 %v1799_v40  ;;  %v1669_v29 = vld [vmem:[#allocation2 + $0x508] sm:$0xff]  ;;  %v1671_v40 = vld [vmem:[#allocation2 + $0x518] sm:$0xff] }
 0x2a1   :  { %v1837_v13 = vunpack.c.h.s8.bf16 %v1669_v29  ;;  %v1839_v27 = vunpack.c.h.s8.bf16 %v1671_v40 }
 0x2a3   :  { %2029 = vmatpush1.bf16.msra.mxu0 %v1796_v55  ;;  %2111 = vmatpush1.bf16.msra.mxu1 %v1798_v19  ;;  %v1829_v55 = vunpack.c.l.s8.bf16 %v1669_v29  ;;  %v1831_v19 = vunpack.c.l.s8.bf16 %v1671_v40 }
 0x2a4   :  { %2030 = vmatprep.subr.bf16.mxu0 %v1805_v35  ;;  %2112 = vmatprep.subr.bf16.mxu1 %v1807_v6  ;;  %v1668_v35 = vld [vmem:[#allocation2 + $0x500] sm:$0xff]  ;;  %v1670_v6 = vld [vmem:[#allocation2 + $0x510] sm:$0xff] }
 0x2a5   :  { %v1836_v21 = vunpack.c.h.s8.bf16 %v1668_v35  ;;  %v1838_v26 = vunpack.c.h.s8.bf16 %v1670_v6 }
 0x2a7   :  { %2031 = vmatpush1.bf16.msra.mxu0 %v1804_v44  ;;  %2113 = vmatpush1.bf16.msra.mxu1 %v1806_v18  ;;  %v1828_v44 = vunpack.c.l.s8.bf16 %v1668_v35  ;;  %v1830_v18 = vunpack.c.l.s8.bf16 %v1670_v6 }
 0x2a8   :  { %2032 = vmatprep.subr.bf16.mxu0 %v1813_v39  ;;  %2114 = vmatprep.subr.bf16.mxu1 %v1815_v38  ;;  %v1677_v39 = vld [vmem:[#allocation2 + $0x548] sm:$0xff]  ;;  %v1679_v38 = vld [vmem:[#allocation2 + $0x558] sm:$0xff] }
 0x2a9   :  { %v1853_v29 = vunpack.c.h.s8.bf16 %v1677_v39  ;;  %v1855_v40 = vunpack.c.h.s8.bf16 %v1679_v38 }
 0x2ab   :  { %2033 = vmatpush1.bf16.msra.mxu0 %v1812_v30  ;;  %2115 = vmatpush1.bf16.msra.mxu1 %v1814_v5  ;;  %v1845_v30 = vunpack.c.l.s8.bf16 %v1677_v39  ;;  %v1847_v5 = vunpack.c.l.s8.bf16 %v1679_v38 }
 0x2ac   :  { %2034 = vmatprep.subr.bf16.mxu0 %v1821_v24  ;;  %2116 = vmatprep.subr.bf16.mxu1 %v1823_v58  ;;  %v1676_v24 = vld [vmem:[#allocation2 + $0x540] sm:$0xff]  ;;  %v1678_v58 = vld [vmem:[#allocation2 + $0x550] sm:$0xff] }
 0x2ad   :  { %v1852_v35 = vunpack.c.h.s8.bf16 %v1676_v24  ;;  %v1854_v6 = vunpack.c.h.s8.bf16 %v1678_v58 }
 0x2af   :  { %2035 = vmatpush1.bf16.msra.mxu0 %v1820_v10  ;;  %2117 = vmatpush1.bf16.msra.mxu1 %v1822_v20  ;;  %v1844_v10 = vunpack.c.l.s8.bf16 %v1676_v24  ;;  %v1846_v20 = vunpack.c.l.s8.bf16 %v1678_v58 }
 0x2b0   :  { %2036 = vmatprep.subr.bf16.mxu0 %v1829_v55  ;;  %2118 = vmatprep.subr.bf16.mxu1 %v1831_v19  ;;  %v1685_v55 = vld [vmem:[#allocation2 + $0x588] sm:$0xff]  ;;  %v1687_v19 = vld [vmem:[#allocation2 + $0x598] sm:$0xff] }
 0x2b1   :  { %v1869_v39 = vunpack.c.h.s8.bf16 %v1685_v55  ;;  %v1871_v38 = vunpack.c.h.s8.bf16 %v1687_v19 }
 0x2b3   :  { %2037 = vmatpush1.bf16.msra.mxu0 %v1828_v44  ;;  %2119 = vmatpush1.bf16.msra.mxu1 %v1830_v18  ;;  %v1861_v44 = vunpack.c.l.s8.bf16 %v1685_v55  ;;  %v1863_v18 = vunpack.c.l.s8.bf16 %v1687_v19 }
 0x2b4   :  { %2038 = vmatprep.subr.bf16.mxu0 %v1837_v13  ;;  %2120 = vmatprep.subr.bf16.mxu1 %v1839_v27  ;;  %v1684_v13 = vld [vmem:[#allocation2 + $0x580] sm:$0xff]  ;;  %v1686_v27 = vld [vmem:[#allocation2 + $0x590] sm:$0xff] }
 0x2b5   :  { %v1868_v24 = vunpack.c.h.s8.bf16 %v1684_v13  ;;  %v1870_v58 = vunpack.c.h.s8.bf16 %v1686_v27 }
 0x2b7   :  { %2039 = vmatpush1.bf16.msra.mxu0 %v1836_v21  ;;  %2121 = vmatpush1.bf16.msra.mxu1 %v1838_v26  ;;  %v1860_v21 = vunpack.c.l.s8.bf16 %v1684_v13  ;;  %v1862_v26 = vunpack.c.l.s8.bf16 %v1686_v27 }
 0x2b8   :  { %2040 = vmatprep.subr.bf16.mxu0 %v1845_v30  ;;  %2122 = vmatprep.subr.bf16.mxu1 %v1847_v5  ;;  %v1693_v30 = vld [vmem:[#allocation2 + $0x5c8] sm:$0xff]  ;;  %v1695_v5 = vld [vmem:[#allocation2 + $0x5d8] sm:$0xff] }
 0x2b9   :  { %v1885_v55 = vunpack.c.h.s8.bf16 %v1693_v30  ;;  %v1887_v19 = vunpack.c.h.s8.bf16 %v1695_v5 }
 0x2bb   :  { %2041 = vmatpush1.bf16.msra.mxu0 %v1844_v10  ;;  %2123 = vmatpush1.bf16.msra.mxu1 %v1846_v20  ;;  %v1877_v10 = vunpack.c.l.s8.bf16 %v1693_v30  ;;  %v1879_v20 = vunpack.c.l.s8.bf16 %v1695_v5 }
 0x2bc   :  { %2042 = vmatprep.subr.bf16.mxu0 %v1853_v29  ;;  %2124 = vmatprep.subr.bf16.mxu1 %v1855_v40  ;;  %v1692_v29 = vld [vmem:[#allocation2 + $0x5c0] sm:$0xff]  ;;  %v1694_v40 = vld [vmem:[#allocation2 + $0x5d0] sm:$0xff] }
 0x2bd   :  { %v1884_v13 = vunpack.c.h.s8.bf16 %v1692_v29  ;;  %v1886_v27 = vunpack.c.h.s8.bf16 %v1694_v40 }
 0x2bf   :  { %2043 = vmatpush1.bf16.msra.mxu0 %v1852_v35  ;;  %2125 = vmatpush1.bf16.msra.mxu1 %v1854_v6  ;;  %v1876_v35 = vunpack.c.l.s8.bf16 %v1692_v29  ;;  %v1878_v6 = vunpack.c.l.s8.bf16 %v1694_v40 }
 0x2c0   :  { %2044 = vmatprep.subr.bf16.mxu0 %v1861_v44  ;;  %2126 = vmatprep.subr.bf16.mxu1 %v1863_v18  ;;  %v1701_v44 = vld [vmem:[#allocation2 + $0x608] sm:$0xff]  ;;  %v1703_v18 = vld [vmem:[#allocation2 + $0x618] sm:$0xff] }
 0x2c1   :  { %v1901_v30 = vunpack.c.h.s8.bf16 %v1701_v44  ;;  %v1903_v5 = vunpack.c.h.s8.bf16 %v1703_v18 }
 0x2c3   :  { %2045 = vmatpush1.bf16.msra.mxu0 %v1860_v21  ;;  %2127 = vmatpush1.bf16.msra.mxu1 %v1862_v26  ;;  %v1893_v21 = vunpack.c.l.s8.bf16 %v1701_v44  ;;  %v1895_v26 = vunpack.c.l.s8.bf16 %v1703_v18 }
 0x2c4   :  { %2046 = vmatprep.subr.bf16.mxu0 %v1869_v39  ;;  %2128 = vmatprep.subr.bf16.mxu1 %v1871_v38  ;;  %v1700_v39 = vld [vmem:[#allocation2 + $0x600] sm:$0xff]  ;;  %v1702_v38 = vld [vmem:[#allocation2 + $0x610] sm:$0xff] }
 0x2c5   :  { %v1900_v29 = vunpack.c.h.s8.bf16 %v1700_v39  ;;  %v1902_v40 = vunpack.c.h.s8.bf16 %v1702_v38 }
 0x2c7   :  { %2047 = vmatpush1.bf16.msra.mxu0 %v1868_v24  ;;  %2129 = vmatpush1.bf16.msra.mxu1 %v1870_v58  ;;  %v1892_v24 = vunpack.c.l.s8.bf16 %v1700_v39  ;;  %v1894_v58 = vunpack.c.l.s8.bf16 %v1702_v38 }
 0x2c8   :  { %2048 = vmatprep.subr.bf16.mxu0 %v1877_v10  ;;  %2130 = vmatprep.subr.bf16.mxu1 %v1879_v20  ;;  %v1709_v10 = vld [vmem:[#allocation2 + $0x648] sm:$0xff]  ;;  %v1711_v20 = vld [vmem:[#allocation2 + $0x658] sm:$0xff] }
 0x2cb   :  { %2049 = vmatpush1.bf16.msra.mxu0 %v1876_v35  ;;  %2131 = vmatpush1.bf16.msra.mxu1 %v1878_v6  ;;  %v1909_v35 = vunpack.c.l.s8.bf16 %v1709_v10  ;;  %v1911_v6 = vunpack.c.l.s8.bf16 %v1711_v20 }
 0x2cc   :  { %2050 = vmatprep.subr.bf16.mxu0 %v1885_v55  ;;  %2132 = vmatprep.subr.bf16.mxu1 %v1887_v19  ;;  %v1708_v55 = vld [vmem:[#allocation2 + $0x640] sm:$0xff]  ;;  %v1710_v19 = vld [vmem:[#allocation2 + $0x650] sm:$0xff] }
 0x2cd   :  { %v1908_v44 = vunpack.c.l.s8.bf16 %v1708_v55  ;;  %v1910_v18 = vunpack.c.l.s8.bf16 %v1710_v19  ;;  %v1916_v39 = vunpack.c.h.s8.bf16 %v1708_v55  ;;  %v1918_v38 = vunpack.c.h.s8.bf16 %v1710_v19 }
 0x2cf   :  { %2051 = vmatpush1.bf16.msra.mxu0 %v1884_v13  ;;  %2133 = vmatpush1.bf16.msra.mxu1 %v1886_v27  ;;  %v1917_v13 = vunpack.c.h.s8.bf16 %v1709_v10  ;;  %v1919_v27 = vunpack.c.h.s8.bf16 %v1711_v20 }
 0x2d0   :  { %2061 = vmatprep.subr.bf16.mxu0 %v1893_v21  ;;  %2143 = vmatprep.subr.bf16.mxu1 %v1895_v26  ;;  %v1717_v21 = vld [vmem:[#allocation2 + $0x688] sm:$0xff]  ;;  %v1719_v26 = vld [vmem:[#allocation2 + $0x698] sm:$0xff] }
 0x2d1   :  { %v1933_v10 = vunpack.c.h.s8.bf16 %v1717_v21  ;;  %v1935_v20 = vunpack.c.h.s8.bf16 %v1719_v26 }
 0x2d2   :  { %2053 = vmatmul.mubr.bf16.vlgmr.msra.gmra.mrb[20].mxu0 %v8031_v61  ;;  %2135 = vmatmul.mubr.bf16.vlgmr.msra.gmra.mrb[28].mxu1 %v8031_v61 }
 0x2d3   :  { %2062 = vmatpush1.bf16.msra.mxu0 %v1892_v24  ;;  %2144 = vmatpush1.bf16.msra.mxu1 %v1894_v58  ;;  %v1925_v24 = vunpack.c.l.s8.bf16 %v1717_v21  ;;  %v1927_v58 = vunpack.c.l.s8.bf16 %v1719_v26 }
 0x2d4   :  { %2063 = vmatprep.subr.bf16.mxu0 %v1901_v30  ;;  %2145 = vmatprep.subr.bf16.mxu1 %v1903_v5  ;;  %v1716_v30 = vld [vmem:[#allocation2 + $0x680] sm:$0xff]  ;;  %v1718_v5 = vld [vmem:[#allocation2 + $0x690] sm:$0xff] }
 0x2d5   :  { %2093 = vmatprep.mubr.bf16.mxu0 %v8087_v7  ;;  %2175 = vmatprep.mubr.bf16.mxu1 %v8087_v7  ;;  %v1932_v55 = vunpack.c.h.s8.bf16 %v1716_v30  ;;  %v1934_v19 = vunpack.c.h.s8.bf16 %v1718_v5 }
 0x2d7   :  { %2064 = vmatpush1.bf16.msra.mxu0 %v1900_v29  ;;  %2146 = vmatpush1.bf16.msra.mxu1 %v1902_v40  ;;  %v1924_v29 = vunpack.c.l.s8.bf16 %v1716_v30  ;;  %v1926_v40 = vunpack.c.l.s8.bf16 %v1718_v5 }
 0x2d8   :  { %2065 = vmatprep.subr.bf16.mxu0 %v1909_v35  ;;  %2147 = vmatprep.subr.bf16.mxu1 %v1911_v6  ;;  %v1725_v35 = vld [vmem:[#allocation2 + $0x6c8] sm:$0xff]  ;;  %v1727_v6 = vld [vmem:[#allocation2 + $0x6d8] sm:$0xff] }
 0x2d9   :  { %v1949_v21 = vunpack.c.h.s8.bf16 %v1725_v35  ;;  %v1951_v26 = vunpack.c.h.s8.bf16 %v1727_v6 }
 0x2db   :  { %2066 = vmatpush1.bf16.msra.mxu0 %v1908_v44  ;;  %2148 = vmatpush1.bf16.msra.mxu1 %v1910_v18  ;;  %v1941_v44 = vunpack.c.l.s8.bf16 %v1725_v35  ;;  %v1943_v18 = vunpack.c.l.s8.bf16 %v1727_v6 }
 0x2dc   :  { %2067 = vmatprep.subr.bf16.mxu0 %v1917_v13  ;;  %2149 = vmatprep.subr.bf16.mxu1 %v1919_v27  ;;  %v1724_v13 = vld [vmem:[#allocation2 + $0x6c0] sm:$0xff]  ;;  %v1726_v27 = vld [vmem:[#allocation2 + $0x6d0] sm:$0xff] }
 0x2dd   :  { %v1948_v30 = vunpack.c.h.s8.bf16 %v1724_v13  ;;  %v1950_v5 = vunpack.c.h.s8.bf16 %v1726_v27 }
 0x2df   :  { %2068 = vmatpush1.bf16.msra.mxu0 %v1916_v39  ;;  %2150 = vmatpush1.bf16.msra.mxu1 %v1918_v38  ;;  %v1940_v39 = vunpack.c.l.s8.bf16 %v1724_v13  ;;  %v1942_v38 = vunpack.c.l.s8.bf16 %v1726_v27 }
 0x2e0   :  { %2069 = vmatprep.subr.bf16.mxu0 %v1925_v24  ;;  %2151 = vmatprep.subr.bf16.mxu1 %v1927_v58  ;;  %v1733_v24 = vld [vmem:[#allocation2 + $0x708] sm:$0xff]  ;;  %v1735_v58 = vld [vmem:[#allocation2 + $0x718] sm:$0xff] }
 0x2e1   :  { %v1965_v35 = vunpack.c.h.s8.bf16 %v1733_v24  ;;  %v1967_v6 = vunpack.c.h.s8.bf16 %v1735_v58 }
 0x2e3   :  { %2070 = vmatpush1.bf16.msra.mxu0 %v1924_v29  ;;  %2152 = vmatpush1.bf16.msra.mxu1 %v1926_v40  ;;  %v1957_v29 = vunpack.c.l.s8.bf16 %v1733_v24  ;;  %v1959_v40 = vunpack.c.l.s8.bf16 %v1735_v58 }
 0x2e4   :  { %2071 = vmatprep.subr.bf16.mxu0 %v1933_v10  ;;  %2153 = vmatprep.subr.bf16.mxu1 %v1935_v20  ;;  %v1732_v10 = vld [vmem:[#allocation2 + $0x700] sm:$0xff]  ;;  %v1734_v20 = vld [vmem:[#allocation2 + $0x710] sm:$0xff] }
 0x2e5   :  { %v1964_v13 = vunpack.c.h.s8.bf16 %v1732_v10  ;;  %v1966_v27 = vunpack.c.h.s8.bf16 %v1734_v20 }
 0x2e7   :  { %2072 = vmatpush1.bf16.msra.mxu0 %v1932_v55  ;;  %2154 = vmatpush1.bf16.msra.mxu1 %v1934_v19  ;;  %v1956_v55 = vunpack.c.l.s8.bf16 %v1732_v10  ;;  %v1958_v19 = vunpack.c.l.s8.bf16 %v1734_v20 }
 0x2e8   :  { %2073 = vmatprep.subr.bf16.mxu0 %v1941_v44  ;;  %2155 = vmatprep.subr.bf16.mxu1 %v1943_v18  ;;  %v1741_v44 = vld [vmem:[#allocation2 + $0x748] sm:$0xff]  ;;  %v1743_v18 = vld [vmem:[#allocation2 + $0x758] sm:$0xff] }
 0x2e9   :  { %v1981_v24 = vunpack.c.h.s8.bf16 %v1741_v44  ;;  %v1983_v58 = vunpack.c.h.s8.bf16 %v1743_v18 }
 0x2eb   :  { %2074 = vmatpush1.bf16.msra.mxu0 %v1940_v39  ;;  %2156 = vmatpush1.bf16.msra.mxu1 %v1942_v38  ;;  %v1973_v39 = vunpack.c.l.s8.bf16 %v1741_v44  ;;  %v1975_v38 = vunpack.c.l.s8.bf16 %v1743_v18 }
 0x2ec   :  { %2075 = vmatprep.subr.bf16.mxu0 %v1949_v21  ;;  %2157 = vmatprep.subr.bf16.mxu1 %v1951_v26  ;;  %v1740_v21 = vld [vmem:[#allocation2 + $0x740] sm:$0xff]  ;;  %v1742_v26 = vld [vmem:[#allocation2 + $0x750] sm:$0xff] }
 0x2ed   :  { %v1980_v10 = vunpack.c.h.s8.bf16 %v1740_v21  ;;  %v1982_v20 = vunpack.c.h.s8.bf16 %v1742_v26 }
 0x2ef   :  { %2076 = vmatpush1.bf16.msra.mxu0 %v1948_v30  ;;  %2158 = vmatpush1.bf16.msra.mxu1 %v1950_v5  ;;  %v1972_v30 = vunpack.c.l.s8.bf16 %v1740_v21  ;;  %v1974_v5 = vunpack.c.l.s8.bf16 %v1742_v26 }
 0x2f0   :  { %2077 = vmatprep.subr.bf16.mxu0 %v1957_v29  ;;  %2159 = vmatprep.subr.bf16.mxu1 %v1959_v40  ;;  %v1749_v29 = vld [vmem:[#allocation2 + $0x788] sm:$0xff]  ;;  %v1751_v40 = vld [vmem:[#allocation2 + $0x798] sm:$0xff] }
 0x2f1   :  { %v1997_v44 = vunpack.c.h.s8.bf16 %v1749_v29  ;;  %v1999_v18 = vunpack.c.h.s8.bf16 %v1751_v40 }
 0x2f3   :  { %2078 = vmatpush1.bf16.msra.mxu0 %v1956_v55  ;;  %2160 = vmatpush1.bf16.msra.mxu1 %v1958_v19  ;;  %v1989_v55 = vunpack.c.l.s8.bf16 %v1749_v29  ;;  %v1991_v19 = vunpack.c.l.s8.bf16 %v1751_v40 }
 0x2f4   :  { %2079 = vmatprep.subr.bf16.mxu0 %v1965_v35  ;;  %2161 = vmatprep.subr.bf16.mxu1 %v1967_v6  ;;  %v1748_v35 = vld [vmem:[#allocation2 + $0x780] sm:$0xff]  ;;  %v1750_v6 = vld [vmem:[#allocation2 + $0x790] sm:$0xff] }
 0x2f5   :  { %v1996_v21 = vunpack.c.h.s8.bf16 %v1748_v35  ;;  %v1998_v26 = vunpack.c.h.s8.bf16 %v1750_v6 }
 0x2f7   :  { %2080 = vmatpush1.bf16.msra.mxu0 %v1964_v13  ;;  %2162 = vmatpush1.bf16.msra.mxu1 %v1966_v27  ;;  %v1988_v13 = vunpack.c.l.s8.bf16 %v1748_v35  ;;  %v1990_v27 = vunpack.c.l.s8.bf16 %v1750_v6 }
 0x2f8   :  { %2081 = vmatprep.subr.bf16.mxu0 %v1973_v39  ;;  %2163 = vmatprep.subr.bf16.mxu1 %v1975_v38  ;;  %v1757_v39 = vld [vmem:[#allocation2 + $0x7c8] sm:$0xff]  ;;  %v1759_v38 = vld [vmem:[#allocation2 + $0x7d8] sm:$0xff] }
 0x2f9   :  { %v2013_v29 = vunpack.c.h.s8.bf16 %v1757_v39  ;;  %v2015_v40 = vunpack.c.h.s8.bf16 %v1759_v38 }
 0x2fb   :  { %2082 = vmatpush1.bf16.msra.mxu0 %v1972_v30  ;;  %2164 = vmatpush1.bf16.msra.mxu1 %v1974_v5  ;;  %v2005_v30 = vunpack.c.l.s8.bf16 %v1757_v39  ;;  %v2007_v5 = vunpack.c.l.s8.bf16 %v1759_v38 }
 0x2fc   :  { %2083 = vmatprep.subr.bf16.mxu0 %v1981_v24  ;;  %2165 = vmatprep.subr.bf16.mxu1 %v1983_v58  ;;  %v1756_v24 = vld [vmem:[#allocation2 + $0x7c0] sm:$0xff]  ;;  %v1758_v58 = vld [vmem:[#allocation2 + $0x7d0] sm:$0xff] }
 0x2fd   :  { %v2012_v35 = vunpack.c.h.s8.bf16 %v1756_v24  ;;  %v2014_v6 = vunpack.c.h.s8.bf16 %v1758_v58 }
 0x2ff   :  { %2084 = vmatpush1.bf16.msra.mxu0 %v1980_v10  ;;  %2166 = vmatpush1.bf16.msra.mxu1 %v1982_v20  ;;  %v2004_v10 = vunpack.c.l.s8.bf16 %v1756_v24  ;;  %v2006_v20 = vunpack.c.l.s8.bf16 %v1758_v58 }
 0x300   :  { %2085 = vmatprep.subr.bf16.mxu0 %v1989_v55  ;;  %2167 = vmatprep.subr.bf16.mxu1 %v1991_v19  ;;  %v1641_v55 = vld [vmem:[#allocation2 + $0x428] sm:$0xff]  ;;  %v1643_v19 = vld [vmem:[#allocation2 + $0x438] sm:$0xff] }
 0x301   :  { %v1777_v39 = vunpack.c.h.s8.bf16 %v1641_v55  ;;  %v1779_v38 = vunpack.c.h.s8.bf16 %v1643_v19 }
 0x303   :  { %2086 = vmatpush1.bf16.msra.mxu0 %v1988_v13  ;;  %2168 = vmatpush1.bf16.msra.mxu1 %v1990_v27  ;;  %v1769_v13 = vunpack.c.l.s8.bf16 %v1641_v55  ;;  %v1771_v27 = vunpack.c.l.s8.bf16 %v1643_v19 }
 0x304   :  { %2087 = vmatprep.subr.bf16.mxu0 %v1997_v44  ;;  %2169 = vmatprep.subr.bf16.mxu1 %v1999_v18  ;;  %v1640_v44 = vld [vmem:[#allocation2 + $0x420] sm:$0xff]  ;;  %v1642_v18 = vld [vmem:[#allocation2 + $0x430] sm:$0xff] }
 0x305   :  { %v1776_v24 = vunpack.c.h.s8.bf16 %v1640_v44  ;;  %v1778_v58 = vunpack.c.h.s8.bf16 %v1642_v18 }
 0x307   :  { %2088 = vmatpush1.bf16.msra.mxu0 %v1996_v21  ;;  %2170 = vmatpush1.bf16.msra.mxu1 %v1998_v26  ;;  %v1768_v21 = vunpack.c.l.s8.bf16 %v1640_v44  ;;  %v1770_v26 = vunpack.c.l.s8.bf16 %v1642_v18 }
 0x308   :  { %2089 = vmatprep.subr.bf16.mxu0 %v2005_v30  ;;  %2171 = vmatprep.subr.bf16.mxu1 %v2007_v5  ;;  %v1649_v30 = vld [vmem:[#allocation2 + $0x468] sm:$0xff]  ;;  %v1651_v5 = vld [vmem:[#allocation2 + $0x478] sm:$0xff] }
 0x30b   :  { %2090 = vmatpush1.bf16.msra.mxu0 %v2004_v10  ;;  %2172 = vmatpush1.bf16.msra.mxu1 %v2006_v20  ;;  %v1785_v10 = vunpack.c.l.s8.bf16 %v1649_v30  ;;  %v1787_v20 = vunpack.c.l.s8.bf16 %v1651_v5 }
 0x30c   :  { %2091 = vmatprep.subr.bf16.mxu0 %v2013_v29  ;;  %2173 = vmatprep.subr.bf16.mxu1 %v2015_v40  ;;  %v1648_v29 = vld [vmem:[#allocation2 + $0x460] sm:$0xff]  ;;  %v1650_v40 = vld [vmem:[#allocation2 + $0x470] sm:$0xff] }
 0x30d   :  { %v1784_v55 = vunpack.c.l.s8.bf16 %v1648_v29  ;;  %v1786_v19 = vunpack.c.l.s8.bf16 %v1650_v40  ;;  %v1792_v44 = vunpack.c.h.s8.bf16 %v1648_v29  ;;  %v1794_v18 = vunpack.c.h.s8.bf16 %v1650_v40 }
 0x30f   :  { %2092 = vmatpush1.bf16.msra.mxu0 %v2012_v35  ;;  %2174 = vmatpush1.bf16.msra.mxu1 %v2014_v6  ;;  %v1793_v35 = vunpack.c.h.s8.bf16 %v1649_v30  ;;  %v1795_v6 = vunpack.c.h.s8.bf16 %v1651_v5 }
 0x310   :  { %2184 = vmatprep.subr.bf16.mxu0 %v1769_v13  ;;  %2266 = vmatprep.subr.bf16.mxu1 %v1771_v27  ;;  %v1657_v13 = vld [vmem:[#allocation2 + $0x4a8] sm:$0xff]  ;;  %v1659_v27 = vld [vmem:[#allocation2 + $0x4b8] sm:$0xff] }
 0x311   :  { %v1809_v30 = vunpack.c.h.s8.bf16 %v1657_v13  ;;  %v1811_v5 = vunpack.c.h.s8.bf16 %v1659_v27 }
 0x312   :  { %2094 = vmatmul.mubr.bf16.vlgmr.msra.gmra.mrb[20].mxu0 %v8085_v4  ;;  %2176 = vmatmul.mubr.bf16.vlgmr.msra.gmra.mrb[28].mxu1 %v8085_v4 }
 0x313   :  { %2185 = vmatpush1.bf16.msra.mxu0 %v1768_v21  ;;  %2267 = vmatpush1.bf16.msra.mxu1 %v1770_v26  ;;  %v1801_v21 = vunpack.c.l.s8.bf16 %v1657_v13  ;;  %v1803_v26 = vunpack.c.l.s8.bf16 %v1659_v27 }
 0x314   :  { %2186 = vmatprep.subr.bf16.mxu0 %v1777_v39  ;;  %2268 = vmatprep.subr.bf16.mxu1 %v1779_v38  ;;  %v1656_v39 = vld [vmem:[#allocation2 + $0x4a0] sm:$0xff] }
 0x315   :  { %2216 = vmatprep.mubr.bf16.mxu0 %v8035_v63  ;;  %2298 = vmatprep.mubr.bf16.mxu1 %v8035_v63  ;;  %v1658_v63 = vld [vmem:[#allocation2 + $0x4b0] sm:$0xff]  ;;  %v1800_v38 = vunpack.c.l.s8.bf16 %v1656_v39 }
 0x316   :  { %v1810_v29 = vunpack.c.h.s8.bf16 %v1658_v63 }
 0x317   :  { %2187 = vmatpush1.bf16.msra.mxu0 %v1776_v24  ;;  %2269 = vmatpush1.bf16.msra.mxu1 %v1778_v58  ;;  %v1802_v24 = vunpack.c.l.s8.bf16 %v1658_v63  ;;  %v1665_v58 = vld [vmem:[#allocation2 + $0x4e8] sm:$0xff] }
 0x318   :  { %2188 = vmatprep.subr.bf16.mxu0 %v1785_v10  ;;  %2270 = vmatprep.subr.bf16.mxu1 %v1787_v20  ;;  %v1667_v10 = vld [vmem:[#allocation2 + $0x4f8] sm:$0xff]  ;;  %v1808_v20 = vunpack.c.h.s8.bf16 %v1656_v39  ;;  %v1817_v40 = vunpack.c.l.s8.bf16 %v1665_v58  ;;  %v1825_v13 = vunpack.c.h.s8.bf16 %v1665_v58 }
 0x319   :  { %v1827_v27 = vunpack.c.h.s8.bf16 %v1667_v10 }
 0x31b   :  { %2189 = vmatpush1.bf16.msra.mxu0 %v1784_v55  ;;  %2271 = vmatpush1.bf16.msra.mxu1 %v1786_v19  ;;  %v1819_v55 = vunpack.c.l.s8.bf16 %v1667_v10  ;;  %v1664_v19 = vld [vmem:[#allocation2 + $0x4e0] sm:$0xff] }
 0x31c   :  { %2190 = vmatprep.subr.bf16.mxu0 %v1793_v35  ;;  %2272 = vmatprep.subr.bf16.mxu1 %v1795_v6  ;;  %v1666_v35 = vld [vmem:[#allocation2 + $0x4f0] sm:$0xff]  ;;  %v1816_v6 = vunpack.c.l.s8.bf16 %v1664_v19 }
 0x31d   :  { %v1826_v39 = vunpack.c.h.s8.bf16 %v1666_v35 }
 0x31f   :  { %2191 = vmatpush1.bf16.msra.mxu0 %v1792_v44  ;;  %2273 = vmatpush1.bf16.msra.mxu1 %v1794_v18  ;;  %v1818_v44 = vunpack.c.l.s8.bf16 %v1666_v35  ;;  %v1673_v18 = vld [vmem:[#allocation2 + $0x528] sm:$0xff] }
 0x320   :  { %2192 = vmatprep.subr.bf16.mxu0 %v1801_v21  ;;  %2274 = vmatprep.subr.bf16.mxu1 %v1803_v26  ;;  %v1675_v21 = vld [vmem:[#allocation2 + $0x538] sm:$0xff]  ;;  %v1824_v26 = vunpack.c.h.s8.bf16 %v1664_v19  ;;  %v1833_v63 = vunpack.c.l.s8.bf16 %v1673_v18  ;;  %v1841_v58 = vunpack.c.h.s8.bf16 %v1673_v18 }
 0x321   :  { %v1843_v10 = vunpack.c.h.s8.bf16 %v1675_v21 }
 0x323   :  { %2193 = vmatpush1.bf16.msra.mxu0 %v1800_v38  ;;  %2275 = vmatpush1.bf16.msra.mxu1 %v1802_v24  ;;  %v1835_v38 = vunpack.c.l.s8.bf16 %v1675_v21  ;;  %v1672_v24 = vld [vmem:[#allocation2 + $0x520] sm:$0xff] }
 0x324   :  { %2194 = vmatprep.subr.bf16.mxu0 %v1809_v30  ;;  %2276 = vmatprep.subr.bf16.mxu1 %v1811_v5  ;;  %v1674_v30 = vld [vmem:[#allocation2 + $0x530] sm:$0xff]  ;;  %v1832_v5 = vunpack.c.l.s8.bf16 %v1672_v24 }
 0x325   :  { %v1842_v19 = vunpack.c.h.s8.bf16 %v1674_v30 }
 0x327   :  { %2195 = vmatpush1.bf16.msra.mxu0 %v1808_v20  ;;  %2277 = vmatpush1.bf16.msra.mxu1 %v1810_v29  ;;  %v1834_v20 = vunpack.c.l.s8.bf16 %v1674_v30  ;;  %v1681_v29 = vld [vmem:[#allocation2 + $0x568] sm:$0xff] }
 0x328   :  { %2196 = vmatprep.subr.bf16.mxu0 %v1817_v40  ;;  %2278 = vmatprep.subr.bf16.mxu1 %v1819_v55  ;;  %v1683_v40 = vld [vmem:[#allocation2 + $0x578] sm:$0xff]  ;;  %v1840_v55 = vunpack.c.h.s8.bf16 %v1672_v24  ;;  %v1849_v35 = vunpack.c.l.s8.bf16 %v1681_v29  ;;  %v1857_v18 = vunpack.c.h.s8.bf16 %v1681_v29 }
 0x329   :  { %v1859_v21 = vunpack.c.h.s8.bf16 %v1683_v40 }
 0x32b   :  { %2197 = vmatpush1.bf16.msra.mxu0 %v1816_v6  ;;  %2279 = vmatpush1.bf16.msra.mxu1 %v1818_v44  ;;  %v1851_v6 = vunpack.c.l.s8.bf16 %v1683_v40  ;;  %v1680_v44 = vld [vmem:[#allocation2 + $0x560] sm:$0xff] }
 0x32c   :  { %2198 = vmatprep.subr.bf16.mxu0 %v1825_v13  ;;  %2280 = vmatprep.subr.bf16.mxu1 %v1827_v27  ;;  %v1682_v13 = vld [vmem:[#allocation2 + $0x570] sm:$0xff]  ;;  %v1848_v27 = vunpack.c.l.s8.bf16 %v1680_v44 }
 0x32d   :  { %v1858_v24 = vunpack.c.h.s8.bf16 %v1682_v13 }
 0x32f   :  { %2199 = vmatpush1.bf16.msra.mxu0 %v1824_v26  ;;  %2281 = vmatpush1.bf16.msra.mxu1 %v1826_v39  ;;  %v1850_v26 = vunpack.c.l.s8.bf16 %v1682_v13  ;;  %v1689_v39 = vld [vmem:[#allocation2 + $0x5a8] sm:$0xff] }
 0x330   :  { %2200 = vmatprep.subr.bf16.mxu0 %v1833_v63  ;;  %2282 = vmatprep.subr.bf16.mxu1 %v1835_v38  ;;  %v1691_v63 = vld [vmem:[#allocation2 + $0x5b8] sm:$0xff]  ;;  %v1856_v38 = vunpack.c.h.s8.bf16 %v1680_v44  ;;  %v1865_v30 = vunpack.c.l.s8.bf16 %v1689_v39  ;;  %v1873_v29 = vunpack.c.h.s8.bf16 %v1689_v39 }
 0x331   :  { %v1875_v40 = vunpack.c.h.s8.bf16 %v1691_v63 }
 0x333   :  { %2201 = vmatpush1.bf16.msra.mxu0 %v1832_v5  ;;  %2283 = vmatpush1.bf16.msra.mxu1 %v1834_v20  ;;  %v1867_v5 = vunpack.c.l.s8.bf16 %v1691_v63  ;;  %v1688_v20 = vld [vmem:[#allocation2 + $0x5a0] sm:$0xff] }
 0x334   :  { %2202 = vmatprep.subr.bf16.mxu0 %v1841_v58  ;;  %2284 = vmatprep.subr.bf16.mxu1 %v1843_v10  ;;  %v1690_v58 = vld [vmem:[#allocation2 + $0x5b0] sm:$0xff]  ;;  %v1864_v10 = vunpack.c.l.s8.bf16 %v1688_v20 }
 0x335   :  { %v1874_v44 = vunpack.c.h.s8.bf16 %v1690_v58 }
 0x337   :  { %2203 = vmatpush1.bf16.msra.mxu0 %v1840_v55  ;;  %2285 = vmatpush1.bf16.msra.mxu1 %v1842_v19  ;;  %v1866_v55 = vunpack.c.l.s8.bf16 %v1690_v58  ;;  %v1697_v19 = vld [vmem:[#allocation2 + $0x5e8] sm:$0xff] }
 0x338   :  { %2204 = vmatprep.subr.bf16.mxu0 %v1849_v35  ;;  %2286 = vmatprep.subr.bf16.mxu1 %v1851_v6  ;;  %v1699_v35 = vld [vmem:[#allocation2 + $0x5f8] sm:$0xff]  ;;  %v1872_v6 = vunpack.c.h.s8.bf16 %v1688_v20  ;;  %v1881_v13 = vunpack.c.l.s8.bf16 %v1697_v19  ;;  %v1889_v39 = vunpack.c.h.s8.bf16 %v1697_v19 }
 0x339   :  { %v1891_v63 = vunpack.c.h.s8.bf16 %v1699_v35 }
 0x33b   :  { %2205 = vmatpush1.bf16.msra.mxu0 %v1848_v27  ;;  %2287 = vmatpush1.bf16.msra.mxu1 %v1850_v26  ;;  %v1883_v27 = vunpack.c.l.s8.bf16 %v1699_v35  ;;  %v1696_v26 = vld [vmem:[#allocation2 + $0x5e0] sm:$0xff] }
 0x33c   :  { %2206 = vmatprep.subr.bf16.mxu0 %v1857_v18  ;;  %2288 = vmatprep.subr.bf16.mxu1 %v1859_v21  ;;  %v1698_v18 = vld [vmem:[#allocation2 + $0x5f0] sm:$0xff]  ;;  %v1880_v21 = vunpack.c.l.s8.bf16 %v1696_v26 }
 0x33d   :  { %v1890_v20 = vunpack.c.h.s8.bf16 %v1698_v18 }
 0x33f   :  { %2207 = vmatpush1.bf16.msra.mxu0 %v1856_v38  ;;  %2289 = vmatpush1.bf16.msra.mxu1 %v1858_v24  ;;  %v1882_v38 = vunpack.c.l.s8.bf16 %v1698_v18  ;;  %v1705_v24 = vld [vmem:[#allocation2 + $0x628] sm:$0xff] }
 0x340   :  { %2208 = vmatprep.subr.bf16.mxu0 %v1865_v30  ;;  %2290 = vmatprep.subr.bf16.mxu1 %v1867_v5  ;;  %v1707_v30 = vld [vmem:[#allocation2 + $0x638] sm:$0xff]  ;;  %v1888_v5 = vunpack.c.h.s8.bf16 %v1696_v26  ;;  %v1897_v58 = vunpack.c.l.s8.bf16 %v1705_v24  ;;  %v1905_v19 = vunpack.c.h.s8.bf16 %v1705_v24 }
 0x341   :  { %v1907_v35 = vunpack.c.h.s8.bf16 %v1707_v30 }
 0x343   :  { %2209 = vmatpush1.bf16.msra.mxu0 %v1864_v10  ;;  %2291 = vmatpush1.bf16.msra.mxu1 %v1866_v55  ;;  %v1899_v10 = vunpack.c.l.s8.bf16 %v1707_v30  ;;  %v1704_v55 = vld [vmem:[#allocation2 + $0x620] sm:$0xff] }
 0x344   :  { %2210 = vmatprep.subr.bf16.mxu0 %v1873_v29  ;;  %2292 = vmatprep.subr.bf16.mxu1 %v1875_v40  ;;  %v1706_v29 = vld [vmem:[#allocation2 + $0x630] sm:$0xff]  ;;  %v1896_v40 = vunpack.c.l.s8.bf16 %v1704_v55 }
 0x345   :  { %v1906_v26 = vunpack.c.h.s8.bf16 %v1706_v29 }
 0x347   :  { %2211 = vmatpush1.bf16.msra.mxu0 %v1872_v6  ;;  %2293 = vmatpush1.bf16.msra.mxu1 %v1874_v44  ;;  %v1898_v6 = vunpack.c.l.s8.bf16 %v1706_v29  ;;  %v1713_v44 = vld [vmem:[#allocation2 + $0x668] sm:$0xff] }
 0x348   :  { %2212 = vmatprep.subr.bf16.mxu0 %v1881_v13  ;;  %2294 = vmatprep.subr.bf16.mxu1 %v1883_v27  ;;  %v1715_v13 = vld [vmem:[#allocation2 + $0x678] sm:$0xff]  ;;  %v1904_v27 = vunpack.c.h.s8.bf16 %v1704_v55  ;;  %v1913_v18 = vunpack.c.l.s8.bf16 %v1713_v44 }
 0x349   :  { %v1923_v30 = vunpack.c.h.s8.bf16 %v1715_v13 }
 0x34b   :  { %2213 = vmatpush1.bf16.msra.mxu0 %v1880_v21  ;;  %2295 = vmatpush1.bf16.msra.mxu1 %v1882_v38  ;;  %v1915_v21 = vunpack.c.l.s8.bf16 %v1715_v13  ;;  %v1712_v38 = vld [vmem:[#allocation2 + $0x660] sm:$0xff]  ;;  %v1729_v13 = vld [vmem:[#allocation2 + $0x6e8] sm:$0xff] }
 0x34c   :  { %2214 = vmatprep.subr.bf16.mxu0 %v1889_v39  ;;  %2296 = vmatprep.subr.bf16.mxu1 %v1891_v63  ;;  %v1714_v39 = vld [vmem:[#allocation2 + $0x670] sm:$0xff]  ;;  %v1912_v63 = vunpack.c.l.s8.bf16 %v1712_v38 }
 0x34d   :  { %v1914_v24 = vunpack.c.l.s8.bf16 %v1714_v39 }
 0x34f   :  { %2215 = vmatpush1.bf16.msra.mxu0 %v1888_v5  ;;  %2297 = vmatpush1.bf16.msra.mxu1 %v1890_v20  ;;  %v1721_v5 = vld [vmem:[#allocation2 + $0x6a8] sm:$0xff]  ;;  %v1723_v20 = vld [vmem:[#allocation2 + $0x6b8] sm:$0xff] }
 0x350   :  { %2225 = vmatprep.subr.bf16.mxu0 %v1897_v58  ;;  %2307 = vmatprep.subr.bf16.mxu1 %v1899_v10  ;;  %v1920_v58 = vunpack.c.h.s8.bf16 %v1712_v38  ;;  %v1922_v10 = vunpack.c.h.s8.bf16 %v1714_v39  ;;  %v1929_v55 = vunpack.c.l.s8.bf16 %v1721_v5  ;;  %v1931_v29 = vunpack.c.l.s8.bf16 %v1723_v20  ;;  %v1728_v39 = vld [vmem:[#allocation2 + $0x6e0] sm:$0xff] }
 0x352   :  { %2217 = vmatmul.mubr.bf16.vlgmr.msra.gmra.mrb[24].mxu0 %v8031_v61  ;;  %2299 = vmatmul.mubr.bf16.vlgmr.msra.gmra.mrb[32].mxu1 %v8031_v61  ;;  %v1921_v61 = vunpack.c.h.s8.bf16 %v1713_v44  ;;  %v1939_v44 = vunpack.c.h.s8.bf16 %v1723_v20  ;;  %v1737_v20 = vld [vmem:[#allocation2 + $0x728] sm:$0xff] }
 0x353   :  { %2226 = vmatpush1.bf16.msra.mxu0 %v1896_v40  ;;  %2308 = vmatpush1.bf16.msra.mxu1 %v1898_v6  ;;  %v1720_v40 = vld [vmem:[#allocation2 + $0x6a0] sm:$0xff] }
 0x354   :  { %2227 = vmatprep.subr.bf16.mxu0 %v1905_v19  ;;  %2309 = vmatprep.subr.bf16.mxu1 %v1907_v35  ;;  %v1928_v6 = vunpack.c.l.s8.bf16 %v1720_v40  ;;  %v1937_v35 = vunpack.c.h.s8.bf16 %v1721_v5 }
 0x355   :  { %2257 = vmatprep.mubr.bf16.mxu0 %v8087_v7  ;;  %2339 = vmatprep.mubr.bf16.mxu1 %v8087_v7  ;;  %v1722_v7 = vld [vmem:[#allocation2 + $0x6b0] sm:$0xff] }
 0x356   :  { %v1930_v19 = vunpack.c.l.s8.bf16 %v1722_v7 }
 0x357   :  { %2228 = vmatpush1.bf16.msra.mxu0 %v1904_v27  ;;  %2310 = vmatpush1.bf16.msra.mxu1 %v1906_v26  ;;  %v1731_v27 = vld [vmem:[#allocation2 + $0x6f8] sm:$0xff]  ;;  %v1936_v26 = vunpack.c.h.s8.bf16 %v1720_v40 }
 0x358   :  { %2229 = vmatprep.subr.bf16.mxu0 %v1913_v18  ;;  %2311 = vmatprep.subr.bf16.mxu1 %v1915_v21  ;;  %v1938_v18 = vunpack.c.h.s8.bf16 %v1722_v7  ;;  %v1945_v21 = vunpack.c.l.s8.bf16 %v1729_v13  ;;  %v1947_v38 = vunpack.c.l.s8.bf16 %v1731_v27  ;;  %v1955_v5 = vunpack.c.h.s8.bf16 %v1731_v27  ;;  %v1736_v7 = vld [vmem:[#allocation2 + $0x720] sm:$0xff]  ;;  %v1745_v27 = vld [vmem:[#allocation2 + $0x768] sm:$0xff] }
 0x35b   :  { %2230 = vmatpush1.bf16.msra.mxu0 %v1912_v63  ;;  %2312 = vmatpush1.bf16.msra.mxu1 %v1914_v24  ;;  %v1730_v63 = vld [vmem:[#allocation2 + $0x6f0] sm:$0xff]  ;;  %v1944_v24 = vunpack.c.l.s8.bf16 %v1728_v39 }
 0x35c   :  { %2231 = vmatprep.subr.bf16.mxu0 %v1921_v61  ;;  %2313 = vmatprep.subr.bf16.mxu1 %v1923_v30  ;;  %v1946_v61 = vunpack.c.l.s8.bf16 %v1730_v63  ;;  %v1953_v30 = vunpack.c.h.s8.bf16 %v1729_v13 }
 0x35f   :  { %2232 = vmatpush1.bf16.msra.mxu0 %v1920_v58  ;;  %2314 = vmatpush1.bf16.msra.mxu1 %v1922_v10  ;;  %v1739_v58 = vld [vmem:[#allocation2 + $0x738] sm:$0xff]  ;;  %v1952_v10 = vunpack.c.h.s8.bf16 %v1728_v39 }
 0x360   :  { %2233 = vmatprep.subr.bf16.mxu0 %v1929_v55  ;;  %2315 = vmatprep.subr.bf16.mxu1 %v1931_v29  ;;  %v1954_v55 = vunpack.c.h.s8.bf16 %v1730_v63  ;;  %v1961_v29 = vunpack.c.l.s8.bf16 %v1737_v20  ;;  %v1963_v40 = vunpack.c.l.s8.bf16 %v1739_v58  ;;  %v1971_v13 = vunpack.c.h.s8.bf16 %v1739_v58  ;;  %v1744_v63 = vld [vmem:[#allocation2 + $0x760] sm:$0xff]  ;;  %v1753_v58 = vld [vmem:[#allocation2 + $0x7a8] sm:$0xff] }
 0x363   :  { %2234 = vmatpush1.bf16.msra.mxu0 %v1928_v6  ;;  %2316 = vmatpush1.bf16.msra.mxu1 %v1930_v19  ;;  %v1738_v6 = vld [vmem:[#allocation2 + $0x730] sm:$0xff]  ;;  %v1960_v19 = vunpack.c.l.s8.bf16 %v1736_v7 }
 0x364   :  { %2235 = vmatprep.subr.bf16.mxu0 %v1937_v35  ;;  %2317 = vmatprep.subr.bf16.mxu1 %v1939_v44  ;;  %v1962_v35 = vunpack.c.l.s8.bf16 %v1738_v6  ;;  %v1969_v44 = vunpack.c.h.s8.bf16 %v1737_v20 }
 0x367   :  { %2236 = vmatpush1.bf16.msra.mxu0 %v1936_v26  ;;  %2318 = vmatpush1.bf16.msra.mxu1 %v1938_v18  ;;  %v1747_v26 = vld [vmem:[#allocation2 + $0x778] sm:$0xff]  ;;  %v1968_v18 = vunpack.c.h.s8.bf16 %v1736_v7 }
 0x368   :  { %2237 = vmatprep.subr.bf16.mxu0 %v1945_v21  ;;  %2319 = vmatprep.subr.bf16.mxu1 %v1947_v38  ;;  %v1970_v21 = vunpack.c.h.s8.bf16 %v1738_v6  ;;  %v1977_v38 = vunpack.c.l.s8.bf16 %v1745_v27  ;;  %v1979_v39 = vunpack.c.l.s8.bf16 %v1747_v26  ;;  %v1987_v20 = vunpack.c.h.s8.bf16 %v1747_v26  ;;  %v1752_v6 = vld [vmem:[#allocation2 + $0x7a0] sm:$0xff]  ;;  %v1761_v26 = vld [vmem:[#allocation2 + $0x7e8] sm:$0xff] }
 0x36b   :  { %2238 = vmatpush1.bf16.msra.mxu0 %v1944_v24  ;;  %2320 = vmatpush1.bf16.msra.mxu1 %v1946_v61  ;;  %v1746_v24 = vld [vmem:[#allocation2 + $0x770] sm:$0xff]  ;;  %v1976_v61 = vunpack.c.l.s8.bf16 %v1744_v63 }
 0x36c   :  { %2239 = vmatprep.subr.bf16.mxu0 %v1953_v30  ;;  %2321 = vmatprep.subr.bf16.mxu1 %v1955_v5  ;;  %v1978_v30 = vunpack.c.l.s8.bf16 %v1746_v24  ;;  %v1985_v5 = vunpack.c.h.s8.bf16 %v1745_v27 }
 0x36f   :  { %2240 = vmatpush1.bf16.msra.mxu0 %v1952_v10  ;;  %2322 = vmatpush1.bf16.msra.mxu1 %v1954_v55  ;;  %v1755_v10 = vld [vmem:[#allocation2 + $0x7b8] sm:$0xff]  ;;  %v1984_v55 = vunpack.c.h.s8.bf16 %v1744_v63 }
 0x370   :  { %2241 = vmatprep.subr.bf16.mxu0 %v1961_v29  ;;  %2323 = vmatprep.subr.bf16.mxu1 %v1963_v40  ;;  %v1986_v29 = vunpack.c.h.s8.bf16 %v1746_v24  ;;  %v1993_v40 = vunpack.c.l.s8.bf16 %v1753_v58  ;;  %v1995_v7 = vunpack.c.l.s8.bf16 %v1755_v10  ;;  %v2003_v27 = vunpack.c.h.s8.bf16 %v1755_v10  ;;  %v1760_v24 = vld [vmem:[#allocation2 + $0x7e0] sm:$0xff] }
 0x371   :  { %v2016_v10 = vunpack.c.h.s8.bf16 %v1760_v24 }
 0x373   :  { %2242 = vmatpush1.bf16.msra.mxu0 %v1960_v19  ;;  %2324 = vmatpush1.bf16.msra.mxu1 %v1962_v35  ;;  %v1754_v19 = vld [vmem:[#allocation2 + $0x7b0] sm:$0xff]  ;;  %v1992_v35 = vunpack.c.l.s8.bf16 %v1752_v6 }
 0x374   :  { %2243 = vmatprep.subr.bf16.mxu0 %v1969_v44  ;;  %2325 = vmatprep.subr.bf16.mxu1 %v1971_v13  ;;  %v1994_v44 = vunpack.c.l.s8.bf16 %v1754_v19  ;;  %v2001_v13 = vunpack.c.h.s8.bf16 %v1753_v58 }
 0x377   :  { %2244 = vmatpush1.bf16.msra.mxu0 %v1968_v18  ;;  %2326 = vmatpush1.bf16.msra.mxu1 %v1970_v21  ;;  %v1763_v18 = vld [vmem:[#allocation2 + $0x7f8] sm:$0xff]  ;;  %v2000_v21 = vunpack.c.h.s8.bf16 %v1752_v6 }
 0x378   :  { %2245 = vmatprep.subr.bf16.mxu0 %v1977_v38  ;;  %2327 = vmatprep.subr.bf16.mxu1 %v1979_v39  ;;  %v2002_v38 = vunpack.c.h.s8.bf16 %v1754_v19  ;;  %v2009_v39 = vunpack.c.l.s8.bf16 %v1761_v26  ;;  %v2011_v63 = vunpack.c.l.s8.bf16 %v1763_v18  ;;  %v2019_v58 = vunpack.c.h.s8.bf16 %v1763_v18  ;;  %v10323_v19 = vld [vmem:[#allocation83_spill] sm:$0xff]  ;;  %v10330_v18 = vld [vmem:[#allocation89_spill] sm:$0xff] }
 0x37b   :  { %2246 = vmatpush1.bf16.msra.mxu0 %v1976_v61  ;;  %2328 = vmatpush1.bf16.msra.mxu1 %v1978_v30  ;;  %v1762_v61 = vld [vmem:[#allocation2 + $0x7f0] sm:$0xff]  ;;  %v2008_v30 = vunpack.c.l.s8.bf16 %v1760_v24 }
 0x37c   :  { %2247 = vmatprep.subr.bf16.mxu0 %v1985_v5  ;;  %2329 = vmatprep.subr.bf16.mxu1 %v1987_v20  ;;  %v2010_v5 = vunpack.c.l.s8.bf16 %v1762_v61  ;;  %v2017_v20 = vunpack.c.h.s8.bf16 %v1761_v26 }
 0x37f   :  { %2248 = vmatpush1.bf16.msra.mxu0 %v1984_v55  ;;  %2330 = vmatpush1.bf16.msra.mxu1 %v1986_v29  ;;  %v2018_v55 = vunpack.c.h.s8.bf16 %v1762_v61  ;;  %v10319_v29 = vunpack.c.l.s8.bf16 %v8171_v47  ;;  %v10338_v61 = vunpack.c.h.s8.bf16 %v10330_v18 }
 0x380   :  { %2249 = vmatprep.subr.bf16.mxu0 %v1993_v40  ;;  %2331 = vmatprep.subr.bf16.mxu1 %v1995_v7  ;;  %v10320_v40 = vunpack.c.l.s8.bf16 %v8175_v48  ;;  %v10321_v7 = vld [vmem:[#allocation82_spill] sm:$0xff] }
 0x381   :  { %v10322_v6 = vunpack.c.l.s8.bf16 %v10321_v7  ;;  %v10328_v26 = vunpack.c.h.s8.bf16 %v10321_v7 }
 0x383   :  { %2250 = vmatpush1.bf16.msra.mxu0 %v1992_v35  ;;  %2332 = vmatpush1.bf16.msra.mxu1 %v1994_v44  ;;  %v10324_v35 = vunpack.c.l.s8.bf16 %v10323_v19  ;;  %v10325_v44 = vunpack.c.h.s8.bf16 %v8171_v47  ;;  %v10334_v47 = vld [vmem:[#allocation88_spill] sm:$0xff] }
 0x384   :  { %2251 = vmatprep.subr.bf16.mxu0 %v2001_v13  ;;  %2333 = vmatprep.subr.bf16.mxu1 %v2003_v27  ;;  %v10326_v13 = vunpack.c.h.s8.bf16 %v8175_v48  ;;  %v10327_v27 = vld [vmem:[#allocation59_spill] sm:$0xff]  ;;  %v10336_v48 = vld [vmem:[#allocation90_spill] sm:$0xff] }
 0x385   :  { %v10337_v24 = vunpack.c.l.s8.bf16 %v10336_v48 }
 0x387   :  { %2252 = vmatpush1.bf16.msra.mxu0 %v2000_v21  ;;  %2334 = vmatpush1.bf16.msra.mxu1 %v2002_v38  ;;  %v10331_v21 = vunpack.c.l.s8.bf16 %v10330_v18  ;;  %v10332_v38 = vld [vmem:[#allocation91_spill] sm:$0xff] }
 0x388   :  { %2253 = vmatprep.subr.bf16.mxu0 %v2009_v39  ;;  %2335 = vmatprep.subr.bf16.mxu1 %v2011_v63  ;;  %v10333_v39 = vunpack.c.l.s8.bf16 %v10332_v38  ;;  %v10335_v63 = vunpack.c.l.s8.bf16 %v10334_v47 }
 0x38b   :  { %2254 = vmatpush1.bf16.msra.mxu0 %v2008_v30  ;;  %2336 = vmatpush1.bf16.msra.mxu1 %v2010_v5  ;;  %v10339_v30 = vunpack.c.h.s8.bf16 %v10332_v38  ;;  %v10340_v5 = vunpack.c.h.s8.bf16 %v10334_v47 }
 0x38c   :  { %2255 = vmatprep.subr.bf16.mxu0 %v2017_v20  ;;  %2337 = vmatprep.subr.bf16.mxu1 %v2019_v58  ;;  %v10341_v20 = vunpack.c.h.s8.bf16 %v10336_v48  ;;  %v10342_v58 = vld [vmem:[#allocation97_spill] sm:$0xff] }
 0x38f   :  { %2256 = vmatpush1.bf16.msra.mxu0 %v2016_v10  ;;  %2338 = vmatpush1.bf16.msra.mxu1 %v2018_v55  ;;  %v10343_v10 = vunpack.c.l.s8.bf16 %v10342_v58  ;;  %v10344_v55 = vld [vmem:[#allocation99_spill] sm:$0xff] }
 0x390   :  { %2348 = vmatprep.subr.bf16.mxu0 %v10319_v29  ;;  %2430 = vmatprep.subr.bf16.mxu1 %v10320_v40  ;;  %v10345_v29 = vunpack.c.l.s8.bf16 %v10344_v55  ;;  %v10346_v40 = vld [vmem:[#allocation96_spill] sm:$0xff] }
 0x391   :  { %v10347_v7 = vunpack.c.l.s8.bf16 %v10346_v40 }
 0x392   :  { %2258 = vmatmul.mubr.bf16.vlgmr.msra.gmra.mrb[24].mxu0 %v8085_v4  ;;  %2340 = vmatmul.mubr.bf16.vlgmr.msra.gmra.mrb[32].mxu1 %v8085_v4  ;;  %v10329_v4 = vunpack.c.h.s8.bf16 %v10323_v19 }
 0x393   :  { %2349 = vmatpush1.bf16.msra.mxu0 %v10322_v6  ;;  %2431 = vmatpush1.bf16.msra.mxu1 %v10324_v35  ;;  %v10348_v6 = vld [vmem:[#allocation98_spill] sm:$0xff]  ;;  %v10350_v35 = vunpack.c.h.s8.bf16 %v10342_v58 }
 0x394   :  { %2350 = vmatprep.subr.bf16.mxu0 %v10325_v44  ;;  %2432 = vmatprep.subr.bf16.mxu1 %v10326_v13  ;;  %v10349_v19 = vunpack.c.l.s8.bf16 %v10348_v6  ;;  %v10351_v44 = vunpack.c.h.s8.bf16 %v10344_v55  ;;  %v10352_v13 = vunpack.c.h.s8.bf16 %v10346_v40 }
 0x395   :  { %2380 = vmatprep.mubr.bf16.mxu0 %v10327_v27  ;;  %2462 = vmatprep.mubr.bf16.mxu1 %v10327_v27 }
 0x397   :  { %2351 = vmatpush1.bf16.msra.mxu0 %v10328_v26  ;;  %2433 = vmatpush1.bf16.msra.mxu1 %v10329_v4  ;;  %v10353_v26 = vunpack.c.h.s8.bf16 %v10348_v6  ;;  %v10354_v4 = vld [vmem:[#allocation105_spill] sm:$0xff] }
 0x398   :  { %2352 = vmatprep.subr.bf16.mxu0 %v10331_v21  ;;  %2434 = vmatprep.subr.bf16.mxu1 %v10333_v39  ;;  %v10355_v18 = vunpack.c.l.s8.bf16 %v10354_v4  ;;  %v10356_v21 = vld [vmem:[#allocation107_spill] sm:$0xff]  ;;  %v10358_v39 = vld [vmem:[#allocation104_spill] sm:$0xff] }
 0x399   :  { %v10357_v38 = vunpack.c.l.s8.bf16 %v10356_v21  ;;  %v10359_v47 = vunpack.c.l.s8.bf16 %v10358_v39 }
 0x39b   :  { %2353 = vmatpush1.bf16.msra.mxu0 %v10335_v63  ;;  %2435 = vmatpush1.bf16.msra.mxu1 %v10337_v24  ;;  %v10360_v63 = vld [vmem:[#allocation106_spill] sm:$0xff]  ;;  %v10362_v24 = vunpack.c.h.s8.bf16 %v10354_v4 }
 0x39c   :  { %2354 = vmatprep.subr.bf16.mxu0 %v10338_v61  ;;  %2436 = vmatprep.subr.bf16.mxu1 %v10339_v30  ;;  %v10361_v48 = vunpack.c.l.s8.bf16 %v10360_v63  ;;  %v10363_v61 = vunpack.c.h.s8.bf16 %v10356_v21  ;;  %v10364_v30 = vunpack.c.h.s8.bf16 %v10358_v39 }
 0x39f   :  { %2355 = vmatpush1.bf16.msra.mxu0 %v10340_v5  ;;  %2437 = vmatpush1.bf16.msra.mxu1 %v10341_v20  ;;  %v10365_v5 = vunpack.c.h.s8.bf16 %v10360_v63  ;;  %v10366_v20 = vld [vmem:[#allocation113_spill] sm:$0xff] }
 0x3a0   :  { %2356 = vmatprep.subr.bf16.mxu0 %v10343_v10  ;;  %2438 = vmatprep.subr.bf16.mxu1 %v10345_v29  ;;  %v10367_v58 = vunpack.c.l.s8.bf16 %v10366_v20  ;;  %v10368_v10 = vld [vmem:[#allocation115_spill] sm:$0xff]  ;;  %v10370_v29 = vld [vmem:[#allocation112_spill] sm:$0xff] }
 0x3a1   :  { %v10369_v55 = vunpack.c.l.s8.bf16 %v10368_v10  ;;  %v10371_v40 = vunpack.c.l.s8.bf16 %v10370_v29 }
 0x3a3   :  { %2357 = vmatpush1.bf16.msra.mxu0 %v10347_v7  ;;  %2439 = vmatpush1.bf16.msra.mxu1 %v10349_v19  ;;  %v10372_v7 = vld [vmem:[#allocation114_spill] sm:$0xff]  ;;  %v10374_v19 = vunpack.c.h.s8.bf16 %v10366_v20 }
 0x3a4   :  { %2358 = vmatprep.subr.bf16.mxu0 %v10350_v35  ;;  %2440 = vmatprep.subr.bf16.mxu1 %v10351_v44  ;;  %v10373_v6 = vunpack.c.l.s8.bf16 %v10372_v7  ;;  %v10375_v35 = vunpack.c.h.s8.bf16 %v10368_v10  ;;  %v10376_v44 = vunpack.c.h.s8.bf16 %v10370_v29 }
 0x3a7   :  { %2359 = vmatpush1.bf16.msra.mxu0 %v10352_v13  ;;  %2441 = vmatpush1.bf16.msra.mxu1 %v10353_v26  ;;  %v10377_v13 = vunpack.c.h.s8.bf16 %v10372_v7  ;;  %v10378_v26 = vld [vmem:[#allocation121_spill] sm:$0xff] }
 0x3a8   :  { %2360 = vmatprep.subr.bf16.mxu0 %v10355_v18  ;;  %2442 = vmatprep.subr.bf16.mxu1 %v10357_v38  ;;  %v10379_v4 = vunpack.c.l.s8.bf16 %v10378_v26  ;;  %v10380_v18 = vld [vmem:[#allocation123_spill] sm:$0xff]  ;;  %v10382_v38 = vld [vmem:[#allocation120_spill] sm:$0xff] }
 0x3a9   :  { %v10381_v21 = vunpack.c.l.s8.bf16 %v10380_v18  ;;  %v10383_v39 = vunpack.c.l.s8.bf16 %v10382_v38 }
 0x3ab   :  { %2361 = vmatpush1.bf16.msra.mxu0 %v10359_v47  ;;  %2443 = vmatpush1.bf16.msra.mxu1 %v10361_v48  ;;  %v10384_v47 = vld [vmem:[#allocation122_spill] sm:$0xff]  ;;  %v10386_v48 = vunpack.c.h.s8.bf16 %v10378_v26 }
 0x3ac   :  { %2362 = vmatprep.subr.bf16.mxu0 %v10362_v24  ;;  %2444 = vmatprep.subr.bf16.mxu1 %v10363_v61  ;;  %v10385_v63 = vunpack.c.l.s8.bf16 %v10384_v47  ;;  %v10387_v24 = vunpack.c.h.s8.bf16 %v10380_v18  ;;  %v10388_v61 = vunpack.c.h.s8.bf16 %v10382_v38 }
 0x3af   :  { %2363 = vmatpush1.bf16.msra.mxu0 %v10364_v30  ;;  %2445 = vmatpush1.bf16.msra.mxu1 %v10365_v5  ;;  %v10389_v30 = vunpack.c.h.s8.bf16 %v10384_v47  ;;  %v10390_v5 = vld [vmem:[#allocation129_spill] sm:$0xff] }
 0x3b0   :  { %2364 = vmatprep.subr.bf16.mxu0 %v10367_v58  ;;  %2446 = vmatprep.subr.bf16.mxu1 %v10369_v55  ;;  %v10391_v20 = vunpack.c.l.s8.bf16 %v10390_v5  ;;  %v10392_v58 = vld [vmem:[#allocation131_spill] sm:$0xff]  ;;  %v10394_v55 = vld [vmem:[#allocation128_spill] sm:$0xff] }
 0x3b1   :  { %v10393_v10 = vunpack.c.l.s8.bf16 %v10392_v58  ;;  %v10395_v29 = vunpack.c.l.s8.bf16 %v10394_v55 }
 0x3b3   :  { %2365 = vmatpush1.bf16.msra.mxu0 %v10371_v40  ;;  %2447 = vmatpush1.bf16.msra.mxu1 %v10373_v6  ;;  %v10396_v40 = vld [vmem:[#allocation130_spill] sm:$0xff]  ;;  %v10398_v6 = vunpack.c.h.s8.bf16 %v10390_v5 }
 0x3b4   :  { %2366 = vmatprep.subr.bf16.mxu0 %v10374_v19  ;;  %2448 = vmatprep.subr.bf16.mxu1 %v10375_v35  ;;  %v10397_v7 = vunpack.c.l.s8.bf16 %v10396_v40  ;;  %v10399_v19 = vunpack.c.h.s8.bf16 %v10392_v58  ;;  %v10400_v35 = vunpack.c.h.s8.bf16 %v10394_v55  ;;  %v10419_v55 = vld [vmem:[#allocation144_spill] sm:$0xff] }
 0x3b7   :  { %2367 = vmatpush1.bf16.msra.mxu0 %v10376_v44  ;;  %2449 = vmatpush1.bf16.msra.mxu1 %v10377_v13  ;;  %v10401_v44 = vunpack.c.h.s8.bf16 %v10396_v40  ;;  %v10402_v13 = vld [vmem:[#allocation137_spill] sm:$0xff]  ;;  %v10421_v40 = vld [vmem:[#allocation146_spill] sm:$0xff] }
 0x3b8   :  { %2368 = vmatprep.subr.bf16.mxu0 %v10379_v4  ;;  %2450 = vmatprep.subr.bf16.mxu1 %v10381_v21  ;;  %v10403_v26 = vunpack.c.l.s8.bf16 %v10402_v13  ;;  %v10404_v4 = vld [vmem:[#allocation139_spill] sm:$0xff]  ;;  %v10406_v21 = vld [vmem:[#allocation136_spill] sm:$0xff] }
 0x3b9   :  { %v10405_v18 = vunpack.c.l.s8.bf16 %v10404_v4  ;;  %v10407_v38 = vunpack.c.l.s8.bf16 %v10406_v21 }
 0x3bb   :  { %2369 = vmatpush1.bf16.msra.mxu0 %v10383_v39  ;;  %2451 = vmatpush1.bf16.msra.mxu1 %v10385_v63  ;;  %v10408_v39 = vld [vmem:[#allocation138_spill] sm:$0xff]  ;;  %v10410_v63 = vunpack.c.h.s8.bf16 %v10402_v13  ;;  %v10427_v13 = vunpack.c.h.s8.bf16 %v10421_v40 }
 0x3bc   :  { %2370 = vmatprep.subr.bf16.mxu0 %v10386_v48  ;;  %2452 = vmatprep.subr.bf16.mxu1 %v10387_v24  ;;  %v10409_v47 = vunpack.c.l.s8.bf16 %v10408_v39  ;;  %v10411_v48 = vunpack.c.h.s8.bf16 %v10404_v4  ;;  %v10412_v24 = vunpack.c.h.s8.bf16 %v10406_v21  ;;  %v10429_v4 = vunpack.c.l.s8.bf16 %v8451_v60 }
 0x3bf   :  { %2371 = vmatpush1.bf16.msra.mxu0 %v10388_v61  ;;  %2453 = vmatpush1.bf16.msra.mxu1 %v10389_v30  ;;  %v10413_v61 = vunpack.c.h.s8.bf16 %v10408_v39  ;;  %v10414_v30 = vld [vmem:[#allocation145_spill] sm:$0xff] }
 0x3c0   :  { %2372 = vmatprep.subr.bf16.mxu0 %v10391_v20  ;;  %2454 = vmatprep.subr.bf16.mxu1 %v10393_v10  ;;  %v10415_v5 = vunpack.c.l.s8.bf16 %v10414_v30  ;;  %v10416_v20 = vld [vmem:[#allocation147_spill] sm:$0xff]  ;;  %v10418_v10 = vld [vmem:[#allocation58_spill] sm:$0xff] }
 0x3c1   :  { %v10417_v58 = vunpack.c.l.s8.bf16 %v10416_v20 }
 0x3c3   :  { %2373 = vmatpush1.bf16.msra.mxu0 %v10395_v29  ;;  %2455 = vmatpush1.bf16.msra.mxu1 %v10397_v7  ;;  %v10420_v29 = vunpack.c.l.s8.bf16 %v10419_v55  ;;  %v10422_v7 = vunpack.c.l.s8.bf16 %v10421_v40 }
 0x3c4   :  { %2374 = vmatprep.subr.bf16.mxu0 %v10398_v6  ;;  %2456 = vmatprep.subr.bf16.mxu1 %v10399_v19  ;;  %v10423_v6 = vunpack.c.h.s8.bf16 %v10414_v30  ;;  %v10424_v19 = vunpack.c.h.s8.bf16 %v10416_v20  ;;  %v10439_v30 = vunpack.c.l.s8.bf16 %v8475_v36 }
 0x3c7   :  { %2375 = vmatpush1.bf16.msra.mxu0 %v10400_v35  ;;  %2457 = vmatpush1.bf16.msra.mxu1 %v10401_v44  ;;  %v10425_v35 = vld [vmem:[#allocation63_spill] sm:$0xff]  ;;  %v10426_v44 = vunpack.c.h.s8.bf16 %v10419_v55  ;;  %v10445_v55 = vunpack.c.h.s8.bf16 %v8475_v36  ;;  %v10452_v36 = vunpack.c.h.s8.bf16 %v8495_v43 }
 0x3c8   :  { %2376 = vmatprep.subr.bf16.mxu0 %v10403_v26  ;;  %2458 = vmatprep.subr.bf16.mxu1 %v10405_v18  ;;  %v10428_v26 = vunpack.c.l.s8.bf16 %v8443_v52  ;;  %v10430_v18 = vld [vmem:[#allocation152_spill] sm:$0xff] }
 0x3c9   :  { %v10431_v21 = vunpack.c.l.s8.bf16 %v10430_v18 }
 0x3cb   :  { %2377 = vmatpush1.bf16.msra.mxu0 %v10407_v38  ;;  %2459 = vmatpush1.bf16.msra.mxu1 %v10409_v47  ;;  %v10432_v38 = vld [vmem:[#allocation153_spill] sm:$0xff]  ;;  %v10434_v47 = vunpack.c.h.s8.bf16 %v8443_v52  ;;  %v10442_v52 = vld [vmem:[#allocation159_spill] sm:$0xff] }
 0x3cc   :  { %2378 = vmatprep.subr.bf16.mxu0 %v10410_v63  ;;  %2460 = vmatprep.subr.bf16.mxu1 %v10411_v48  ;;  %v10433_v39 = vunpack.c.l.s8.bf16 %v10432_v38  ;;  %v10435_v63 = vunpack.c.h.s8.bf16 %v8451_v60  ;;  %v10436_v48 = vunpack.c.h.s8.bf16 %v10430_v18  ;;  %v10444_v60 = vunpack.c.h.s8.bf16 %v8471_v8 }
 0x3cd   :  { %v10447_v40 = vunpack.c.h.s8.bf16 %v10442_v52  ;;  %v10457_v18 = vunpack.c.l.s8.bf16 %v8515_v0 }
 0x3cf   :  { %2379 = vmatpush1.bf16.msra.mxu0 %v10412_v24  ;;  %2461 = vmatpush1.bf16.msra.mxu1 %v10413_v61  ;;  %v10437_v24 = vunpack.c.h.s8.bf16 %v10432_v38  ;;  %v10438_v61 = vunpack.c.l.s8.bf16 %v8471_v8  ;;  %v10451_v8 = vunpack.c.l.s8.bf16 %v8497_v15  ;;  %v10463_v38 = vunpack.c.h.s8.bf16 %v8513_v32 }
 0x3d0   :  { %2389 = vmatprep.subr.bf16.mxu0 %v10415_v5  ;;  %2471 = vmatprep.subr.bf16.mxu1 %v10417_v58  ;;  %v10440_v5 = vld [vmem:[#allocation158_spill] sm:$0xff]  ;;  %v10443_v58 = vunpack.c.l.s8.bf16 %v10442_v52  ;;  %v10481_v52 = vunpack.c.l.s8.bf16 %v8575_v1 }
 0x3d1   :  { %v10441_v20 = vunpack.c.l.s8.bf16 %v10440_v5 }
 0x3d2   :  { %2381 = vmatmul.mubr.bf16.vlgmr.msra.gmra.mrb[20].mxu0 %v10418_v10  ;;  %2463 = vmatmul.mubr.bf16.vlgmr.msra.gmra.mrb[28].mxu1 %v10418_v10 }
 0x3d3   :  { %2390 = vmatpush1.bf16.msra.mxu0 %v10420_v29  ;;  %2472 = vmatpush1.bf16.msra.mxu1 %v10422_v7  ;;  %v10446_v29 = vunpack.c.h.s8.bf16 %v10440_v5  ;;  %v10448_v7 = vunpack.c.l.s8.bf16 %v8495_v43  ;;  %v10459_v43 = vunpack.c.l.s8.bf16 %v8513_v32  ;;  %v10470_v32 = vunpack.c.h.s8.bf16 %v8525_v57 }
 0x3d4   :  { %2391 = vmatprep.subr.bf16.mxu0 %v10423_v6  ;;  %2473 = vmatprep.subr.bf16.mxu1 %v10424_v19  ;;  %v10449_v6 = vunpack.c.l.s8.bf16 %v8499_v62  ;;  %v10450_v19 = vunpack.c.l.s8.bf16 %v8493_v17  ;;  %v10479_v5 = vunpack.c.h.s8.bf16 %v8545_v46 }
 0x3d5   :  { %2421 = vmatprep.mubr.bf16.mxu0 %v10425_v35  ;;  %2503 = vmatprep.mubr.bf16.mxu1 %v10425_v35 }
 0x3d7   :  { %2392 = vmatpush1.bf16.msra.mxu0 %v10426_v44  ;;  %2474 = vmatpush1.bf16.msra.mxu1 %v10427_v13  ;;  %v10453_v44 = vunpack.c.h.s8.bf16 %v8499_v62  ;;  %v10454_v13 = vunpack.c.h.s8.bf16 %v8493_v17  ;;  %v10460_v62 = vunpack.c.h.s8.bf16 %v8511_v23  ;;  %v10461_v17 = vunpack.c.h.s8.bf16 %v8515_v0 }
 0x3d8   :  { %2393 = vmatprep.subr.bf16.mxu0 %v10428_v26  ;;  %2475 = vmatprep.subr.bf16.mxu1 %v10429_v4  ;;  %v10455_v26 = vunpack.c.h.s8.bf16 %v8497_v15  ;;  %v10456_v4 = vunpack.c.l.s8.bf16 %v8511_v23  ;;  %v10462_v15 = vunpack.c.h.s8.bf16 %v8509_v56  ;;  %v10467_v23 = vunpack.c.l.s8.bf16 %v8529_v12 }
 0x3d9   :  { %v10468_v0 = vunpack.c.h.s8.bf16 %v8527_v2 }
 0x3db   :  { %2394 = vmatpush1.bf16.msra.mxu0 %v10431_v21  ;;  %2476 = vmatpush1.bf16.msra.mxu1 %v10433_v39  ;;  %v10458_v21 = vunpack.c.l.s8.bf16 %v8509_v56  ;;  %v10464_v39 = vunpack.c.l.s8.bf16 %v8527_v2  ;;  %v10469_v56 = vunpack.c.h.s8.bf16 %v8531_v14  ;;  %v10475_v2 = vunpack.c.l.s8.bf16 %v8545_v46 }
 0x3dc   :  { %2395 = vmatprep.subr.bf16.mxu0 %v10434_v47  ;;  %2477 = vmatprep.subr.bf16.mxu1 %v10435_v63  ;;  %v10465_v47 = vunpack.c.l.s8.bf16 %v8531_v14  ;;  %v10466_v63 = vunpack.c.l.s8.bf16 %v8525_v57  ;;  %v10476_v14 = vunpack.c.h.s8.bf16 %v8543_v59  ;;  %v10477_v57 = vunpack.c.h.s8.bf16 %v8547_v31 }
 0x3dd   :  { %v10485_v46 = vunpack.c.h.s8.bf16 %v8575_v1 }
 0x3df   :  { %2396 = vmatpush1.bf16.msra.mxu0 %v10436_v48  ;;  %2478 = vmatpush1.bf16.msra.mxu1 %v10437_v24  ;;  %v10471_v48 = vunpack.c.h.s8.bf16 %v8529_v12  ;;  %v10472_v24 = vunpack.c.l.s8.bf16 %v8543_v59  ;;  %v10478_v12 = vunpack.c.h.s8.bf16 %v8541_v28  ;;  %v10482_v59 = vunpack.c.l.s8.bf16 %v8565_v53 }
 0x3e0   :  { %2397 = vmatprep.subr.bf16.mxu0 %v10438_v61  ;;  %2479 = vmatprep.subr.bf16.mxu1 %v10439_v30  ;;  %v10473_v61 = vunpack.c.l.s8.bf16 %v8547_v31  ;;  %v10474_v30 = vunpack.c.l.s8.bf16 %v8541_v28  ;;  %v10483_v31 = vunpack.c.l.s8.bf16 %v8569_v25  ;;  %v10484_v28 = vunpack.c.h.s8.bf16 %v8567_v37 }
 0x3e3   :  { %2398 = vmatpush1.bf16.msra.mxu0 %v10441_v20  ;;  %2480 = vmatpush1.bf16.msra.mxu1 %v10443_v58  ;;  %v10480_v20 = vunpack.c.l.s8.bf16 %v8567_v37  ;;  %v10486_v58 = vunpack.c.h.s8.bf16 %v8565_v53 }
 0x3e4   :  { %2399 = vmatprep.subr.bf16.mxu0 %v10444_v60  ;;  %2481 = vmatprep.subr.bf16.mxu1 %v10445_v55  ;;  %v10487_v60 = vunpack.c.h.s8.bf16 %v8569_v25  ;;  %v10488_v55 = vld [vmem:[#allocation85_spill] sm:$0xff] }
 0x3e7   :  { %2400 = vmatpush1.bf16.msra.mxu0 %v10446_v29  ;;  %2482 = vmatpush1.bf16.msra.mxu1 %v10447_v40  ;;  %v10489_v29 = vunpack.c.l.s8.bf16 %v10488_v55  ;;  %v10490_v40 = vld [vmem:[#allocation87_spill] sm:$0xff] }
 0x3e8   :  { %2401 = vmatprep.subr.bf16.mxu0 %v10448_v7  ;;  %2483 = vmatprep.subr.bf16.mxu1 %v10449_v6  ;;  %v10491_v7 = vunpack.c.l.s8.bf16 %v10490_v40  ;;  %v10492_v6 = vld [vmem:[#allocation62_spill] sm:$0xff] }
 0x3eb   :  { %2402 = vmatpush1.bf16.msra.mxu0 %v10450_v19  ;;  %2484 = vmatpush1.bf16.msra.mxu1 %v10451_v8 }
 0x3ec   :  { %2403 = vmatprep.subr.bf16.mxu0 %v10452_v36  ;;  %2485 = vmatprep.subr.bf16.mxu1 %v10453_v44 }
 0x3ef   :  { %2404 = vmatpush1.bf16.msra.mxu0 %v10454_v13  ;;  %2486 = vmatpush1.bf16.msra.mxu1 %v10455_v26 }
 0x3f0   :  { %2405 = vmatprep.subr.bf16.mxu0 %v10456_v4  ;;  %2487 = vmatprep.subr.bf16.mxu1 %v10457_v18 }
 0x3f3   :  { %2406 = vmatpush1.bf16.msra.mxu0 %v10458_v21  ;;  %2488 = vmatpush1.bf16.msra.mxu1 %v10459_v43 }
 0x3f4   :  { %2407 = vmatprep.subr.bf16.mxu0 %v10460_v62  ;;  %2489 = vmatprep.subr.bf16.mxu1 %v10461_v17 }
 0x3f7   :  { %2408 = vmatpush1.bf16.msra.mxu0 %v10462_v15  ;;  %2490 = vmatpush1.bf16.msra.mxu1 %v10463_v38 }
 0x3f8   :  { %2409 = vmatprep.subr.bf16.mxu0 %v10464_v39  ;;  %2491 = vmatprep.subr.bf16.mxu1 %v10465_v47 }
 0x3fb   :  { %2410 = vmatpush1.bf16.msra.mxu0 %v10466_v63  ;;  %2492 = vmatpush1.bf16.msra.mxu1 %v10467_v23 }
 0x3fc   :  { %2411 = vmatprep.subr.bf16.mxu0 %v10468_v0  ;;  %2493 = vmatprep.subr.bf16.mxu1 %v10469_v56 }
 0x3ff   :  { %2412 = vmatpush1.bf16.msra.mxu0 %v10470_v32  ;;  %2494 = vmatpush1.bf16.msra.mxu1 %v10471_v48 }
 0x400   :  { %2413 = vmatprep.subr.bf16.mxu0 %v10472_v24  ;;  %2495 = vmatprep.subr.bf16.mxu1 %v10473_v61 }
 0x403   :  { %2414 = vmatpush1.bf16.msra.mxu0 %v10474_v30  ;;  %2496 = vmatpush1.bf16.msra.mxu1 %v10475_v2 }
 0x404   :  { %2415 = vmatprep.subr.bf16.mxu0 %v10476_v14  ;;  %2497 = vmatprep.subr.bf16.mxu1 %v10477_v57 }
 0x407   :  { %2416 = vmatpush1.bf16.msra.mxu0 %v10478_v12  ;;  %2498 = vmatpush1.bf16.msra.mxu1 %v10479_v5 }
 0x408   :  { %2417 = vmatprep.subr.bf16.mxu0 %v10480_v20  ;;  %2499 = vmatprep.subr.bf16.mxu1 %v10481_v52 }
 0x40b   :  { %2418 = vmatpush1.bf16.msra.mxu0 %v10482_v59  ;;  %2500 = vmatpush1.bf16.msra.mxu1 %v10483_v31 }
 0x40c   :  { %2419 = vmatprep.subr.bf16.mxu0 %v10484_v28  ;;  %2501 = vmatprep.subr.bf16.mxu1 %v10485_v46 }
 0x40f   :  { %2420 = vmatpush1.bf16.msra.mxu0 %v10486_v58  ;;  %2502 = vmatpush1.bf16.msra.mxu1 %v10487_v60 }
 0x410   :  { %2512 = vmatprep.subr.bf16.mxu0 %v10489_v29  ;;  %2594 = vmatprep.subr.bf16.mxu1 %v10491_v7 }
 0x412   :  { %2422 = vmatmul.mubr.bf16.vlgmr.msra.gmra.mrb[20].mxu0 %v10492_v6  ;;  %2504 = vmatmul.mubr.bf16.vlgmr.msra.gmra.mrb[28].mxu1 %v10492_v6 }
 0x413   :  { %7510 = shalt.err (!%p7507_p8)  }
 0x414   :  { %7522 = shalt.err (!%p7979_p7)  }
 0x415   :  { %2687 = dma.hbm_to_vmem [thread:$0]  %s8600_s14, 16384, %s7957_s0, [#allocation3 + $0x1]  ;;  %v10493_v53 = vld [vmem:[#allocation84_spill] sm:$0xff]  ;;  %v10495_v25 = vld [vmem:[#allocation86_spill] sm:$0xff]  ;;  %v10497_v19 = vunpack.c.h.s8.bf16 %v10488_v55  ;;  %v10498_v8 = vunpack.c.h.s8.bf16 %v10490_v40  ;;  %2544 = vmatprep.mubr.bf16.mxu0 %v10327_v27  ;;  %2626 = vmatprep.mubr.bf16.mxu1 %v10327_v27  ;;  %v10501_v13 = vld [vmem:[#allocation93_spill] sm:$0xff] }
 0x416   :  { %v10494_v37 = vunpack.c.l.s8.bf16 %v10493_v53  ;;  %v10496_v1 = vunpack.c.l.s8.bf16 %v10495_v25  ;;  %v10499_v36 = vunpack.c.h.s8.bf16 %v10493_v53  ;;  %v10500_v44 = vunpack.c.h.s8.bf16 %v10495_v25  ;;  %v10503_v4 = vld [vmem:[#allocation95_spill] sm:$0xff]  ;;  %v10505_v21 = vld [vmem:[#allocation92_spill] sm:$0xff]  ;;  %v10507_v62 = vld [vmem:[#allocation94_spill] sm:$0xff] }
 0x417   :  { %v10502_v26 = vunpack.c.l.s8.bf16 %v10501_v13  ;;  %v10504_v18 = vunpack.c.l.s8.bf16 %v10503_v4  ;;  %v10506_v43 = vunpack.c.l.s8.bf16 %v10505_v21  ;;  %v10508_v17 = vunpack.c.l.s8.bf16 %v10507_v62  ;;  %v10513_v47 = vld [vmem:[#allocation101_spill] sm:$0xff]  ;;  %v10515_v23 = vld [vmem:[#allocation103_spill] sm:$0xff]  ;;  %v10517_v56 = vld [vmem:[#allocation100_spill] sm:$0xff] }
 0x418   :  { %2513 = vmatpush1.bf16.msra.mxu0 %v10494_v37  ;;  %2595 = vmatpush1.bf16.msra.mxu1 %v10496_v1  ;;  %v10509_v27 = vunpack.c.h.s8.bf16 %v10501_v13  ;;  %v10510_v15 = vunpack.c.h.s8.bf16 %v10503_v4  ;;  %v10511_v38 = vunpack.c.h.s8.bf16 %v10505_v21  ;;  %v10512_v39 = vunpack.c.h.s8.bf16 %v10507_v62  ;;  %v10519_v48 = vld [vmem:[#allocation102_spill] sm:$0xff]  ;;  %v10525_v57 = vld [vmem:[#allocation109_spill] sm:$0xff]  ;;  %v10527_v5 = vld [vmem:[#allocation111_spill] sm:$0xff] }
 0x419   :  { %2514 = vmatprep.subr.bf16.mxu0 %v10497_v19  ;;  %2596 = vmatprep.subr.bf16.mxu1 %v10498_v8  ;;  %v10514_v63 = vunpack.c.l.s8.bf16 %v10513_v47  ;;  %v10516_v0 = vunpack.c.l.s8.bf16 %v10515_v23  ;;  %v10518_v32 = vunpack.c.l.s8.bf16 %v10517_v56  ;;  %v10520_v24 = vunpack.c.l.s8.bf16 %v10519_v48  ;;  %v10529_v52 = vld [vmem:[#allocation108_spill] sm:$0xff]  ;;  %v10531_v31 = vld [vmem:[#allocation110_spill] sm:$0xff]  ;;  %v10537_v29 = vld [vmem:[#allocation117_spill] sm:$0xff] }
 0x41a   :  { %v10521_v61 = vunpack.c.h.s8.bf16 %v10513_v47  ;;  %v10522_v30 = vunpack.c.h.s8.bf16 %v10515_v23  ;;  %v10523_v2 = vunpack.c.h.s8.bf16 %v10517_v56  ;;  %v10524_v14 = vunpack.c.h.s8.bf16 %v10519_v48  ;;  %v10539_v7 = vld [vmem:[#allocation119_spill] sm:$0xff]  ;;  %v10541_v37 = vld [vmem:[#allocation116_spill] sm:$0xff]  ;;  %v10543_v1 = vld [vmem:[#allocation118_spill] sm:$0xff] }
 0x41b   :  { %v10526_v12 = vunpack.c.l.s8.bf16 %v10525_v57  ;;  %v10528_v20 = vunpack.c.l.s8.bf16 %v10527_v5  ;;  %v10530_v59 = vunpack.c.l.s8.bf16 %v10529_v52  ;;  %v10532_v28 = vunpack.c.l.s8.bf16 %v10531_v31 }
 0x41c   :  { %2515 = vmatpush1.bf16.msra.mxu0 %v10499_v36  ;;  %2597 = vmatpush1.bf16.msra.mxu1 %v10500_v44  ;;  %v10533_v46 = vunpack.c.h.s8.bf16 %v10525_v57  ;;  %v10534_v58 = vunpack.c.h.s8.bf16 %v10527_v5  ;;  %v10535_v60 = vunpack.c.h.s8.bf16 %v10529_v52  ;;  %v10536_v55 = vunpack.c.h.s8.bf16 %v10531_v31 }
 0x41d   :  { %2516 = vmatprep.subr.bf16.mxu0 %v10502_v26  ;;  %2598 = vmatprep.subr.bf16.mxu1 %v10504_v18  ;;  %v10538_v40 = vunpack.c.l.s8.bf16 %v10537_v29  ;;  %v10540_v53 = vunpack.c.l.s8.bf16 %v10539_v7  ;;  %v10542_v25 = vunpack.c.l.s8.bf16 %v10541_v37  ;;  %v10544_v19 = vunpack.c.l.s8.bf16 %v10543_v1  ;;  %v10549_v26 = vld [vmem:[#allocation125_spill] sm:$0xff]  ;;  %v10551_v18 = vld [vmem:[#allocation127_spill] sm:$0xff] }
 0x41e   :  { %v10545_v8 = vunpack.c.h.s8.bf16 %v10537_v29  ;;  %v10546_v36 = vunpack.c.h.s8.bf16 %v10539_v7  ;;  %v10547_v44 = vunpack.c.h.s8.bf16 %v10541_v37  ;;  %v10548_v13 = vunpack.c.h.s8.bf16 %v10543_v1 }
 0x41f   :  { %v10550_v4 = vunpack.c.l.s8.bf16 %v10549_v26  ;;  %v10552_v21 = vunpack.c.l.s8.bf16 %v10551_v18 }
 0x420   :  { %2517 = vmatpush1.bf16.msra.mxu0 %v10506_v43  ;;  %2599 = vmatpush1.bf16.msra.mxu1 %v10508_v17  ;;  %v10553_v43 = vld [vmem:[#allocation124_spill] sm:$0xff]  ;;  %v10555_v17 = vld [vmem:[#allocation126_spill] sm:$0xff] }
 0x421   :  { %2518 = vmatprep.subr.bf16.mxu0 %v10509_v27  ;;  %2600 = vmatprep.subr.bf16.mxu1 %v10510_v15  ;;  %v10554_v62 = vunpack.c.l.s8.bf16 %v10553_v43  ;;  %v10556_v27 = vunpack.c.l.s8.bf16 %v10555_v17  ;;  %v10557_v15 = vunpack.c.h.s8.bf16 %v10549_v26  ;;  %v10560_v47 = vunpack.c.h.s8.bf16 %v10555_v17  ;;  %v10597_v26 = vld [vmem:[#allocation155_spill] sm:$0xff]  ;;  %v10603_v17 = vld [vmem:[#allocation156_spill] sm:$0xff] }
 0x424   :  { %2519 = vmatpush1.bf16.msra.mxu0 %v10511_v38  ;;  %2601 = vmatpush1.bf16.msra.mxu1 %v10512_v39  ;;  %v10558_v38 = vunpack.c.h.s8.bf16 %v10551_v18  ;;  %v10559_v39 = vunpack.c.h.s8.bf16 %v10553_v43  ;;  %v10599_v18 = vld [vmem:[#allocation157_spill] sm:$0xff]  ;;  %v10601_v43 = vld [vmem:[#allocation154_spill] sm:$0xff] }
 0x425   :  { %2520 = vmatprep.subr.bf16.mxu0 %v10514_v63  ;;  %2602 = vmatprep.subr.bf16.mxu1 %v10516_v0  ;;  %v10561_v63 = vld [vmem:[#allocation133_spill] sm:$0xff]  ;;  %v10563_v0 = vld [vmem:[#allocation135_spill] sm:$0xff] }
 0x426   :  { %v10562_v23 = vunpack.c.l.s8.bf16 %v10561_v63  ;;  %v10564_v56 = vunpack.c.l.s8.bf16 %v10563_v0 }
 0x428   :  { %2521 = vmatpush1.bf16.msra.mxu0 %v10518_v32  ;;  %2603 = vmatpush1.bf16.msra.mxu1 %v10520_v24  ;;  %v10565_v32 = vld [vmem:[#allocation132_spill] sm:$0xff]  ;;  %v10567_v24 = vld [vmem:[#allocation134_spill] sm:$0xff] }
 0x429   :  { %2522 = vmatprep.subr.bf16.mxu0 %v10521_v61  ;;  %2604 = vmatprep.subr.bf16.mxu1 %v10522_v30  ;;  %v10566_v48 = vunpack.c.l.s8.bf16 %v10565_v32  ;;  %v10568_v61 = vunpack.c.l.s8.bf16 %v10567_v24  ;;  %v10569_v30 = vunpack.c.h.s8.bf16 %v10561_v63  ;;  %v10572_v57 = vunpack.c.h.s8.bf16 %v10567_v24 }
 0x42a   :  { %v10610_v63 = vunpack.c.l.s8.bf16 %v8487_v45  ;;  %v10616_v24 = vunpack.c.h.s8.bf16 %v8485_v3 }
 0x42c   :  { %2523 = vmatpush1.bf16.msra.mxu0 %v10523_v2  ;;  %2605 = vmatpush1.bf16.msra.mxu1 %v10524_v14  ;;  %v10570_v2 = vunpack.c.h.s8.bf16 %v10563_v0  ;;  %v10571_v14 = vunpack.c.h.s8.bf16 %v10565_v32  ;;  %v10612_v0 = vunpack.c.l.s8.bf16 %v8485_v3  ;;  %v10614_v32 = vunpack.c.h.s8.bf16 %v8487_v45 }
 0x42d   :  { %2524 = vmatprep.subr.bf16.mxu0 %v10526_v12  ;;  %2606 = vmatprep.subr.bf16.mxu1 %v10528_v20  ;;  %v10573_v12 = vld [vmem:[#allocation141_spill] sm:$0xff]  ;;  %v10575_v20 = vld [vmem:[#allocation143_spill] sm:$0xff]  ;;  %v10621_v45 = vunpack.c.h.s8.bf16 %v8503_v16  ;;  %v10623_v3 = vunpack.c.h.s8.bf16 %v8501_v51 }
 0x42e   :  { %v10574_v5 = vunpack.c.l.s8.bf16 %v10573_v12  ;;  %v10576_v52 = vunpack.c.l.s8.bf16 %v10575_v20 }
 0x430   :  { %2525 = vmatpush1.bf16.msra.mxu0 %v10530_v59  ;;  %2607 = vmatpush1.bf16.msra.mxu1 %v10532_v28  ;;  %v10577_v59 = vld [vmem:[#allocation140_spill] sm:$0xff]  ;;  %v10579_v28 = vld [vmem:[#allocation142_spill] sm:$0xff] }
 0x431   :  { %2526 = vmatprep.subr.bf16.mxu0 %v10533_v46  ;;  %2608 = vmatprep.subr.bf16.mxu1 %v10534_v58  ;;  %v10578_v31 = vunpack.c.l.s8.bf16 %v10577_v59  ;;  %v10580_v46 = vunpack.c.l.s8.bf16 %v10579_v28  ;;  %v10581_v58 = vunpack.c.h.s8.bf16 %v10573_v12  ;;  %v10584_v29 = vunpack.c.h.s8.bf16 %v10579_v28 }
 0x432   :  { %v10626_v12 = vunpack.c.l.s8.bf16 %v8523_v9 }
 0x434   :  { %2527 = vmatpush1.bf16.msra.mxu0 %v10535_v60  ;;  %2609 = vmatpush1.bf16.msra.mxu1 %v10536_v55  ;;  %v10582_v60 = vunpack.c.h.s8.bf16 %v10575_v20  ;;  %v10583_v55 = vunpack.c.h.s8.bf16 %v10577_v59  ;;  %v10632_v20 = vunpack.c.h.s8.bf16 %v8521_v41  ;;  %v10634_v59 = vunpack.c.l.s8.bf16 %v8539_v49 }
 0x435   :  { %2528 = vmatprep.subr.bf16.mxu0 %v10538_v40  ;;  %2610 = vmatprep.subr.bf16.mxu1 %v10540_v53  ;;  %v10585_v40 = vld [vmem:[#allocation149_spill] sm:$0xff]  ;;  %v10587_v53 = vld [vmem:[#allocation151_spill] sm:$0xff] }
 0x436   :  { %v10586_v7 = vunpack.c.l.s8.bf16 %v10585_v40  ;;  %v10588_v37 = vunpack.c.l.s8.bf16 %v10587_v53 }
 0x438   :  { %2529 = vmatpush1.bf16.msra.mxu0 %v10542_v25  ;;  %2611 = vmatpush1.bf16.msra.mxu1 %v10544_v19  ;;  %v10589_v25 = vld [vmem:[#allocation148_spill] sm:$0xff]  ;;  %v10591_v19 = vld [vmem:[#allocation150_spill] sm:$0xff] }
 0x439   :  { %2530 = vmatprep.subr.bf16.mxu0 %v10545_v8  ;;  %2612 = vmatprep.subr.bf16.mxu1 %v10546_v36  ;;  %v10590_v1 = vunpack.c.l.s8.bf16 %v10589_v25  ;;  %v10592_v8 = vunpack.c.l.s8.bf16 %v10591_v19  ;;  %v10593_v36 = vunpack.c.h.s8.bf16 %v10585_v40 }
 0x43c   :  { %2531 = vmatpush1.bf16.msra.mxu0 %v10547_v44  ;;  %2613 = vmatpush1.bf16.msra.mxu1 %v10548_v13  ;;  %v10594_v44 = vunpack.c.h.s8.bf16 %v10587_v53  ;;  %v10595_v13 = vunpack.c.h.s8.bf16 %v10589_v25 }
 0x43d   :  { %2532 = vmatprep.subr.bf16.mxu0 %v10550_v4  ;;  %2614 = vmatprep.subr.bf16.mxu1 %v10552_v21  ;;  %v10598_v4 = vunpack.c.l.s8.bf16 %v10597_v26  ;;  %v10600_v21 = vunpack.c.l.s8.bf16 %v10599_v18 }
 0x440   :  { %2533 = vmatpush1.bf16.msra.mxu0 %v10554_v62  ;;  %2615 = vmatpush1.bf16.msra.mxu1 %v10556_v27  ;;  %v10602_v62 = vunpack.c.l.s8.bf16 %v10601_v43  ;;  %v10604_v27 = vunpack.c.l.s8.bf16 %v10603_v17 }
 0x441   :  { %2534 = vmatprep.subr.bf16.mxu0 %v10557_v15  ;;  %2616 = vmatprep.subr.bf16.mxu1 %v10558_v38  ;;  %v10606_v15 = vunpack.c.h.s8.bf16 %v10599_v18  ;;  %v10607_v38 = vunpack.c.h.s8.bf16 %v10601_v43 }
 0x444   :  { %2535 = vmatpush1.bf16.msra.mxu0 %v10559_v39  ;;  %2617 = vmatpush1.bf16.msra.mxu1 %v10560_v47  ;;  %v10608_v39 = vunpack.c.h.s8.bf16 %v10603_v17  ;;  %v10609_v47 = vunpack.c.l.s8.bf16 %v8483_v54 }
 0x445   :  { %2536 = vmatprep.subr.bf16.mxu0 %v10562_v23  ;;  %2618 = vmatprep.subr.bf16.mxu1 %v10564_v56  ;;  %v10611_v23 = vunpack.c.l.s8.bf16 %v8481_v34  ;;  %v10613_v56 = vunpack.c.h.s8.bf16 %v8483_v54  ;;  %v10620_v54 = vunpack.c.l.s8.bf16 %v8505_v33 }
 0x448   :  { %2537 = vmatpush1.bf16.msra.mxu0 %v10566_v48  ;;  %2619 = vmatpush1.bf16.msra.mxu1 %v10568_v61  ;;  %v10615_v48 = vunpack.c.h.s8.bf16 %v8481_v34  ;;  %v10617_v61 = vunpack.c.l.s8.bf16 %v8503_v16  ;;  %v10622_v34 = vunpack.c.h.s8.bf16 %v8507_v50  ;;  %v10628_v16 = vunpack.c.l.s8.bf16 %v8521_v41 }
 0x449   :  { %2538 = vmatprep.subr.bf16.mxu0 %v10569_v30  ;;  %2620 = vmatprep.subr.bf16.mxu1 %v10570_v2  ;;  %v10618_v30 = vunpack.c.l.s8.bf16 %v8507_v50  ;;  %v10619_v2 = vunpack.c.l.s8.bf16 %v8501_v51  ;;  %v10629_v50 = vunpack.c.h.s8.bf16 %v8519_v42  ;;  %v10630_v51 = vunpack.c.h.s8.bf16 %v8523_v9 }
 0x44a   :  { %v10639_v9 = vunpack.c.h.s8.bf16 %v8535_v22 }
 0x44c   :  { %2539 = vmatpush1.bf16.msra.mxu0 %v10571_v14  ;;  %2621 = vmatpush1.bf16.msra.mxu1 %v10572_v57  ;;  %v10624_v14 = vunpack.c.h.s8.bf16 %v8505_v33  ;;  %v10625_v57 = vunpack.c.l.s8.bf16 %v8519_v42  ;;  %v10631_v33 = vunpack.c.h.s8.bf16 %v8517_v11  ;;  %v10637_v42 = vld [vmem:[#allocation161_spill] sm:$0xff] }
 0x44d   :  { %2540 = vmatprep.subr.bf16.mxu0 %v10574_v5  ;;  %2622 = vmatprep.subr.bf16.mxu1 %v10576_v52  ;;  %v10627_v5 = vunpack.c.l.s8.bf16 %v8517_v11  ;;  %v10633_v52 = vunpack.c.l.s8.bf16 %v8535_v22  ;;  %v10640_v11 = vunpack.c.h.s8.bf16 %v8539_v49  ;;  %v10649_v22 = vld [vmem:[#allocation164_spill] sm:$0xff] }
 0x450   :  { %2541 = vmatpush1.bf16.msra.mxu0 %v10578_v31  ;;  %2623 = vmatpush1.bf16.msra.mxu1 %v10580_v46  ;;  %v10635_v31 = vld [vmem:[#allocation160_spill] sm:$0xff]  ;;  %v10638_v46 = vunpack.c.l.s8.bf16 %v10637_v42 }
 0x451   :  { %2542 = vmatprep.subr.bf16.mxu0 %v10581_v58  ;;  %2624 = vmatprep.subr.bf16.mxu1 %v10582_v60  ;;  %v10636_v28 = vunpack.c.l.s8.bf16 %v10635_v31  ;;  %v10641_v41 = vunpack.c.h.s8.bf16 %v10635_v31  ;;  %v10642_v58 = vunpack.c.h.s8.bf16 %v10637_v42  ;;  %v10643_v60 = vld [vmem:[#allocation163_spill] sm:$0xff] }
 0x452   :  { %v10651_v49 = vunpack.c.h.s8.bf16 %v10643_v60 }
 0x454   :  { %2543 = vmatpush1.bf16.msra.mxu0 %v10583_v55  ;;  %2625 = vmatpush1.bf16.msra.mxu1 %v10584_v29  ;;  %v10644_v55 = vunpack.c.l.s8.bf16 %v10643_v60  ;;  %v10645_v29 = vld [vmem:[#allocation165_spill] sm:$0xff] }
 0x455   :  { %2553 = vmatprep.subr.bf16.mxu0 %v10586_v7  ;;  %2635 = vmatprep.subr.bf16.mxu1 %v10588_v37  ;;  %v10646_v40 = vunpack.c.l.s8.bf16 %v10645_v29  ;;  %v10647_v7 = vld [vmem:[#allocation162_spill] sm:$0xff]  ;;  %v10650_v37 = vunpack.c.l.s8.bf16 %v10649_v22  ;;  %v10652_v25 = vunpack.c.h.s8.bf16 %v10645_v29 }
 0x456   :  { %v10648_v53 = vunpack.c.l.s8.bf16 %v10647_v7 }
 0x457   :  { %2545 = vmatmul.mubr.bf16.vlgmr.msra.gmra.mrb[24].mxu0 %v10418_v10  ;;  %2627 = vmatmul.mubr.bf16.vlgmr.msra.gmra.mrb[32].mxu1 %v10418_v10  ;;  %v10596_v10 = vunpack.c.h.s8.bf16 %v10591_v19  ;;  %v10654_v19 = vunpack.c.h.s8.bf16 %v10649_v22 }
 0x458   :  { %2554 = vmatpush1.bf16.msra.mxu0 %v10590_v1  ;;  %2636 = vmatpush1.bf16.msra.mxu1 %v10592_v8  ;;  %v10653_v1 = vunpack.c.h.s8.bf16 %v10647_v7  ;;  %v10655_v8 = vld [vmem:[#allocation167_spill] sm:$0xff] }
 0x459   :  { %2555 = vmatprep.subr.bf16.mxu0 %v10593_v36  ;;  %2637 = vmatprep.subr.bf16.mxu1 %v10594_v44  ;;  %v10656_v36 = vunpack.c.l.s8.bf16 %v10655_v8  ;;  %v10657_v44 = vld [vmem:[#allocation169_spill] sm:$0xff] }
 0x45a   :  { %2585 = vmatprep.mubr.bf16.mxu0 %v10425_v35  ;;  %2667 = vmatprep.mubr.bf16.mxu1 %v10425_v35  ;;  %v10605_v35 = vunpack.c.h.s8.bf16 %v10597_v26  ;;  %v10664_v43 = vunpack.c.h.s8.bf16 %v10657_v44 }
 0x45c   :  { %2556 = vmatpush1.bf16.msra.mxu0 %v10595_v13  ;;  %2638 = vmatpush1.bf16.msra.mxu1 %v10596_v10  ;;  %v10658_v13 = vunpack.c.l.s8.bf16 %v10657_v44  ;;  %v10659_v10 = vld [vmem:[#allocation166_spill] sm:$0xff] }
 0x45d   :  { %2557 = vmatprep.subr.bf16.mxu0 %v10598_v4  ;;  %2639 = vmatprep.subr.bf16.mxu1 %v10600_v21  ;;  %v10660_v26 = vunpack.c.l.s8.bf16 %v10659_v10  ;;  %v10661_v4 = vld [vmem:[#allocation168_spill] sm:$0xff]  ;;  %v10663_v21 = vunpack.c.h.s8.bf16 %v10655_v8 }
 0x45e   :  { %v10662_v18 = vunpack.c.l.s8.bf16 %v10661_v4  ;;  %v10666_v17 = vunpack.c.h.s8.bf16 %v10661_v4 }
 0x460   :  { %2558 = vmatpush1.bf16.msra.mxu0 %v10602_v62  ;;  %2640 = vmatpush1.bf16.msra.mxu1 %v10604_v27  ;;  %v10665_v62 = vunpack.c.h.s8.bf16 %v10659_v10 }
 0x461   :  { %2559 = vmatprep.subr.bf16.mxu0 %v10605_v35  ;;  %2641 = vmatprep.subr.bf16.mxu1 %v10606_v15 }
 0x464   :  { %2560 = vmatpush1.bf16.msra.mxu0 %v10607_v38  ;;  %2642 = vmatpush1.bf16.msra.mxu1 %v10608_v39 }
 0x465   :  { %2561 = vmatprep.subr.bf16.mxu0 %v10609_v47  ;;  %2643 = vmatprep.subr.bf16.mxu1 %v10610_v63 }
 0x468   :  { %2562 = vmatpush1.bf16.msra.mxu0 %v10611_v23  ;;  %2644 = vmatpush1.bf16.msra.mxu1 %v10612_v0 }
 0x469   :  { %2563 = vmatprep.subr.bf16.mxu0 %v10613_v56  ;;  %2645 = vmatprep.subr.bf16.mxu1 %v10614_v32 }
 0x46c   :  { %2564 = vmatpush1.bf16.msra.mxu0 %v10615_v48  ;;  %2646 = vmatpush1.bf16.msra.mxu1 %v10616_v24 }
 0x46d   :  { %2565 = vmatprep.subr.bf16.mxu0 %v10617_v61  ;;  %2647 = vmatprep.subr.bf16.mxu1 %v10618_v30 }
 0x470   :  { %2566 = vmatpush1.bf16.msra.mxu0 %v10619_v2  ;;  %2648 = vmatpush1.bf16.msra.mxu1 %v10620_v54 }
 0x471   :  { %2567 = vmatprep.subr.bf16.mxu0 %v10621_v45  ;;  %2649 = vmatprep.subr.bf16.mxu1 %v10622_v34 }
 0x474   :  { %2568 = vmatpush1.bf16.msra.mxu0 %v10623_v3  ;;  %2650 = vmatpush1.bf16.msra.mxu1 %v10624_v14 }
 0x475   :  { %2569 = vmatprep.subr.bf16.mxu0 %v10625_v57  ;;  %2651 = vmatprep.subr.bf16.mxu1 %v10626_v12 }
 0x478   :  { %2570 = vmatpush1.bf16.msra.mxu0 %v10627_v5  ;;  %2652 = vmatpush1.bf16.msra.mxu1 %v10628_v16 }
 0x479   :  { %2571 = vmatprep.subr.bf16.mxu0 %v10629_v50  ;;  %2653 = vmatprep.subr.bf16.mxu1 %v10630_v51 }
 0x47c   :  { %2572 = vmatpush1.bf16.msra.mxu0 %v10631_v33  ;;  %2654 = vmatpush1.bf16.msra.mxu1 %v10632_v20 }
 0x47d   :  { %2573 = vmatprep.subr.bf16.mxu0 %v10633_v52  ;;  %2655 = vmatprep.subr.bf16.mxu1 %v10634_v59 }
 0x480   :  { %2574 = vmatpush1.bf16.msra.mxu0 %v10636_v28  ;;  %2656 = vmatpush1.bf16.msra.mxu1 %v10638_v46 }
 0x481   :  { %2575 = vmatprep.subr.bf16.mxu0 %v10639_v9  ;;  %2657 = vmatprep.subr.bf16.mxu1 %v10640_v11 }
 0x484   :  { %2576 = vmatpush1.bf16.msra.mxu0 %v10641_v41  ;;  %2658 = vmatpush1.bf16.msra.mxu1 %v10642_v58 }
 0x485   :  { %2577 = vmatprep.subr.bf16.mxu0 %v10644_v55  ;;  %2659 = vmatprep.subr.bf16.mxu1 %v10646_v40 }
 0x488   :  { %2578 = vmatpush1.bf16.msra.mxu0 %v10648_v53  ;;  %2660 = vmatpush1.bf16.msra.mxu1 %v10650_v37 }
 0x489   :  { %2579 = vmatprep.subr.bf16.mxu0 %v10651_v49  ;;  %2661 = vmatprep.subr.bf16.mxu1 %v10652_v25 }
 0x48c   :  { %2580 = vmatpush1.bf16.msra.mxu0 %v10653_v1  ;;  %2662 = vmatpush1.bf16.msra.mxu1 %v10654_v19 }
 0x48d   :  { %2581 = vmatprep.subr.bf16.mxu0 %v10656_v36  ;;  %2663 = vmatprep.subr.bf16.mxu1 %v10658_v13 }
 0x490   :  { %2582 = vmatpush1.bf16.msra.mxu0 %v10660_v26  ;;  %2664 = vmatpush1.bf16.msra.mxu1 %v10662_v18 }
 0x491   :  { %2583 = vmatprep.subr.bf16.mxu0 %v10663_v21  ;;  %2665 = vmatprep.subr.bf16.mxu1 %v10664_v43 }
 0x494   :  { %2584 = vmatpush1.bf16.msra.mxu0 %v10665_v62  ;;  %2666 = vmatpush1.bf16.msra.mxu1 %v10666_v17 }
 0x497   :  { %2586 = vmatmul.mubr.bf16.vlgmr.msra.gmra.mrb[24].mxu0 %v10492_v6  ;;  %2668 = vmatmul.mubr.bf16.vlgmr.msra.gmra.mrb[32].mxu1 %v10492_v6 }
 0x498   :  { %7594 = dma.done.wait [#allocation3], 16384 }
 0x499   :  { %7595 = vsyncadd [#allocation3], 4294950912  ;;  %v10667_v27 = vld [vmem:[#allocation67_spill] sm:$0xff]  ;;  %v2691_v35 = vld [vmem:[#allocation2 + $0x8] sm:$0xff]  ;;  %s9408_s11 = scalar_lea.hbm %s9956_s4, 81920  ;;  %p7527_p11 = scmp.lt.u32.totalorder %s8987_s8, %s9956_s4 }
 0x49a   :  { %3106 = vmatprep.mubr.bf16.mxu0 %v10667_v27  ;;  %3188 = vmatprep.mubr.bf16.mxu1 %v10667_v27  ;;  %v2693_v15 = vld [vmem:[#allocation2 + $0x18] sm:$0xff]  ;;  %v2690_v38 = vld [vmem:[#allocation2] sm:$0xff]  ;;  %v2819_v39 = vunpack.c.l.s8.bf16 %v2691_v35  ;;  %v2692_v23 = vld [vmem:[#allocation2 + $0x10] sm:$0xff]  ;;  %v2827_v0 = vunpack.c.h.s8.bf16 %v2691_v35  ;;  %p7525_p10 = scmp.ne.s32.totalorder %s8987_s8, %s9408_s11  ;;  %p7528_p12 = scmp.lt.u32.totalorder %s7929_s16, %s9408_s11 }
 0x49b   :  { %v2821_v47 = vunpack.c.l.s8.bf16 %v2693_v15  ;;  %v2818_v63 = vunpack.c.l.s8.bf16 %v2690_v38  ;;  %v2820_v56 = vunpack.c.l.s8.bf16 %v2692_v23  ;;  %v2829_v32 = vunpack.c.h.s8.bf16 %v2693_v15  ;;  %v2699_v48 = vld [vmem:[#allocation2 + $0x48] sm:$0xff]  ;;  %v2701_v24 = vld [vmem:[#allocation2 + $0x58] sm:$0xff]  ;;  %v2698_v54 = vld [vmem:[#allocation2 + $0x40] sm:$0xff]  ;;  %p7530_p0 = scmp.lt.u32.totalorder %s9408_s11, %s8987_s8 }
 0x49c   :  { %3074 = vmatprep.subr.bf16.mxu0 %v2819_v39  ;;  %v2826_v6 = vunpack.c.h.s8.bf16 %v2690_v38  ;;  %v2828_v61 = vunpack.c.h.s8.bf16 %v2692_v23  ;;  %v2835_v30 = vunpack.c.l.s8.bf16 %v2699_v48  ;;  %v2837_v2 = vunpack.c.l.s8.bf16 %v2701_v24  ;;  %v2700_v45 = vld [vmem:[#allocation2 + $0x50] sm:$0xff]  ;;  %v2707_v12 = vld [vmem:[#allocation2 + $0x88] sm:$0xff]  ;;  %v2709_v5 = vld [vmem:[#allocation2 + $0x98] sm:$0xff]  ;;  %p7529_p13 = por %p7528_p12, %p7527_p11 }
 0x49d   :  { %3156 = vmatprep.subr.bf16.mxu1 %v2821_v47  ;;  %3075 = vmatpush1.bf16.msra.mxu0 %v2818_v63  ;;  %v2834_v34 = vunpack.c.l.s8.bf16 %v2698_v54  ;;  %v2836_v3 = vunpack.c.l.s8.bf16 %v2700_v45  ;;  %v2843_v14 = vunpack.c.h.s8.bf16 %v2699_v48  ;;  %v2845_v57 = vunpack.c.h.s8.bf16 %v2701_v24  ;;  %v2706_v20 = vld [vmem:[#allocation2 + $0x80] sm:$0xff]  ;;  %v2708_v52 = vld [vmem:[#allocation2 + $0x90] sm:$0xff]  ;;  %v2715_v46 = vld [vmem:[#allocation2 + $0xc8] sm:$0xff] }
 0x49e   :  { %3157 = vmatpush1.bf16.msra.mxu1 %v2820_v56  ;;  %3076 = vmatprep.subr.bf16.mxu0 %v2827_v0  ;;  %v2842_v16 = vunpack.c.h.s8.bf16 %v2698_v54  ;;  %v2844_v50 = vunpack.c.h.s8.bf16 %v2700_v45  ;;  %v2851_v51 = vunpack.c.l.s8.bf16 %v2707_v12  ;;  %v2853_v33 = vunpack.c.l.s8.bf16 %v2709_v5  ;;  %v2717_v9 = vld [vmem:[#allocation2 + $0xd8] sm:$0xff]  ;;  %v2714_v55 = vld [vmem:[#allocation2 + $0xc0] sm:$0xff]  ;;  %v2716_v29 = vld [vmem:[#allocation2 + $0xd0] sm:$0xff]  ;;  %p7531_p1 = por %p7530_p0, %p7529_p13 }
 0x49f   :  { %3158 = vmatprep.subr.bf16.mxu1 %v2829_v32  ;;  %v2850_v59 = vunpack.c.l.s8.bf16 %v2706_v20  ;;  %v2852_v31 = vunpack.c.l.s8.bf16 %v2708_v52  ;;  %v2859_v28 = vunpack.c.h.s8.bf16 %v2707_v12  ;;  %v2861_v42 = vunpack.c.h.s8.bf16 %v2709_v5  ;;  %v2723_v37 = vld [vmem:[#allocation2 + $0x108] sm:$0xff]  ;;  %v2725_v49 = vld [vmem:[#allocation2 + $0x118] sm:$0xff]  ;;  %v2722_v36 = vld [vmem:[#allocation2 + $0x100] sm:$0xff] }
 0x4a0   :  { %v2858_v11 = vunpack.c.h.s8.bf16 %v2706_v20  ;;  %v2860_v41 = vunpack.c.h.s8.bf16 %v2708_v52  ;;  %v2867_v58 = vunpack.c.l.s8.bf16 %v2715_v46  ;;  %v2869_v60 = vunpack.c.l.s8.bf16 %v2717_v9  ;;  %v2724_v44 = vld [vmem:[#allocation2 + $0x110] sm:$0xff]  ;;  %v2731_v18 = vld [vmem:[#allocation2 + $0x148] sm:$0xff]  ;;  %v2733_v21 = vld [vmem:[#allocation2 + $0x158] sm:$0xff]  ;;  %p7532_p3 = pnand %p7531_p1, %p7525_p10 }
 0x4a1   :  { %3077 = vmatpush1.bf16.msra.mxu0 %v2826_v6  ;;  %v2866_v40 = vunpack.c.l.s8.bf16 %v2714_v55  ;;  %v2868_v7 = vunpack.c.l.s8.bf16 %v2716_v29  ;;  %v2875_v53 = vunpack.c.h.s8.bf16 %v2715_v46  ;;  %v2877_v22 = vunpack.c.h.s8.bf16 %v2717_v9  ;;  %v2730_v15 = vld [vmem:[#allocation2 + $0x140] sm:$0xff]  ;;  %v2732_v38 = vld [vmem:[#allocation2 + $0x150] sm:$0xff]  ;;  %v2739_v0 = vld [vmem:[#allocation2 + $0x188] sm:$0xff] }
 0x4a2   :  { %3159 = vmatpush1.bf16.msra.mxu1 %v2828_v61  ;;  %3078 = vmatprep.subr.bf16.mxu0 %v2835_v30  ;;  %v2874_v25 = vunpack.c.h.s8.bf16 %v2714_v55  ;;  %v2876_v1 = vunpack.c.h.s8.bf16 %v2716_v29  ;;  %v2883_v19 = vunpack.c.l.s8.bf16 %v2723_v37  ;;  %v2885_v8 = vunpack.c.l.s8.bf16 %v2725_v49  ;;  %v2741_v56 = vld [vmem:[#allocation2 + $0x198] sm:$0xff]  ;;  %v2738_v61 = vld [vmem:[#allocation2 + $0x180] sm:$0xff]  ;;  %v2740_v30 = vld [vmem:[#allocation2 + $0x190] sm:$0xff] }
 0x4a3   :  { %3160 = vmatprep.subr.bf16.mxu1 %v2837_v2  ;;  %v2882_v13 = vunpack.c.l.s8.bf16 %v2722_v36  ;;  %v2884_v10 = vunpack.c.l.s8.bf16 %v2724_v44  ;;  %v2891_v26 = vunpack.c.h.s8.bf16 %v2723_v37  ;;  %v2893_v4 = vunpack.c.h.s8.bf16 %v2725_v49 }
 0x4a4   :  { %v2890_v43 = vunpack.c.h.s8.bf16 %v2722_v36  ;;  %v2892_v62 = vunpack.c.h.s8.bf16 %v2724_v44  ;;  %v2899_v17 = vunpack.c.l.s8.bf16 %v2731_v18  ;;  %v2901_v35 = vunpack.c.l.s8.bf16 %v2733_v21  ;;  %v10669_v36 = vld [vmem:[#allocation71_spill] sm:$0xff] }
 0x4a5   :  { %3079 = vmatpush1.bf16.msra.mxu0 %v2834_v34  ;;  %v2898_v39 = vunpack.c.l.s8.bf16 %v2730_v15  ;;  %v2900_v47 = vunpack.c.l.s8.bf16 %v2732_v38  ;;  %v2907_v63 = vunpack.c.h.s8.bf16 %v2731_v18  ;;  %v2909_v23 = vunpack.c.h.s8.bf16 %v2733_v21  ;;  %v2773_v18 = vld [vmem:[#allocation2 + $0x298] sm:$0xff] }
 0x4a6   :  { %3161 = vmatpush1.bf16.msra.mxu1 %v2836_v3  ;;  %3080 = vmatprep.subr.bf16.mxu0 %v2843_v14  ;;  %v2906_v32 = vunpack.c.h.s8.bf16 %v2730_v15  ;;  %v2908_v48 = vunpack.c.h.s8.bf16 %v2732_v38  ;;  %v2915_v24 = vunpack.c.l.s8.bf16 %v2739_v0  ;;  %v2917_v6 = vunpack.c.l.s8.bf16 %v2741_v56  ;;  %v2747_v3 = vld [vmem:[#allocation2 + $0x1c8] sm:$0xff]  ;;  %v2749_v14 = vld [vmem:[#allocation2 + $0x1d8] sm:$0xff]  ;;  %v2772_v15 = vld [vmem:[#allocation2 + $0x290] sm:$0xff] }
 0x4a7   :  { %3162 = vmatprep.subr.bf16.mxu1 %v2845_v57  ;;  %v2914_v2 = vunpack.c.l.s8.bf16 %v2738_v61  ;;  %v2916_v54 = vunpack.c.l.s8.bf16 %v2740_v30  ;;  %v2923_v45 = vunpack.c.h.s8.bf16 %v2739_v0  ;;  %v2925_v34 = vunpack.c.h.s8.bf16 %v2741_v56  ;;  %v2781_v0 = vld [vmem:[#allocation2 + $0x2d8] sm:$0xff] }
 0x4a8   :  { %v2922_v57 = vunpack.c.h.s8.bf16 %v2738_v61  ;;  %v2924_v12 = vunpack.c.h.s8.bf16 %v2740_v30  ;;  %v2931_v5 = vunpack.c.l.s8.bf16 %v2747_v3  ;;  %v2939_v52 = vunpack.c.h.s8.bf16 %v2747_v3  ;;  %v2780_v61 = vld [vmem:[#allocation2 + $0x2d0] sm:$0xff]  ;;  %v2789_v3 = vld [vmem:[#allocation2 + $0x318] sm:$0xff] }
 0x4a9   :  { %3081 = vmatpush1.bf16.msra.mxu0 %v2842_v16  ;;  %v2933_v16 = vunpack.c.l.s8.bf16 %v2749_v14 }
 0x4aa   :  { %3163 = vmatpush1.bf16.msra.mxu1 %v2844_v50  ;;  %3082 = vmatprep.subr.bf16.mxu0 %v2851_v51  ;;  %v2746_v50 = vld [vmem:[#allocation2 + $0x1c0] sm:$0xff]  ;;  %v2748_v51 = vld [vmem:[#allocation2 + $0x1d0] sm:$0xff] }
 0x4ab   :  { %3164 = vmatprep.subr.bf16.mxu1 %v2853_v33  ;;  %v2930_v33 = vunpack.c.l.s8.bf16 %v2746_v50  ;;  %v2932_v20 = vunpack.c.l.s8.bf16 %v2748_v51  ;;  %v2940_v46 = vunpack.c.h.s8.bf16 %v2748_v51 }
 0x4ad   :  { %3083 = vmatpush1.bf16.msra.mxu0 %v2850_v59  ;;  %v2941_v59 = vunpack.c.h.s8.bf16 %v2749_v14 }
 0x4ae   :  { %3165 = vmatpush1.bf16.msra.mxu1 %v2852_v31  ;;  %3084 = vmatprep.subr.bf16.mxu0 %v2859_v28  ;;  %v2755_v31 = vld [vmem:[#allocation2 + $0x208] sm:$0xff]  ;;  %v2757_v28 = vld [vmem:[#allocation2 + $0x218] sm:$0xff] }
 0x4af   :  { %3166 = vmatprep.subr.bf16.mxu1 %v2861_v42  ;;  %v2938_v42 = vunpack.c.h.s8.bf16 %v2746_v50  ;;  %v2947_v9 = vunpack.c.l.s8.bf16 %v2755_v31  ;;  %v2955_v29 = vunpack.c.h.s8.bf16 %v2755_v31  ;;  %v2788_v50 = vld [vmem:[#allocation2 + $0x310] sm:$0xff]  ;;  %v2797_v31 = vld [vmem:[#allocation2 + $0x358] sm:$0xff] }
 0x4b1   :  { %3085 = vmatpush1.bf16.msra.mxu0 %v2858_v11  ;;  %v2949_v11 = vunpack.c.l.s8.bf16 %v2757_v28 }
 0x4b2   :  { %3167 = vmatpush1.bf16.msra.mxu1 %v2860_v41  ;;  %3086 = vmatprep.subr.bf16.mxu0 %v2867_v58  ;;  %v2754_v41 = vld [vmem:[#allocation2 + $0x200] sm:$0xff]  ;;  %v2756_v58 = vld [vmem:[#allocation2 + $0x210] sm:$0xff] }
 0x4b3   :  { %3168 = vmatprep.subr.bf16.mxu1 %v2869_v60  ;;  %v2946_v60 = vunpack.c.l.s8.bf16 %v2754_v41  ;;  %v2948_v55 = vunpack.c.l.s8.bf16 %v2756_v58  ;;  %v2954_v37 = vunpack.c.h.s8.bf16 %v2754_v41  ;;  %v2956_v49 = vunpack.c.h.s8.bf16 %v2756_v58  ;;  %v2796_v41 = vld [vmem:[#allocation2 + $0x350] sm:$0xff] }
 0x4b5   :  { %3087 = vmatpush1.bf16.msra.mxu0 %v2866_v40  ;;  %v2957_v40 = vunpack.c.h.s8.bf16 %v2757_v28 }
 0x4b6   :  { %3169 = vmatpush1.bf16.msra.mxu1 %v2868_v7  ;;  %3088 = vmatprep.subr.bf16.mxu0 %v2875_v53  ;;  %v2763_v7 = vld [vmem:[#allocation2 + $0x248] sm:$0xff]  ;;  %v2765_v53 = vld [vmem:[#allocation2 + $0x258] sm:$0xff] }
 0x4b7   :  { %3170 = vmatprep.subr.bf16.mxu1 %v2877_v22  ;;  %v10668_v22 = vld [vmem:[#allocation66_spill] sm:$0xff] }
 0x4b9   :  { %3089 = vmatpush1.bf16.msra.mxu0 %v2874_v25  ;;  %v2963_v25 = vunpack.c.l.s8.bf16 %v2763_v7 }
 0x4ba   :  { %3171 = vmatpush1.bf16.msra.mxu1 %v2876_v1  ;;  %3090 = vmatprep.subr.bf16.mxu0 %v2883_v19  ;;  %v2965_v1 = vunpack.c.l.s8.bf16 %v2765_v53  ;;  %v2762_v19 = vld [vmem:[#allocation2 + $0x240] sm:$0xff] }
 0x4bb   :  { %3172 = vmatprep.subr.bf16.mxu1 %v2885_v8  ;;  %v2764_v8 = vld [vmem:[#allocation2 + $0x250] sm:$0xff]  ;;  %v2962_v44 = vunpack.c.l.s8.bf16 %v2762_v19  ;;  %v2970_v21 = vunpack.c.h.s8.bf16 %v2762_v19 }
 0x4bc   :  { %v2804_v19 = vld [vmem:[#allocation2 + $0x390] sm:$0xff] }
 0x4bd   :  { %3091 = vmatpush1.bf16.msra.mxu0 %v2882_v13  ;;  %v2964_v13 = vunpack.c.l.s8.bf16 %v2764_v8 }
 0x4be   :  { %3173 = vmatpush1.bf16.msra.mxu1 %v2884_v10  ;;  %3092 = vmatprep.subr.bf16.mxu0 %v2891_v26  ;;  %v2971_v10 = vunpack.c.h.s8.bf16 %v2763_v7  ;;  %v2973_v26 = vunpack.c.h.s8.bf16 %v2765_v53  ;;  %v2805_v7 = vld [vmem:[#allocation2 + $0x398] sm:$0xff] }
 0x4bf   :  { %3174 = vmatprep.subr.bf16.mxu1 %v2893_v4  ;;  %v2771_v4 = vld [vmem:[#allocation2 + $0x288] sm:$0xff] }
 0x4c1   :  { %3093 = vmatpush1.bf16.msra.mxu0 %v2890_v43  ;;  %v2972_v43 = vunpack.c.h.s8.bf16 %v2764_v8 }
 0x4c2   :  { %3175 = vmatpush1.bf16.msra.mxu1 %v2892_v62  ;;  %3094 = vmatprep.subr.bf16.mxu0 %v2899_v17  ;;  %v2979_v62 = vunpack.c.l.s8.bf16 %v2771_v4  ;;  %v2981_v17 = vunpack.c.l.s8.bf16 %v2773_v18 }
 0x4c3   :  { %3176 = vmatprep.subr.bf16.mxu1 %v2901_v35  ;;  %v2770_v35 = vld [vmem:[#allocation2 + $0x280] sm:$0xff] }
 0x4c4   :  { %v2978_v38 = vunpack.c.l.s8.bf16 %v2770_v35  ;;  %v2986_v56 = vunpack.c.h.s8.bf16 %v2770_v35  ;;  %v2812_v35 = vld [vmem:[#allocation2 + $0x3d0] sm:$0xff] }
 0x4c5   :  { %3095 = vmatpush1.bf16.msra.mxu0 %v2898_v39  ;;  %v2980_v39 = vunpack.c.l.s8.bf16 %v2772_v15 }
 0x4c6   :  { %3177 = vmatpush1.bf16.msra.mxu1 %v2900_v47  ;;  %3096 = vmatprep.subr.bf16.mxu0 %v2907_v63  ;;  %v2987_v47 = vunpack.c.h.s8.bf16 %v2771_v4  ;;  %v2989_v63 = vunpack.c.h.s8.bf16 %v2773_v18  ;;  %v2813_v4 = vld [vmem:[#allocation2 + $0x3d8] sm:$0xff] }
 0x4c7   :  { %3178 = vmatprep.subr.bf16.mxu1 %v2909_v23  ;;  %v2779_v23 = vld [vmem:[#allocation2 + $0x2c8] sm:$0xff] }
 0x4c9   :  { %3097 = vmatpush1.bf16.msra.mxu0 %v2906_v32  ;;  %v2988_v32 = vunpack.c.h.s8.bf16 %v2772_v15 }
 0x4ca   :  { %3179 = vmatpush1.bf16.msra.mxu1 %v2908_v48  ;;  %3098 = vmatprep.subr.bf16.mxu0 %v2915_v24  ;;  %v2995_v48 = vunpack.c.l.s8.bf16 %v2779_v23  ;;  %v2997_v24 = vunpack.c.l.s8.bf16 %v2781_v0 }
 0x4cb   :  { %3180 = vmatprep.subr.bf16.mxu1 %v2917_v6  ;;  %v2778_v6 = vld [vmem:[#allocation2 + $0x2c0] sm:$0xff] }
 0x4cc   :  { %v2994_v30 = vunpack.c.l.s8.bf16 %v2778_v6  ;;  %v3002_v14 = vunpack.c.h.s8.bf16 %v2778_v6  ;;  %v9277_v6 = vld [vmem:[#allocation2 + $0x30] sm:$0xff] }
 0x4cd   :  { %3099 = vmatpush1.bf16.msra.mxu0 %v2914_v2  ;;  %v2996_v2 = vunpack.c.l.s8.bf16 %v2780_v61 }
 0x4ce   :  { %3181 = vmatpush1.bf16.msra.mxu1 %v2916_v54  ;;  %3100 = vmatprep.subr.bf16.mxu0 %v2923_v45  ;;  %v3003_v54 = vunpack.c.h.s8.bf16 %v2779_v23  ;;  %v3005_v45 = vunpack.c.h.s8.bf16 %v2781_v0  ;;  %v9271_v23 = vld [vmem:[#allocation2 + $0x38] sm:$0xff] }
 0x4cf   :  { %3182 = vmatprep.subr.bf16.mxu1 %v2925_v34  ;;  %v2787_v34 = vld [vmem:[#allocation2 + $0x308] sm:$0xff] }
 0x4d1   :  { %3101 = vmatpush1.bf16.msra.mxu0 %v2922_v57  ;;  %v3004_v57 = vunpack.c.h.s8.bf16 %v2780_v61 }
 0x4d2   :  { %3183 = vmatpush1.bf16.msra.mxu1 %v2924_v12  ;;  %3102 = vmatprep.subr.bf16.mxu0 %v2931_v5  ;;  %v3011_v12 = vunpack.c.l.s8.bf16 %v2787_v34  ;;  %v3013_v5 = vunpack.c.l.s8.bf16 %v2789_v3 }
 0x4d3   :  { %3184 = vmatprep.subr.bf16.mxu1 %v2933_v16  ;;  %v2786_v16 = vld [vmem:[#allocation2 + $0x300] sm:$0xff] }
 0x4d4   :  { %v3010_v51 = vunpack.c.l.s8.bf16 %v2786_v16  ;;  %v3018_v28 = vunpack.c.h.s8.bf16 %v2786_v16  ;;  %v9299_v16 = vld [vmem:[#allocation2 + $0xf8] sm:$0xff] }
 0x4d5   :  { %3103 = vmatpush1.bf16.msra.mxu0 %v2930_v33  ;;  %v3012_v33 = vunpack.c.l.s8.bf16 %v2788_v50 }
 0x4d6   :  { %3185 = vmatpush1.bf16.msra.mxu1 %v2932_v20  ;;  %3104 = vmatprep.subr.bf16.mxu0 %v2939_v52  ;;  %v3019_v20 = vunpack.c.h.s8.bf16 %v2787_v34  ;;  %v3021_v52 = vunpack.c.h.s8.bf16 %v2789_v3  ;;  %v9287_v34 = vld [vmem:[#allocation2 + $0x70] sm:$0xff]  ;;  %v9289_v3 = vld [vmem:[#allocation2 + $0xa8] sm:$0xff] }
 0x4d7   :  { %3186 = vmatprep.subr.bf16.mxu1 %v2941_v59  ;;  %v2795_v59 = vld [vmem:[#allocation2 + $0x348] sm:$0xff] }
 0x4d9   :  { %3105 = vmatpush1.bf16.msra.mxu0 %v2938_v42  ;;  %v3020_v42 = vunpack.c.h.s8.bf16 %v2788_v50  ;;  %v9301_v50 = vld [vmem:[#allocation2 + $0xe0] sm:$0xff] }
 0x4da   :  { %3187 = vmatpush1.bf16.msra.mxu1 %v2940_v46  ;;  %3115 = vmatprep.subr.bf16.mxu0 %v2947_v9  ;;  %v3027_v46 = vunpack.c.l.s8.bf16 %v2795_v59  ;;  %v3029_v9 = vunpack.c.l.s8.bf16 %v2797_v31 }
 0x4db   :  { %3197 = vmatprep.subr.bf16.mxu1 %v2949_v11  ;;  %v2794_v11 = vld [vmem:[#allocation2 + $0x340] sm:$0xff] }
 0x4dc   :  { %3107 = vmatmul.mubr.bf16.vlgmr.msra.gmra.mrb[20].mxu0 %v10668_v22  ;;  %v3026_v58 = vunpack.c.l.s8.bf16 %v2794_v11  ;;  %v3034_v53 = vunpack.c.h.s8.bf16 %v2794_v11  ;;  %v9323_v11 = vld [vmem:[#allocation2 + $0x1b8] sm:$0xff] }
 0x4dd   :  { %3189 = vmatmul.mubr.bf16.vlgmr.msra.gmra.mrb[28].mxu1 %v10668_v22  ;;  %3116 = vmatpush1.bf16.msra.mxu0 %v2946_v60  ;;  %v3028_v60 = vunpack.c.l.s8.bf16 %v2796_v41 }
 0x4de   :  { %3198 = vmatpush1.bf16.msra.mxu1 %v2948_v55  ;;  %3117 = vmatprep.subr.bf16.mxu0 %v2955_v29  ;;  %v3035_v55 = vunpack.c.h.s8.bf16 %v2795_v59  ;;  %v3037_v29 = vunpack.c.h.s8.bf16 %v2797_v31  ;;  %v9311_v59 = vld [vmem:[#allocation2 + $0x130] sm:$0xff]  ;;  %v9313_v31 = vld [vmem:[#allocation2 + $0x168] sm:$0xff] }
 0x4df   :  { %3199 = vmatprep.subr.bf16.mxu1 %v2957_v40  ;;  %3147 = vmatprep.mubr.bf16.mxu0 %v10669_v36  ;;  %v2803_v40 = vld [vmem:[#allocation2 + $0x388] sm:$0xff] }
 0x4e0   :  { %3229 = vmatprep.mubr.bf16.mxu1 %v10669_v36 }
 0x4e1   :  { %3118 = vmatpush1.bf16.msra.mxu0 %v2954_v37  ;;  %v3036_v37 = vunpack.c.h.s8.bf16 %v2796_v41  ;;  %v9325_v41 = vld [vmem:[#allocation2 + $0x1a0] sm:$0xff] }
 0x4e2   :  { %3200 = vmatpush1.bf16.msra.mxu1 %v2956_v49  ;;  %3119 = vmatprep.subr.bf16.mxu0 %v2963_v25  ;;  %v3043_v49 = vunpack.c.l.s8.bf16 %v2803_v40  ;;  %v3045_v25 = vunpack.c.l.s8.bf16 %v2805_v7 }
 0x4e3   :  { %3201 = vmatprep.subr.bf16.mxu1 %v2965_v1  ;;  %v2802_v1 = vld [vmem:[#allocation2 + $0x380] sm:$0xff] }
 0x4e4   :  { %v3042_v8 = vunpack.c.l.s8.bf16 %v2802_v1  ;;  %v3050_v18 = vunpack.c.h.s8.bf16 %v2802_v1  ;;  %v9347_v1 = vld [vmem:[#allocation2 + $0x278] sm:$0xff] }
 0x4e5   :  { %3120 = vmatpush1.bf16.msra.mxu0 %v2962_v44  ;;  %v3044_v44 = vunpack.c.l.s8.bf16 %v2804_v19 }
 0x4e6   :  { %3202 = vmatpush1.bf16.msra.mxu1 %v2964_v13  ;;  %3121 = vmatprep.subr.bf16.mxu0 %v2971_v10  ;;  %v3051_v13 = vunpack.c.h.s8.bf16 %v2803_v40  ;;  %v3053_v10 = vunpack.c.h.s8.bf16 %v2805_v7  ;;  %v9335_v40 = vld [vmem:[#allocation2 + $0x1f0] sm:$0xff]  ;;  %v9337_v7 = vld [vmem:[#allocation2 + $0x228] sm:$0xff] }
 0x4e7   :  { %3203 = vmatprep.subr.bf16.mxu1 %v2973_v26  ;;  %v2811_v26 = vld [vmem:[#allocation2 + $0x3c8] sm:$0xff] }
 0x4e9   :  { %3122 = vmatpush1.bf16.msra.mxu0 %v2970_v21  ;;  %v3052_v21 = vunpack.c.h.s8.bf16 %v2804_v19  ;;  %v9349_v19 = vld [vmem:[#allocation2 + $0x260] sm:$0xff] }
 0x4ea   :  { %3204 = vmatpush1.bf16.msra.mxu1 %v2972_v43  ;;  %3123 = vmatprep.subr.bf16.mxu0 %v2979_v62  ;;  %v3059_v43 = vunpack.c.l.s8.bf16 %v2811_v26  ;;  %v3061_v62 = vunpack.c.l.s8.bf16 %v2813_v4 }
 0x4eb   :  { %3205 = vmatprep.subr.bf16.mxu1 %v2981_v17  ;;  %v2810_v17 = vld [vmem:[#allocation2 + $0x3c0] sm:$0xff] }
 0x4ec   :  { %v3058_v15 = vunpack.c.l.s8.bf16 %v2810_v17  ;;  %v3066_v0 = vunpack.c.h.s8.bf16 %v2810_v17  ;;  %v9371_v17 = vld [vmem:[#allocation2 + $0x338] sm:$0xff] }
 0x4ed   :  { %3124 = vmatpush1.bf16.msra.mxu0 %v2978_v38  ;;  %v3060_v38 = vunpack.c.l.s8.bf16 %v2812_v35 }
 0x4ee   :  { %3206 = vmatpush1.bf16.msra.mxu1 %v2980_v39  ;;  %3125 = vmatprep.subr.bf16.mxu0 %v2987_v47  ;;  %v3067_v39 = vunpack.c.h.s8.bf16 %v2811_v26  ;;  %v3069_v47 = vunpack.c.h.s8.bf16 %v2813_v4  ;;  %v9359_v26 = vld [vmem:[#allocation2 + $0x2b0] sm:$0xff]  ;;  %v9361_v4 = vld [vmem:[#allocation2 + $0x2e8] sm:$0xff] }
 0x4ef   :  { %3207 = vmatprep.subr.bf16.mxu1 %v2989_v63  ;;  %v9269_v63 = vld [vmem:[#allocation2 + $0x28] sm:$0xff] }
 0x4f0   :  { %v2831_v61 = vunpack.c.h.s8.bf16 %v9269_v63 }
 0x4f1   :  { %3126 = vmatpush1.bf16.msra.mxu0 %v2986_v56  ;;  %v3068_v56 = vunpack.c.h.s8.bf16 %v2812_v35  ;;  %v9373_v35 = vld [vmem:[#allocation2 + $0x320] sm:$0xff] }
 0x4f2   :  { %3208 = vmatpush1.bf16.msra.mxu1 %v2988_v32  ;;  %3127 = vmatprep.subr.bf16.mxu0 %v2995_v48  ;;  %v2823_v32 = vunpack.c.l.s8.bf16 %v9269_v63  ;;  %v2825_v48 = vunpack.c.l.s8.bf16 %v9271_v23 }
 0x4f3   :  { %3209 = vmatprep.subr.bf16.mxu1 %v2997_v24  ;;  %v9275_v24 = vld [vmem:[#allocation2 + $0x20] sm:$0xff] }
 0x4f5   :  { %3128 = vmatpush1.bf16.msra.mxu0 %v2994_v30  ;;  %v9387_v30 = vld [vmem:[#allocation2 + $0x3b8] sm:$0xff] }
 0x4f6   :  { %3210 = vmatpush1.bf16.msra.mxu1 %v2996_v2  ;;  %3129 = vmatprep.subr.bf16.mxu0 %v3003_v54  ;;  %v9281_v2 = vld [vmem:[#allocation2 + $0x68] sm:$0xff]  ;;  %v9283_v54 = vld [vmem:[#allocation2 + $0x78] sm:$0xff]  ;;  %10676 = vst [vmem:[#allocation90_spill] sm:$0xff] %v9387_v30  ;;  %v9401_v30 = vld [vmem:[#allocation2 + $0x3f0] sm:$0xff] }
 0x4f7   :  { %3211 = vmatprep.subr.bf16.mxu1 %v3005_v45  ;;  %v9285_v45 = vld [vmem:[#allocation2 + $0x60] sm:$0xff]  ;;  %10678 = vst [vmem:[#allocation99_spill] sm:$0xff] %v9401_v30 }
 0x4f9   :  { %3130 = vmatpush1.bf16.msra.mxu0 %v3002_v14  ;;  %v9291_v14 = vld [vmem:[#allocation2 + $0xb8] sm:$0xff] }
 0x4fa   :  { %3212 = vmatpush1.bf16.msra.mxu1 %v3004_v57  ;;  %3131 = vmatprep.subr.bf16.mxu0 %v3011_v12  ;;  %v9293_v57 = vld [vmem:[#allocation2 + $0xa0] sm:$0xff]  ;;  %v9295_v12 = vld [vmem:[#allocation2 + $0xb0] sm:$0xff] }
 0x4fb   :  { %3213 = vmatprep.subr.bf16.mxu1 %v3013_v5  ;;  %v9297_v5 = vld [vmem:[#allocation2 + $0xe8] sm:$0xff] }
 0x4fd   :  { %3132 = vmatpush1.bf16.msra.mxu0 %v3010_v51  ;;  %v9303_v51 = vld [vmem:[#allocation2 + $0xf0] sm:$0xff] }
 0x4fe   :  { %3214 = vmatpush1.bf16.msra.mxu1 %v3012_v33  ;;  %3133 = vmatprep.subr.bf16.mxu0 %v3019_v20  ;;  %v9305_v33 = vld [vmem:[#allocation2 + $0x128] sm:$0xff]  ;;  %v9307_v20 = vld [vmem:[#allocation2 + $0x138] sm:$0xff] }
 0x4ff   :  { %3215 = vmatprep.subr.bf16.mxu1 %v3021_v52  ;;  %v9309_v52 = vld [vmem:[#allocation2 + $0x120] sm:$0xff] }
 0x501   :  { %3134 = vmatpush1.bf16.msra.mxu0 %v3018_v28  ;;  %v9315_v28 = vld [vmem:[#allocation2 + $0x178] sm:$0xff] }
 0x502   :  { %3216 = vmatpush1.bf16.msra.mxu1 %v3020_v42  ;;  %3135 = vmatprep.subr.bf16.mxu0 %v3027_v46  ;;  %v9317_v42 = vld [vmem:[#allocation2 + $0x160] sm:$0xff]  ;;  %v9319_v46 = vld [vmem:[#allocation2 + $0x170] sm:$0xff] }
 0x503   :  { %3217 = vmatprep.subr.bf16.mxu1 %v3029_v9  ;;  %v9321_v9 = vld [vmem:[#allocation2 + $0x1a8] sm:$0xff] }
 0x505   :  { %3136 = vmatpush1.bf16.msra.mxu0 %v3026_v58  ;;  %v9327_v58 = vld [vmem:[#allocation2 + $0x1b0] sm:$0xff] }
 0x506   :  { %3218 = vmatpush1.bf16.msra.mxu1 %v3028_v60  ;;  %3137 = vmatprep.subr.bf16.mxu0 %v3035_v55  ;;  %v9329_v60 = vld [vmem:[#allocation2 + $0x1e8] sm:$0xff]  ;;  %v9331_v55 = vld [vmem:[#allocation2 + $0x1f8] sm:$0xff] }
 0x507   :  { %3219 = vmatprep.subr.bf16.mxu1 %v3037_v29  ;;  %v9333_v29 = vld [vmem:[#allocation2 + $0x1e0] sm:$0xff] }
 0x509   :  { %3138 = vmatpush1.bf16.msra.mxu0 %v3034_v53  ;;  %v9339_v53 = vld [vmem:[#allocation2 + $0x238] sm:$0xff] }
 0x50a   :  { %3220 = vmatpush1.bf16.msra.mxu1 %v3036_v37  ;;  %3139 = vmatprep.subr.bf16.mxu0 %v3043_v49  ;;  %v9341_v37 = vld [vmem:[#allocation2 + $0x220] sm:$0xff]  ;;  %v9343_v49 = vld [vmem:[#allocation2 + $0x230] sm:$0xff] }
 0x50b   :  { %3221 = vmatprep.subr.bf16.mxu1 %v3045_v25  ;;  %v9345_v25 = vld [vmem:[#allocation2 + $0x268] sm:$0xff] }
 0x50d   :  { %3140 = vmatpush1.bf16.msra.mxu0 %v3042_v8  ;;  %v9351_v8 = vld [vmem:[#allocation2 + $0x270] sm:$0xff] }
 0x50e   :  { %3222 = vmatpush1.bf16.msra.mxu1 %v3044_v44  ;;  %3141 = vmatprep.subr.bf16.mxu0 %v3051_v13  ;;  %v9353_v44 = vld [vmem:[#allocation2 + $0x2a8] sm:$0xff]  ;;  %v9355_v13 = vld [vmem:[#allocation2 + $0x2b8] sm:$0xff] }
 0x50f   :  { %3223 = vmatprep.subr.bf16.mxu1 %v3053_v10  ;;  %v9357_v10 = vld [vmem:[#allocation2 + $0x2a0] sm:$0xff] }
 0x511   :  { %3142 = vmatpush1.bf16.msra.mxu0 %v3050_v18  ;;  %v9363_v18 = vld [vmem:[#allocation2 + $0x2f8] sm:$0xff] }
 0x512   :  { %3224 = vmatpush1.bf16.msra.mxu1 %v3052_v21  ;;  %3143 = vmatprep.subr.bf16.mxu0 %v3059_v43  ;;  %v9365_v21 = vld [vmem:[#allocation2 + $0x2e0] sm:$0xff]  ;;  %v9367_v43 = vld [vmem:[#allocation2 + $0x2f0] sm:$0xff] }
 0x513   :  { %3225 = vmatprep.subr.bf16.mxu1 %v3061_v62  ;;  %v9369_v62 = vld [vmem:[#allocation2 + $0x328] sm:$0xff] }
 0x515   :  { %3144 = vmatpush1.bf16.msra.mxu0 %v3058_v15  ;;  %v9375_v15 = vld [vmem:[#allocation2 + $0x330] sm:$0xff] }
 0x516   :  { %3226 = vmatpush1.bf16.msra.mxu1 %v3060_v38  ;;  %3145 = vmatprep.subr.bf16.mxu0 %v3067_v39  ;;  %10670 = vst [vmem:[#allocation82_spill] sm:$0xff] %v9375_v15  ;;  %v9377_v38 = vld [vmem:[#allocation2 + $0x368] sm:$0xff]  ;;  %v9379_v39 = vld [vmem:[#allocation2 + $0x378] sm:$0xff] }
 0x517   :  { %3227 = vmatprep.subr.bf16.mxu1 %v3069_v47  ;;  %10671 = vst [vmem:[#allocation83_spill] sm:$0xff] %v9377_v38  ;;  %10672 = vst [vmem:[#allocation59_spill] sm:$0xff] %v9379_v39  ;;  %v9381_v47 = vld [vmem:[#allocation2 + $0x360] sm:$0xff]  ;;  %v2833_v38 = vunpack.c.h.s8.bf16 %v9271_v23  ;;  %v9397_v15 = vld [vmem:[#allocation2 + $0x3f8] sm:$0xff] }
 0x518   :  { %10673 = vst [vmem:[#allocation89_spill] sm:$0xff] %v9381_v47  ;;  %v9391_v39 = vld [vmem:[#allocation2 + $0x3a0] sm:$0xff]  ;;  %v9393_v47 = vld [vmem:[#allocation2 + $0x3b0] sm:$0xff] }
 0x519   :  { %3146 = vmatpush1.bf16.msra.mxu0 %v3066_v0  ;;  %v9383_v0 = vld [vmem:[#allocation2 + $0x370] sm:$0xff] }
 0x51a   :  { %3228 = vmatpush1.bf16.msra.mxu1 %v3068_v56  ;;  %10674 = vst [vmem:[#allocation91_spill] sm:$0xff] %v9383_v0  ;;  %v9385_v56 = vld [vmem:[#allocation2 + $0x3a8] sm:$0xff]  ;;  %3238 = vmatprep.subr.bf16.mxu0 %v2823_v32  ;;  %v10679_v32 = vld [vmem:[#allocation70_spill] sm:$0xff] }
 0x51b   :  { %10675 = vst [vmem:[#allocation88_spill] sm:$0xff] %v9385_v56  ;;  %3320 = vmatprep.subr.bf16.mxu1 %v2825_v48  ;;  %v9395_v0 = vld [vmem:[#allocation2 + $0x3e8] sm:$0xff]  ;;  %v9399_v56 = vld [vmem:[#allocation2 + $0x3e0] sm:$0xff] }
 0x51c   :  { %10677 = vst [vmem:[#allocation97_spill] sm:$0xff] %v9399_v56  ;;  %3148 = vmatmul.mubr.bf16.vlgmr.msra.gmra.mrb[20].mxu0 %v10679_v32 }
 0x51d   :  { %3230 = vmatmul.mubr.bf16.vlgmr.msra.gmra.mrb[28].mxu1 %v10679_v32 }
 0x51e   :  { %7535 = shalt.err (!%p7532_p3)  }
 0x51f   :  { %7547 = shalt.err (!%p7947_p9)  }
 0x520   :  { %3421 = dma.hbm_to_vmem [thread:$0]  %s8987_s8, 16384, %s7915_s9, [#allocation3]  ;;  %v10680_v63 = vunpack.c.l.s8.bf16 %v9275_v24  ;;  %v10681_v23 = vunpack.c.l.s8.bf16 %v9277_v6  ;;  %v2830_v48 = vunpack.c.h.s8.bf16 %v9275_v24  ;;  %v2832_v32 = vunpack.c.h.s8.bf16 %v9277_v6  ;;  %3270 = vmatprep.mubr.bf16.mxu0 %v10667_v27  ;;  %3352 = vmatprep.mubr.bf16.mxu1 %v10667_v27 }
 0x521   :  { %v2839_v30 = vunpack.c.l.s8.bf16 %v9281_v2  ;;  %v2841_v56 = vunpack.c.l.s8.bf16 %v9283_v54  ;;  %v2847_v24 = vunpack.c.h.s8.bf16 %v9281_v2  ;;  %v2849_v6 = vunpack.c.h.s8.bf16 %v9283_v54 }
 0x522   :  { %3239 = vmatpush1.bf16.msra.mxu0 %v10680_v63  ;;  %3321 = vmatpush1.bf16.msra.mxu1 %v10681_v23  ;;  %v2838_v63 = vunpack.c.l.s8.bf16 %v9285_v45  ;;  %v2840_v23 = vunpack.c.l.s8.bf16 %v9287_v34  ;;  %v2855_v27 = vunpack.c.l.s8.bf16 %v9289_v3  ;;  %v2856_v2 = vunpack.c.l.s8.bf16 %v9295_v12 }
 0x523   :  { %3240 = vmatprep.subr.bf16.mxu0 %v2831_v61  ;;  %3322 = vmatprep.subr.bf16.mxu1 %v2833_v38  ;;  %v2846_v61 = vunpack.c.h.s8.bf16 %v9285_v45  ;;  %v2848_v38 = vunpack.c.h.s8.bf16 %v9287_v34  ;;  %v2863_v54 = vunpack.c.h.s8.bf16 %v9289_v3  ;;  %v2865_v45 = vunpack.c.h.s8.bf16 %v9291_v14 }
 0x524   :  { %v2862_v34 = vunpack.c.h.s8.bf16 %v9293_v57  ;;  %v2872_v3 = vunpack.c.l.s8.bf16 %v9303_v51 }
 0x526   :  { %3241 = vmatpush1.bf16.msra.mxu0 %v2830_v48  ;;  %3323 = vmatpush1.bf16.msra.mxu1 %v2832_v32  ;;  %v2857_v32 = vunpack.c.l.s8.bf16 %v9291_v14  ;;  %v2871_v48 = vunpack.c.l.s8.bf16 %v9297_v5  ;;  %v2879_v14 = vunpack.c.h.s8.bf16 %v9297_v5  ;;  %v2888_v5 = vunpack.c.l.s8.bf16 %v9311_v59 }
 0x527   :  { %3242 = vmatprep.subr.bf16.mxu0 %v2839_v30  ;;  %3324 = vmatprep.subr.bf16.mxu1 %v2841_v56  ;;  %v2854_v30 = vunpack.c.l.s8.bf16 %v9293_v57  ;;  %v2864_v56 = vunpack.c.h.s8.bf16 %v9295_v12  ;;  %v2881_v57 = vunpack.c.h.s8.bf16 %v9299_v16  ;;  %v2878_v12 = vunpack.c.h.s8.bf16 %v9301_v50 }
 0x52a   :  { %3243 = vmatpush1.bf16.msra.mxu0 %v2838_v63  ;;  %3325 = vmatpush1.bf16.msra.mxu1 %v2840_v23  ;;  %v2873_v63 = vunpack.c.l.s8.bf16 %v9299_v16  ;;  %v2870_v23 = vunpack.c.l.s8.bf16 %v9301_v50  ;;  %v2895_v16 = vunpack.c.h.s8.bf16 %v9305_v33  ;;  %v2897_v50 = vunpack.c.h.s8.bf16 %v9307_v20 }
 0x52b   :  { %3244 = vmatprep.subr.bf16.mxu0 %v2847_v24  ;;  %3326 = vmatprep.subr.bf16.mxu1 %v2849_v6  ;;  %v2880_v24 = vunpack.c.h.s8.bf16 %v9303_v51  ;;  %v2887_v6 = vunpack.c.l.s8.bf16 %v9305_v33  ;;  %v2894_v51 = vunpack.c.h.s8.bf16 %v9309_v52  ;;  %v2904_v33 = vunpack.c.l.s8.bf16 %v9319_v46 }
 0x52e   :  { %3245 = vmatpush1.bf16.msra.mxu0 %v2846_v61  ;;  %3327 = vmatpush1.bf16.msra.mxu1 %v2848_v38  ;;  %v2889_v61 = vunpack.c.l.s8.bf16 %v9307_v20  ;;  %v2886_v38 = vunpack.c.l.s8.bf16 %v9309_v52  ;;  %v2911_v20 = vunpack.c.h.s8.bf16 %v9313_v31  ;;  %v2913_v52 = vunpack.c.h.s8.bf16 %v9315_v28 }
 0x52f   :  { %3246 = vmatprep.subr.bf16.mxu0 %v2855_v27  ;;  %3328 = vmatprep.subr.bf16.mxu1 %v2857_v32  ;;  %v2896_v27 = vunpack.c.h.s8.bf16 %v9311_v59  ;;  %v2903_v32 = vunpack.c.l.s8.bf16 %v9313_v31  ;;  %v2910_v59 = vunpack.c.h.s8.bf16 %v9317_v42  ;;  %v2920_v31 = vunpack.c.l.s8.bf16 %v9327_v58 }
 0x532   :  { %3247 = vmatpush1.bf16.msra.mxu0 %v2854_v30  ;;  %3329 = vmatpush1.bf16.msra.mxu1 %v2856_v2  ;;  %v2905_v30 = vunpack.c.l.s8.bf16 %v9315_v28  ;;  %v2902_v2 = vunpack.c.l.s8.bf16 %v9317_v42  ;;  %v2927_v28 = vunpack.c.h.s8.bf16 %v9321_v9  ;;  %v2929_v42 = vunpack.c.h.s8.bf16 %v9323_v11 }
 0x533   :  { %3248 = vmatprep.subr.bf16.mxu0 %v2863_v54  ;;  %3330 = vmatprep.subr.bf16.mxu1 %v2865_v45  ;;  %v2912_v54 = vunpack.c.h.s8.bf16 %v9319_v46  ;;  %v2919_v45 = vunpack.c.l.s8.bf16 %v9321_v9  ;;  %v2926_v46 = vunpack.c.h.s8.bf16 %v9325_v41  ;;  %v2936_v9 = vunpack.c.l.s8.bf16 %v9335_v40 }
 0x536   :  { %3249 = vmatpush1.bf16.msra.mxu0 %v2862_v34  ;;  %3331 = vmatpush1.bf16.msra.mxu1 %v2864_v56  ;;  %v2921_v34 = vunpack.c.l.s8.bf16 %v9323_v11  ;;  %v2918_v56 = vunpack.c.l.s8.bf16 %v9325_v41  ;;  %v2943_v11 = vunpack.c.h.s8.bf16 %v9329_v60  ;;  %v2945_v41 = vunpack.c.h.s8.bf16 %v9331_v55 }
 0x537   :  { %3250 = vmatprep.subr.bf16.mxu0 %v2871_v48  ;;  %3332 = vmatprep.subr.bf16.mxu1 %v2873_v63  ;;  %v2928_v48 = vunpack.c.h.s8.bf16 %v9327_v58  ;;  %v2935_v63 = vunpack.c.l.s8.bf16 %v9329_v60  ;;  %v2942_v58 = vunpack.c.h.s8.bf16 %v9333_v29  ;;  %v2952_v60 = vunpack.c.l.s8.bf16 %v9343_v49 }
 0x53a   :  { %3251 = vmatpush1.bf16.msra.mxu0 %v2870_v23  ;;  %3333 = vmatpush1.bf16.msra.mxu1 %v2872_v3  ;;  %v2937_v23 = vunpack.c.l.s8.bf16 %v9331_v55  ;;  %v2934_v3 = vunpack.c.l.s8.bf16 %v9333_v29  ;;  %v2959_v55 = vunpack.c.h.s8.bf16 %v9337_v7  ;;  %v2961_v29 = vunpack.c.h.s8.bf16 %v9339_v53 }
 0x53b   :  { %3252 = vmatprep.subr.bf16.mxu0 %v2879_v14  ;;  %3334 = vmatprep.subr.bf16.mxu1 %v2881_v57  ;;  %v2944_v14 = vunpack.c.h.s8.bf16 %v9335_v40  ;;  %v2951_v57 = vunpack.c.l.s8.bf16 %v9337_v7  ;;  %v2958_v40 = vunpack.c.h.s8.bf16 %v9341_v37  ;;  %v2968_v7 = vunpack.c.l.s8.bf16 %v9351_v8 }
 0x53e   :  { %3253 = vmatpush1.bf16.msra.mxu0 %v2878_v12  ;;  %3335 = vmatpush1.bf16.msra.mxu1 %v2880_v24  ;;  %v2953_v12 = vunpack.c.l.s8.bf16 %v9339_v53  ;;  %v2950_v24 = vunpack.c.l.s8.bf16 %v9341_v37  ;;  %v2975_v53 = vunpack.c.h.s8.bf16 %v9345_v25  ;;  %v2977_v37 = vunpack.c.h.s8.bf16 %v9347_v1 }
 0x53f   :  { %3254 = vmatprep.subr.bf16.mxu0 %v2887_v6  ;;  %3336 = vmatprep.subr.bf16.mxu1 %v2889_v61  ;;  %v2960_v6 = vunpack.c.h.s8.bf16 %v9343_v49  ;;  %v2967_v61 = vunpack.c.l.s8.bf16 %v9345_v25  ;;  %v2974_v49 = vunpack.c.h.s8.bf16 %v9349_v19  ;;  %v2984_v25 = vunpack.c.l.s8.bf16 %v9359_v26 }
 0x542   :  { %3255 = vmatpush1.bf16.msra.mxu0 %v2886_v38  ;;  %3337 = vmatpush1.bf16.msra.mxu1 %v2888_v5  ;;  %v2969_v38 = vunpack.c.l.s8.bf16 %v9347_v1  ;;  %v2976_v5 = vunpack.c.h.s8.bf16 %v9351_v8  ;;  %v2991_v1 = vunpack.c.h.s8.bf16 %v9353_v44  ;;  %v2990_v8 = vunpack.c.h.s8.bf16 %v9357_v10 }
 0x543   :  { %3256 = vmatprep.subr.bf16.mxu0 %v2895_v16  ;;  %3338 = vmatprep.subr.bf16.mxu1 %v2897_v50  ;;  %v2985_v16 = vunpack.c.l.s8.bf16 %v9355_v13  ;;  %v2982_v50 = vunpack.c.l.s8.bf16 %v9357_v10  ;;  %v3009_v10 = vunpack.c.h.s8.bf16 %v9363_v18 }
 0x546   :  { %3257 = vmatpush1.bf16.msra.mxu0 %v2894_v51  ;;  %3339 = vmatpush1.bf16.msra.mxu1 %v2896_v27  ;;  %v2992_v51 = vunpack.c.h.s8.bf16 %v9359_v26  ;;  %v2999_v27 = vunpack.c.l.s8.bf16 %v9361_v4  ;;  %v3006_v26 = vunpack.c.h.s8.bf16 %v9365_v21 }
 0x547   :  { %3258 = vmatprep.subr.bf16.mxu0 %v2903_v32  ;;  %3340 = vmatprep.subr.bf16.mxu1 %v2905_v30  ;;  %v3001_v32 = vunpack.c.l.s8.bf16 %v9363_v18  ;;  %v2998_v30 = vunpack.c.l.s8.bf16 %v9365_v21  ;;  %v3023_v18 = vunpack.c.h.s8.bf16 %v9369_v62  ;;  %v3025_v21 = vunpack.c.h.s8.bf16 %v9371_v17 }
 0x54a   :  { %3259 = vmatpush1.bf16.msra.mxu0 %v2902_v2  ;;  %3341 = vmatpush1.bf16.msra.mxu1 %v2904_v33  ;;  %v3008_v2 = vunpack.c.h.s8.bf16 %v9367_v43  ;;  %v3015_v33 = vunpack.c.l.s8.bf16 %v9369_v62 }
 0x54b   :  { %3260 = vmatprep.subr.bf16.mxu0 %v2911_v20  ;;  %3342 = vmatprep.subr.bf16.mxu1 %v2913_v52  ;;  %v3017_v20 = vunpack.c.l.s8.bf16 %v9371_v17  ;;  %v3014_v52 = vunpack.c.l.s8.bf16 %v9373_v35 }
 0x54e   :  { %3261 = vmatpush1.bf16.msra.mxu0 %v2910_v59  ;;  %3343 = vmatpush1.bf16.msra.mxu1 %v2912_v54  ;;  %v10682_v59 = vld [vmem:[#allocation82_spill] sm:$0xff] }
 0x54f   :  { %3262 = vmatprep.subr.bf16.mxu0 %v2919_v45  ;;  %3344 = vmatprep.subr.bf16.mxu1 %v2921_v34  ;;  %v3024_v54 = vunpack.c.h.s8.bf16 %v10682_v59  ;;  %v10683_v45 = vld [vmem:[#allocation83_spill] sm:$0xff] }
 0x550   :  { %v3031_v34 = vunpack.c.l.s8.bf16 %v10683_v45  ;;  %v3039_v17 = vunpack.c.h.s8.bf16 %v10683_v45 }
 0x552   :  { %3263 = vmatpush1.bf16.msra.mxu0 %v2918_v56  ;;  %3345 = vmatpush1.bf16.msra.mxu1 %v2920_v31  ;;  %v10684_v56 = vld [vmem:[#allocation59_spill] sm:$0xff] }
 0x553   :  { %3264 = vmatprep.subr.bf16.mxu0 %v2927_v28  ;;  %3346 = vmatprep.subr.bf16.mxu1 %v2929_v42  ;;  %v3033_v31 = vunpack.c.l.s8.bf16 %v10684_v56  ;;  %v10685_v28 = vld [vmem:[#allocation89_spill] sm:$0xff] }
 0x554   :  { %v3030_v42 = vunpack.c.l.s8.bf16 %v10685_v28 }
 0x556   :  { %3265 = vmatpush1.bf16.msra.mxu0 %v2926_v46  ;;  %3347 = vmatpush1.bf16.msra.mxu1 %v2928_v48  ;;  %v10686_v46 = vld [vmem:[#allocation91_spill] sm:$0xff]  ;;  %v3038_v48 = vunpack.c.h.s8.bf16 %v10685_v28 }
 0x557   :  { %3266 = vmatprep.subr.bf16.mxu0 %v2935_v63  ;;  %3348 = vmatprep.subr.bf16.mxu1 %v2937_v23  ;;  %v3032_v62 = vunpack.c.l.s8.bf16 %v10686_v46  ;;  %v3040_v63 = vunpack.c.h.s8.bf16 %v10686_v46  ;;  %v10687_v23 = vld [vmem:[#allocation88_spill] sm:$0xff] }
 0x55a   :  { %3267 = vmatpush1.bf16.msra.mxu0 %v2934_v3  ;;  %3349 = vmatpush1.bf16.msra.mxu1 %v2936_v9  ;;  %v3047_v3 = vunpack.c.l.s8.bf16 %v10687_v23  ;;  %v10688_v9 = vld [vmem:[#allocation90_spill] sm:$0xff] }
 0x55b   :  { %3268 = vmatprep.subr.bf16.mxu0 %v2943_v11  ;;  %3350 = vmatprep.subr.bf16.mxu1 %v2945_v41  ;;  %v3049_v11 = vunpack.c.l.s8.bf16 %v10688_v9  ;;  %v3046_v41 = vunpack.c.l.s8.bf16 %v9391_v39 }
 0x55e   :  { %3269 = vmatpush1.bf16.msra.mxu0 %v2942_v58  ;;  %3351 = vmatpush1.bf16.msra.mxu1 %v2944_v14  ;;  %v3048_v58 = vunpack.c.l.s8.bf16 %v9393_v47  ;;  %v3055_v14 = vunpack.c.h.s8.bf16 %v10687_v23 }
 0x55f   :  { %3279 = vmatprep.subr.bf16.mxu0 %v2951_v57  ;;  %3361 = vmatprep.subr.bf16.mxu1 %v2953_v12  ;;  %v3057_v57 = vunpack.c.h.s8.bf16 %v10688_v9  ;;  %v3054_v12 = vunpack.c.h.s8.bf16 %v9391_v39  ;;  %v3073_v39 = vunpack.c.h.s8.bf16 %v9397_v15 }
 0x561   :  { %3271 = vmatmul.mubr.bf16.vlgmr.msra.gmra.mrb[24].mxu0 %v10668_v22  ;;  %3353 = vmatmul.mubr.bf16.vlgmr.msra.gmra.mrb[32].mxu1 %v10668_v22  ;;  %v2966_v22 = vunpack.c.l.s8.bf16 %v9349_v19  ;;  %v2993_v19 = vunpack.c.h.s8.bf16 %v9355_v13  ;;  %v3007_v13 = vunpack.c.h.s8.bf16 %v9361_v4  ;;  %v3016_v4 = vunpack.c.l.s8.bf16 %v10682_v59 }
 0x562   :  { %3280 = vmatpush1.bf16.msra.mxu0 %v2950_v24  ;;  %3362 = vmatpush1.bf16.msra.mxu1 %v2952_v60  ;;  %v3056_v24 = vunpack.c.h.s8.bf16 %v9393_v47  ;;  %v3063_v60 = vunpack.c.l.s8.bf16 %v9395_v0 }
 0x563   :  { %3281 = vmatprep.subr.bf16.mxu0 %v2959_v55  ;;  %3363 = vmatprep.subr.bf16.mxu1 %v2961_v29  ;;  %v3065_v55 = vunpack.c.l.s8.bf16 %v9397_v15  ;;  %v10689_v29 = vld [vmem:[#allocation97_spill] sm:$0xff] }
 0x564   :  { %3311 = vmatprep.mubr.bf16.mxu0 %v10669_v36  ;;  %3393 = vmatprep.mubr.bf16.mxu1 %v10669_v36  ;;  %v2983_v36 = vunpack.c.l.s8.bf16 %v9353_v44  ;;  %v3000_v44 = vunpack.c.l.s8.bf16 %v9367_v43  ;;  %v3022_v43 = vunpack.c.h.s8.bf16 %v9373_v35  ;;  %v3041_v35 = vunpack.c.h.s8.bf16 %v10684_v56 }
 0x565   :  { %v3070_v47 = vunpack.c.h.s8.bf16 %v10689_v29 }
 0x566   :  { %3282 = vmatpush1.bf16.msra.mxu0 %v2958_v40  ;;  %3364 = vmatpush1.bf16.msra.mxu1 %v2960_v6  ;;  %v3062_v40 = vunpack.c.l.s8.bf16 %v10689_v29  ;;  %v10690_v6 = vld [vmem:[#allocation99_spill] sm:$0xff] }
 0x567   :  { %3283 = vmatprep.subr.bf16.mxu0 %v2967_v61  ;;  %3365 = vmatprep.subr.bf16.mxu1 %v2969_v38  ;;  %v3064_v61 = vunpack.c.l.s8.bf16 %v10690_v6  ;;  %v3071_v38 = vunpack.c.h.s8.bf16 %v9395_v0 }
 0x56a   :  { %3284 = vmatpush1.bf16.msra.mxu0 %v2966_v22  ;;  %3366 = vmatpush1.bf16.msra.mxu1 %v2968_v7  ;;  %v3072_v22 = vunpack.c.h.s8.bf16 %v10690_v6  ;;  %v10691_v7 = vld [vmem:[#allocation70_spill] sm:$0xff] }
 0x56b   :  { %3285 = vmatprep.subr.bf16.mxu0 %v2975_v53  ;;  %3367 = vmatprep.subr.bf16.mxu1 %v2977_v37 }
 0x56e   :  { %3286 = vmatpush1.bf16.msra.mxu0 %v2974_v49  ;;  %3368 = vmatpush1.bf16.msra.mxu1 %v2976_v5 }
 0x56f   :  { %3287 = vmatprep.subr.bf16.mxu0 %v2983_v36  ;;  %3369 = vmatprep.subr.bf16.mxu1 %v2985_v16 }
 0x572   :  { %3288 = vmatpush1.bf16.msra.mxu0 %v2982_v50  ;;  %3370 = vmatpush1.bf16.msra.mxu1 %v2984_v25 }
 0x573   :  { %3289 = vmatprep.subr.bf16.mxu0 %v2991_v1  ;;  %3371 = vmatprep.subr.bf16.mxu1 %v2993_v19 }
 0x576   :  { %3290 = vmatpush1.bf16.msra.mxu0 %v2990_v8  ;;  %3372 = vmatpush1.bf16.msra.mxu1 %v2992_v51 }
 0x577   :  { %3291 = vmatprep.subr.bf16.mxu0 %v2999_v27  ;;  %3373 = vmatprep.subr.bf16.mxu1 %v3001_v32 }
 0x57a   :  { %3292 = vmatpush1.bf16.msra.mxu0 %v2998_v30  ;;  %3374 = vmatpush1.bf16.msra.mxu1 %v3000_v44 }
 0x57b   :  { %3293 = vmatprep.subr.bf16.mxu0 %v3007_v13  ;;  %3375 = vmatprep.subr.bf16.mxu1 %v3009_v10 }
 0x57e   :  { %3294 = vmatpush1.bf16.msra.mxu0 %v3006_v26  ;;  %3376 = vmatpush1.bf16.msra.mxu1 %v3008_v2 }
 0x57f   :  { %3295 = vmatprep.subr.bf16.mxu0 %v3015_v33  ;;  %3377 = vmatprep.subr.bf16.mxu1 %v3017_v20 }
 0x582   :  { %3296 = vmatpush1.bf16.msra.mxu0 %v3014_v52  ;;  %3378 = vmatpush1.bf16.msra.mxu1 %v3016_v4 }
 0x583   :  { %3297 = vmatprep.subr.bf16.mxu0 %v3023_v18  ;;  %3379 = vmatprep.subr.bf16.mxu1 %v3025_v21 }
 0x586   :  { %3298 = vmatpush1.bf16.msra.mxu0 %v3022_v43  ;;  %3380 = vmatpush1.bf16.msra.mxu1 %v3024_v54 }
 0x587   :  { %3299 = vmatprep.subr.bf16.mxu0 %v3031_v34  ;;  %3381 = vmatprep.subr.bf16.mxu1 %v3033_v31 }
 0x58a   :  { %3300 = vmatpush1.bf16.msra.mxu0 %v3030_v42  ;;  %3382 = vmatpush1.bf16.msra.mxu1 %v3032_v62 }
 0x58b   :  { %3301 = vmatprep.subr.bf16.mxu0 %v3039_v17  ;;  %3383 = vmatprep.subr.bf16.mxu1 %v3041_v35 }
 0x58e   :  { %3302 = vmatpush1.bf16.msra.mxu0 %v3038_v48  ;;  %3384 = vmatpush1.bf16.msra.mxu1 %v3040_v63 }
 0x58f   :  { %3303 = vmatprep.subr.bf16.mxu0 %v3047_v3  ;;  %3385 = vmatprep.subr.bf16.mxu1 %v3049_v11 }
 0x592   :  { %3304 = vmatpush1.bf16.msra.mxu0 %v3046_v41  ;;  %3386 = vmatpush1.bf16.msra.mxu1 %v3048_v58 }
 0x593   :  { %3305 = vmatprep.subr.bf16.mxu0 %v3055_v14  ;;  %3387 = vmatprep.subr.bf16.mxu1 %v3057_v57 }
 0x596   :  { %3306 = vmatpush1.bf16.msra.mxu0 %v3054_v12  ;;  %3388 = vmatpush1.bf16.msra.mxu1 %v3056_v24 }
 0x597   :  { %3307 = vmatprep.subr.bf16.mxu0 %v3063_v60  ;;  %3389 = vmatprep.subr.bf16.mxu1 %v3065_v55 }
 0x59a   :  { %3308 = vmatpush1.bf16.msra.mxu0 %v3062_v40  ;;  %3390 = vmatpush1.bf16.msra.mxu1 %v3064_v61 }
 0x59b   :  { %3309 = vmatprep.subr.bf16.mxu0 %v3071_v38  ;;  %3391 = vmatprep.subr.bf16.mxu1 %v3073_v39 }
 0x59e   :  { %3310 = vmatpush1.bf16.msra.mxu0 %v3070_v47  ;;  %3392 = vmatpush1.bf16.msra.mxu1 %v3072_v22 }
 0x5a1   :  { %3312 = vmatmul.mubr.bf16.vlgmr.msra.gmra.mrb[24].mxu0 %v10691_v7  ;;  %3394 = vmatmul.mubr.bf16.vlgmr.msra.gmra.mrb[32].mxu1 %v10691_v7 }
 0x5a2   :  { %7596 = dma.done.wait [#allocation3 + $0x1], 16384 }
 0x5a3   :  { %7597 = vsyncadd [#allocation3 + $0x1], 4294950912  ;;  %v10692_v53 = vld [vmem:[#allocation69_spill] sm:$0xff]  ;;  %v3427_v0 = vld [vmem:[#allocation2 + $0x418] sm:$0xff]  ;;  %p7550_p9 = scmp.ne.s32.totalorder %s9408_s11, %s7929_s16  ;;  %p7552_p4 = scmp.lt.u32.totalorder %s9408_s11, %s9956_s4 }
 0x5a4   :  { %3840 = vmatprep.mubr.bf16.mxu0 %v10692_v53  ;;  %3922 = vmatprep.mubr.bf16.mxu1 %v10692_v53  ;;  %v3425_v15 = vld [vmem:[#allocation2 + $0x408] sm:$0xff]  ;;  %v3424_v37 = vld [vmem:[#allocation2 + $0x400] sm:$0xff]  ;;  %v3555_v5 = vunpack.c.l.s8.bf16 %v3427_v0  ;;  %v3426_v16 = vld [vmem:[#allocation2 + $0x410] sm:$0xff]  ;;  %v3563_v1 = vunpack.c.h.s8.bf16 %v3427_v0  ;;  %p7553_p5 = scmp.lt.u32.totalorder %s7929_s16, %s7929_s16 }
 0x5a5   :  { %v3553_v49 = vunpack.c.l.s8.bf16 %v3425_v15  ;;  %v3552_v36 = vunpack.c.l.s8.bf16 %v3424_v37  ;;  %v3561_v50 = vunpack.c.h.s8.bf16 %v3425_v15  ;;  %v3554_v25 = vunpack.c.l.s8.bf16 %v3426_v16  ;;  %v3433_v19 = vld [vmem:[#allocation2 + $0x448] sm:$0xff]  ;;  %v3435_v8 = vld [vmem:[#allocation2 + $0x458] sm:$0xff]  ;;  %v3432_v44 = vld [vmem:[#allocation2 + $0x440] sm:$0xff] }
 0x5a6   :  { %3890 = vmatprep.subr.bf16.mxu1 %v3555_v5  ;;  %v3560_v51 = vunpack.c.h.s8.bf16 %v3424_v37  ;;  %v3562_v27 = vunpack.c.h.s8.bf16 %v3426_v16  ;;  %v3569_v32 = vunpack.c.l.s8.bf16 %v3433_v19  ;;  %v3571_v30 = vunpack.c.l.s8.bf16 %v3435_v8  ;;  %v3434_v13 = vld [vmem:[#allocation2 + $0x450] sm:$0xff]  ;;  %v3441_v20 = vld [vmem:[#allocation2 + $0x488] sm:$0xff]  ;;  %v3443_v52 = vld [vmem:[#allocation2 + $0x498] sm:$0xff]  ;;  %p7554_p6 = por %p7553_p5, %p7552_p4 }
 0x5a7   :  { %3808 = vmatprep.subr.bf16.mxu0 %v3553_v49  ;;  %3891 = vmatpush1.bf16.msra.mxu1 %v3554_v25  ;;  %v3568_v10 = vunpack.c.l.s8.bf16 %v3432_v44  ;;  %v3570_v26 = vunpack.c.l.s8.bf16 %v3434_v13  ;;  %v3577_v2 = vunpack.c.h.s8.bf16 %v3433_v19  ;;  %v3579_v33 = vunpack.c.h.s8.bf16 %v3435_v8  ;;  %v3440_v43 = vld [vmem:[#allocation2 + $0x480] sm:$0xff]  ;;  %v3442_v54 = vld [vmem:[#allocation2 + $0x490] sm:$0xff]  ;;  %v3449_v28 = vld [vmem:[#allocation2 + $0x4c8] sm:$0xff] }
 0x5a8   :  { %3809 = vmatpush1.bf16.msra.mxu0 %v3552_v36  ;;  %3892 = vmatprep.subr.bf16.mxu1 %v3563_v1  ;;  %v3576_v59 = vunpack.c.h.s8.bf16 %v3432_v44  ;;  %v3578_v4 = vunpack.c.h.s8.bf16 %v3434_v13  ;;  %v3585_v18 = vunpack.c.l.s8.bf16 %v3441_v20  ;;  %v3587_v21 = vunpack.c.l.s8.bf16 %v3443_v52  ;;  %v3451_v42 = vld [vmem:[#allocation2 + $0x4d8] sm:$0xff]  ;;  %v3448_v48 = vld [vmem:[#allocation2 + $0x4c0] sm:$0xff]  ;;  %v3450_v63 = vld [vmem:[#allocation2 + $0x4d0] sm:$0xff]  ;;  %p7556_p2 = por %p7554_p6, %p7528_p12 }
 0x5a9   :  { %3810 = vmatprep.subr.bf16.mxu0 %v3561_v50  ;;  %v3584_v45 = vunpack.c.l.s8.bf16 %v3440_v43  ;;  %v3586_v34 = vunpack.c.l.s8.bf16 %v3442_v54  ;;  %v3593_v56 = vunpack.c.h.s8.bf16 %v3441_v20  ;;  %v3595_v31 = vunpack.c.h.s8.bf16 %v3443_v52  ;;  %v3457_v41 = vld [vmem:[#allocation2 + $0x508] sm:$0xff]  ;;  %v3459_v58 = vld [vmem:[#allocation2 + $0x518] sm:$0xff]  ;;  %v3456_v60 = vld [vmem:[#allocation2 + $0x500] sm:$0xff] }
 0x5aa   :  { %v3592_v46 = vunpack.c.h.s8.bf16 %v3440_v43  ;;  %v3594_v62 = vunpack.c.h.s8.bf16 %v3442_v54  ;;  %v3601_v17 = vunpack.c.l.s8.bf16 %v3449_v28  ;;  %v3603_v35 = vunpack.c.l.s8.bf16 %v3451_v42  ;;  %v3458_v55 = vld [vmem:[#allocation2 + $0x510] sm:$0xff]  ;;  %v3465_v38 = vld [vmem:[#allocation2 + $0x548] sm:$0xff]  ;;  %v3467_v39 = vld [vmem:[#allocation2 + $0x558] sm:$0xff]  ;;  %p7557_p8 = pnand %p7556_p2, %p7550_p9 }
 0x5ab   :  { %3893 = vmatpush1.bf16.msra.mxu1 %v3562_v27  ;;  %v3600_v23 = vunpack.c.l.s8.bf16 %v3448_v48  ;;  %v3602_v3 = vunpack.c.l.s8.bf16 %v3450_v63  ;;  %v3609_v9 = vunpack.c.h.s8.bf16 %v3449_v28  ;;  %v3611_v11 = vunpack.c.h.s8.bf16 %v3451_v42  ;;  %v3464_v0 = vld [vmem:[#allocation2 + $0x540] sm:$0xff]  ;;  %v3466_v37 = vld [vmem:[#allocation2 + $0x550] sm:$0xff]  ;;  %v3473_v50 = vld [vmem:[#allocation2 + $0x588] sm:$0xff] }
 0x5ac   :  { %3811 = vmatpush1.bf16.msra.mxu0 %v3560_v51  ;;  %3894 = vmatprep.subr.bf16.mxu1 %v3571_v30  ;;  %v3608_v14 = vunpack.c.h.s8.bf16 %v3448_v48  ;;  %v3610_v57 = vunpack.c.h.s8.bf16 %v3450_v63  ;;  %v3617_v12 = vunpack.c.l.s8.bf16 %v3457_v41  ;;  %v3619_v24 = vunpack.c.l.s8.bf16 %v3459_v58  ;;  %v3475_v25 = vld [vmem:[#allocation2 + $0x598] sm:$0xff]  ;;  %v3472_v27 = vld [vmem:[#allocation2 + $0x580] sm:$0xff] }
 0x5ad   :  { %3812 = vmatprep.subr.bf16.mxu0 %v3569_v32  ;;  %v3616_v29 = vunpack.c.l.s8.bf16 %v3456_v60  ;;  %v3618_v40 = vunpack.c.l.s8.bf16 %v3458_v55  ;;  %v3625_v6 = vunpack.c.h.s8.bf16 %v3457_v41  ;;  %v3627_v61 = vunpack.c.h.s8.bf16 %v3459_v58  ;;  %v3474_v32 = vld [vmem:[#allocation2 + $0x590] sm:$0xff] }
 0x5ae   :  { %v3624_v47 = vunpack.c.h.s8.bf16 %v3456_v60  ;;  %v3626_v22 = vunpack.c.h.s8.bf16 %v3458_v55  ;;  %v3633_v7 = vunpack.c.l.s8.bf16 %v3465_v38  ;;  %v3635_v15 = vunpack.c.l.s8.bf16 %v3467_v39  ;;  %v10694_v60 = vld [vmem:[#allocation75_spill] sm:$0xff] }
 0x5af   :  { %3895 = vmatpush1.bf16.msra.mxu1 %v3570_v26  ;;  %v3632_v49 = vunpack.c.l.s8.bf16 %v3464_v0  ;;  %v3634_v5 = vunpack.c.l.s8.bf16 %v3466_v37  ;;  %v3641_v36 = vunpack.c.h.s8.bf16 %v3465_v38  ;;  %v3643_v16 = vunpack.c.h.s8.bf16 %v3467_v39  ;;  %v3481_v26 = vld [vmem:[#allocation2 + $0x5c8] sm:$0xff]  ;;  %v3507_v38 = vld [vmem:[#allocation2 + $0x698] sm:$0xff] }
 0x5b0   :  { %3813 = vmatpush1.bf16.msra.mxu0 %v3568_v10  ;;  %3896 = vmatprep.subr.bf16.mxu1 %v3579_v33  ;;  %v3640_v1 = vunpack.c.h.s8.bf16 %v3464_v0  ;;  %v3642_v19 = vunpack.c.h.s8.bf16 %v3466_v37  ;;  %v3649_v8 = vunpack.c.l.s8.bf16 %v3473_v50  ;;  %v3651_v51 = vunpack.c.l.s8.bf16 %v3475_v25  ;;  %v3506_v0 = vld [vmem:[#allocation2 + $0x690] sm:$0xff] }
 0x5b1   :  { %3814 = vmatprep.subr.bf16.mxu0 %v3577_v2  ;;  %v3648_v30 = vunpack.c.l.s8.bf16 %v3472_v27  ;;  %v3650_v44 = vunpack.c.l.s8.bf16 %v3474_v32  ;;  %v3657_v13 = vunpack.c.h.s8.bf16 %v3473_v50  ;;  %v3659_v10 = vunpack.c.h.s8.bf16 %v3475_v25  ;;  %v3483_v2 = vld [vmem:[#allocation2 + $0x5d8] sm:$0xff] }
 0x5b2   :  { %v3656_v33 = vunpack.c.h.s8.bf16 %v3472_v27  ;;  %v3658_v20 = vunpack.c.h.s8.bf16 %v3474_v32  ;;  %v3665_v52 = vunpack.c.l.s8.bf16 %v3481_v26  ;;  %v3673_v54 = vunpack.c.h.s8.bf16 %v3481_v26  ;;  %v3515_v50 = vld [vmem:[#allocation2 + $0x6d8] sm:$0xff]  ;;  %v3514_v27 = vld [vmem:[#allocation2 + $0x6d0] sm:$0xff] }
 0x5b3   :  { %3897 = vmatpush1.bf16.msra.mxu1 %v3578_v4  ;;  %v3480_v4 = vld [vmem:[#allocation2 + $0x5c0] sm:$0xff]  ;;  %v3523_v26 = vld [vmem:[#allocation2 + $0x718] sm:$0xff] }
 0x5b4   :  { %3815 = vmatpush1.bf16.msra.mxu0 %v3576_v59  ;;  %3898 = vmatprep.subr.bf16.mxu1 %v3587_v21  ;;  %v3667_v59 = vunpack.c.l.s8.bf16 %v3483_v2  ;;  %v3664_v21 = vunpack.c.l.s8.bf16 %v3480_v4 }
 0x5b5   :  { %3816 = vmatprep.subr.bf16.mxu0 %v3585_v18  ;;  %v3482_v18 = vld [vmem:[#allocation2 + $0x5d0] sm:$0xff] }
 0x5b6   :  { %v3666_v43 = vunpack.c.l.s8.bf16 %v3482_v18  ;;  %v3674_v28 = vunpack.c.h.s8.bf16 %v3482_v18 }
 0x5b7   :  { %3899 = vmatpush1.bf16.msra.mxu1 %v3586_v34  ;;  %v3489_v34 = vld [vmem:[#allocation2 + $0x608] sm:$0xff] }
 0x5b8   :  { %3817 = vmatpush1.bf16.msra.mxu0 %v3584_v45  ;;  %3900 = vmatprep.subr.bf16.mxu1 %v3595_v31  ;;  %v3675_v45 = vunpack.c.h.s8.bf16 %v3483_v2  ;;  %v3672_v31 = vunpack.c.h.s8.bf16 %v3480_v4  ;;  %v3681_v42 = vunpack.c.l.s8.bf16 %v3489_v34  ;;  %v3689_v63 = vunpack.c.h.s8.bf16 %v3489_v34  ;;  %v3522_v4 = vld [vmem:[#allocation2 + $0x710] sm:$0xff]  ;;  %v3531_v34 = vld [vmem:[#allocation2 + $0x758] sm:$0xff] }
 0x5b9   :  { %3818 = vmatprep.subr.bf16.mxu0 %v3593_v56  ;;  %v3491_v56 = vld [vmem:[#allocation2 + $0x618] sm:$0xff] }
 0x5bb   :  { %3901 = vmatpush1.bf16.msra.mxu1 %v3594_v62  ;;  %v3488_v62 = vld [vmem:[#allocation2 + $0x600] sm:$0xff] }
 0x5bc   :  { %3819 = vmatpush1.bf16.msra.mxu0 %v3592_v46  ;;  %3902 = vmatprep.subr.bf16.mxu1 %v3603_v35  ;;  %v3683_v46 = vunpack.c.l.s8.bf16 %v3491_v56  ;;  %v3680_v35 = vunpack.c.l.s8.bf16 %v3488_v62  ;;  %v3688_v41 = vunpack.c.h.s8.bf16 %v3488_v62  ;;  %v3530_v62 = vld [vmem:[#allocation2 + $0x750] sm:$0xff] }
 0x5bd   :  { %3820 = vmatprep.subr.bf16.mxu0 %v3601_v17  ;;  %v3490_v17 = vld [vmem:[#allocation2 + $0x610] sm:$0xff] }
 0x5be   :  { %v3682_v48 = vunpack.c.l.s8.bf16 %v3490_v17  ;;  %v3690_v58 = vunpack.c.h.s8.bf16 %v3490_v17 }
 0x5bf   :  { %3903 = vmatpush1.bf16.msra.mxu1 %v3602_v3  ;;  %v3497_v3 = vld [vmem:[#allocation2 + $0x648] sm:$0xff] }
 0x5c0   :  { %3821 = vmatpush1.bf16.msra.mxu0 %v3600_v23  ;;  %3904 = vmatprep.subr.bf16.mxu1 %v3611_v11  ;;  %v3691_v23 = vunpack.c.h.s8.bf16 %v3491_v56  ;;  %v10693_v11 = vld [vmem:[#allocation68_spill] sm:$0xff] }
 0x5c1   :  { %3822 = vmatprep.subr.bf16.mxu0 %v3609_v9  ;;  %v3499_v9 = vld [vmem:[#allocation2 + $0x658] sm:$0xff] }
 0x5c3   :  { %3905 = vmatpush1.bf16.msra.mxu1 %v3610_v57  ;;  %v3699_v57 = vunpack.c.l.s8.bf16 %v3499_v9 }
 0x5c4   :  { %3823 = vmatpush1.bf16.msra.mxu0 %v3608_v14  ;;  %3906 = vmatprep.subr.bf16.mxu1 %v3619_v24  ;;  %v3697_v14 = vunpack.c.l.s8.bf16 %v3497_v3  ;;  %v3498_v24 = vld [vmem:[#allocation2 + $0x650] sm:$0xff] }
 0x5c5   :  { %3824 = vmatprep.subr.bf16.mxu0 %v3617_v12  ;;  %v3496_v12 = vld [vmem:[#allocation2 + $0x640] sm:$0xff] }
 0x5c6   :  { %v3696_v55 = vunpack.c.l.s8.bf16 %v3496_v12  ;;  %v3704_v39 = vunpack.c.h.s8.bf16 %v3496_v12  ;;  %v3538_v12 = vld [vmem:[#allocation2 + $0x790] sm:$0xff] }
 0x5c7   :  { %3907 = vmatpush1.bf16.msra.mxu1 %v3618_v40  ;;  %v3705_v40 = vunpack.c.h.s8.bf16 %v3497_v3  ;;  %v3539_v3 = vld [vmem:[#allocation2 + $0x798] sm:$0xff] }
 0x5c8   :  { %3825 = vmatpush1.bf16.msra.mxu0 %v3616_v29  ;;  %3908 = vmatprep.subr.bf16.mxu1 %v3627_v61  ;;  %v3698_v29 = vunpack.c.l.s8.bf16 %v3498_v24  ;;  %v3505_v61 = vld [vmem:[#allocation2 + $0x688] sm:$0xff] }
 0x5c9   :  { %3826 = vmatprep.subr.bf16.mxu0 %v3625_v6  ;;  %v3707_v6 = vunpack.c.h.s8.bf16 %v3499_v9 }
 0x5cb   :  { %3909 = vmatpush1.bf16.msra.mxu1 %v3626_v22  ;;  %v3713_v22 = vunpack.c.l.s8.bf16 %v3505_v61 }
 0x5cc   :  { %3827 = vmatpush1.bf16.msra.mxu0 %v3624_v47  ;;  %3910 = vmatprep.subr.bf16.mxu1 %v3635_v15  ;;  %v3706_v47 = vunpack.c.h.s8.bf16 %v3498_v24  ;;  %v3504_v15 = vld [vmem:[#allocation2 + $0x680] sm:$0xff] }
 0x5cd   :  { %3828 = vmatprep.subr.bf16.mxu0 %v3633_v7  ;;  %v3715_v7 = vunpack.c.l.s8.bf16 %v3507_v38  ;;  %v3712_v37 = vunpack.c.l.s8.bf16 %v3504_v15  ;;  %v3720_v25 = vunpack.c.h.s8.bf16 %v3504_v15  ;;  %v3546_v15 = vld [vmem:[#allocation2 + $0x7d0] sm:$0xff] }
 0x5cf   :  { %3911 = vmatpush1.bf16.msra.mxu1 %v3634_v5  ;;  %v3721_v5 = vunpack.c.h.s8.bf16 %v3505_v61  ;;  %v3547_v61 = vld [vmem:[#allocation2 + $0x7d8] sm:$0xff] }
 0x5d0   :  { %3829 = vmatpush1.bf16.msra.mxu0 %v3632_v49  ;;  %3912 = vmatprep.subr.bf16.mxu1 %v3643_v16  ;;  %v3714_v49 = vunpack.c.l.s8.bf16 %v3506_v0  ;;  %v3513_v16 = vld [vmem:[#allocation2 + $0x6c8] sm:$0xff] }
 0x5d1   :  { %3830 = vmatprep.subr.bf16.mxu0 %v3641_v36  ;;  %v3723_v36 = vunpack.c.h.s8.bf16 %v3507_v38 }
 0x5d3   :  { %3913 = vmatpush1.bf16.msra.mxu1 %v3642_v19  ;;  %v3729_v19 = vunpack.c.l.s8.bf16 %v3513_v16 }
 0x5d4   :  { %3831 = vmatpush1.bf16.msra.mxu0 %v3640_v1  ;;  %3914 = vmatprep.subr.bf16.mxu1 %v3651_v51  ;;  %v3722_v1 = vunpack.c.h.s8.bf16 %v3506_v0  ;;  %v3512_v51 = vld [vmem:[#allocation2 + $0x6c0] sm:$0xff] }
 0x5d5   :  { %3832 = vmatprep.subr.bf16.mxu0 %v3649_v8  ;;  %v3731_v8 = vunpack.c.l.s8.bf16 %v3515_v50  ;;  %v3728_v32 = vunpack.c.l.s8.bf16 %v3512_v51  ;;  %v3736_v2 = vunpack.c.h.s8.bf16 %v3512_v51  ;;  %v9575_v51 = vld [vmem:[#allocation2 + $0x430] sm:$0xff] }
 0x5d7   :  { %3915 = vmatpush1.bf16.msra.mxu1 %v3650_v44  ;;  %v3737_v44 = vunpack.c.h.s8.bf16 %v3513_v16  ;;  %v9569_v16 = vld [vmem:[#allocation2 + $0x438] sm:$0xff] }
 0x5d8   :  { %3833 = vmatpush1.bf16.msra.mxu0 %v3648_v30  ;;  %3916 = vmatprep.subr.bf16.mxu1 %v3659_v10  ;;  %v3730_v30 = vunpack.c.l.s8.bf16 %v3514_v27  ;;  %v3521_v10 = vld [vmem:[#allocation2 + $0x708] sm:$0xff] }
 0x5d9   :  { %3834 = vmatprep.subr.bf16.mxu0 %v3657_v13  ;;  %v3739_v13 = vunpack.c.h.s8.bf16 %v3515_v50 }
 0x5db   :  { %3917 = vmatpush1.bf16.msra.mxu1 %v3658_v20  ;;  %v3745_v20 = vunpack.c.l.s8.bf16 %v3521_v10 }
 0x5dc   :  { %3835 = vmatpush1.bf16.msra.mxu0 %v3656_v33  ;;  %3918 = vmatprep.subr.bf16.mxu1 %v3667_v59  ;;  %v3738_v33 = vunpack.c.h.s8.bf16 %v3514_v27  ;;  %v3520_v59 = vld [vmem:[#allocation2 + $0x700] sm:$0xff] }
 0x5dd   :  { %3836 = vmatprep.subr.bf16.mxu0 %v3665_v52  ;;  %v3747_v52 = vunpack.c.l.s8.bf16 %v3523_v26  ;;  %v3744_v18 = vunpack.c.l.s8.bf16 %v3520_v59  ;;  %v3752_v56 = vunpack.c.h.s8.bf16 %v3520_v59  ;;  %v9597_v59 = vld [vmem:[#allocation2 + $0x4f8] sm:$0xff] }
 0x5df   :  { %3919 = vmatpush1.bf16.msra.mxu1 %v3666_v43  ;;  %v3753_v43 = vunpack.c.h.s8.bf16 %v3521_v10  ;;  %v9585_v10 = vld [vmem:[#allocation2 + $0x470] sm:$0xff] }
 0x5e0   :  { %3837 = vmatpush1.bf16.msra.mxu0 %v3664_v21  ;;  %3920 = vmatprep.subr.bf16.mxu1 %v3675_v45  ;;  %v3746_v21 = vunpack.c.l.s8.bf16 %v3522_v4  ;;  %v3529_v45 = vld [vmem:[#allocation2 + $0x748] sm:$0xff] }
 0x5e1   :  { %3838 = vmatprep.subr.bf16.mxu0 %v3673_v54  ;;  %v3755_v54 = vunpack.c.h.s8.bf16 %v3523_v26  ;;  %v9587_v26 = vld [vmem:[#allocation2 + $0x4a8] sm:$0xff] }
 0x5e3   :  { %3921 = vmatpush1.bf16.msra.mxu1 %v3674_v28  ;;  %v3761_v28 = vunpack.c.l.s8.bf16 %v3529_v45 }
 0x5e4   :  { %3839 = vmatpush1.bf16.msra.mxu0 %v3672_v31  ;;  %3931 = vmatprep.subr.bf16.mxu1 %v3683_v46  ;;  %v3754_v31 = vunpack.c.h.s8.bf16 %v3522_v4  ;;  %v3528_v46 = vld [vmem:[#allocation2 + $0x740] sm:$0xff] }
 0x5e5   :  { %3849 = vmatprep.subr.bf16.mxu0 %v3681_v42  ;;  %v3763_v42 = vunpack.c.l.s8.bf16 %v3531_v34  ;;  %v3760_v17 = vunpack.c.l.s8.bf16 %v3528_v46  ;;  %v3768_v9 = vunpack.c.h.s8.bf16 %v3528_v46  ;;  %v9599_v4 = vld [vmem:[#allocation2 + $0x4e0] sm:$0xff]  ;;  %v9621_v46 = vld [vmem:[#allocation2 + $0x5b8] sm:$0xff] }
 0x5e6   :  { %3923 = vmatmul.mubr.bf16.vlgmr.msra.gmra.mrb[28].mxu1 %v10693_v11 }
 0x5e7   :  { %3841 = vmatmul.mubr.bf16.vlgmr.msra.gmra.mrb[20].mxu0 %v10693_v11  ;;  %3932 = vmatpush1.bf16.msra.mxu1 %v3682_v48  ;;  %v3769_v48 = vunpack.c.h.s8.bf16 %v3529_v45  ;;  %v9609_v45 = vld [vmem:[#allocation2 + $0x530] sm:$0xff] }
 0x5e8   :  { %3850 = vmatpush1.bf16.msra.mxu0 %v3680_v35  ;;  %3933 = vmatprep.subr.bf16.mxu1 %v3691_v23  ;;  %v3762_v35 = vunpack.c.l.s8.bf16 %v3530_v62  ;;  %v3537_v23 = vld [vmem:[#allocation2 + $0x788] sm:$0xff] }
 0x5e9   :  { %3851 = vmatprep.subr.bf16.mxu0 %v3689_v63  ;;  %3881 = vmatprep.mubr.bf16.mxu0 %v10694_v60  ;;  %v3771_v63 = vunpack.c.h.s8.bf16 %v3531_v34  ;;  %v9611_v34 = vld [vmem:[#allocation2 + $0x568] sm:$0xff] }
 0x5ea   :  { %3963 = vmatprep.mubr.bf16.mxu1 %v10694_v60 }
 0x5eb   :  { %3934 = vmatpush1.bf16.msra.mxu1 %v3690_v58  ;;  %v3777_v58 = vunpack.c.l.s8.bf16 %v3537_v23 }
 0x5ec   :  { %3852 = vmatpush1.bf16.msra.mxu0 %v3688_v41  ;;  %3935 = vmatprep.subr.bf16.mxu1 %v3699_v57  ;;  %v3770_v41 = vunpack.c.h.s8.bf16 %v3530_v62  ;;  %v3536_v57 = vld [vmem:[#allocation2 + $0x780] sm:$0xff] }
 0x5ed   :  { %3853 = vmatprep.subr.bf16.mxu0 %v3697_v14  ;;  %v3779_v14 = vunpack.c.l.s8.bf16 %v3539_v3  ;;  %v3776_v24 = vunpack.c.l.s8.bf16 %v3536_v57  ;;  %v3784_v38 = vunpack.c.h.s8.bf16 %v3536_v57  ;;  %v9623_v62 = vld [vmem:[#allocation2 + $0x5a0] sm:$0xff]  ;;  %v9645_v57 = vld [vmem:[#allocation2 + $0x678] sm:$0xff] }
 0x5ef   :  { %3936 = vmatpush1.bf16.msra.mxu1 %v3698_v29  ;;  %v3785_v29 = vunpack.c.h.s8.bf16 %v3537_v23  ;;  %v9633_v23 = vld [vmem:[#allocation2 + $0x5f0] sm:$0xff] }
 0x5f0   :  { %3854 = vmatpush1.bf16.msra.mxu0 %v3696_v55  ;;  %3937 = vmatprep.subr.bf16.mxu1 %v3707_v6  ;;  %v3778_v55 = vunpack.c.l.s8.bf16 %v3538_v12  ;;  %v3545_v6 = vld [vmem:[#allocation2 + $0x7c8] sm:$0xff] }
 0x5f1   :  { %3855 = vmatprep.subr.bf16.mxu0 %v3705_v40  ;;  %v3787_v40 = vunpack.c.h.s8.bf16 %v3539_v3  ;;  %v9635_v3 = vld [vmem:[#allocation2 + $0x628] sm:$0xff] }
 0x5f3   :  { %3938 = vmatpush1.bf16.msra.mxu1 %v3706_v47  ;;  %v3793_v47 = vunpack.c.l.s8.bf16 %v3545_v6 }
 0x5f4   :  { %3856 = vmatpush1.bf16.msra.mxu0 %v3704_v39  ;;  %3939 = vmatprep.subr.bf16.mxu1 %v3715_v7  ;;  %v3786_v39 = vunpack.c.h.s8.bf16 %v3538_v12  ;;  %v3544_v7 = vld [vmem:[#allocation2 + $0x7c0] sm:$0xff] }
 0x5f5   :  { %3857 = vmatprep.subr.bf16.mxu0 %v3713_v22  ;;  %v3795_v22 = vunpack.c.l.s8.bf16 %v3547_v61  ;;  %v3792_v0 = vunpack.c.l.s8.bf16 %v3544_v7  ;;  %v3800_v50 = vunpack.c.h.s8.bf16 %v3544_v7  ;;  %v9647_v12 = vld [vmem:[#allocation2 + $0x660] sm:$0xff]  ;;  %v9669_v7 = vld [vmem:[#allocation2 + $0x738] sm:$0xff] }
 0x5f7   :  { %3940 = vmatpush1.bf16.msra.mxu1 %v3714_v49  ;;  %v3801_v49 = vunpack.c.h.s8.bf16 %v3545_v6  ;;  %v9657_v6 = vld [vmem:[#allocation2 + $0x6b0] sm:$0xff] }
 0x5f8   :  { %3858 = vmatpush1.bf16.msra.mxu0 %v3712_v37  ;;  %3941 = vmatprep.subr.bf16.mxu1 %v3723_v36  ;;  %v3794_v37 = vunpack.c.l.s8.bf16 %v3546_v15  ;;  %v9567_v36 = vld [vmem:[#allocation2 + $0x428] sm:$0xff] }
 0x5f9   :  { %3859 = vmatprep.subr.bf16.mxu0 %v3721_v5  ;;  %v3803_v5 = vunpack.c.h.s8.bf16 %v3547_v61  ;;  %v9659_v61 = vld [vmem:[#allocation2 + $0x6e8] sm:$0xff]  ;;  %v3565_v27 = vunpack.c.h.s8.bf16 %v9567_v36 }
 0x5fb   :  { %3942 = vmatpush1.bf16.msra.mxu1 %v3722_v1  ;;  %v3557_v1 = vunpack.c.l.s8.bf16 %v9567_v36 }
 0x5fc   :  { %3860 = vmatpush1.bf16.msra.mxu0 %v3720_v25  ;;  %3943 = vmatprep.subr.bf16.mxu1 %v3731_v8  ;;  %v3802_v25 = vunpack.c.h.s8.bf16 %v3546_v15  ;;  %v9573_v8 = vld [vmem:[#allocation2 + $0x420] sm:$0xff] }
 0x5fd   :  { %3861 = vmatprep.subr.bf16.mxu0 %v3729_v19  ;;  %v3559_v19 = vunpack.c.l.s8.bf16 %v9569_v16  ;;  %v9671_v15 = vld [vmem:[#allocation2 + $0x720] sm:$0xff] }
 0x5fe   :  { %10695 = vst [vmem:[#allocation96_spill] sm:$0xff] %v9671_v15  ;;  %v9699_v15 = vld [vmem:[#allocation2 + $0x7f0] sm:$0xff] }
 0x5ff   :  { %3944 = vmatpush1.bf16.msra.mxu1 %v3730_v30  ;;  %v9579_v30 = vld [vmem:[#allocation2 + $0x468] sm:$0xff]  ;;  %10703 = vst [vmem:[#allocation112_spill] sm:$0xff] %v9699_v15 }
 0x600   :  { %3862 = vmatpush1.bf16.msra.mxu0 %v3728_v32  ;;  %3945 = vmatprep.subr.bf16.mxu1 %v3739_v13  ;;  %v9583_v13 = vld [vmem:[#allocation2 + $0x460] sm:$0xff]  ;;  %v9685_v32 = vld [vmem:[#allocation2 + $0x7b8] sm:$0xff] }
 0x601   :  { %3863 = vmatprep.subr.bf16.mxu0 %v3737_v44  ;;  %v9581_v44 = vld [vmem:[#allocation2 + $0x478] sm:$0xff] }
 0x603   :  { %3946 = vmatpush1.bf16.msra.mxu1 %v3738_v33  ;;  %v9591_v33 = vld [vmem:[#allocation2 + $0x4a0] sm:$0xff] }
 0x604   :  { %3864 = vmatpush1.bf16.msra.mxu0 %v3736_v2  ;;  %3947 = vmatprep.subr.bf16.mxu1 %v3747_v52  ;;  %v9589_v2 = vld [vmem:[#allocation2 + $0x4b8] sm:$0xff]  ;;  %v9595_v52 = vld [vmem:[#allocation2 + $0x4e8] sm:$0xff] }
 0x605   :  { %3865 = vmatprep.subr.bf16.mxu0 %v3745_v20  ;;  %v9593_v20 = vld [vmem:[#allocation2 + $0x4b0] sm:$0xff] }
 0x607   :  { %3948 = vmatpush1.bf16.msra.mxu1 %v3746_v21  ;;  %v9603_v21 = vld [vmem:[#allocation2 + $0x528] sm:$0xff] }
 0x608   :  { %3866 = vmatpush1.bf16.msra.mxu0 %v3744_v18  ;;  %3949 = vmatprep.subr.bf16.mxu1 %v3755_v54  ;;  %v9601_v18 = vld [vmem:[#allocation2 + $0x4f0] sm:$0xff]  ;;  %v9607_v54 = vld [vmem:[#allocation2 + $0x520] sm:$0xff] }
 0x609   :  { %3867 = vmatprep.subr.bf16.mxu0 %v3753_v43  ;;  %v9605_v43 = vld [vmem:[#allocation2 + $0x538] sm:$0xff] }
 0x60b   :  { %3950 = vmatpush1.bf16.msra.mxu1 %v3754_v31  ;;  %v9615_v31 = vld [vmem:[#allocation2 + $0x560] sm:$0xff] }
 0x60c   :  { %3868 = vmatpush1.bf16.msra.mxu0 %v3752_v56  ;;  %3951 = vmatprep.subr.bf16.mxu1 %v3763_v42  ;;  %v9613_v56 = vld [vmem:[#allocation2 + $0x578] sm:$0xff]  ;;  %v9619_v42 = vld [vmem:[#allocation2 + $0x5a8] sm:$0xff] }
 0x60d   :  { %3869 = vmatprep.subr.bf16.mxu0 %v3761_v28  ;;  %v9617_v28 = vld [vmem:[#allocation2 + $0x570] sm:$0xff] }
 0x60f   :  { %3952 = vmatpush1.bf16.msra.mxu1 %v3762_v35  ;;  %v9627_v35 = vld [vmem:[#allocation2 + $0x5e8] sm:$0xff] }
 0x610   :  { %3870 = vmatpush1.bf16.msra.mxu0 %v3760_v17  ;;  %3953 = vmatprep.subr.bf16.mxu1 %v3771_v63  ;;  %v9625_v17 = vld [vmem:[#allocation2 + $0x5b0] sm:$0xff]  ;;  %v9631_v63 = vld [vmem:[#allocation2 + $0x5e0] sm:$0xff] }
 0x611   :  { %3871 = vmatprep.subr.bf16.mxu0 %v3769_v48  ;;  %v9629_v48 = vld [vmem:[#allocation2 + $0x5f8] sm:$0xff] }
 0x613   :  { %3954 = vmatpush1.bf16.msra.mxu1 %v3770_v41  ;;  %v9639_v41 = vld [vmem:[#allocation2 + $0x620] sm:$0xff] }
 0x614   :  { %3872 = vmatpush1.bf16.msra.mxu0 %v3768_v9  ;;  %3955 = vmatprep.subr.bf16.mxu1 %v3779_v14  ;;  %v9637_v9 = vld [vmem:[#allocation2 + $0x638] sm:$0xff]  ;;  %v9643_v14 = vld [vmem:[#allocation2 + $0x668] sm:$0xff] }
 0x615   :  { %3873 = vmatprep.subr.bf16.mxu0 %v3777_v58  ;;  %v9641_v58 = vld [vmem:[#allocation2 + $0x630] sm:$0xff] }
 0x617   :  { %3956 = vmatpush1.bf16.msra.mxu1 %v3778_v55  ;;  %v9651_v55 = vld [vmem:[#allocation2 + $0x6a8] sm:$0xff] }
 0x618   :  { %3874 = vmatpush1.bf16.msra.mxu0 %v3776_v24  ;;  %3957 = vmatprep.subr.bf16.mxu1 %v3787_v40  ;;  %v9649_v24 = vld [vmem:[#allocation2 + $0x670] sm:$0xff]  ;;  %v9655_v40 = vld [vmem:[#allocation2 + $0x6a0] sm:$0xff] }
 0x619   :  { %3875 = vmatprep.subr.bf16.mxu0 %v3785_v29  ;;  %v9653_v29 = vld [vmem:[#allocation2 + $0x6b8] sm:$0xff] }
 0x61b   :  { %3958 = vmatpush1.bf16.msra.mxu1 %v3786_v39  ;;  %v9663_v39 = vld [vmem:[#allocation2 + $0x6e0] sm:$0xff] }
 0x61c   :  { %3876 = vmatpush1.bf16.msra.mxu0 %v3784_v38  ;;  %3959 = vmatprep.subr.bf16.mxu1 %v3795_v22  ;;  %v9661_v38 = vld [vmem:[#allocation2 + $0x6f8] sm:$0xff]  ;;  %v9667_v22 = vld [vmem:[#allocation2 + $0x728] sm:$0xff] }
 0x61d   :  { %3877 = vmatprep.subr.bf16.mxu0 %v3793_v47  ;;  %v9665_v47 = vld [vmem:[#allocation2 + $0x6f0] sm:$0xff] }
 0x61f   :  { %3960 = vmatpush1.bf16.msra.mxu1 %v3794_v37  ;;  %v9675_v37 = vld [vmem:[#allocation2 + $0x768] sm:$0xff] }
 0x620   :  { %3878 = vmatpush1.bf16.msra.mxu0 %v3792_v0  ;;  %3961 = vmatprep.subr.bf16.mxu1 %v3803_v5  ;;  %v9673_v0 = vld [vmem:[#allocation2 + $0x730] sm:$0xff]  ;;  %10697 = vst [vmem:[#allocation105_spill] sm:$0xff] %v9675_v37  ;;  %v9679_v5 = vld [vmem:[#allocation2 + $0x760] sm:$0xff] }
 0x621   :  { %3879 = vmatprep.subr.bf16.mxu0 %v3801_v49  ;;  %10696 = vst [vmem:[#allocation98_spill] sm:$0xff] %v9673_v0  ;;  %v9677_v49 = vld [vmem:[#allocation2 + $0x778] sm:$0xff]  ;;  %10699 = vst [vmem:[#allocation104_spill] sm:$0xff] %v9679_v5  ;;  %v9689_v37 = vld [vmem:[#allocation2 + $0x7a0] sm:$0xff] }
 0x622   :  { %10698 = vst [vmem:[#allocation107_spill] sm:$0xff] %v9677_v49  ;;  %v3567_v49 = vunpack.c.h.s8.bf16 %v9569_v16  ;;  %v9691_v5 = vld [vmem:[#allocation2 + $0x7b0] sm:$0xff]  ;;  %v9693_v0 = vld [vmem:[#allocation2 + $0x7e8] sm:$0xff] }
 0x623   :  { %3962 = vmatpush1.bf16.msra.mxu1 %v3802_v25  ;;  %v9683_v25 = vld [vmem:[#allocation2 + $0x7a8] sm:$0xff] }
 0x624   :  { %3880 = vmatpush1.bf16.msra.mxu0 %v3800_v50  ;;  %v9681_v50 = vld [vmem:[#allocation2 + $0x770] sm:$0xff]  ;;  %10701 = vst [vmem:[#allocation113_spill] sm:$0xff] %v9683_v25  ;;  %4054 = vmatprep.subr.bf16.mxu1 %v3559_v19  ;;  %v9697_v25 = vld [vmem:[#allocation2 + $0x7e0] sm:$0xff] }
 0x625   :  { %10700 = vst [vmem:[#allocation106_spill] sm:$0xff] %v9681_v50  ;;  %3972 = vmatprep.subr.bf16.mxu0 %v3557_v1  ;;  %v9695_v50 = vld [vmem:[#allocation2 + $0x7f8] sm:$0xff]  ;;  %10702 = vst [vmem:[#allocation115_spill] sm:$0xff] %v9697_v25 }
 0x626   :  { %v10704_v1 = vld [vmem:[#allocation74_spill] sm:$0xff] }
 0x627   :  { %3882 = vmatmul.mubr.bf16.vlgmr.msra.gmra.mrb[20].mxu0 %v10704_v1  ;;  %3964 = vmatmul.mubr.bf16.vlgmr.msra.gmra.mrb[28].mxu1 %v10704_v1 }
 0x628   :  { %7560 = shalt.err (!%p7557_p8)  }
 0x629   :  { %7572 = shalt.err (!%p7979_p7)  }
 0x62a   :  { %4155 = dma.hbm_to_vmem [thread:$0]  %s9408_s11, 16384, %s7957_s0, [#allocation3 + $0x1]  ;;  %v10705_v36 = vunpack.c.l.s8.bf16 %v9573_v8  ;;  %v10706_v16 = vunpack.c.l.s8.bf16 %v9575_v51  ;;  %v3564_v19 = vunpack.c.h.s8.bf16 %v9573_v8  ;;  %v3566_v1 = vunpack.c.h.s8.bf16 %v9575_v51  ;;  %4004 = vmatprep.mubr.bf16.mxu0 %v10692_v53  ;;  %4086 = vmatprep.mubr.bf16.mxu1 %v10692_v53 }
 0x62b   :  { %v3573_v15 = vunpack.c.l.s8.bf16 %v9579_v30  ;;  %v3575_v25 = vunpack.c.l.s8.bf16 %v9581_v44  ;;  %v3581_v8 = vunpack.c.h.s8.bf16 %v9579_v30  ;;  %v3583_v51 = vunpack.c.h.s8.bf16 %v9581_v44 }
 0x62c   :  { %3973 = vmatpush1.bf16.msra.mxu0 %v10705_v36  ;;  %4055 = vmatpush1.bf16.msra.mxu1 %v10706_v16  ;;  %v3572_v36 = vunpack.c.l.s8.bf16 %v9583_v13  ;;  %v3574_v16 = vunpack.c.l.s8.bf16 %v9585_v10  ;;  %v3589_v53 = vunpack.c.l.s8.bf16 %v9587_v26  ;;  %v3590_v30 = vunpack.c.l.s8.bf16 %v9593_v20 }
 0x62d   :  { %3974 = vmatprep.subr.bf16.mxu0 %v3565_v27  ;;  %4056 = vmatprep.subr.bf16.mxu1 %v3567_v49  ;;  %v3580_v27 = vunpack.c.h.s8.bf16 %v9583_v13  ;;  %v3582_v49 = vunpack.c.h.s8.bf16 %v9585_v10  ;;  %v3597_v44 = vunpack.c.h.s8.bf16 %v9587_v26  ;;  %v3599_v13 = vunpack.c.h.s8.bf16 %v9589_v2 }
 0x62e   :  { %v3596_v10 = vunpack.c.h.s8.bf16 %v9591_v33  ;;  %v3606_v26 = vunpack.c.l.s8.bf16 %v9601_v18 }
 0x630   :  { %3975 = vmatpush1.bf16.msra.mxu0 %v3564_v19  ;;  %4057 = vmatpush1.bf16.msra.mxu1 %v3566_v1  ;;  %v3591_v1 = vunpack.c.l.s8.bf16 %v9589_v2  ;;  %v3605_v19 = vunpack.c.l.s8.bf16 %v9595_v52  ;;  %v3613_v2 = vunpack.c.h.s8.bf16 %v9595_v52  ;;  %v3622_v52 = vunpack.c.l.s8.bf16 %v9609_v45 }
 0x631   :  { %3976 = vmatprep.subr.bf16.mxu0 %v3573_v15  ;;  %4058 = vmatprep.subr.bf16.mxu1 %v3575_v25  ;;  %v3588_v15 = vunpack.c.l.s8.bf16 %v9591_v33  ;;  %v3598_v25 = vunpack.c.h.s8.bf16 %v9593_v20  ;;  %v3615_v33 = vunpack.c.h.s8.bf16 %v9597_v59  ;;  %v3612_v20 = vunpack.c.h.s8.bf16 %v9599_v4 }
 0x634   :  { %3977 = vmatpush1.bf16.msra.mxu0 %v3572_v36  ;;  %4059 = vmatpush1.bf16.msra.mxu1 %v3574_v16  ;;  %v3607_v36 = vunpack.c.l.s8.bf16 %v9597_v59  ;;  %v3604_v16 = vunpack.c.l.s8.bf16 %v9599_v4  ;;  %v3629_v59 = vunpack.c.h.s8.bf16 %v9603_v21  ;;  %v3631_v4 = vunpack.c.h.s8.bf16 %v9605_v43 }
 0x635   :  { %3978 = vmatprep.subr.bf16.mxu0 %v3581_v8  ;;  %4060 = vmatprep.subr.bf16.mxu1 %v3583_v51  ;;  %v3614_v8 = vunpack.c.h.s8.bf16 %v9601_v18  ;;  %v3621_v51 = vunpack.c.l.s8.bf16 %v9603_v21  ;;  %v3628_v18 = vunpack.c.h.s8.bf16 %v9607_v54  ;;  %v3638_v21 = vunpack.c.l.s8.bf16 %v9617_v28 }
 0x638   :  { %3979 = vmatpush1.bf16.msra.mxu0 %v3580_v27  ;;  %4061 = vmatpush1.bf16.msra.mxu1 %v3582_v49  ;;  %v3623_v27 = vunpack.c.l.s8.bf16 %v9605_v43  ;;  %v3620_v49 = vunpack.c.l.s8.bf16 %v9607_v54  ;;  %v3645_v43 = vunpack.c.h.s8.bf16 %v9611_v34  ;;  %v3647_v54 = vunpack.c.h.s8.bf16 %v9613_v56 }
 0x639   :  { %3980 = vmatprep.subr.bf16.mxu0 %v3589_v53  ;;  %4062 = vmatprep.subr.bf16.mxu1 %v3591_v1  ;;  %v3630_v53 = vunpack.c.h.s8.bf16 %v9609_v45  ;;  %v3637_v1 = vunpack.c.l.s8.bf16 %v9611_v34  ;;  %v3644_v45 = vunpack.c.h.s8.bf16 %v9615_v31  ;;  %v3654_v34 = vunpack.c.l.s8.bf16 %v9625_v17 }
 0x63c   :  { %3981 = vmatpush1.bf16.msra.mxu0 %v3588_v15  ;;  %4063 = vmatpush1.bf16.msra.mxu1 %v3590_v30  ;;  %v3639_v15 = vunpack.c.l.s8.bf16 %v9613_v56  ;;  %v3636_v30 = vunpack.c.l.s8.bf16 %v9615_v31  ;;  %v3661_v56 = vunpack.c.h.s8.bf16 %v9619_v42  ;;  %v3663_v31 = vunpack.c.h.s8.bf16 %v9621_v46 }
 0x63d   :  { %3982 = vmatprep.subr.bf16.mxu0 %v3597_v44  ;;  %4064 = vmatprep.subr.bf16.mxu1 %v3599_v13  ;;  %v3646_v44 = vunpack.c.h.s8.bf16 %v9617_v28  ;;  %v3653_v13 = vunpack.c.l.s8.bf16 %v9619_v42  ;;  %v3660_v28 = vunpack.c.h.s8.bf16 %v9623_v62  ;;  %v3670_v42 = vunpack.c.l.s8.bf16 %v9633_v23 }
 0x640   :  { %3983 = vmatpush1.bf16.msra.mxu0 %v3596_v10  ;;  %4065 = vmatpush1.bf16.msra.mxu1 %v3598_v25  ;;  %v3655_v10 = vunpack.c.l.s8.bf16 %v9621_v46  ;;  %v3652_v25 = vunpack.c.l.s8.bf16 %v9623_v62  ;;  %v3677_v46 = vunpack.c.h.s8.bf16 %v9627_v35  ;;  %v3679_v62 = vunpack.c.h.s8.bf16 %v9629_v48 }
 0x641   :  { %3984 = vmatprep.subr.bf16.mxu0 %v3605_v19  ;;  %4066 = vmatprep.subr.bf16.mxu1 %v3607_v36  ;;  %v3662_v19 = vunpack.c.h.s8.bf16 %v9625_v17  ;;  %v3669_v36 = vunpack.c.l.s8.bf16 %v9627_v35  ;;  %v3676_v17 = vunpack.c.h.s8.bf16 %v9631_v63  ;;  %v3686_v35 = vunpack.c.l.s8.bf16 %v9641_v58 }
 0x644   :  { %3985 = vmatpush1.bf16.msra.mxu0 %v3604_v16  ;;  %4067 = vmatpush1.bf16.msra.mxu1 %v3606_v26  ;;  %v3671_v16 = vunpack.c.l.s8.bf16 %v9629_v48  ;;  %v3668_v26 = vunpack.c.l.s8.bf16 %v9631_v63  ;;  %v3693_v48 = vunpack.c.h.s8.bf16 %v9635_v3  ;;  %v3695_v63 = vunpack.c.h.s8.bf16 %v9637_v9 }
 0x645   :  { %3986 = vmatprep.subr.bf16.mxu0 %v3613_v2  ;;  %4068 = vmatprep.subr.bf16.mxu1 %v3615_v33  ;;  %v3678_v2 = vunpack.c.h.s8.bf16 %v9633_v23  ;;  %v3685_v33 = vunpack.c.l.s8.bf16 %v9635_v3  ;;  %v3692_v23 = vunpack.c.h.s8.bf16 %v9639_v41  ;;  %v3702_v3 = vunpack.c.l.s8.bf16 %v9649_v24 }
 0x648   :  { %3987 = vmatpush1.bf16.msra.mxu0 %v3612_v20  ;;  %4069 = vmatpush1.bf16.msra.mxu1 %v3614_v8  ;;  %v3687_v20 = vunpack.c.l.s8.bf16 %v9637_v9  ;;  %v3684_v8 = vunpack.c.l.s8.bf16 %v9639_v41  ;;  %v3709_v9 = vunpack.c.h.s8.bf16 %v9643_v14  ;;  %v3711_v41 = vunpack.c.h.s8.bf16 %v9645_v57 }
 0x649   :  { %3988 = vmatprep.subr.bf16.mxu0 %v3621_v51  ;;  %4070 = vmatprep.subr.bf16.mxu1 %v3623_v27  ;;  %v3694_v51 = vunpack.c.h.s8.bf16 %v9641_v58  ;;  %v3701_v27 = vunpack.c.l.s8.bf16 %v9643_v14  ;;  %v3708_v58 = vunpack.c.h.s8.bf16 %v9647_v12  ;;  %v3718_v14 = vunpack.c.l.s8.bf16 %v9657_v6 }
 0x64c   :  { %3989 = vmatpush1.bf16.msra.mxu0 %v3620_v49  ;;  %4071 = vmatpush1.bf16.msra.mxu1 %v3622_v52  ;;  %v3703_v49 = vunpack.c.l.s8.bf16 %v9645_v57  ;;  %v3710_v52 = vunpack.c.h.s8.bf16 %v9649_v24  ;;  %v3725_v57 = vunpack.c.h.s8.bf16 %v9651_v55  ;;  %v3724_v24 = vunpack.c.h.s8.bf16 %v9655_v40 }
 0x64d   :  { %3990 = vmatprep.subr.bf16.mxu0 %v3629_v59  ;;  %4072 = vmatprep.subr.bf16.mxu1 %v3631_v4  ;;  %v3719_v59 = vunpack.c.l.s8.bf16 %v9653_v29  ;;  %v3716_v4 = vunpack.c.l.s8.bf16 %v9655_v40  ;;  %v3743_v40 = vunpack.c.h.s8.bf16 %v9661_v38 }
 0x650   :  { %3991 = vmatpush1.bf16.msra.mxu0 %v3628_v18  ;;  %4073 = vmatpush1.bf16.msra.mxu1 %v3630_v53  ;;  %v3726_v18 = vunpack.c.h.s8.bf16 %v9657_v6  ;;  %v3733_v53 = vunpack.c.l.s8.bf16 %v9659_v61  ;;  %v3740_v6 = vunpack.c.h.s8.bf16 %v9663_v39 }
 0x651   :  { %3992 = vmatprep.subr.bf16.mxu0 %v3637_v1  ;;  %4074 = vmatprep.subr.bf16.mxu1 %v3639_v15  ;;  %v3735_v1 = vunpack.c.l.s8.bf16 %v9661_v38  ;;  %v3732_v15 = vunpack.c.l.s8.bf16 %v9663_v39  ;;  %v3757_v38 = vunpack.c.h.s8.bf16 %v9667_v22  ;;  %v3759_v39 = vunpack.c.h.s8.bf16 %v9669_v7 }
 0x654   :  { %3993 = vmatpush1.bf16.msra.mxu0 %v3636_v30  ;;  %4075 = vmatpush1.bf16.msra.mxu1 %v3638_v21  ;;  %v3742_v30 = vunpack.c.h.s8.bf16 %v9665_v47  ;;  %v3749_v21 = vunpack.c.l.s8.bf16 %v9667_v22 }
 0x655   :  { %3994 = vmatprep.subr.bf16.mxu0 %v3645_v43  ;;  %4076 = vmatprep.subr.bf16.mxu1 %v3647_v54  ;;  %v3751_v43 = vunpack.c.l.s8.bf16 %v9669_v7  ;;  %v10707_v54 = vld [vmem:[#allocation96_spill] sm:$0xff] }
 0x658   :  { %3995 = vmatpush1.bf16.msra.mxu0 %v3644_v45  ;;  %4077 = vmatpush1.bf16.msra.mxu1 %v3646_v44  ;;  %v3748_v45 = vunpack.c.l.s8.bf16 %v10707_v54  ;;  %v10708_v44 = vld [vmem:[#allocation98_spill] sm:$0xff] }
 0x659   :  { %3996 = vmatprep.subr.bf16.mxu0 %v3653_v13  ;;  %4078 = vmatprep.subr.bf16.mxu1 %v3655_v10  ;;  %v3758_v13 = vunpack.c.h.s8.bf16 %v10708_v44  ;;  %v10709_v10 = vld [vmem:[#allocation105_spill] sm:$0xff] }
 0x65a   :  { %v3773_v7 = vunpack.c.h.s8.bf16 %v10709_v10 }
 0x65c   :  { %3997 = vmatpush1.bf16.msra.mxu0 %v3652_v25  ;;  %4079 = vmatpush1.bf16.msra.mxu1 %v3654_v34  ;;  %v3765_v25 = vunpack.c.l.s8.bf16 %v10709_v10  ;;  %v10710_v34 = vld [vmem:[#allocation107_spill] sm:$0xff] }
 0x65d   :  { %3998 = vmatprep.subr.bf16.mxu0 %v3661_v56  ;;  %4080 = vmatprep.subr.bf16.mxu1 %v3663_v31  ;;  %v3767_v56 = vunpack.c.l.s8.bf16 %v10710_v34  ;;  %v10711_v31 = vld [vmem:[#allocation104_spill] sm:$0xff] }
 0x660   :  { %3999 = vmatpush1.bf16.msra.mxu0 %v3660_v28  ;;  %4081 = vmatpush1.bf16.msra.mxu1 %v3662_v19  ;;  %v3764_v28 = vunpack.c.l.s8.bf16 %v10711_v31  ;;  %v10712_v19 = vld [vmem:[#allocation106_spill] sm:$0xff] }
 0x661   :  { %4000 = vmatprep.subr.bf16.mxu0 %v3669_v36  ;;  %4082 = vmatprep.subr.bf16.mxu1 %v3671_v16  ;;  %v3766_v22 = vunpack.c.l.s8.bf16 %v10712_v19  ;;  %v3775_v36 = vunpack.c.h.s8.bf16 %v10710_v34  ;;  %v3772_v16 = vunpack.c.h.s8.bf16 %v10711_v31 }
 0x664   :  { %4001 = vmatpush1.bf16.msra.mxu0 %v3668_v26  ;;  %4083 = vmatpush1.bf16.msra.mxu1 %v3670_v42  ;;  %v3774_v26 = vunpack.c.h.s8.bf16 %v10712_v19  ;;  %v10713_v42 = vld [vmem:[#allocation113_spill] sm:$0xff] }
 0x665   :  { %4002 = vmatprep.subr.bf16.mxu0 %v3677_v46  ;;  %4084 = vmatprep.subr.bf16.mxu1 %v3679_v62  ;;  %v3781_v46 = vunpack.c.l.s8.bf16 %v10713_v42  ;;  %v3783_v62 = vunpack.c.l.s8.bf16 %v9685_v32 }
 0x668   :  { %4003 = vmatpush1.bf16.msra.mxu0 %v3676_v17  ;;  %4085 = vmatpush1.bf16.msra.mxu1 %v3678_v2  ;;  %v3780_v17 = vunpack.c.l.s8.bf16 %v9689_v37  ;;  %v3782_v2 = vunpack.c.l.s8.bf16 %v9691_v5 }
 0x669   :  { %4013 = vmatprep.subr.bf16.mxu0 %v3685_v33  ;;  %4095 = vmatprep.subr.bf16.mxu1 %v3687_v20  ;;  %v3789_v33 = vunpack.c.h.s8.bf16 %v10713_v42  ;;  %v3791_v20 = vunpack.c.h.s8.bf16 %v9685_v32  ;;  %v3805_v32 = vunpack.c.h.s8.bf16 %v9693_v0 }
 0x66b   :  { %4005 = vmatmul.mubr.bf16.vlgmr.msra.gmra.mrb[24].mxu0 %v10693_v11  ;;  %4087 = vmatmul.mubr.bf16.vlgmr.msra.gmra.mrb[32].mxu1 %v10693_v11  ;;  %v3700_v11 = vunpack.c.l.s8.bf16 %v9647_v12  ;;  %v3727_v12 = vunpack.c.h.s8.bf16 %v9653_v29  ;;  %v3741_v29 = vunpack.c.h.s8.bf16 %v9659_v61  ;;  %v3750_v61 = vunpack.c.l.s8.bf16 %v10708_v44 }
 0x66c   :  { %4014 = vmatpush1.bf16.msra.mxu0 %v3684_v8  ;;  %4096 = vmatpush1.bf16.msra.mxu1 %v3686_v35  ;;  %v3788_v8 = vunpack.c.h.s8.bf16 %v9689_v37  ;;  %v3790_v35 = vunpack.c.h.s8.bf16 %v9691_v5  ;;  %v3807_v37 = vunpack.c.h.s8.bf16 %v9695_v50 }
 0x66d   :  { %4015 = vmatprep.subr.bf16.mxu0 %v3693_v48  ;;  %4097 = vmatprep.subr.bf16.mxu1 %v3695_v63  ;;  %v3797_v48 = vunpack.c.l.s8.bf16 %v9693_v0  ;;  %v3799_v63 = vunpack.c.l.s8.bf16 %v9695_v50 }
 0x66e   :  { %4045 = vmatprep.mubr.bf16.mxu0 %v10694_v60  ;;  %4127 = vmatprep.mubr.bf16.mxu1 %v10694_v60  ;;  %v3717_v60 = vunpack.c.l.s8.bf16 %v9651_v55  ;;  %v3734_v55 = vunpack.c.l.s8.bf16 %v9665_v47  ;;  %v3756_v47 = vunpack.c.h.s8.bf16 %v10707_v54 }
 0x670   :  { %4016 = vmatpush1.bf16.msra.mxu0 %v3692_v23  ;;  %4098 = vmatpush1.bf16.msra.mxu1 %v3694_v51  ;;  %v10714_v23 = vld [vmem:[#allocation115_spill] sm:$0xff] }
 0x671   :  { %4017 = vmatprep.subr.bf16.mxu0 %v3701_v27  ;;  %4099 = vmatprep.subr.bf16.mxu1 %v3703_v49  ;;  %v3796_v51 = vunpack.c.l.s8.bf16 %v10714_v23  ;;  %v10715_v27 = vld [vmem:[#allocation112_spill] sm:$0xff]  ;;  %v3804_v5 = vunpack.c.h.s8.bf16 %v10714_v23 }
 0x672   :  { %v3798_v49 = vunpack.c.l.s8.bf16 %v10715_v27 }
 0x674   :  { %4018 = vmatpush1.bf16.msra.mxu0 %v3700_v11  ;;  %4100 = vmatpush1.bf16.msra.mxu1 %v3702_v3  ;;  %v3806_v11 = vunpack.c.h.s8.bf16 %v10715_v27  ;;  %v10716_v3 = vld [vmem:[#allocation74_spill] sm:$0xff] }
 0x675   :  { %4019 = vmatprep.subr.bf16.mxu0 %v3709_v9  ;;  %4101 = vmatprep.subr.bf16.mxu1 %v3711_v41 }
 0x678   :  { %4020 = vmatpush1.bf16.msra.mxu0 %v3708_v58  ;;  %4102 = vmatpush1.bf16.msra.mxu1 %v3710_v52 }
 0x679   :  { %4021 = vmatprep.subr.bf16.mxu0 %v3717_v60  ;;  %4103 = vmatprep.subr.bf16.mxu1 %v3719_v59 }
 0x67c   :  { %4022 = vmatpush1.bf16.msra.mxu0 %v3716_v4  ;;  %4104 = vmatpush1.bf16.msra.mxu1 %v3718_v14 }
 0x67d   :  { %4023 = vmatprep.subr.bf16.mxu0 %v3725_v57  ;;  %4105 = vmatprep.subr.bf16.mxu1 %v3727_v12 }
 0x680   :  { %4024 = vmatpush1.bf16.msra.mxu0 %v3724_v24  ;;  %4106 = vmatpush1.bf16.msra.mxu1 %v3726_v18 }
 0x681   :  { %4025 = vmatprep.subr.bf16.mxu0 %v3733_v53  ;;  %4107 = vmatprep.subr.bf16.mxu1 %v3735_v1 }
 0x684   :  { %4026 = vmatpush1.bf16.msra.mxu0 %v3732_v15  ;;  %4108 = vmatpush1.bf16.msra.mxu1 %v3734_v55 }
 0x685   :  { %4027 = vmatprep.subr.bf16.mxu0 %v3741_v29  ;;  %4109 = vmatprep.subr.bf16.mxu1 %v3743_v40 }
 0x688   :  { %4028 = vmatpush1.bf16.msra.mxu0 %v3740_v6  ;;  %4110 = vmatpush1.bf16.msra.mxu1 %v3742_v30 }
 0x689   :  { %4029 = vmatprep.subr.bf16.mxu0 %v3749_v21  ;;  %4111 = vmatprep.subr.bf16.mxu1 %v3751_v43 }
 0x68c   :  { %4030 = vmatpush1.bf16.msra.mxu0 %v3748_v45  ;;  %4112 = vmatpush1.bf16.msra.mxu1 %v3750_v61 }
 0x68d   :  { %4031 = vmatprep.subr.bf16.mxu0 %v3757_v38  ;;  %4113 = vmatprep.subr.bf16.mxu1 %v3759_v39 }
 0x690   :  { %4032 = vmatpush1.bf16.msra.mxu0 %v3756_v47  ;;  %4114 = vmatpush1.bf16.msra.mxu1 %v3758_v13 }
 0x691   :  { %4033 = vmatprep.subr.bf16.mxu0 %v3765_v25  ;;  %4115 = vmatprep.subr.bf16.mxu1 %v3767_v56 }
 0x694   :  { %4034 = vmatpush1.bf16.msra.mxu0 %v3764_v28  ;;  %4116 = vmatpush1.bf16.msra.mxu1 %v3766_v22 }
 0x695   :  { %4035 = vmatprep.subr.bf16.mxu0 %v3773_v7  ;;  %4117 = vmatprep.subr.bf16.mxu1 %v3775_v36 }
 0x698   :  { %4036 = vmatpush1.bf16.msra.mxu0 %v3772_v16  ;;  %4118 = vmatpush1.bf16.msra.mxu1 %v3774_v26 }
 0x699   :  { %4037 = vmatprep.subr.bf16.mxu0 %v3781_v46  ;;  %4119 = vmatprep.subr.bf16.mxu1 %v3783_v62 }
 0x69c   :  { %4038 = vmatpush1.bf16.msra.mxu0 %v3780_v17  ;;  %4120 = vmatpush1.bf16.msra.mxu1 %v3782_v2 }
 0x69d   :  { %4039 = vmatprep.subr.bf16.mxu0 %v3789_v33  ;;  %4121 = vmatprep.subr.bf16.mxu1 %v3791_v20 }
 0x6a0   :  { %4040 = vmatpush1.bf16.msra.mxu0 %v3788_v8  ;;  %4122 = vmatpush1.bf16.msra.mxu1 %v3790_v35 }
 0x6a1   :  { %4041 = vmatprep.subr.bf16.mxu0 %v3797_v48  ;;  %4123 = vmatprep.subr.bf16.mxu1 %v3799_v63 }
 0x6a4   :  { %4042 = vmatpush1.bf16.msra.mxu0 %v3796_v51  ;;  %4124 = vmatpush1.bf16.msra.mxu1 %v3798_v49 }
 0x6a5   :  { %4043 = vmatprep.subr.bf16.mxu0 %v3805_v32  ;;  %4125 = vmatprep.subr.bf16.mxu1 %v3807_v37 }
 0x6a8   :  { %4044 = vmatpush1.bf16.msra.mxu0 %v3804_v5  ;;  %4126 = vmatpush1.bf16.msra.mxu1 %v3806_v11 }
 0x6ab   :  { %4046 = vmatmul.mubr.bf16.vlgmr.msra.gmra.mrb[24].mxu0 %v10716_v3  ;;  %4128 = vmatmul.mubr.bf16.vlgmr.msra.gmra.mrb[32].mxu1 %v10716_v3 }
 0x6ac   :  { %7598 = dma.done.wait [#allocation3], 16384 }
 0x6ad   :  { %7599 = vsyncadd [#allocation3], 4294950912  ;;  %v10717_v9 = vld [vmem:[#allocation73_spill] sm:$0xff]  ;;  %v4161_v50 = vld [vmem:[#allocation2 + $0x18] sm:$0xff] }
 0x6ae   :  { %4574 = vmatprep.mubr.bf16.mxu0 %v10717_v9  ;;  %4656 = vmatprep.mubr.bf16.mxu1 %v10717_v9  ;;  %v4159_v0 = vld [vmem:[#allocation2 + $0x8] sm:$0xff]  ;;  %v4158_v41 = vld [vmem:[#allocation2] sm:$0xff]  ;;  %v4289_v60 = vunpack.c.l.s8.bf16 %v4161_v50  ;;  %v4297_v59 = vunpack.c.h.s8.bf16 %v4161_v50  ;;  %v4160_v4 = vld [vmem:[#allocation2 + $0x10] sm:$0xff] }
 0x6af   :  { %v4287_v58 = vunpack.c.l.s8.bf16 %v4159_v0  ;;  %v4295_v52 = vunpack.c.h.s8.bf16 %v4159_v0  ;;  %v4286_v14 = vunpack.c.l.s8.bf16 %v4158_v41  ;;  %v4288_v57 = vunpack.c.l.s8.bf16 %v4160_v4  ;;  %v4167_v12 = vld [vmem:[#allocation2 + $0x48] sm:$0xff]  ;;  %v4169_v24 = vld [vmem:[#allocation2 + $0x58] sm:$0xff]  ;;  %v4166_v55 = vld [vmem:[#allocation2 + $0x40] sm:$0xff] }
 0x6b0   :  { %4624 = vmatprep.subr.bf16.mxu1 %v4289_v60  ;;  %v4294_v18 = vunpack.c.h.s8.bf16 %v4158_v41  ;;  %v4296_v53 = vunpack.c.h.s8.bf16 %v4160_v4  ;;  %v4303_v1 = vunpack.c.l.s8.bf16 %v4167_v12  ;;  %v4305_v15 = vunpack.c.l.s8.bf16 %v4169_v24  ;;  %v4168_v29 = vld [vmem:[#allocation2 + $0x50] sm:$0xff]  ;;  %v4175_v43 = vld [vmem:[#allocation2 + $0x88] sm:$0xff]  ;;  %v4177_v54 = vld [vmem:[#allocation2 + $0x98] sm:$0xff] }
 0x6b1   :  { %4542 = vmatprep.subr.bf16.mxu0 %v4287_v58  ;;  %4625 = vmatpush1.bf16.msra.mxu1 %v4288_v57  ;;  %v4302_v40 = vunpack.c.l.s8.bf16 %v4166_v55  ;;  %v4304_v6 = vunpack.c.l.s8.bf16 %v4168_v29  ;;  %v4311_v30 = vunpack.c.h.s8.bf16 %v4167_v12  ;;  %v4313_v21 = vunpack.c.h.s8.bf16 %v4169_v24  ;;  %v4174_v39 = vld [vmem:[#allocation2 + $0x80] sm:$0xff]  ;;  %v4176_v47 = vld [vmem:[#allocation2 + $0x90] sm:$0xff]  ;;  %v4183_v56 = vld [vmem:[#allocation2 + $0xc8] sm:$0xff] }
 0x6b2   :  { %4543 = vmatpush1.bf16.msra.mxu0 %v4286_v14  ;;  %4626 = vmatprep.subr.bf16.mxu1 %v4297_v59  ;;  %v4310_v45 = vunpack.c.h.s8.bf16 %v4166_v55  ;;  %v4312_v44 = vunpack.c.h.s8.bf16 %v4168_v29  ;;  %v4319_v61 = vunpack.c.l.s8.bf16 %v4175_v43  ;;  %v4321_v38 = vunpack.c.l.s8.bf16 %v4177_v54  ;;  %v4185_v31 = vld [vmem:[#allocation2 + $0xd8] sm:$0xff]  ;;  %v4182_v36 = vld [vmem:[#allocation2 + $0xc0] sm:$0xff]  ;;  %v4184_v16 = vld [vmem:[#allocation2 + $0xd0] sm:$0xff] }
 0x6b3   :  { %4544 = vmatprep.subr.bf16.mxu0 %v4295_v52  ;;  %v4318_v13 = vunpack.c.l.s8.bf16 %v4174_v39  ;;  %v4320_v10 = vunpack.c.l.s8.bf16 %v4176_v47  ;;  %v4327_v25 = vunpack.c.h.s8.bf16 %v4175_v43  ;;  %v4329_v34 = vunpack.c.h.s8.bf16 %v4177_v54  ;;  %v4191_v17 = vld [vmem:[#allocation2 + $0x108] sm:$0xff]  ;;  %v4193_v2 = vld [vmem:[#allocation2 + $0x118] sm:$0xff]  ;;  %v4190_v48 = vld [vmem:[#allocation2 + $0x100] sm:$0xff] }
 0x6b4   :  { %v4326_v28 = vunpack.c.h.s8.bf16 %v4174_v39  ;;  %v4328_v19 = vunpack.c.h.s8.bf16 %v4176_v47  ;;  %v4335_v22 = vunpack.c.l.s8.bf16 %v4183_v56  ;;  %v4337_v7 = vunpack.c.l.s8.bf16 %v4185_v31  ;;  %v4192_v63 = vld [vmem:[#allocation2 + $0x110] sm:$0xff]  ;;  %v4199_v32 = vld [vmem:[#allocation2 + $0x148] sm:$0xff]  ;;  %v4201_v37 = vld [vmem:[#allocation2 + $0x158] sm:$0xff] }
 0x6b5   :  { %4627 = vmatpush1.bf16.msra.mxu1 %v4296_v53  ;;  %v4334_v26 = vunpack.c.l.s8.bf16 %v4182_v36  ;;  %v4336_v42 = vunpack.c.l.s8.bf16 %v4184_v16  ;;  %v4343_v46 = vunpack.c.h.s8.bf16 %v4183_v56  ;;  %v4345_v62 = vunpack.c.h.s8.bf16 %v4185_v31  ;;  %v4198_v50 = vld [vmem:[#allocation2 + $0x140] sm:$0xff]  ;;  %v4200_v41 = vld [vmem:[#allocation2 + $0x150] sm:$0xff]  ;;  %v4207_v4 = vld [vmem:[#allocation2 + $0x188] sm:$0xff] }
 0x6b6   :  { %4545 = vmatpush1.bf16.msra.mxu0 %v4294_v18  ;;  %4628 = vmatprep.subr.bf16.mxu1 %v4305_v15  ;;  %v4342_v33 = vunpack.c.h.s8.bf16 %v4182_v36  ;;  %v4344_v20 = vunpack.c.h.s8.bf16 %v4184_v16  ;;  %v4351_v8 = vunpack.c.l.s8.bf16 %v4191_v17  ;;  %v4353_v35 = vunpack.c.l.s8.bf16 %v4193_v2  ;;  %v4209_v14 = vld [vmem:[#allocation2 + $0x198] sm:$0xff]  ;;  %v4206_v53 = vld [vmem:[#allocation2 + $0x180] sm:$0xff] }
 0x6b7   :  { %4546 = vmatprep.subr.bf16.mxu0 %v4303_v1  ;;  %v4350_v23 = vunpack.c.l.s8.bf16 %v4190_v48  ;;  %v4352_v51 = vunpack.c.l.s8.bf16 %v4192_v63  ;;  %v4359_v27 = vunpack.c.h.s8.bf16 %v4191_v17  ;;  %v4361_v49 = vunpack.c.h.s8.bf16 %v4193_v2  ;;  %v4208_v1 = vld [vmem:[#allocation2 + $0x190] sm:$0xff] }
 0x6b8   :  { %v4358_v5 = vunpack.c.h.s8.bf16 %v4190_v48  ;;  %v4360_v11 = vunpack.c.h.s8.bf16 %v4192_v63  ;;  %v4367_v3 = vunpack.c.l.s8.bf16 %v4199_v32  ;;  %v4369_v0 = vunpack.c.l.s8.bf16 %v4201_v37  ;;  %v10719_v48 = vld [vmem:[#allocation79_spill] sm:$0xff] }
 0x6b9   :  { %4629 = vmatpush1.bf16.msra.mxu1 %v4304_v6  ;;  %v4366_v58 = vunpack.c.l.s8.bf16 %v4198_v50  ;;  %v4368_v52 = vunpack.c.l.s8.bf16 %v4200_v41  ;;  %v4375_v60 = vunpack.c.h.s8.bf16 %v4199_v32  ;;  %v4377_v59 = vunpack.c.h.s8.bf16 %v4201_v37  ;;  %v4215_v6 = vld [vmem:[#allocation2 + $0x1c8] sm:$0xff]  ;;  %v4241_v32 = vld [vmem:[#allocation2 + $0x298] sm:$0xff] }
 0x6ba   :  { %4547 = vmatpush1.bf16.msra.mxu0 %v4302_v40  ;;  %4630 = vmatprep.subr.bf16.mxu1 %v4313_v21  ;;  %v4374_v57 = vunpack.c.h.s8.bf16 %v4198_v50  ;;  %v4376_v12 = vunpack.c.h.s8.bf16 %v4200_v41  ;;  %v4383_v24 = vunpack.c.l.s8.bf16 %v4207_v4  ;;  %v4385_v18 = vunpack.c.l.s8.bf16 %v4209_v14  ;;  %v4240_v50 = vld [vmem:[#allocation2 + $0x290] sm:$0xff] }
 0x6bb   :  { %4548 = vmatprep.subr.bf16.mxu0 %v4311_v30  ;;  %v4382_v15 = vunpack.c.l.s8.bf16 %v4206_v53  ;;  %v4384_v55 = vunpack.c.l.s8.bf16 %v4208_v1  ;;  %v4391_v29 = vunpack.c.h.s8.bf16 %v4207_v4  ;;  %v4393_v40 = vunpack.c.h.s8.bf16 %v4209_v14  ;;  %v4217_v30 = vld [vmem:[#allocation2 + $0x1d8] sm:$0xff] }
 0x6bc   :  { %v4390_v21 = vunpack.c.h.s8.bf16 %v4206_v53  ;;  %v4392_v43 = vunpack.c.h.s8.bf16 %v4208_v1  ;;  %v4399_v54 = vunpack.c.l.s8.bf16 %v4215_v6  ;;  %v4407_v47 = vunpack.c.h.s8.bf16 %v4215_v6  ;;  %v4249_v4 = vld [vmem:[#allocation2 + $0x2d8] sm:$0xff]  ;;  %v4248_v53 = vld [vmem:[#allocation2 + $0x2d0] sm:$0xff] }
 0x6bd   :  { %4631 = vmatpush1.bf16.msra.mxu1 %v4312_v44  ;;  %v4214_v44 = vld [vmem:[#allocation2 + $0x1c0] sm:$0xff]  ;;  %v4257_v6 = vld [vmem:[#allocation2 + $0x318] sm:$0xff] }
 0x6be   :  { %4549 = vmatpush1.bf16.msra.mxu0 %v4310_v45  ;;  %4632 = vmatprep.subr.bf16.mxu1 %v4321_v38  ;;  %v4401_v45 = vunpack.c.l.s8.bf16 %v4217_v30  ;;  %v4398_v38 = vunpack.c.l.s8.bf16 %v4214_v44 }
 0x6bf   :  { %4550 = vmatprep.subr.bf16.mxu0 %v4319_v61  ;;  %v4216_v61 = vld [vmem:[#allocation2 + $0x1d0] sm:$0xff] }
 0x6c0   :  { %v4400_v39 = vunpack.c.l.s8.bf16 %v4216_v61  ;;  %v4408_v56 = vunpack.c.h.s8.bf16 %v4216_v61 }
 0x6c1   :  { %4633 = vmatpush1.bf16.msra.mxu1 %v4320_v10  ;;  %v4223_v10 = vld [vmem:[#allocation2 + $0x208] sm:$0xff] }
 0x6c2   :  { %4551 = vmatpush1.bf16.msra.mxu0 %v4318_v13  ;;  %4634 = vmatprep.subr.bf16.mxu1 %v4329_v34  ;;  %v4409_v13 = vunpack.c.h.s8.bf16 %v4217_v30  ;;  %v4406_v34 = vunpack.c.h.s8.bf16 %v4214_v44  ;;  %v4415_v31 = vunpack.c.l.s8.bf16 %v4223_v10  ;;  %v4423_v16 = vunpack.c.h.s8.bf16 %v4223_v10  ;;  %v4256_v44 = vld [vmem:[#allocation2 + $0x310] sm:$0xff]  ;;  %v4265_v10 = vld [vmem:[#allocation2 + $0x358] sm:$0xff] }
 0x6c3   :  { %4552 = vmatprep.subr.bf16.mxu0 %v4327_v25  ;;  %v4225_v25 = vld [vmem:[#allocation2 + $0x218] sm:$0xff] }
 0x6c5   :  { %4635 = vmatpush1.bf16.msra.mxu1 %v4328_v19  ;;  %v4222_v19 = vld [vmem:[#allocation2 + $0x200] sm:$0xff] }
 0x6c6   :  { %4553 = vmatpush1.bf16.msra.mxu0 %v4326_v28  ;;  %4636 = vmatprep.subr.bf16.mxu1 %v4337_v7  ;;  %v4417_v28 = vunpack.c.l.s8.bf16 %v4225_v25  ;;  %v4414_v7 = vunpack.c.l.s8.bf16 %v4222_v19  ;;  %v4422_v17 = vunpack.c.h.s8.bf16 %v4222_v19  ;;  %v4264_v19 = vld [vmem:[#allocation2 + $0x350] sm:$0xff] }
 0x6c7   :  { %4554 = vmatprep.subr.bf16.mxu0 %v4335_v22  ;;  %v4224_v22 = vld [vmem:[#allocation2 + $0x210] sm:$0xff] }
 0x6c8   :  { %v4416_v36 = vunpack.c.l.s8.bf16 %v4224_v22  ;;  %v4424_v2 = vunpack.c.h.s8.bf16 %v4224_v22 }
 0x6c9   :  { %4637 = vmatpush1.bf16.msra.mxu1 %v4336_v42  ;;  %v4231_v42 = vld [vmem:[#allocation2 + $0x248] sm:$0xff] }
 0x6ca   :  { %4555 = vmatpush1.bf16.msra.mxu0 %v4334_v26  ;;  %4638 = vmatprep.subr.bf16.mxu1 %v4345_v62  ;;  %v4425_v26 = vunpack.c.h.s8.bf16 %v4225_v25  ;;  %v10718_v62 = vld [vmem:[#allocation72_spill] sm:$0xff] }
 0x6cb   :  { %4556 = vmatprep.subr.bf16.mxu0 %v4343_v46  ;;  %v4233_v46 = vld [vmem:[#allocation2 + $0x258] sm:$0xff] }
 0x6cd   :  { %4639 = vmatpush1.bf16.msra.mxu1 %v4344_v20  ;;  %v4433_v20 = vunpack.c.l.s8.bf16 %v4233_v46 }
 0x6ce   :  { %4557 = vmatpush1.bf16.msra.mxu0 %v4342_v33  ;;  %4640 = vmatprep.subr.bf16.mxu1 %v4353_v35  ;;  %v4431_v33 = vunpack.c.l.s8.bf16 %v4231_v42  ;;  %v4232_v35 = vld [vmem:[#allocation2 + $0x250] sm:$0xff] }
 0x6cf   :  { %4558 = vmatprep.subr.bf16.mxu0 %v4351_v8  ;;  %v4230_v8 = vld [vmem:[#allocation2 + $0x240] sm:$0xff] }
 0x6d0   :  { %v4430_v63 = vunpack.c.l.s8.bf16 %v4230_v8  ;;  %v4438_v37 = vunpack.c.h.s8.bf16 %v4230_v8  ;;  %v4272_v8 = vld [vmem:[#allocation2 + $0x390] sm:$0xff] }
 0x6d1   :  { %4641 = vmatpush1.bf16.msra.mxu1 %v4352_v51  ;;  %v4439_v51 = vunpack.c.h.s8.bf16 %v4231_v42  ;;  %v4273_v42 = vld [vmem:[#allocation2 + $0x398] sm:$0xff] }
 0x6d2   :  { %4559 = vmatpush1.bf16.msra.mxu0 %v4350_v23  ;;  %4642 = vmatprep.subr.bf16.mxu1 %v4361_v49  ;;  %v4432_v23 = vunpack.c.l.s8.bf16 %v4232_v35  ;;  %v4239_v49 = vld [vmem:[#allocation2 + $0x288] sm:$0xff] }
 0x6d3   :  { %4560 = vmatprep.subr.bf16.mxu0 %v4359_v27  ;;  %v4441_v27 = vunpack.c.h.s8.bf16 %v4233_v46 }
 0x6d5   :  { %4643 = vmatpush1.bf16.msra.mxu1 %v4360_v11  ;;  %v4447_v11 = vunpack.c.l.s8.bf16 %v4239_v49 }
 0x6d6   :  { %4561 = vmatpush1.bf16.msra.mxu0 %v4358_v5  ;;  %4644 = vmatprep.subr.bf16.mxu1 %v4369_v0  ;;  %v4440_v5 = vunpack.c.h.s8.bf16 %v4232_v35  ;;  %v4238_v0 = vld [vmem:[#allocation2 + $0x280] sm:$0xff] }
 0x6d7   :  { %4562 = vmatprep.subr.bf16.mxu0 %v4367_v3  ;;  %v4449_v3 = vunpack.c.l.s8.bf16 %v4241_v32  ;;  %v4446_v41 = vunpack.c.l.s8.bf16 %v4238_v0  ;;  %v4454_v14 = vunpack.c.h.s8.bf16 %v4238_v0  ;;  %v4280_v0 = vld [vmem:[#allocation2 + $0x3d0] sm:$0xff] }
 0x6d9   :  { %4645 = vmatpush1.bf16.msra.mxu1 %v4368_v52  ;;  %v4455_v52 = vunpack.c.h.s8.bf16 %v4239_v49  ;;  %v4281_v49 = vld [vmem:[#allocation2 + $0x3d8] sm:$0xff] }
 0x6da   :  { %4563 = vmatpush1.bf16.msra.mxu0 %v4366_v58  ;;  %4646 = vmatprep.subr.bf16.mxu1 %v4377_v59  ;;  %v4448_v58 = vunpack.c.l.s8.bf16 %v4240_v50  ;;  %v4247_v59 = vld [vmem:[#allocation2 + $0x2c8] sm:$0xff] }
 0x6db   :  { %4564 = vmatprep.subr.bf16.mxu0 %v4375_v60  ;;  %v4457_v60 = vunpack.c.h.s8.bf16 %v4241_v32 }
 0x6dd   :  { %4647 = vmatpush1.bf16.msra.mxu1 %v4376_v12  ;;  %v4463_v12 = vunpack.c.l.s8.bf16 %v4247_v59 }
 0x6de   :  { %4565 = vmatpush1.bf16.msra.mxu0 %v4374_v57  ;;  %4648 = vmatprep.subr.bf16.mxu1 %v4385_v18  ;;  %v4456_v57 = vunpack.c.h.s8.bf16 %v4240_v50  ;;  %v4246_v18 = vld [vmem:[#allocation2 + $0x2c0] sm:$0xff] }
 0x6df   :  { %4566 = vmatprep.subr.bf16.mxu0 %v4383_v24  ;;  %v4465_v24 = vunpack.c.l.s8.bf16 %v4249_v4  ;;  %v4462_v1 = vunpack.c.l.s8.bf16 %v4246_v18  ;;  %v4470_v30 = vunpack.c.h.s8.bf16 %v4246_v18  ;;  %v4164_v18 = vld [vmem:[#allocation2 + $0x30] sm:$0xff] }
 0x6e1   :  { %4649 = vmatpush1.bf16.msra.mxu1 %v4384_v55  ;;  %v4471_v55 = vunpack.c.h.s8.bf16 %v4247_v59  ;;  %v4165_v59 = vld [vmem:[#allocation2 + $0x38] sm:$0xff] }
 0x6e2   :  { %4567 = vmatpush1.bf16.msra.mxu0 %v4382_v15  ;;  %4650 = vmatprep.subr.bf16.mxu1 %v4393_v40  ;;  %v4464_v15 = vunpack.c.l.s8.bf16 %v4248_v53  ;;  %v4255_v40 = vld [vmem:[#allocation2 + $0x308] sm:$0xff] }
 0x6e3   :  { %4568 = vmatprep.subr.bf16.mxu0 %v4391_v29  ;;  %v4473_v29 = vunpack.c.h.s8.bf16 %v4249_v4 }
 0x6e5   :  { %4651 = vmatpush1.bf16.msra.mxu1 %v4392_v43  ;;  %v4479_v43 = vunpack.c.l.s8.bf16 %v4255_v40 }
 0x6e6   :  { %4569 = vmatpush1.bf16.msra.mxu0 %v4390_v21  ;;  %4652 = vmatprep.subr.bf16.mxu1 %v4401_v45  ;;  %v4472_v21 = vunpack.c.h.s8.bf16 %v4248_v53  ;;  %v4254_v45 = vld [vmem:[#allocation2 + $0x300] sm:$0xff] }
 0x6e7   :  { %4570 = vmatprep.subr.bf16.mxu0 %v4399_v54  ;;  %v4481_v54 = vunpack.c.l.s8.bf16 %v4257_v6  ;;  %v4478_v61 = vunpack.c.l.s8.bf16 %v4254_v45  ;;  %v4486_v25 = vunpack.c.h.s8.bf16 %v4254_v45  ;;  %v4170_v45 = vld [vmem:[#allocation2 + $0x60] sm:$0xff] }
 0x6e9   :  { %4653 = vmatpush1.bf16.msra.mxu1 %v4400_v39  ;;  %v4487_v39 = vunpack.c.h.s8.bf16 %v4255_v40  ;;  %v4173_v40 = vld [vmem:[#allocation2 + $0x78] sm:$0xff] }
 0x6ea   :  { %4571 = vmatpush1.bf16.msra.mxu0 %v4398_v38  ;;  %4654 = vmatprep.subr.bf16.mxu1 %v4409_v13  ;;  %v4480_v38 = vunpack.c.l.s8.bf16 %v4256_v44  ;;  %v4263_v13 = vld [vmem:[#allocation2 + $0x348] sm:$0xff] }
 0x6eb   :  { %4572 = vmatprep.subr.bf16.mxu0 %v4407_v47  ;;  %v4489_v47 = vunpack.c.h.s8.bf16 %v4257_v6  ;;  %v10720_v6 = vld [vmem:[#allocation78_spill] sm:$0xff] }
 0x6ed   :  { %4655 = vmatpush1.bf16.msra.mxu1 %v4408_v56  ;;  %v4495_v56 = vunpack.c.l.s8.bf16 %v4263_v13 }
 0x6ee   :  { %4573 = vmatpush1.bf16.msra.mxu0 %v4406_v34  ;;  %4665 = vmatprep.subr.bf16.mxu1 %v4417_v28  ;;  %v4488_v34 = vunpack.c.h.s8.bf16 %v4256_v44  ;;  %v4262_v28 = vld [vmem:[#allocation2 + $0x340] sm:$0xff]  ;;  %v4172_v44 = vld [vmem:[#allocation2 + $0x70] sm:$0xff] }
 0x6ef   :  { %4583 = vmatprep.subr.bf16.mxu0 %v4415_v31  ;;  %v4497_v31 = vunpack.c.l.s8.bf16 %v4265_v10  ;;  %v4494_v22 = vunpack.c.l.s8.bf16 %v4262_v28  ;;  %v4502_v46 = vunpack.c.h.s8.bf16 %v4262_v28  ;;  %v4178_v28 = vld [vmem:[#allocation2 + $0xa0] sm:$0xff] }
 0x6f0   :  { %4657 = vmatmul.mubr.bf16.vlgmr.msra.gmra.mrb[28].mxu1 %v10718_v62 }
 0x6f1   :  { %4575 = vmatmul.mubr.bf16.vlgmr.msra.gmra.mrb[20].mxu0 %v10718_v62  ;;  %4666 = vmatpush1.bf16.msra.mxu1 %v4416_v36  ;;  %v4503_v36 = vunpack.c.h.s8.bf16 %v4263_v13  ;;  %v4179_v13 = vld [vmem:[#allocation2 + $0xa8] sm:$0xff] }
 0x6f2   :  { %4584 = vmatpush1.bf16.msra.mxu0 %v4414_v7  ;;  %4667 = vmatprep.subr.bf16.mxu1 %v4425_v26  ;;  %v4496_v7 = vunpack.c.l.s8.bf16 %v4264_v19  ;;  %v4271_v26 = vld [vmem:[#allocation2 + $0x388] sm:$0xff] }
 0x6f3   :  { %4585 = vmatprep.subr.bf16.mxu0 %v4423_v16  ;;  %4615 = vmatprep.mubr.bf16.mxu0 %v10719_v48  ;;  %v4505_v16 = vunpack.c.h.s8.bf16 %v4265_v10  ;;  %v4181_v10 = vld [vmem:[#allocation2 + $0xb8] sm:$0xff] }
 0x6f4   :  { %4697 = vmatprep.mubr.bf16.mxu1 %v10719_v48 }
 0x6f5   :  { %4668 = vmatpush1.bf16.msra.mxu1 %v4424_v2  ;;  %v4511_v2 = vunpack.c.l.s8.bf16 %v4271_v26 }
 0x6f6   :  { %4586 = vmatpush1.bf16.msra.mxu0 %v4422_v17  ;;  %4669 = vmatprep.subr.bf16.mxu1 %v4433_v20  ;;  %v4504_v17 = vunpack.c.h.s8.bf16 %v4264_v19  ;;  %v4270_v20 = vld [vmem:[#allocation2 + $0x380] sm:$0xff]  ;;  %v4322_v19 = vunpack.c.l.s8.bf16 %v4178_v28 }
 0x6f7   :  { %4587 = vmatprep.subr.bf16.mxu0 %v4431_v33  ;;  %v4513_v33 = vunpack.c.l.s8.bf16 %v4273_v42  ;;  %v4510_v35 = vunpack.c.l.s8.bf16 %v4270_v20  ;;  %v4518_v32 = vunpack.c.h.s8.bf16 %v4270_v20  ;;  %v4188_v20 = vld [vmem:[#allocation2 + $0xf0] sm:$0xff] }
 0x6f9   :  { %4670 = vmatpush1.bf16.msra.mxu1 %v4432_v23  ;;  %v4519_v23 = vunpack.c.h.s8.bf16 %v4271_v26  ;;  %v4189_v26 = vld [vmem:[#allocation2 + $0xf8] sm:$0xff] }
 0x6fa   :  { %4588 = vmatpush1.bf16.msra.mxu0 %v4430_v63  ;;  %4671 = vmatprep.subr.bf16.mxu1 %v4441_v27  ;;  %v4512_v63 = vunpack.c.l.s8.bf16 %v4272_v8  ;;  %v4279_v27 = vld [vmem:[#allocation2 + $0x3c8] sm:$0xff] }
 0x6fb   :  { %4589 = vmatprep.subr.bf16.mxu0 %v4439_v51  ;;  %v4521_v51 = vunpack.c.h.s8.bf16 %v4273_v42  ;;  %v4330_v42 = vunpack.c.h.s8.bf16 %v4178_v28  ;;  %v4220_v28 = vld [vmem:[#allocation2 + $0x1f0] sm:$0xff] }
 0x6fd   :  { %4672 = vmatpush1.bf16.msra.mxu1 %v4440_v5  ;;  %v4527_v5 = vunpack.c.l.s8.bf16 %v4279_v27 }
 0x6fe   :  { %4590 = vmatpush1.bf16.msra.mxu0 %v4438_v37  ;;  %4673 = vmatprep.subr.bf16.mxu1 %v4449_v3  ;;  %v4520_v37 = vunpack.c.h.s8.bf16 %v4272_v8  ;;  %v4278_v3 = vld [vmem:[#allocation2 + $0x3c0] sm:$0xff] }
 0x6ff   :  { %4591 = vmatprep.subr.bf16.mxu0 %v4447_v11  ;;  %v4529_v11 = vunpack.c.l.s8.bf16 %v4281_v49  ;;  %v4526_v50 = vunpack.c.l.s8.bf16 %v4278_v3  ;;  %v4534_v4 = vunpack.c.h.s8.bf16 %v4278_v3  ;;  %v4196_v3 = vld [vmem:[#allocation2 + $0x130] sm:$0xff] }
 0x701   :  { %4674 = vmatpush1.bf16.msra.mxu1 %v4448_v58  ;;  %v4535_v58 = vunpack.c.h.s8.bf16 %v4279_v27  ;;  %v4197_v27 = vld [vmem:[#allocation2 + $0x138] sm:$0xff] }
 0x702   :  { %4592 = vmatpush1.bf16.msra.mxu0 %v4446_v41  ;;  %4675 = vmatprep.subr.bf16.mxu1 %v4457_v60  ;;  %v4528_v41 = vunpack.c.l.s8.bf16 %v4280_v0  ;;  %v4163_v60 = vld [vmem:[#allocation2 + $0x28] sm:$0xff] }
 0x703   :  { %4593 = vmatprep.subr.bf16.mxu0 %v4455_v52  ;;  %v4537_v52 = vunpack.c.h.s8.bf16 %v4281_v49 }
 0x705   :  { %4676 = vmatpush1.bf16.msra.mxu1 %v4456_v57  ;;  %v4291_v57 = vunpack.c.l.s8.bf16 %v4163_v60 }
 0x706   :  { %4594 = vmatpush1.bf16.msra.mxu0 %v4454_v14  ;;  %4677 = vmatprep.subr.bf16.mxu1 %v4465_v24  ;;  %v4536_v14 = vunpack.c.h.s8.bf16 %v4280_v0  ;;  %v4162_v24 = vld [vmem:[#allocation2 + $0x20] sm:$0xff] }
 0x707   :  { %4595 = vmatprep.subr.bf16.mxu0 %v4463_v12  ;;  %v4293_v12 = vunpack.c.l.s8.bf16 %v4165_v59  ;;  %v4290_v53 = vunpack.c.l.s8.bf16 %v4162_v24 }
 0x709   :  { %4678 = vmatpush1.bf16.msra.mxu1 %v4464_v15  ;;  %v4299_v15 = vunpack.c.h.s8.bf16 %v4163_v60  ;;  %v4205_v60 = vld [vmem:[#allocation2 + $0x178] sm:$0xff] }
 0x70a   :  { %4596 = vmatpush1.bf16.msra.mxu0 %v4462_v1  ;;  %4679 = vmatprep.subr.bf16.mxu1 %v4473_v29  ;;  %v4292_v1 = vunpack.c.l.s8.bf16 %v4164_v18  ;;  %v4171_v29 = vld [vmem:[#allocation2 + $0x68] sm:$0xff] }
 0x70b   :  { %4597 = vmatprep.subr.bf16.mxu0 %v4471_v55  ;;  %v4301_v55 = vunpack.c.h.s8.bf16 %v4165_v59 }
 0x70d   :  { %4680 = vmatpush1.bf16.msra.mxu1 %v4472_v21  ;;  %v4300_v21 = vunpack.c.h.s8.bf16 %v4164_v18 }
 0x70e   :  { %4598 = vmatpush1.bf16.msra.mxu0 %v4470_v30  ;;  %4681 = vmatprep.subr.bf16.mxu1 %v4481_v54  ;;  %v4298_v30 = vunpack.c.h.s8.bf16 %v4162_v24  ;;  %v4309_v54 = vunpack.c.l.s8.bf16 %v4173_v40  ;;  %v4204_v24 = vld [vmem:[#allocation2 + $0x170] sm:$0xff] }
 0x70f   :  { %4599 = vmatprep.subr.bf16.mxu0 %v4479_v43  ;;  %v4307_v43 = vunpack.c.l.s8.bf16 %v4171_v29 }
 0x711   :  { %4682 = vmatpush1.bf16.msra.mxu1 %v4480_v38  ;;  %v4308_v38 = vunpack.c.l.s8.bf16 %v4172_v44 }
 0x712   :  { %4600 = vmatpush1.bf16.msra.mxu0 %v4478_v61  ;;  %4683 = vmatprep.subr.bf16.mxu1 %v4489_v47  ;;  %v4306_v61 = vunpack.c.l.s8.bf16 %v4170_v45  ;;  %v4317_v47 = vunpack.c.h.s8.bf16 %v4173_v40 }
 0x713   :  { %4601 = vmatprep.subr.bf16.mxu0 %v4487_v39  ;;  %v4315_v39 = vunpack.c.h.s8.bf16 %v4171_v29  ;;  %v4213_v29 = vld [vmem:[#allocation2 + $0x1b8] sm:$0xff] }
 0x715   :  { %4684 = vmatpush1.bf16.msra.mxu1 %v4488_v34  ;;  %v4316_v34 = vunpack.c.h.s8.bf16 %v4172_v44 }
 0x716   :  { %4602 = vmatpush1.bf16.msra.mxu0 %v4486_v25  ;;  %4685 = vmatprep.subr.bf16.mxu1 %v4497_v31  ;;  %v4314_v25 = vunpack.c.h.s8.bf16 %v4170_v45  ;;  %v4325_v31 = vunpack.c.l.s8.bf16 %v4181_v10  ;;  %v4212_v45 = vld [vmem:[#allocation2 + $0x1b0] sm:$0xff] }
 0x717   :  { %4603 = vmatprep.subr.bf16.mxu0 %v4495_v56  ;;  %v4323_v56 = vunpack.c.l.s8.bf16 %v4179_v13 }
 0x719   :  { %4686 = vmatpush1.bf16.msra.mxu1 %v4496_v7  ;;  %v4331_v7 = vunpack.c.h.s8.bf16 %v4179_v13  ;;  %v4221_v13 = vld [vmem:[#allocation2 + $0x1f8] sm:$0xff] }
 0x71a   :  { %4604 = vmatpush1.bf16.msra.mxu0 %v4494_v22  ;;  %4687 = vmatprep.subr.bf16.mxu1 %v4505_v16  ;;  %v4187_v16 = vld [vmem:[#allocation2 + $0xe8] sm:$0xff] }
 0x71b   :  { %4605 = vmatprep.subr.bf16.mxu0 %v4503_v36  ;;  %v4333_v36 = vunpack.c.h.s8.bf16 %v4181_v10 }
 0x71d   :  { %4688 = vmatpush1.bf16.msra.mxu1 %v4504_v17  ;;  %v4339_v17 = vunpack.c.l.s8.bf16 %v4187_v16 }
 0x71e   :  { %4606 = vmatpush1.bf16.msra.mxu0 %v4502_v46  ;;  %4689 = vmatprep.subr.bf16.mxu1 %v4513_v33  ;;  %v4186_v33 = vld [vmem:[#allocation2 + $0xe0] sm:$0xff] }
 0x71f   :  { %4607 = vmatprep.subr.bf16.mxu0 %v4511_v2  ;;  %v4341_v2 = vunpack.c.l.s8.bf16 %v4189_v26  ;;  %v4338_v8 = vunpack.c.l.s8.bf16 %v4186_v33  ;;  %v4346_v49 = vunpack.c.h.s8.bf16 %v4186_v33  ;;  %v4228_v33 = vld [vmem:[#allocation2 + $0x230] sm:$0xff] }
 0x721   :  { %4690 = vmatpush1.bf16.msra.mxu1 %v4512_v63  ;;  %v4347_v63 = vunpack.c.h.s8.bf16 %v4187_v16  ;;  %v4229_v16 = vld [vmem:[#allocation2 + $0x238] sm:$0xff] }
 0x722   :  { %4608 = vmatpush1.bf16.msra.mxu0 %v4510_v35  ;;  %4691 = vmatprep.subr.bf16.mxu1 %v4521_v51  ;;  %v4340_v35 = vunpack.c.l.s8.bf16 %v4188_v20  ;;  %v4195_v51 = vld [vmem:[#allocation2 + $0x128] sm:$0xff] }
 0x723   :  { %4609 = vmatprep.subr.bf16.mxu0 %v4519_v23  ;;  %v4349_v23 = vunpack.c.h.s8.bf16 %v4189_v26 }
 0x725   :  { %4692 = vmatpush1.bf16.msra.mxu1 %v4520_v37  ;;  %v4355_v37 = vunpack.c.l.s8.bf16 %v4195_v51 }
 0x726   :  { %4610 = vmatpush1.bf16.msra.mxu0 %v4518_v32  ;;  %4693 = vmatprep.subr.bf16.mxu1 %v4529_v11  ;;  %v4348_v32 = vunpack.c.h.s8.bf16 %v4188_v20  ;;  %v4194_v11 = vld [vmem:[#allocation2 + $0x120] sm:$0xff] }
 0x727   :  { %4611 = vmatprep.subr.bf16.mxu0 %v4527_v5  ;;  %v4357_v5 = vunpack.c.l.s8.bf16 %v4197_v27  ;;  %v4354_v0 = vunpack.c.l.s8.bf16 %v4194_v11  ;;  %v4362_v59 = vunpack.c.h.s8.bf16 %v4194_v11  ;;  %v4236_v11 = vld [vmem:[#allocation2 + $0x270] sm:$0xff] }
 0x729   :  { %4694 = vmatpush1.bf16.msra.mxu1 %v4528_v41  ;;  %v4363_v41 = vunpack.c.h.s8.bf16 %v4195_v51  ;;  %v4237_v51 = vld [vmem:[#allocation2 + $0x278] sm:$0xff] }
 0x72a   :  { %4612 = vmatpush1.bf16.msra.mxu0 %v4526_v50  ;;  %4695 = vmatprep.subr.bf16.mxu1 %v4537_v52  ;;  %v4356_v50 = vunpack.c.l.s8.bf16 %v4196_v3  ;;  %v4203_v52 = vld [vmem:[#allocation2 + $0x168] sm:$0xff] }
 0x72b   :  { %4613 = vmatprep.subr.bf16.mxu0 %v4535_v58  ;;  %v4365_v58 = vunpack.c.h.s8.bf16 %v4197_v27 }
 0x72d   :  { %4696 = vmatpush1.bf16.msra.mxu1 %v4536_v14  ;;  %v4371_v14 = vunpack.c.l.s8.bf16 %v4203_v52 }
 0x72e   :  { %4614 = vmatpush1.bf16.msra.mxu0 %v4534_v4  ;;  %4788 = vmatprep.subr.bf16.mxu1 %v4293_v12  ;;  %v4364_v4 = vunpack.c.h.s8.bf16 %v4196_v3  ;;  %v4202_v12 = vld [vmem:[#allocation2 + $0x160] sm:$0xff] }
 0x72f   :  { %4706 = vmatprep.subr.bf16.mxu0 %v4291_v57  ;;  %v4373_v57 = vunpack.c.l.s8.bf16 %v4205_v60  ;;  %v4370_v18 = vunpack.c.l.s8.bf16 %v4202_v12  ;;  %v4378_v40 = vunpack.c.h.s8.bf16 %v4202_v12 }
 0x730   :  { %4698 = vmatmul.mubr.bf16.vlgmr.msra.gmra.mrb[28].mxu1 %v10720_v6 }
 0x731   :  { %4616 = vmatmul.mubr.bf16.vlgmr.msra.gmra.mrb[20].mxu0 %v10720_v6  ;;  %4789 = vmatpush1.bf16.msra.mxu1 %v4292_v1  ;;  %v4379_v1 = vunpack.c.h.s8.bf16 %v4203_v52 }
 0x732   :  { %4707 = vmatpush1.bf16.msra.mxu0 %v4290_v53  ;;  %4790 = vmatprep.subr.bf16.mxu1 %v4301_v55  ;;  %v4372_v53 = vunpack.c.l.s8.bf16 %v4204_v24  ;;  %v4211_v55 = vld [vmem:[#allocation2 + $0x1a8] sm:$0xff] }
 0x733   :  { %4708 = vmatprep.subr.bf16.mxu0 %v4299_v15  ;;  %4738 = vmatprep.mubr.bf16.mxu0 %v10717_v9  ;;  %v4381_v15 = vunpack.c.h.s8.bf16 %v4205_v60  ;;  %v4444_v60 = vunpack.c.h.s8.bf16 %v4236_v11 }
 0x734   :  { %4820 = vmatprep.mubr.bf16.mxu1 %v10717_v9  ;;  %v4180_v9 = vld [vmem:[#allocation2 + $0xb0] sm:$0xff] }
 0x735   :  { %4791 = vmatpush1.bf16.msra.mxu1 %v4300_v21  ;;  %v4324_v22 = vunpack.c.l.s8.bf16 %v4180_v9  ;;  %v4332_v46 = vunpack.c.h.s8.bf16 %v4180_v9  ;;  %v4387_v21 = vunpack.c.l.s8.bf16 %v4211_v55 }
 0x736   :  { %4709 = vmatpush1.bf16.msra.mxu0 %v4298_v30  ;;  %4792 = vmatprep.subr.bf16.mxu1 %v4309_v54  ;;  %v4380_v30 = vunpack.c.h.s8.bf16 %v4204_v24  ;;  %v4210_v54 = vld [vmem:[#allocation2 + $0x1a0] sm:$0xff] }
 0x737   :  { %4710 = vmatprep.subr.bf16.mxu0 %v4307_v43  ;;  %v4389_v43 = vunpack.c.l.s8.bf16 %v4213_v29  ;;  %v4386_v44 = vunpack.c.l.s8.bf16 %v4210_v54  ;;  %v4394_v10 = vunpack.c.h.s8.bf16 %v4210_v54 }
 0x739   :  { %4793 = vmatpush1.bf16.msra.mxu1 %v4308_v38  ;;  %v4395_v38 = vunpack.c.h.s8.bf16 %v4211_v55 }
 0x73a   :  { %4711 = vmatpush1.bf16.msra.mxu0 %v4306_v61  ;;  %4794 = vmatprep.subr.bf16.mxu1 %v4317_v47  ;;  %v4388_v61 = vunpack.c.l.s8.bf16 %v4212_v45  ;;  %v4219_v47 = vld [vmem:[#allocation2 + $0x1e8] sm:$0xff] }
 0x73b   :  { %4712 = vmatprep.subr.bf16.mxu0 %v4315_v39  ;;  %v4397_v39 = vunpack.c.h.s8.bf16 %v4213_v29 }
 0x73d   :  { %4795 = vmatpush1.bf16.msra.mxu1 %v4316_v34  ;;  %v4403_v34 = vunpack.c.l.s8.bf16 %v4219_v47 }
 0x73e   :  { %4713 = vmatpush1.bf16.msra.mxu0 %v4314_v25  ;;  %4796 = vmatprep.subr.bf16.mxu1 %v4325_v31  ;;  %v4396_v25 = vunpack.c.h.s8.bf16 %v4212_v45  ;;  %v4218_v31 = vld [vmem:[#allocation2 + $0x1e0] sm:$0xff] }
 0x73f   :  { %4714 = vmatprep.subr.bf16.mxu0 %v4323_v56  ;;  %v4405_v56 = vunpack.c.l.s8.bf16 %v4221_v13  ;;  %v4402_v9 = vunpack.c.l.s8.bf16 %v4218_v31  ;;  %v4410_v26 = vunpack.c.h.s8.bf16 %v4218_v31 }
 0x741   :  { %4797 = vmatpush1.bf16.msra.mxu1 %v4324_v22  ;;  %v4411_v22 = vunpack.c.h.s8.bf16 %v4219_v47 }
 0x742   :  { %4715 = vmatpush1.bf16.msra.mxu0 %v4322_v19  ;;  %4798 = vmatprep.subr.bf16.mxu1 %v4333_v36  ;;  %v4404_v19 = vunpack.c.l.s8.bf16 %v4220_v28  ;;  %v4227_v36 = vld [vmem:[#allocation2 + $0x228] sm:$0xff] }
 0x743   :  { %4716 = vmatprep.subr.bf16.mxu0 %v4331_v7  ;;  %v4413_v7 = vunpack.c.h.s8.bf16 %v4221_v13 }
 0x745   :  { %4799 = vmatpush1.bf16.msra.mxu1 %v4332_v46  ;;  %v4419_v46 = vunpack.c.l.s8.bf16 %v4227_v36 }
 0x746   :  { %4717 = vmatpush1.bf16.msra.mxu0 %v4330_v42  ;;  %4800 = vmatprep.subr.bf16.mxu1 %v4341_v2  ;;  %v4412_v42 = vunpack.c.h.s8.bf16 %v4220_v28  ;;  %v4226_v2 = vld [vmem:[#allocation2 + $0x220] sm:$0xff] }
 0x747   :  { %4718 = vmatprep.subr.bf16.mxu0 %v4339_v17  ;;  %v4421_v17 = vunpack.c.l.s8.bf16 %v4229_v16  ;;  %v4418_v20 = vunpack.c.l.s8.bf16 %v4226_v2  ;;  %v4426_v27 = vunpack.c.h.s8.bf16 %v4226_v2 }
 0x749   :  { %4801 = vmatpush1.bf16.msra.mxu1 %v4340_v35  ;;  %v4427_v35 = vunpack.c.h.s8.bf16 %v4227_v36 }
 0x74a   :  { %4719 = vmatpush1.bf16.msra.mxu0 %v4338_v8  ;;  %4802 = vmatprep.subr.bf16.mxu1 %v4349_v23  ;;  %v4420_v8 = vunpack.c.l.s8.bf16 %v4228_v33  ;;  %v4235_v23 = vld [vmem:[#allocation2 + $0x268] sm:$0xff] }
 0x74b   :  { %4720 = vmatprep.subr.bf16.mxu0 %v4347_v63  ;;  %v4429_v63 = vunpack.c.h.s8.bf16 %v4229_v16 }
 0x74d   :  { %4803 = vmatpush1.bf16.msra.mxu1 %v4348_v32  ;;  %v4435_v32 = vunpack.c.l.s8.bf16 %v4235_v23 }
 0x74e   :  { %4721 = vmatpush1.bf16.msra.mxu0 %v4346_v49  ;;  %4804 = vmatprep.subr.bf16.mxu1 %v4357_v5  ;;  %v4428_v49 = vunpack.c.h.s8.bf16 %v4228_v33  ;;  %v4234_v5 = vld [vmem:[#allocation2 + $0x260] sm:$0xff] }
 0x74f   :  { %4722 = vmatprep.subr.bf16.mxu0 %v4355_v37  ;;  %v4437_v37 = vunpack.c.l.s8.bf16 %v4237_v51  ;;  %v4434_v3 = vunpack.c.l.s8.bf16 %v4234_v5  ;;  %v4442_v52 = vunpack.c.h.s8.bf16 %v4234_v5 }
 0x751   :  { %4805 = vmatpush1.bf16.msra.mxu1 %v4356_v50  ;;  %v4445_v50 = vunpack.c.h.s8.bf16 %v4237_v51 }
 0x752   :  { %4723 = vmatpush1.bf16.msra.mxu0 %v4354_v0  ;;  %4806 = vmatprep.subr.bf16.mxu1 %v4365_v58  ;;  %v4436_v0 = vunpack.c.l.s8.bf16 %v4236_v11  ;;  %v4245_v58 = vld [vmem:[#allocation2 + $0x2b8] sm:$0xff] }
 0x753   :  { %4724 = vmatprep.subr.bf16.mxu0 %v4363_v41  ;;  %v4243_v41 = vld [vmem:[#allocation2 + $0x2a8] sm:$0xff] }
 0x754   :  { %v4459_v24 = vunpack.c.h.s8.bf16 %v4243_v41 }
 0x755   :  { %4807 = vmatpush1.bf16.msra.mxu1 %v4364_v4  ;;  %v4453_v4 = vunpack.c.l.s8.bf16 %v4245_v58 }
 0x756   :  { %4725 = vmatpush1.bf16.msra.mxu0 %v4362_v59  ;;  %4808 = vmatprep.subr.bf16.mxu1 %v4373_v57  ;;  %v4451_v59 = vunpack.c.l.s8.bf16 %v4243_v41 }
 0x757   :  { %4726 = vmatprep.subr.bf16.mxu0 %v4371_v14  ;;  %v4242_v14 = vld [vmem:[#allocation2 + $0x2a0] sm:$0xff] }
 0x758   :  { %v4450_v57 = vunpack.c.l.s8.bf16 %v4242_v14 }
 0x759   :  { %4809 = vmatpush1.bf16.msra.mxu1 %v4372_v53  ;;  %v4251_v53 = vld [vmem:[#allocation2 + $0x2e8] sm:$0xff] }
 0x75a   :  { %4727 = vmatpush1.bf16.msra.mxu0 %v4370_v18  ;;  %4810 = vmatprep.subr.bf16.mxu1 %v4381_v15  ;;  %v4461_v18 = vunpack.c.h.s8.bf16 %v4245_v58  ;;  %v4458_v15 = vunpack.c.h.s8.bf16 %v4242_v14  ;;  %v4467_v29 = vunpack.c.l.s8.bf16 %v4251_v53  ;;  %v4475_v45 = vunpack.c.h.s8.bf16 %v4251_v53 }
 0x75b   :  { %4728 = vmatprep.subr.bf16.mxu0 %v4379_v1  ;;  %v4253_v1 = vld [vmem:[#allocation2 + $0x2f8] sm:$0xff] }
 0x75d   :  { %4811 = vmatpush1.bf16.msra.mxu1 %v4380_v30  ;;  %v4250_v30 = vld [vmem:[#allocation2 + $0x2e0] sm:$0xff] }
 0x75e   :  { %4729 = vmatpush1.bf16.msra.mxu0 %v4378_v40  ;;  %4812 = vmatprep.subr.bf16.mxu1 %v4389_v43  ;;  %v4469_v40 = vunpack.c.l.s8.bf16 %v4253_v1  ;;  %v4466_v43 = vunpack.c.l.s8.bf16 %v4250_v30 }
 0x75f   :  { %4730 = vmatprep.subr.bf16.mxu0 %v4387_v21  ;;  %v4252_v21 = vld [vmem:[#allocation2 + $0x2f0] sm:$0xff] }
 0x760   :  { %v4468_v54 = vunpack.c.l.s8.bf16 %v4252_v21  ;;  %v4476_v47 = vunpack.c.h.s8.bf16 %v4252_v21 }
 0x761   :  { %4813 = vmatpush1.bf16.msra.mxu1 %v4388_v61  ;;  %v4259_v61 = vld [vmem:[#allocation2 + $0x328] sm:$0xff] }
 0x762   :  { %4731 = vmatpush1.bf16.msra.mxu0 %v4386_v44  ;;  %4814 = vmatprep.subr.bf16.mxu1 %v4397_v39  ;;  %v4477_v44 = vunpack.c.h.s8.bf16 %v4253_v1  ;;  %v4474_v39 = vunpack.c.h.s8.bf16 %v4250_v30  ;;  %v4483_v13 = vunpack.c.l.s8.bf16 %v4259_v61  ;;  %v4491_v28 = vunpack.c.h.s8.bf16 %v4259_v61 }
 0x763   :  { %4732 = vmatprep.subr.bf16.mxu0 %v4395_v38  ;;  %v4261_v38 = vld [vmem:[#allocation2 + $0x338] sm:$0xff] }
 0x765   :  { %4815 = vmatpush1.bf16.msra.mxu1 %v4396_v25  ;;  %v4258_v25 = vld [vmem:[#allocation2 + $0x320] sm:$0xff] }
 0x766   :  { %4733 = vmatpush1.bf16.msra.mxu0 %v4394_v10  ;;  %4816 = vmatprep.subr.bf16.mxu1 %v4405_v56  ;;  %v4485_v10 = vunpack.c.l.s8.bf16 %v4261_v38  ;;  %v4482_v56 = vunpack.c.l.s8.bf16 %v4258_v25 }
 0x767   :  { %4734 = vmatprep.subr.bf16.mxu0 %v4403_v34  ;;  %v4260_v34 = vld [vmem:[#allocation2 + $0x330] sm:$0xff] }
 0x768   :  { %v4484_v31 = vunpack.c.l.s8.bf16 %v4260_v34  ;;  %v4492_v36 = vunpack.c.h.s8.bf16 %v4260_v34 }
 0x769   :  { %4817 = vmatpush1.bf16.msra.mxu1 %v4404_v19  ;;  %v4267_v19 = vld [vmem:[#allocation2 + $0x368] sm:$0xff] }
 0x76a   :  { %4735 = vmatpush1.bf16.msra.mxu0 %v4402_v9  ;;  %4818 = vmatprep.subr.bf16.mxu1 %v4413_v7  ;;  %v4493_v9 = vunpack.c.h.s8.bf16 %v4261_v38  ;;  %v4490_v7 = vunpack.c.h.s8.bf16 %v4258_v25  ;;  %v4499_v16 = vunpack.c.l.s8.bf16 %v4267_v19  ;;  %v4507_v33 = vunpack.c.h.s8.bf16 %v4267_v19 }
 0x76b   :  { %4736 = vmatprep.subr.bf16.mxu0 %v4411_v22  ;;  %v4269_v22 = vld [vmem:[#allocation2 + $0x378] sm:$0xff] }
 0x76d   :  { %4819 = vmatpush1.bf16.msra.mxu1 %v4412_v42  ;;  %v4266_v42 = vld [vmem:[#allocation2 + $0x360] sm:$0xff] }
 0x76e   :  { %4737 = vmatpush1.bf16.msra.mxu0 %v4410_v26  ;;  %4829 = vmatprep.subr.bf16.mxu1 %v4421_v17  ;;  %v4501_v26 = vunpack.c.l.s8.bf16 %v4269_v22  ;;  %v4498_v17 = vunpack.c.l.s8.bf16 %v4266_v42 }
 0x76f   :  { %4747 = vmatprep.subr.bf16.mxu0 %v4419_v46  ;;  %v4268_v46 = vld [vmem:[#allocation2 + $0x370] sm:$0xff] }
 0x770   :  { %4821 = vmatmul.mubr.bf16.vlgmr.msra.gmra.mrb[32].mxu1 %v10718_v62  ;;  %v4500_v2 = vunpack.c.l.s8.bf16 %v4268_v46 }
 0x771   :  { %4739 = vmatmul.mubr.bf16.vlgmr.msra.gmra.mrb[24].mxu0 %v10718_v62  ;;  %4830 = vmatpush1.bf16.msra.mxu1 %v4420_v8  ;;  %v4443_v62 = vunpack.c.h.s8.bf16 %v4235_v23  ;;  %v4275_v8 = vld [vmem:[#allocation2 + $0x3a8] sm:$0xff]  ;;  %v4508_v23 = vunpack.c.h.s8.bf16 %v4268_v46 }
 0x772   :  { %4748 = vmatpush1.bf16.msra.mxu0 %v4418_v20  ;;  %4831 = vmatprep.subr.bf16.mxu1 %v4429_v63  ;;  %v4509_v20 = vunpack.c.h.s8.bf16 %v4269_v22  ;;  %v4506_v63 = vunpack.c.h.s8.bf16 %v4266_v42  ;;  %v4515_v51 = vunpack.c.l.s8.bf16 %v4275_v8  ;;  %v4523_v11 = vunpack.c.h.s8.bf16 %v4275_v8 }
 0x773   :  { %4749 = vmatprep.subr.bf16.mxu0 %v4427_v35  ;;  %4779 = vmatprep.mubr.bf16.mxu0 %v10719_v48  ;;  %v4277_v35 = vld [vmem:[#allocation2 + $0x3b8] sm:$0xff] }
 0x774   :  { %4861 = vmatprep.mubr.bf16.mxu1 %v10719_v48  ;;  %v4244_v48 = vld [vmem:[#allocation2 + $0x2b0] sm:$0xff] }
 0x775   :  { %4832 = vmatpush1.bf16.msra.mxu1 %v4428_v49  ;;  %v4452_v12 = vunpack.c.l.s8.bf16 %v4244_v48  ;;  %v4460_v55 = vunpack.c.h.s8.bf16 %v4244_v48  ;;  %v4274_v49 = vld [vmem:[#allocation2 + $0x3a0] sm:$0xff] }
 0x776   :  { %4750 = vmatpush1.bf16.msra.mxu0 %v4426_v27  ;;  %4833 = vmatprep.subr.bf16.mxu1 %v4437_v37  ;;  %v4517_v27 = vunpack.c.l.s8.bf16 %v4277_v35  ;;  %v4514_v37 = vunpack.c.l.s8.bf16 %v4274_v49 }
 0x777   :  { %4751 = vmatprep.subr.bf16.mxu0 %v4435_v32  ;;  %v4276_v32 = vld [vmem:[#allocation2 + $0x3b0] sm:$0xff] }
 0x778   :  { %v4516_v5 = vunpack.c.l.s8.bf16 %v4276_v32  ;;  %v4524_v41 = vunpack.c.h.s8.bf16 %v4276_v32 }
 0x779   :  { %4834 = vmatpush1.bf16.msra.mxu1 %v4436_v0  ;;  %v4283_v0 = vld [vmem:[#allocation2 + $0x3e8] sm:$0xff] }
 0x77a   :  { %4752 = vmatpush1.bf16.msra.mxu0 %v4434_v3  ;;  %4835 = vmatprep.subr.bf16.mxu1 %v4445_v50  ;;  %v4525_v3 = vunpack.c.h.s8.bf16 %v4277_v35  ;;  %v4522_v50 = vunpack.c.h.s8.bf16 %v4274_v49  ;;  %v4531_v58 = vunpack.c.l.s8.bf16 %v4283_v0  ;;  %v4539_v48 = vunpack.c.h.s8.bf16 %v4283_v0 }
 0x77b   :  { %4753 = vmatprep.subr.bf16.mxu0 %v4443_v62  ;;  %v4285_v62 = vld [vmem:[#allocation2 + $0x3f8] sm:$0xff] }
 0x77d   :  { %4836 = vmatpush1.bf16.msra.mxu1 %v4444_v60  ;;  %v4282_v60 = vld [vmem:[#allocation2 + $0x3e0] sm:$0xff] }
 0x77e   :  { %4754 = vmatpush1.bf16.msra.mxu0 %v4442_v52  ;;  %4837 = vmatprep.subr.bf16.mxu1 %v4453_v4  ;;  %v4533_v52 = vunpack.c.l.s8.bf16 %v4285_v62  ;;  %v4530_v4 = vunpack.c.l.s8.bf16 %v4282_v60 }
 0x77f   :  { %4755 = vmatprep.subr.bf16.mxu0 %v4451_v59  ;;  %v4284_v59 = vld [vmem:[#allocation2 + $0x3f0] sm:$0xff] }
 0x780   :  { %v4532_v14 = vunpack.c.l.s8.bf16 %v4284_v59 }
 0x781   :  { %4838 = vmatpush1.bf16.msra.mxu1 %v4452_v12  ;;  %v4538_v12 = vunpack.c.h.s8.bf16 %v4282_v60 }
 0x782   :  { %4756 = vmatpush1.bf16.msra.mxu0 %v4450_v57  ;;  %4839 = vmatprep.subr.bf16.mxu1 %v4461_v18  ;;  %v4541_v57 = vunpack.c.h.s8.bf16 %v4285_v62 }
 0x783   :  { %4757 = vmatprep.subr.bf16.mxu0 %v4459_v24  ;;  %v4540_v24 = vunpack.c.h.s8.bf16 %v4284_v59 }
 0x785   :  { %4840 = vmatpush1.bf16.msra.mxu1 %v4460_v55 }
 0x786   :  { %4758 = vmatpush1.bf16.msra.mxu0 %v4458_v15  ;;  %4841 = vmatprep.subr.bf16.mxu1 %v4469_v40 }
 0x787   :  { %4759 = vmatprep.subr.bf16.mxu0 %v4467_v29 }
 0x789   :  { %4842 = vmatpush1.bf16.msra.mxu1 %v4468_v54 }
 0x78a   :  { %4760 = vmatpush1.bf16.msra.mxu0 %v4466_v43  ;;  %4843 = vmatprep.subr.bf16.mxu1 %v4477_v44 }
 0x78b   :  { %4761 = vmatprep.subr.bf16.mxu0 %v4475_v45 }
 0x78d   :  { %4844 = vmatpush1.bf16.msra.mxu1 %v4476_v47 }
 0x78e   :  { %4762 = vmatpush1.bf16.msra.mxu0 %v4474_v39  ;;  %4845 = vmatprep.subr.bf16.mxu1 %v4485_v10 }
 0x78f   :  { %4763 = vmatprep.subr.bf16.mxu0 %v4483_v13 }
 0x791   :  { %4846 = vmatpush1.bf16.msra.mxu1 %v4484_v31 }
 0x792   :  { %4764 = vmatpush1.bf16.msra.mxu0 %v4482_v56  ;;  %4847 = vmatprep.subr.bf16.mxu1 %v4493_v9 }
 0x793   :  { %4765 = vmatprep.subr.bf16.mxu0 %v4491_v28 }
 0x795   :  { %4848 = vmatpush1.bf16.msra.mxu1 %v4492_v36 }
 0x796   :  { %4766 = vmatpush1.bf16.msra.mxu0 %v4490_v7  ;;  %4849 = vmatprep.subr.bf16.mxu1 %v4501_v26 }
 0x797   :  { %4767 = vmatprep.subr.bf16.mxu0 %v4499_v16 }
 0x799   :  { %4850 = vmatpush1.bf16.msra.mxu1 %v4500_v2 }
 0x79a   :  { %4768 = vmatpush1.bf16.msra.mxu0 %v4498_v17  ;;  %4851 = vmatprep.subr.bf16.mxu1 %v4509_v20 }
 0x79b   :  { %4769 = vmatprep.subr.bf16.mxu0 %v4507_v33 }
 0x79d   :  { %4852 = vmatpush1.bf16.msra.mxu1 %v4508_v23 }
 0x79e   :  { %4770 = vmatpush1.bf16.msra.mxu0 %v4506_v63  ;;  %4853 = vmatprep.subr.bf16.mxu1 %v4517_v27 }
 0x79f   :  { %4771 = vmatprep.subr.bf16.mxu0 %v4515_v51 }
 0x7a1   :  { %4854 = vmatpush1.bf16.msra.mxu1 %v4516_v5 }
 0x7a2   :  { %4772 = vmatpush1.bf16.msra.mxu0 %v4514_v37  ;;  %4855 = vmatprep.subr.bf16.mxu1 %v4525_v3 }
 0x7a3   :  { %4773 = vmatprep.subr.bf16.mxu0 %v4523_v11 }
 0x7a5   :  { %4856 = vmatpush1.bf16.msra.mxu1 %v4524_v41 }
 0x7a6   :  { %4774 = vmatpush1.bf16.msra.mxu0 %v4522_v50  ;;  %4857 = vmatprep.subr.bf16.mxu1 %v4533_v52 }
 0x7a7   :  { %4775 = vmatprep.subr.bf16.mxu0 %v4531_v58 }
 0x7a9   :  { %4858 = vmatpush1.bf16.msra.mxu1 %v4532_v14 }
 0x7aa   :  { %4776 = vmatpush1.bf16.msra.mxu0 %v4530_v4  ;;  %4859 = vmatprep.subr.bf16.mxu1 %v4541_v57 }
 0x7ab   :  { %4777 = vmatprep.subr.bf16.mxu0 %v4539_v48 }
 0x7ad   :  { %4860 = vmatpush1.bf16.msra.mxu1 %v4540_v24 }
 0x7ae   :  { %4778 = vmatpush1.bf16.msra.mxu0 %v4538_v12 }
 0x7b0   :  { %4862 = vmatmul.mubr.bf16.vlgmr.msra.gmra.mrb[32].mxu1 %v10720_v6 }
 0x7b1   :  { %4780 = vmatmul.mubr.bf16.vlgmr.msra.gmra.mrb[24].mxu0 %v10720_v6 }
 0x7b2   :  { %7600 = dma.done.wait [#allocation3 + $0x1], 16384 }
 0x7b3   :  { %7601 = vsyncadd [#allocation3 + $0x1], 4294950912  ;;  %v10721_v18 = vld [vmem:[#allocation77_spill] sm:$0xff]  ;;  %v4883_v1 = vld [vmem:[#allocation2 + $0x418] sm:$0xff]  ;;  %vm7628_vm1 = vmmov 0   ;;  %s10733_s16 = sld [smem:[#allocation170_spill]] }
 0x7b4   :  { %5296 = vmatprep.mubr.bf16.mxu0 %v10721_v18  ;;  %5378 = vmatprep.mubr.bf16.mxu1 %v10721_v18  ;;  %v4881_v53 = vld [vmem:[#allocation2 + $0x408] sm:$0xff]  ;;  %v4880_v15 = vld [vmem:[#allocation2 + $0x400] sm:$0xff]  ;;  %v5011_v40 = vunpack.c.l.s8.bf16 %v4883_v1  ;;  %v5019_v30 = vunpack.c.h.s8.bf16 %v4883_v1  ;;  %v4882_v21 = vld [vmem:[#allocation2 + $0x410] sm:$0xff] }
 0x7b5   :  { %v5009_v55 = vunpack.c.l.s8.bf16 %v4881_v53  ;;  %v5017_v29 = vunpack.c.h.s8.bf16 %v4881_v53  ;;  %v5008_v43 = vunpack.c.l.s8.bf16 %v4880_v15  ;;  %v5010_v54 = vunpack.c.l.s8.bf16 %v4882_v21  ;;  %v4889_v45 = vld [vmem:[#allocation2 + $0x448] sm:$0xff]  ;;  %v4891_v44 = vld [vmem:[#allocation2 + $0x458] sm:$0xff]  ;;  %v4888_v47 = vld [vmem:[#allocation2 + $0x440] sm:$0xff] }
 0x7b6   :  { %5346 = vmatprep.subr.bf16.mxu1 %v5011_v40  ;;  %v5016_v6 = vunpack.c.h.s8.bf16 %v4880_v15  ;;  %v5018_v61 = vunpack.c.h.s8.bf16 %v4882_v21  ;;  %v5025_v38 = vunpack.c.l.s8.bf16 %v4889_v45  ;;  %v5027_v39 = vunpack.c.l.s8.bf16 %v4891_v44  ;;  %v4890_v13 = vld [vmem:[#allocation2 + $0x450] sm:$0xff]  ;;  %v4897_v31 = vld [vmem:[#allocation2 + $0x488] sm:$0xff]  ;;  %v4899_v28 = vld [vmem:[#allocation2 + $0x498] sm:$0xff] }
 0x7b7   :  { %5264 = vmatprep.subr.bf16.mxu0 %v5009_v55  ;;  %5347 = vmatpush1.bf16.msra.mxu1 %v5010_v54  ;;  %v5024_v10 = vunpack.c.l.s8.bf16 %v4888_v47  ;;  %v5026_v25 = vunpack.c.l.s8.bf16 %v4890_v13  ;;  %v5033_v34 = vunpack.c.h.s8.bf16 %v4889_v45  ;;  %v5035_v56 = vunpack.c.h.s8.bf16 %v4891_v44  ;;  %v4896_v36 = vld [vmem:[#allocation2 + $0x480] sm:$0xff]  ;;  %v4898_v16 = vld [vmem:[#allocation2 + $0x490] sm:$0xff]  ;;  %v4905_v2 = vld [vmem:[#allocation2 + $0x4c8] sm:$0xff] }
 0x7b8   :  { %5265 = vmatpush1.bf16.msra.mxu0 %v5008_v43  ;;  %5348 = vmatprep.subr.bf16.mxu1 %v5019_v30  ;;  %v5032_v9 = vunpack.c.h.s8.bf16 %v4888_v47  ;;  %v5034_v19 = vunpack.c.h.s8.bf16 %v4890_v13  ;;  %v5041_v22 = vunpack.c.l.s8.bf16 %v4897_v31  ;;  %v5043_v7 = vunpack.c.l.s8.bf16 %v4899_v28  ;;  %v4907_v33 = vld [vmem:[#allocation2 + $0x4d8] sm:$0xff]  ;;  %v4904_v23 = vld [vmem:[#allocation2 + $0x4c0] sm:$0xff]  ;;  %v4906_v51 = vld [vmem:[#allocation2 + $0x4d0] sm:$0xff] }
 0x7b9   :  { %5266 = vmatprep.subr.bf16.mxu0 %v5017_v29  ;;  %v5040_v26 = vunpack.c.l.s8.bf16 %v4896_v36  ;;  %v5042_v42 = vunpack.c.l.s8.bf16 %v4898_v16  ;;  %v5049_v46 = vunpack.c.h.s8.bf16 %v4897_v31  ;;  %v5051_v17 = vunpack.c.h.s8.bf16 %v4899_v28  ;;  %v4913_v5 = vld [vmem:[#allocation2 + $0x508] sm:$0xff]  ;;  %v4915_v11 = vld [vmem:[#allocation2 + $0x518] sm:$0xff]  ;;  %v4912_v3 = vld [vmem:[#allocation2 + $0x500] sm:$0xff] }
 0x7ba   :  { %v5048_v20 = vunpack.c.h.s8.bf16 %v4896_v36  ;;  %v5050_v8 = vunpack.c.h.s8.bf16 %v4898_v16  ;;  %v5057_v35 = vunpack.c.l.s8.bf16 %v4905_v2  ;;  %v5059_v63 = vunpack.c.l.s8.bf16 %v4907_v33  ;;  %v4914_v0 = vld [vmem:[#allocation2 + $0x510] sm:$0xff]  ;;  %v4921_v14 = vld [vmem:[#allocation2 + $0x548] sm:$0xff]  ;;  %v4923_v48 = vld [vmem:[#allocation2 + $0x558] sm:$0xff] }
 0x7bb   :  { %5349 = vmatpush1.bf16.msra.mxu1 %v5018_v61  ;;  %v5056_v27 = vunpack.c.l.s8.bf16 %v4904_v23  ;;  %v5058_v49 = vunpack.c.l.s8.bf16 %v4906_v51  ;;  %v5065_v32 = vunpack.c.h.s8.bf16 %v4905_v2  ;;  %v5067_v37 = vunpack.c.h.s8.bf16 %v4907_v33  ;;  %v4920_v1 = vld [vmem:[#allocation2 + $0x540] sm:$0xff]  ;;  %v4922_v15 = vld [vmem:[#allocation2 + $0x550] sm:$0xff]  ;;  %v4929_v21 = vld [vmem:[#allocation2 + $0x588] sm:$0xff] }
 0x7bc   :  { %5267 = vmatpush1.bf16.msra.mxu0 %v5016_v6  ;;  %5350 = vmatprep.subr.bf16.mxu1 %v5027_v39  ;;  %v5064_v62 = vunpack.c.h.s8.bf16 %v4904_v23  ;;  %v5066_v50 = vunpack.c.h.s8.bf16 %v4906_v51  ;;  %v5073_v41 = vunpack.c.l.s8.bf16 %v4913_v5  ;;  %v5075_v58 = vunpack.c.l.s8.bf16 %v4915_v11  ;;  %v4931_v43 = vld [vmem:[#allocation2 + $0x598] sm:$0xff]  ;;  %v4928_v61 = vld [vmem:[#allocation2 + $0x580] sm:$0xff] }
 0x7bd   :  { %5268 = vmatprep.subr.bf16.mxu0 %v5025_v38  ;;  %v5072_v52 = vunpack.c.l.s8.bf16 %v4912_v3  ;;  %v5074_v60 = vunpack.c.l.s8.bf16 %v4914_v0  ;;  %v5081_v59 = vunpack.c.h.s8.bf16 %v4913_v5  ;;  %v5083_v4 = vunpack.c.h.s8.bf16 %v4915_v11  ;;  %v4930_v38 = vld [vmem:[#allocation2 + $0x590] sm:$0xff] }
 0x7be   :  { %v5080_v57 = vunpack.c.h.s8.bf16 %v4912_v3  ;;  %v5082_v12 = vunpack.c.h.s8.bf16 %v4914_v0  ;;  %v5089_v24 = vunpack.c.l.s8.bf16 %v4921_v14  ;;  %v5091_v53 = vunpack.c.l.s8.bf16 %v4923_v48 }
 0x7bf   :  { %5351 = vmatpush1.bf16.msra.mxu1 %v5026_v25  ;;  %v5088_v55 = vunpack.c.l.s8.bf16 %v4920_v1  ;;  %v5090_v29 = vunpack.c.l.s8.bf16 %v4922_v15  ;;  %v5097_v40 = vunpack.c.h.s8.bf16 %v4921_v14  ;;  %v5099_v30 = vunpack.c.h.s8.bf16 %v4923_v48  ;;  %v4937_v25 = vld [vmem:[#allocation2 + $0x5c8] sm:$0xff]  ;;  %v4963_v14 = vld [vmem:[#allocation2 + $0x698] sm:$0xff] }
 0x7c0   :  { %5269 = vmatpush1.bf16.msra.mxu0 %v5024_v10  ;;  %5352 = vmatprep.subr.bf16.mxu1 %v5035_v56  ;;  %v5096_v54 = vunpack.c.h.s8.bf16 %v4920_v1  ;;  %v5098_v45 = vunpack.c.h.s8.bf16 %v4922_v15  ;;  %v5105_v44 = vunpack.c.l.s8.bf16 %v4929_v21  ;;  %v5107_v6 = vunpack.c.l.s8.bf16 %v4931_v43  ;;  %v4962_v1 = vld [vmem:[#allocation2 + $0x690] sm:$0xff] }
 0x7c1   :  { %5270 = vmatprep.subr.bf16.mxu0 %v5033_v34  ;;  %v5104_v39 = vunpack.c.l.s8.bf16 %v4928_v61  ;;  %v5106_v47 = vunpack.c.l.s8.bf16 %v4930_v38  ;;  %v5113_v13 = vunpack.c.h.s8.bf16 %v4929_v21  ;;  %v5115_v10 = vunpack.c.h.s8.bf16 %v4931_v43  ;;  %v4939_v34 = vld [vmem:[#allocation2 + $0x5d8] sm:$0xff] }
 0x7c2   :  { %v5112_v56 = vunpack.c.h.s8.bf16 %v4928_v61  ;;  %v5114_v31 = vunpack.c.h.s8.bf16 %v4930_v38  ;;  %v5121_v28 = vunpack.c.l.s8.bf16 %v4937_v25  ;;  %v5129_v16 = vunpack.c.h.s8.bf16 %v4937_v25  ;;  %v4971_v21 = vld [vmem:[#allocation2 + $0x6d8] sm:$0xff]  ;;  %v4970_v61 = vld [vmem:[#allocation2 + $0x6d0] sm:$0xff] }
 0x7c3   :  { %5353 = vmatpush1.bf16.msra.mxu1 %v5034_v19  ;;  %v4936_v19 = vld [vmem:[#allocation2 + $0x5c0] sm:$0xff]  ;;  %v4979_v25 = vld [vmem:[#allocation2 + $0x718] sm:$0xff] }
 0x7c4   :  { %5271 = vmatpush1.bf16.msra.mxu0 %v5032_v9  ;;  %5354 = vmatprep.subr.bf16.mxu1 %v5043_v7  ;;  %v5123_v9 = vunpack.c.l.s8.bf16 %v4939_v34  ;;  %v5120_v7 = vunpack.c.l.s8.bf16 %v4936_v19 }
 0x7c5   :  { %5272 = vmatprep.subr.bf16.mxu0 %v5041_v22  ;;  %v4938_v22 = vld [vmem:[#allocation2 + $0x5d0] sm:$0xff] }
 0x7c6   :  { %v5122_v36 = vunpack.c.l.s8.bf16 %v4938_v22  ;;  %v5130_v2 = vunpack.c.h.s8.bf16 %v4938_v22 }
 0x7c7   :  { %5355 = vmatpush1.bf16.msra.mxu1 %v5042_v42  ;;  %v4945_v42 = vld [vmem:[#allocation2 + $0x608] sm:$0xff] }
 0x7c8   :  { %5273 = vmatpush1.bf16.msra.mxu0 %v5040_v26  ;;  %5356 = vmatprep.subr.bf16.mxu1 %v5051_v17  ;;  %v5131_v26 = vunpack.c.h.s8.bf16 %v4939_v34  ;;  %v5128_v17 = vunpack.c.h.s8.bf16 %v4936_v19  ;;  %v5137_v33 = vunpack.c.l.s8.bf16 %v4945_v42  ;;  %v5145_v51 = vunpack.c.h.s8.bf16 %v4945_v42  ;;  %v4978_v19 = vld [vmem:[#allocation2 + $0x710] sm:$0xff]  ;;  %v4987_v42 = vld [vmem:[#allocation2 + $0x758] sm:$0xff] }
 0x7c9   :  { %5274 = vmatprep.subr.bf16.mxu0 %v5049_v46  ;;  %v4947_v46 = vld [vmem:[#allocation2 + $0x618] sm:$0xff] }
 0x7cb   :  { %5357 = vmatpush1.bf16.msra.mxu1 %v5050_v8  ;;  %v4944_v8 = vld [vmem:[#allocation2 + $0x600] sm:$0xff] }
 0x7cc   :  { %5275 = vmatpush1.bf16.msra.mxu0 %v5048_v20  ;;  %5358 = vmatprep.subr.bf16.mxu1 %v5059_v63  ;;  %v5139_v20 = vunpack.c.l.s8.bf16 %v4947_v46  ;;  %v5136_v63 = vunpack.c.l.s8.bf16 %v4944_v8  ;;  %v5144_v5 = vunpack.c.h.s8.bf16 %v4944_v8  ;;  %v4986_v8 = vld [vmem:[#allocation2 + $0x750] sm:$0xff] }
 0x7cd   :  { %5276 = vmatprep.subr.bf16.mxu0 %v5057_v35  ;;  %v4946_v35 = vld [vmem:[#allocation2 + $0x610] sm:$0xff] }
 0x7ce   :  { %v5138_v23 = vunpack.c.l.s8.bf16 %v4946_v35  ;;  %v5146_v11 = vunpack.c.h.s8.bf16 %v4946_v35 }
 0x7cf   :  { %5359 = vmatpush1.bf16.msra.mxu1 %v5058_v49  ;;  %v4953_v49 = vld [vmem:[#allocation2 + $0x648] sm:$0xff] }
 0x7d0   :  { %5277 = vmatpush1.bf16.msra.mxu0 %v5056_v27  ;;  %5360 = vmatprep.subr.bf16.mxu1 %v5067_v37  ;;  %v5147_v27 = vunpack.c.h.s8.bf16 %v4947_v46  ;;  %v10722_v37 = vld [vmem:[#allocation76_spill] sm:$0xff]  ;;  %v5153_v3 = vunpack.c.l.s8.bf16 %v4953_v49 }
 0x7d1   :  { %5278 = vmatprep.subr.bf16.mxu0 %v5065_v32  ;;  %v4955_v32 = vld [vmem:[#allocation2 + $0x658] sm:$0xff] }
 0x7d2   :  { %v5155_v0 = vunpack.c.l.s8.bf16 %v4955_v32 }
 0x7d3   :  { %5361 = vmatpush1.bf16.msra.mxu1 %v5066_v50  ;;  %v4954_v50 = vld [vmem:[#allocation2 + $0x650] sm:$0xff] }
 0x7d4   :  { %5279 = vmatpush1.bf16.msra.mxu0 %v5064_v62  ;;  %5362 = vmatprep.subr.bf16.mxu1 %v5075_v58  ;;  %v4952_v62 = vld [vmem:[#allocation2 + $0x640] sm:$0xff] }
 0x7d5   :  { %5280 = vmatprep.subr.bf16.mxu0 %v5073_v41  ;;  %v10723_v41 = vld [vmem:[#allocation81_spill] sm:$0xff]  ;;  %v5152_v58 = vunpack.c.l.s8.bf16 %v4952_v62  ;;  %v5160_v48 = vunpack.c.h.s8.bf16 %v4952_v62 }
 0x7d6   :  { %v4994_v62 = vld [vmem:[#allocation2 + $0x790] sm:$0xff] }
 0x7d7   :  { %5363 = vmatpush1.bf16.msra.mxu1 %v5074_v60  ;;  %v5161_v60 = vunpack.c.h.s8.bf16 %v4953_v49  ;;  %v4995_v49 = vld [vmem:[#allocation2 + $0x798] sm:$0xff] }
 0x7d8   :  { %5281 = vmatpush1.bf16.msra.mxu0 %v5072_v52  ;;  %5364 = vmatprep.subr.bf16.mxu1 %v5083_v4  ;;  %v5154_v52 = vunpack.c.l.s8.bf16 %v4954_v50  ;;  %v4961_v4 = vld [vmem:[#allocation2 + $0x688] sm:$0xff] }
 0x7d9   :  { %5282 = vmatprep.subr.bf16.mxu0 %v5081_v59  ;;  %v5163_v59 = vunpack.c.h.s8.bf16 %v4955_v32 }
 0x7db   :  { %5365 = vmatpush1.bf16.msra.mxu1 %v5082_v12  ;;  %v5169_v12 = vunpack.c.l.s8.bf16 %v4961_v4 }
 0x7dc   :  { %5283 = vmatpush1.bf16.msra.mxu0 %v5080_v57  ;;  %5366 = vmatprep.subr.bf16.mxu1 %v5091_v53  ;;  %v5162_v57 = vunpack.c.h.s8.bf16 %v4954_v50  ;;  %v4960_v53 = vld [vmem:[#allocation2 + $0x680] sm:$0xff] }
 0x7dd   :  { %5284 = vmatprep.subr.bf16.mxu0 %v5089_v24  ;;  %v5171_v24 = vunpack.c.l.s8.bf16 %v4963_v14  ;;  %v5168_v15 = vunpack.c.l.s8.bf16 %v4960_v53  ;;  %v5176_v43 = vunpack.c.h.s8.bf16 %v4960_v53  ;;  %v5002_v53 = vld [vmem:[#allocation2 + $0x7d0] sm:$0xff] }
 0x7df   :  { %5367 = vmatpush1.bf16.msra.mxu1 %v5090_v29  ;;  %v5177_v29 = vunpack.c.h.s8.bf16 %v4961_v4  ;;  %v5003_v4 = vld [vmem:[#allocation2 + $0x7d8] sm:$0xff] }
 0x7e0   :  { %5285 = vmatpush1.bf16.msra.mxu0 %v5088_v55  ;;  %5368 = vmatprep.subr.bf16.mxu1 %v5099_v30  ;;  %v5170_v55 = vunpack.c.l.s8.bf16 %v4962_v1  ;;  %v4969_v30 = vld [vmem:[#allocation2 + $0x6c8] sm:$0xff] }
 0x7e1   :  { %5286 = vmatprep.subr.bf16.mxu0 %v5097_v40  ;;  %v5179_v40 = vunpack.c.h.s8.bf16 %v4963_v14 }
 0x7e3   :  { %5369 = vmatpush1.bf16.msra.mxu1 %v5098_v45  ;;  %v5185_v45 = vunpack.c.l.s8.bf16 %v4969_v30 }
 0x7e4   :  { %5287 = vmatpush1.bf16.msra.mxu0 %v5096_v54  ;;  %5370 = vmatprep.subr.bf16.mxu1 %v5107_v6  ;;  %v5178_v54 = vunpack.c.h.s8.bf16 %v4962_v1  ;;  %v4968_v6 = vld [vmem:[#allocation2 + $0x6c0] sm:$0xff] }
 0x7e5   :  { %5288 = vmatprep.subr.bf16.mxu0 %v5105_v44  ;;  %v5187_v44 = vunpack.c.l.s8.bf16 %v4971_v21  ;;  %v5184_v38 = vunpack.c.l.s8.bf16 %v4968_v6  ;;  %v5192_v34 = vunpack.c.h.s8.bf16 %v4968_v6  ;;  %v4886_v6 = vld [vmem:[#allocation2 + $0x430] sm:$0xff] }
 0x7e7   :  { %5371 = vmatpush1.bf16.msra.mxu1 %v5106_v47  ;;  %v5193_v47 = vunpack.c.h.s8.bf16 %v4969_v30  ;;  %v4887_v30 = vld [vmem:[#allocation2 + $0x438] sm:$0xff] }
 0x7e8   :  { %5289 = vmatpush1.bf16.msra.mxu0 %v5104_v39  ;;  %5372 = vmatprep.subr.bf16.mxu1 %v5115_v10  ;;  %v5186_v39 = vunpack.c.l.s8.bf16 %v4970_v61  ;;  %v4977_v10 = vld [vmem:[#allocation2 + $0x708] sm:$0xff] }
 0x7e9   :  { %5290 = vmatprep.subr.bf16.mxu0 %v5113_v13  ;;  %v5195_v13 = vunpack.c.h.s8.bf16 %v4971_v21 }
 0x7eb   :  { %5373 = vmatpush1.bf16.msra.mxu1 %v5114_v31  ;;  %v5201_v31 = vunpack.c.l.s8.bf16 %v4977_v10 }
 0x7ec   :  { %5291 = vmatpush1.bf16.msra.mxu0 %v5112_v56  ;;  %5374 = vmatprep.subr.bf16.mxu1 %v5123_v9  ;;  %v5194_v56 = vunpack.c.h.s8.bf16 %v4970_v61  ;;  %v4976_v9 = vld [vmem:[#allocation2 + $0x700] sm:$0xff] }
 0x7ed   :  { %5292 = vmatprep.subr.bf16.mxu0 %v5121_v28  ;;  %v5203_v28 = vunpack.c.l.s8.bf16 %v4979_v25  ;;  %v5200_v22 = vunpack.c.l.s8.bf16 %v4976_v9  ;;  %v5208_v46 = vunpack.c.h.s8.bf16 %v4976_v9  ;;  %v4892_v9 = vld [vmem:[#allocation2 + $0x460] sm:$0xff] }
 0x7ef   :  { %5375 = vmatpush1.bf16.msra.mxu1 %v5122_v36  ;;  %v5209_v36 = vunpack.c.h.s8.bf16 %v4977_v10  ;;  %v4895_v10 = vld [vmem:[#allocation2 + $0x478] sm:$0xff] }
 0x7f0   :  { %5293 = vmatpush1.bf16.msra.mxu0 %v5120_v7  ;;  %5376 = vmatprep.subr.bf16.mxu1 %v5131_v26  ;;  %v5202_v7 = vunpack.c.l.s8.bf16 %v4978_v19  ;;  %v4985_v26 = vld [vmem:[#allocation2 + $0x748] sm:$0xff] }
 0x7f1   :  { %5294 = vmatprep.subr.bf16.mxu0 %v5129_v16  ;;  %v5211_v16 = vunpack.c.h.s8.bf16 %v4979_v25  ;;  %v10724_v25 = vld [vmem:[#allocation80_spill] sm:$0xff] }
 0x7f3   :  { %5377 = vmatpush1.bf16.msra.mxu1 %v5130_v2  ;;  %v5217_v2 = vunpack.c.l.s8.bf16 %v4985_v26 }
 0x7f4   :  { %5295 = vmatpush1.bf16.msra.mxu0 %v5128_v17  ;;  %5387 = vmatprep.subr.bf16.mxu1 %v5139_v20  ;;  %v5210_v17 = vunpack.c.h.s8.bf16 %v4978_v19  ;;  %v4984_v20 = vld [vmem:[#allocation2 + $0x740] sm:$0xff]  ;;  %v4894_v19 = vld [vmem:[#allocation2 + $0x470] sm:$0xff] }
 0x7f5   :  { %5305 = vmatprep.subr.bf16.mxu0 %v5137_v33  ;;  %v5219_v33 = vunpack.c.l.s8.bf16 %v4987_v42  ;;  %v5216_v35 = vunpack.c.l.s8.bf16 %v4984_v20  ;;  %v5224_v32 = vunpack.c.h.s8.bf16 %v4984_v20  ;;  %v4900_v20 = vld [vmem:[#allocation2 + $0x4a0] sm:$0xff] }
 0x7f6   :  { %5379 = vmatmul.mubr.bf16.vlgmr.msra.gmra.mrb[28].mxu1 %v10722_v37 }
 0x7f7   :  { %5297 = vmatmul.mubr.bf16.vlgmr.msra.gmra.mrb[20].mxu0 %v10722_v37  ;;  %5388 = vmatpush1.bf16.msra.mxu1 %v5138_v23  ;;  %v5225_v23 = vunpack.c.h.s8.bf16 %v4985_v26  ;;  %v4901_v26 = vld [vmem:[#allocation2 + $0x4a8] sm:$0xff] }
 0x7f8   :  { %5306 = vmatpush1.bf16.msra.mxu0 %v5136_v63  ;;  %5389 = vmatprep.subr.bf16.mxu1 %v5147_v27  ;;  %v5218_v63 = vunpack.c.l.s8.bf16 %v4986_v8  ;;  %v4993_v27 = vld [vmem:[#allocation2 + $0x788] sm:$0xff] }
 0x7f9   :  { %5307 = vmatprep.subr.bf16.mxu0 %v5145_v51  ;;  %5337 = vmatprep.mubr.bf16.mxu0 %v10723_v41  ;;  %v5227_v51 = vunpack.c.h.s8.bf16 %v4987_v42  ;;  %v4903_v42 = vld [vmem:[#allocation2 + $0x4b8] sm:$0xff] }
 0x7fa   :  { %5419 = vmatprep.mubr.bf16.mxu1 %v10723_v41 }
 0x7fb   :  { %5390 = vmatpush1.bf16.msra.mxu1 %v5146_v11  ;;  %v5233_v11 = vunpack.c.l.s8.bf16 %v4993_v27 }
 0x7fc   :  { %5308 = vmatpush1.bf16.msra.mxu0 %v5144_v5  ;;  %5391 = vmatprep.subr.bf16.mxu1 %v5155_v0  ;;  %v5226_v5 = vunpack.c.h.s8.bf16 %v4986_v8  ;;  %v4992_v0 = vld [vmem:[#allocation2 + $0x780] sm:$0xff]  ;;  %v5044_v8 = vunpack.c.l.s8.bf16 %v4900_v20 }
 0x7fd   :  { %5309 = vmatprep.subr.bf16.mxu0 %v5153_v3  ;;  %v5235_v3 = vunpack.c.l.s8.bf16 %v4995_v49  ;;  %v5232_v50 = vunpack.c.l.s8.bf16 %v4992_v0  ;;  %v5240_v14 = vunpack.c.h.s8.bf16 %v4992_v0  ;;  %v4910_v0 = vld [vmem:[#allocation2 + $0x4f0] sm:$0xff] }
 0x7ff   :  { %5392 = vmatpush1.bf16.msra.mxu1 %v5154_v52  ;;  %v5241_v52 = vunpack.c.h.s8.bf16 %v4993_v27  ;;  %v4911_v27 = vld [vmem:[#allocation2 + $0x4f8] sm:$0xff] }
 0x800   :  { %5310 = vmatpush1.bf16.msra.mxu0 %v5152_v58  ;;  %5393 = vmatprep.subr.bf16.mxu1 %v5163_v59  ;;  %v5234_v58 = vunpack.c.l.s8.bf16 %v4994_v62  ;;  %v5001_v59 = vld [vmem:[#allocation2 + $0x7c8] sm:$0xff] }
 0x801   :  { %5311 = vmatprep.subr.bf16.mxu0 %v5161_v60  ;;  %v5243_v60 = vunpack.c.h.s8.bf16 %v4995_v49  ;;  %v5052_v49 = vunpack.c.h.s8.bf16 %v4900_v20  ;;  %v4942_v20 = vld [vmem:[#allocation2 + $0x5f0] sm:$0xff] }
 0x803   :  { %5394 = vmatpush1.bf16.msra.mxu1 %v5162_v57  ;;  %v5249_v57 = vunpack.c.l.s8.bf16 %v5001_v59 }
 0x804   :  { %5312 = vmatpush1.bf16.msra.mxu0 %v5160_v48  ;;  %5395 = vmatprep.subr.bf16.mxu1 %v5171_v24  ;;  %v5242_v48 = vunpack.c.h.s8.bf16 %v4994_v62  ;;  %v5000_v24 = vld [vmem:[#allocation2 + $0x7c0] sm:$0xff] }
 0x805   :  { %5313 = vmatprep.subr.bf16.mxu0 %v5169_v12  ;;  %v5251_v12 = vunpack.c.l.s8.bf16 %v5003_v4  ;;  %v5248_v1 = vunpack.c.l.s8.bf16 %v5000_v24  ;;  %v5256_v21 = vunpack.c.h.s8.bf16 %v5000_v24  ;;  %v4918_v24 = vld [vmem:[#allocation2 + $0x530] sm:$0xff] }
 0x807   :  { %5396 = vmatpush1.bf16.msra.mxu1 %v5170_v55  ;;  %v5257_v55 = vunpack.c.h.s8.bf16 %v5001_v59  ;;  %v4919_v59 = vld [vmem:[#allocation2 + $0x538] sm:$0xff] }
 0x808   :  { %5314 = vmatpush1.bf16.msra.mxu0 %v5168_v15  ;;  %5397 = vmatprep.subr.bf16.mxu1 %v5179_v40  ;;  %v5250_v15 = vunpack.c.l.s8.bf16 %v5002_v53  ;;  %v4885_v40 = vld [vmem:[#allocation2 + $0x428] sm:$0xff] }
 0x809   :  { %5315 = vmatprep.subr.bf16.mxu0 %v5177_v29  ;;  %v5259_v29 = vunpack.c.h.s8.bf16 %v5003_v4 }
 0x80b   :  { %5398 = vmatpush1.bf16.msra.mxu1 %v5178_v54  ;;  %v5013_v54 = vunpack.c.l.s8.bf16 %v4885_v40 }
 0x80c   :  { %5316 = vmatpush1.bf16.msra.mxu0 %v5176_v43  ;;  %5399 = vmatprep.subr.bf16.mxu1 %v5187_v44  ;;  %v5258_v43 = vunpack.c.h.s8.bf16 %v5002_v53  ;;  %v4884_v44 = vld [vmem:[#allocation2 + $0x420] sm:$0xff] }
 0x80d   :  { %5317 = vmatprep.subr.bf16.mxu0 %v5185_v45  ;;  %v5015_v45 = vunpack.c.l.s8.bf16 %v4887_v30  ;;  %v5012_v61 = vunpack.c.l.s8.bf16 %v4884_v44 }
 0x80f   :  { %5400 = vmatpush1.bf16.msra.mxu1 %v5186_v39  ;;  %v5021_v39 = vunpack.c.h.s8.bf16 %v4885_v40  ;;  %v4927_v40 = vld [vmem:[#allocation2 + $0x578] sm:$0xff] }
 0x810   :  { %5318 = vmatpush1.bf16.msra.mxu0 %v5184_v38  ;;  %5401 = vmatprep.subr.bf16.mxu1 %v5195_v13  ;;  %v5014_v38 = vunpack.c.l.s8.bf16 %v4886_v6  ;;  %v4893_v13 = vld [vmem:[#allocation2 + $0x468] sm:$0xff] }
 0x811   :  { %5319 = vmatprep.subr.bf16.mxu0 %v5193_v47  ;;  %v5023_v47 = vunpack.c.h.s8.bf16 %v4887_v30 }
 0x813   :  { %5402 = vmatpush1.bf16.msra.mxu1 %v5194_v56  ;;  %v5022_v56 = vunpack.c.h.s8.bf16 %v4886_v6 }
 0x814   :  { %5320 = vmatpush1.bf16.msra.mxu0 %v5192_v34  ;;  %5403 = vmatprep.subr.bf16.mxu1 %v5203_v28  ;;  %v5020_v34 = vunpack.c.h.s8.bf16 %v4884_v44  ;;  %v5031_v28 = vunpack.c.l.s8.bf16 %v4895_v10  ;;  %v4926_v44 = vld [vmem:[#allocation2 + $0x570] sm:$0xff] }
 0x815   :  { %5321 = vmatprep.subr.bf16.mxu0 %v5201_v31  ;;  %v5029_v31 = vunpack.c.l.s8.bf16 %v4893_v13 }
 0x817   :  { %5404 = vmatpush1.bf16.msra.mxu1 %v5202_v7  ;;  %v5030_v7 = vunpack.c.l.s8.bf16 %v4894_v19 }
 0x818   :  { %5322 = vmatpush1.bf16.msra.mxu0 %v5200_v22  ;;  %5405 = vmatprep.subr.bf16.mxu1 %v5211_v16  ;;  %v5028_v22 = vunpack.c.l.s8.bf16 %v4892_v9  ;;  %v5039_v16 = vunpack.c.h.s8.bf16 %v4895_v10 }
 0x819   :  { %5323 = vmatprep.subr.bf16.mxu0 %v5209_v36  ;;  %v5037_v36 = vunpack.c.h.s8.bf16 %v4893_v13  ;;  %v4935_v13 = vld [vmem:[#allocation2 + $0x5b8] sm:$0xff] }
 0x81b   :  { %5406 = vmatpush1.bf16.msra.mxu1 %v5210_v17  ;;  %v5038_v17 = vunpack.c.h.s8.bf16 %v4894_v19 }
 0x81c   :  { %5324 = vmatpush1.bf16.msra.mxu0 %v5208_v46  ;;  %5407 = vmatprep.subr.bf16.mxu1 %v5219_v33  ;;  %v5036_v46 = vunpack.c.h.s8.bf16 %v4892_v9  ;;  %v5047_v33 = vunpack.c.l.s8.bf16 %v4903_v42  ;;  %v4934_v9 = vld [vmem:[#allocation2 + $0x5b0] sm:$0xff] }
 0x81d   :  { %5325 = vmatprep.subr.bf16.mxu0 %v5217_v2  ;;  %v5045_v2 = vunpack.c.l.s8.bf16 %v4901_v26 }
 0x81f   :  { %5408 = vmatpush1.bf16.msra.mxu1 %v5218_v63  ;;  %v5053_v63 = vunpack.c.h.s8.bf16 %v4901_v26  ;;  %v4943_v26 = vld [vmem:[#allocation2 + $0x5f8] sm:$0xff] }
 0x820   :  { %5326 = vmatpush1.bf16.msra.mxu0 %v5216_v35  ;;  %5409 = vmatprep.subr.bf16.mxu1 %v5227_v51  ;;  %v4909_v51 = vld [vmem:[#allocation2 + $0x4e8] sm:$0xff] }
 0x821   :  { %5327 = vmatprep.subr.bf16.mxu0 %v5225_v23  ;;  %v5055_v23 = vunpack.c.h.s8.bf16 %v4903_v42 }
 0x823   :  { %5410 = vmatpush1.bf16.msra.mxu1 %v5226_v5  ;;  %v5061_v5 = vunpack.c.l.s8.bf16 %v4909_v51 }
 0x824   :  { %5328 = vmatpush1.bf16.msra.mxu0 %v5224_v32  ;;  %5411 = vmatprep.subr.bf16.mxu1 %v5235_v3  ;;  %v4908_v3 = vld [vmem:[#allocation2 + $0x4e0] sm:$0xff] }
 0x825   :  { %5329 = vmatprep.subr.bf16.mxu0 %v5233_v11  ;;  %v5063_v11 = vunpack.c.l.s8.bf16 %v4911_v27  ;;  %v5060_v62 = vunpack.c.l.s8.bf16 %v4908_v3  ;;  %v5068_v4 = vunpack.c.h.s8.bf16 %v4908_v3  ;;  %v4950_v3 = vld [vmem:[#allocation2 + $0x630] sm:$0xff] }
 0x827   :  { %5412 = vmatpush1.bf16.msra.mxu1 %v5234_v58  ;;  %v5069_v58 = vunpack.c.h.s8.bf16 %v4909_v51  ;;  %v4951_v51 = vld [vmem:[#allocation2 + $0x638] sm:$0xff] }
 0x828   :  { %5330 = vmatpush1.bf16.msra.mxu0 %v5232_v50  ;;  %5413 = vmatprep.subr.bf16.mxu1 %v5243_v60  ;;  %v5062_v50 = vunpack.c.l.s8.bf16 %v4910_v0  ;;  %v4917_v60 = vld [vmem:[#allocation2 + $0x528] sm:$0xff] }
 0x829   :  { %5331 = vmatprep.subr.bf16.mxu0 %v5241_v52  ;;  %v5071_v52 = vunpack.c.h.s8.bf16 %v4911_v27 }
 0x82b   :  { %5414 = vmatpush1.bf16.msra.mxu1 %v5242_v48  ;;  %v5077_v48 = vunpack.c.l.s8.bf16 %v4917_v60 }
 0x82c   :  { %5332 = vmatpush1.bf16.msra.mxu0 %v5240_v14  ;;  %5415 = vmatprep.subr.bf16.mxu1 %v5251_v12  ;;  %v5070_v14 = vunpack.c.h.s8.bf16 %v4910_v0  ;;  %v4916_v12 = vld [vmem:[#allocation2 + $0x520] sm:$0xff] }
 0x82d   :  { %5333 = vmatprep.subr.bf16.mxu0 %v5249_v57  ;;  %v5079_v57 = vunpack.c.l.s8.bf16 %v4919_v59  ;;  %v5076_v53 = vunpack.c.l.s8.bf16 %v4916_v12  ;;  %v5084_v30 = vunpack.c.h.s8.bf16 %v4916_v12  ;;  %v4958_v12 = vld [vmem:[#allocation2 + $0x670] sm:$0xff] }
 0x82f   :  { %5416 = vmatpush1.bf16.msra.mxu1 %v5250_v15  ;;  %v5085_v15 = vunpack.c.h.s8.bf16 %v4917_v60  ;;  %v4959_v60 = vld [vmem:[#allocation2 + $0x678] sm:$0xff] }
 0x830   :  { %5334 = vmatpush1.bf16.msra.mxu0 %v5248_v1  ;;  %5417 = vmatprep.subr.bf16.mxu1 %v5259_v29  ;;  %v5078_v1 = vunpack.c.l.s8.bf16 %v4918_v24  ;;  %v4925_v29 = vld [vmem:[#allocation2 + $0x568] sm:$0xff] }
 0x831   :  { %5335 = vmatprep.subr.bf16.mxu0 %v5257_v55  ;;  %v5087_v55 = vunpack.c.h.s8.bf16 %v4919_v59 }
 0x833   :  { %5418 = vmatpush1.bf16.msra.mxu1 %v5258_v43  ;;  %v5093_v43 = vunpack.c.l.s8.bf16 %v4925_v29 }
 0x834   :  { %5336 = vmatpush1.bf16.msra.mxu0 %v5256_v21  ;;  %5510 = vmatprep.subr.bf16.mxu1 %v5015_v45  ;;  %v5086_v21 = vunpack.c.h.s8.bf16 %v4918_v24  ;;  %v4924_v45 = vld [vmem:[#allocation2 + $0x560] sm:$0xff] }
 0x835   :  { %5428 = vmatprep.subr.bf16.mxu0 %v5013_v54  ;;  %v5095_v54 = vunpack.c.l.s8.bf16 %v4927_v40  ;;  %v5092_v6 = vunpack.c.l.s8.bf16 %v4924_v45  ;;  %v5100_v10 = vunpack.c.h.s8.bf16 %v4924_v45 }
 0x836   :  { %5420 = vmatmul.mubr.bf16.vlgmr.msra.gmra.mrb[28].mxu1 %v10724_v25 }
 0x837   :  { %5338 = vmatmul.mubr.bf16.vlgmr.msra.gmra.mrb[20].mxu0 %v10724_v25  ;;  %5511 = vmatpush1.bf16.msra.mxu1 %v5014_v38  ;;  %v5101_v38 = vunpack.c.h.s8.bf16 %v4925_v29 }
 0x838   :  { %5429 = vmatpush1.bf16.msra.mxu0 %v5012_v61  ;;  %5512 = vmatprep.subr.bf16.mxu1 %v5023_v47  ;;  %v5094_v61 = vunpack.c.l.s8.bf16 %v4926_v44  ;;  %v4933_v47 = vld [vmem:[#allocation2 + $0x5a8] sm:$0xff] }
 0x839   :  { %5430 = vmatprep.subr.bf16.mxu0 %v5021_v39  ;;  %5460 = vmatprep.mubr.bf16.mxu0 %v10721_v18  ;;  %v5103_v39 = vunpack.c.h.s8.bf16 %v4927_v40  ;;  %v5166_v40 = vunpack.c.h.s8.bf16 %v4958_v12 }
 0x83a   :  { %5542 = vmatprep.mubr.bf16.mxu1 %v10721_v18  ;;  %v4902_v18 = vld [vmem:[#allocation2 + $0x4b0] sm:$0xff] }
 0x83b   :  { %5513 = vmatpush1.bf16.msra.mxu1 %v5022_v56  ;;  %v5046_v35 = vunpack.c.l.s8.bf16 %v4902_v18  ;;  %v5054_v32 = vunpack.c.h.s8.bf16 %v4902_v18  ;;  %v5109_v56 = vunpack.c.l.s8.bf16 %v4933_v47 }
 0x83c   :  { %5431 = vmatpush1.bf16.msra.mxu0 %v5020_v34  ;;  %5514 = vmatprep.subr.bf16.mxu1 %v5031_v28  ;;  %v5102_v34 = vunpack.c.h.s8.bf16 %v4926_v44  ;;  %v4932_v28 = vld [vmem:[#allocation2 + $0x5a0] sm:$0xff] }
 0x83d   :  { %5432 = vmatprep.subr.bf16.mxu0 %v5029_v31  ;;  %v5111_v31 = vunpack.c.l.s8.bf16 %v4935_v13  ;;  %v5108_v19 = vunpack.c.l.s8.bf16 %v4932_v28  ;;  %v5116_v42 = vunpack.c.h.s8.bf16 %v4932_v28 }
 0x83f   :  { %5515 = vmatpush1.bf16.msra.mxu1 %v5030_v7  ;;  %v5117_v7 = vunpack.c.h.s8.bf16 %v4933_v47 }
 0x840   :  { %5433 = vmatpush1.bf16.msra.mxu0 %v5028_v22  ;;  %5516 = vmatprep.subr.bf16.mxu1 %v5039_v16  ;;  %v5110_v22 = vunpack.c.l.s8.bf16 %v4934_v9  ;;  %v4941_v16 = vld [vmem:[#allocation2 + $0x5e8] sm:$0xff] }
 0x841   :  { %5434 = vmatprep.subr.bf16.mxu0 %v5037_v36  ;;  %v5119_v36 = vunpack.c.h.s8.bf16 %v4935_v13 }
 0x843   :  { %5517 = vmatpush1.bf16.msra.mxu1 %v5038_v17  ;;  %v5125_v17 = vunpack.c.l.s8.bf16 %v4941_v16 }
 0x844   :  { %5435 = vmatpush1.bf16.msra.mxu0 %v5036_v46  ;;  %5518 = vmatprep.subr.bf16.mxu1 %v5047_v33  ;;  %v5118_v46 = vunpack.c.h.s8.bf16 %v4934_v9  ;;  %v4940_v33 = vld [vmem:[#allocation2 + $0x5e0] sm:$0xff] }
 0x845   :  { %5436 = vmatprep.subr.bf16.mxu0 %v5045_v2  ;;  %v5127_v2 = vunpack.c.l.s8.bf16 %v4943_v26  ;;  %v5124_v18 = vunpack.c.l.s8.bf16 %v4940_v33  ;;  %v5132_v27 = vunpack.c.h.s8.bf16 %v4940_v33 }
 0x847   :  { %5519 = vmatpush1.bf16.msra.mxu1 %v5046_v35  ;;  %v5133_v35 = vunpack.c.h.s8.bf16 %v4941_v16 }
 0x848   :  { %5437 = vmatpush1.bf16.msra.mxu0 %v5044_v8  ;;  %5520 = vmatprep.subr.bf16.mxu1 %v5055_v23  ;;  %v5126_v8 = vunpack.c.l.s8.bf16 %v4942_v20  ;;  %v4949_v23 = vld [vmem:[#allocation2 + $0x628] sm:$0xff] }
 0x849   :  { %5438 = vmatprep.subr.bf16.mxu0 %v5053_v63  ;;  %v5135_v63 = vunpack.c.h.s8.bf16 %v4943_v26 }
 0x84b   :  { %5521 = vmatpush1.bf16.msra.mxu1 %v5054_v32  ;;  %v5141_v32 = vunpack.c.l.s8.bf16 %v4949_v23 }
 0x84c   :  { %5439 = vmatpush1.bf16.msra.mxu0 %v5052_v49  ;;  %5522 = vmatprep.subr.bf16.mxu1 %v5063_v11  ;;  %v5134_v49 = vunpack.c.h.s8.bf16 %v4942_v20  ;;  %v4948_v11 = vld [vmem:[#allocation2 + $0x620] sm:$0xff] }
 0x84d   :  { %5440 = vmatprep.subr.bf16.mxu0 %v5061_v5  ;;  %v5143_v5 = vunpack.c.l.s8.bf16 %v4951_v51  ;;  %v5140_v0 = vunpack.c.l.s8.bf16 %v4948_v11  ;;  %v5148_v59 = vunpack.c.h.s8.bf16 %v4948_v11 }
 0x84f   :  { %5523 = vmatpush1.bf16.msra.mxu1 %v5062_v50  ;;  %v5149_v50 = vunpack.c.h.s8.bf16 %v4949_v23 }
 0x850   :  { %5441 = vmatpush1.bf16.msra.mxu0 %v5060_v62  ;;  %5524 = vmatprep.subr.bf16.mxu1 %v5071_v52  ;;  %v5142_v62 = vunpack.c.l.s8.bf16 %v4950_v3  ;;  %v4957_v52 = vld [vmem:[#allocation2 + $0x668] sm:$0xff] }
 0x851   :  { %5442 = vmatprep.subr.bf16.mxu0 %v5069_v58  ;;  %v5151_v58 = vunpack.c.h.s8.bf16 %v4951_v51 }
 0x853   :  { %5525 = vmatpush1.bf16.msra.mxu1 %v5070_v14  ;;  %v5157_v14 = vunpack.c.l.s8.bf16 %v4957_v52 }
 0x854   :  { %5443 = vmatpush1.bf16.msra.mxu0 %v5068_v4  ;;  %5526 = vmatprep.subr.bf16.mxu1 %v5079_v57  ;;  %v5150_v4 = vunpack.c.h.s8.bf16 %v4950_v3  ;;  %v4956_v57 = vld [vmem:[#allocation2 + $0x660] sm:$0xff] }
 0x855   :  { %5444 = vmatprep.subr.bf16.mxu0 %v5077_v48  ;;  %v5159_v48 = vunpack.c.l.s8.bf16 %v4959_v60  ;;  %v5156_v24 = vunpack.c.l.s8.bf16 %v4956_v57  ;;  %v5164_v29 = vunpack.c.h.s8.bf16 %v4956_v57 }
 0x857   :  { %5527 = vmatpush1.bf16.msra.mxu1 %v5078_v1  ;;  %v5167_v1 = vunpack.c.h.s8.bf16 %v4959_v60 }
 0x858   :  { %5445 = vmatpush1.bf16.msra.mxu0 %v5076_v53  ;;  %5528 = vmatprep.subr.bf16.mxu1 %v5087_v55  ;;  %v5158_v53 = vunpack.c.l.s8.bf16 %v4958_v12  ;;  %v4967_v55 = vld [vmem:[#allocation2 + $0x6b8] sm:$0xff] }
 0x859   :  { %5446 = vmatprep.subr.bf16.mxu0 %v5085_v15  ;;  %v4965_v15 = vld [vmem:[#allocation2 + $0x6a8] sm:$0xff] }
 0x85a   :  { %v5181_v44 = vunpack.c.h.s8.bf16 %v4965_v15 }
 0x85b   :  { %5529 = vmatpush1.bf16.msra.mxu1 %v5086_v21  ;;  %v5175_v21 = vunpack.c.l.s8.bf16 %v4967_v55 }
 0x85c   :  { %5447 = vmatpush1.bf16.msra.mxu0 %v5084_v30  ;;  %5530 = vmatprep.subr.bf16.mxu1 %v5095_v54  ;;  %v5173_v30 = vunpack.c.l.s8.bf16 %v4965_v15 }
 0x85d   :  { %5448 = vmatprep.subr.bf16.mxu0 %v5093_v43  ;;  %v4964_v43 = vld [vmem:[#allocation2 + $0x6a0] sm:$0xff] }
 0x85e   :  { %v5172_v54 = vunpack.c.l.s8.bf16 %v4964_v43 }
 0x85f   :  { %5531 = vmatpush1.bf16.msra.mxu1 %v5094_v61  ;;  %v4973_v61 = vld [vmem:[#allocation2 + $0x6e8] sm:$0xff] }
 0x860   :  { %5449 = vmatpush1.bf16.msra.mxu0 %v5092_v6  ;;  %5532 = vmatprep.subr.bf16.mxu1 %v5103_v39  ;;  %v5183_v6 = vunpack.c.h.s8.bf16 %v4967_v55  ;;  %v5180_v39 = vunpack.c.h.s8.bf16 %v4964_v43  ;;  %v5189_v13 = vunpack.c.l.s8.bf16 %v4973_v61  ;;  %v5197_v9 = vunpack.c.h.s8.bf16 %v4973_v61 }
 0x861   :  { %5450 = vmatprep.subr.bf16.mxu0 %v5101_v38  ;;  %v4975_v38 = vld [vmem:[#allocation2 + $0x6f8] sm:$0xff] }
 0x863   :  { %5533 = vmatpush1.bf16.msra.mxu1 %v5102_v34  ;;  %v4972_v34 = vld [vmem:[#allocation2 + $0x6e0] sm:$0xff] }
 0x864   :  { %5451 = vmatpush1.bf16.msra.mxu0 %v5100_v10  ;;  %5534 = vmatprep.subr.bf16.mxu1 %v5111_v31  ;;  %v5191_v10 = vunpack.c.l.s8.bf16 %v4975_v38  ;;  %v5188_v31 = vunpack.c.l.s8.bf16 %v4972_v34 }
 0x865   :  { %5452 = vmatprep.subr.bf16.mxu0 %v5109_v56  ;;  %v4974_v56 = vld [vmem:[#allocation2 + $0x6f0] sm:$0xff] }
 0x866   :  { %v5190_v28 = vunpack.c.l.s8.bf16 %v4974_v56  ;;  %v5198_v16 = vunpack.c.h.s8.bf16 %v4974_v56 }
 0x867   :  { %5535 = vmatpush1.bf16.msra.mxu1 %v5110_v22  ;;  %v4981_v22 = vld [vmem:[#allocation2 + $0x728] sm:$0xff] }
 0x868   :  { %5453 = vmatpush1.bf16.msra.mxu0 %v5108_v19  ;;  %5536 = vmatprep.subr.bf16.mxu1 %v5119_v36  ;;  %v5199_v19 = vunpack.c.h.s8.bf16 %v4975_v38  ;;  %v5196_v36 = vunpack.c.h.s8.bf16 %v4972_v34  ;;  %v5205_v26 = vunpack.c.l.s8.bf16 %v4981_v22  ;;  %v5213_v20 = vunpack.c.h.s8.bf16 %v4981_v22 }
 0x869   :  { %5454 = vmatprep.subr.bf16.mxu0 %v5117_v7  ;;  %v4983_v7 = vld [vmem:[#allocation2 + $0x738] sm:$0xff] }
 0x86b   :  { %5537 = vmatpush1.bf16.msra.mxu1 %v5118_v46  ;;  %v4980_v46 = vld [vmem:[#allocation2 + $0x720] sm:$0xff] }
 0x86c   :  { %5455 = vmatpush1.bf16.msra.mxu0 %v5116_v42  ;;  %5538 = vmatprep.subr.bf16.mxu1 %v5127_v2  ;;  %v5207_v42 = vunpack.c.l.s8.bf16 %v4983_v7  ;;  %v5204_v2 = vunpack.c.l.s8.bf16 %v4980_v46 }
 0x86d   :  { %5456 = vmatprep.subr.bf16.mxu0 %v5125_v17  ;;  %v4982_v17 = vld [vmem:[#allocation2 + $0x730] sm:$0xff] }
 0x86e   :  { %v5206_v33 = vunpack.c.l.s8.bf16 %v4982_v17  ;;  %v5214_v23 = vunpack.c.h.s8.bf16 %v4982_v17 }
 0x86f   :  { %5539 = vmatpush1.bf16.msra.mxu1 %v5126_v8  ;;  %v4989_v8 = vld [vmem:[#allocation2 + $0x768] sm:$0xff] }
 0x870   :  { %5457 = vmatpush1.bf16.msra.mxu0 %v5124_v18  ;;  %5540 = vmatprep.subr.bf16.mxu1 %v5135_v63  ;;  %v5215_v18 = vunpack.c.h.s8.bf16 %v4983_v7  ;;  %v5212_v63 = vunpack.c.h.s8.bf16 %v4980_v46  ;;  %v5221_v51 = vunpack.c.l.s8.bf16 %v4989_v8  ;;  %v5229_v3 = vunpack.c.h.s8.bf16 %v4989_v8 }
 0x871   :  { %5458 = vmatprep.subr.bf16.mxu0 %v5133_v35  ;;  %v4991_v35 = vld [vmem:[#allocation2 + $0x778] sm:$0xff] }
 0x873   :  { %5541 = vmatpush1.bf16.msra.mxu1 %v5134_v49  ;;  %v4988_v49 = vld [vmem:[#allocation2 + $0x760] sm:$0xff] }
 0x874   :  { %5459 = vmatpush1.bf16.msra.mxu0 %v5132_v27  ;;  %5551 = vmatprep.subr.bf16.mxu1 %v5143_v5  ;;  %v5223_v27 = vunpack.c.l.s8.bf16 %v4991_v35  ;;  %v5220_v5 = vunpack.c.l.s8.bf16 %v4988_v49 }
 0x875   :  { %5469 = vmatprep.subr.bf16.mxu0 %v5141_v32  ;;  %v4990_v32 = vld [vmem:[#allocation2 + $0x770] sm:$0xff] }
 0x876   :  { %5543 = vmatmul.mubr.bf16.vlgmr.msra.gmra.mrb[32].mxu1 %v10722_v37  ;;  %v5222_v11 = vunpack.c.l.s8.bf16 %v4990_v32 }
 0x877   :  { %5461 = vmatmul.mubr.bf16.vlgmr.msra.gmra.mrb[24].mxu0 %v10722_v37  ;;  %5552 = vmatpush1.bf16.msra.mxu1 %v5142_v62  ;;  %v5165_v37 = vunpack.c.h.s8.bf16 %v4957_v52  ;;  %v4997_v62 = vld [vmem:[#allocation2 + $0x7a8] sm:$0xff]  ;;  %v5230_v52 = vunpack.c.h.s8.bf16 %v4990_v32 }
 0x878   :  { %5470 = vmatpush1.bf16.msra.mxu0 %v5140_v0  ;;  %5553 = vmatprep.subr.bf16.mxu1 %v5151_v58  ;;  %v5231_v0 = vunpack.c.h.s8.bf16 %v4991_v35  ;;  %v5228_v58 = vunpack.c.h.s8.bf16 %v4988_v49  ;;  %v5237_v60 = vunpack.c.l.s8.bf16 %v4997_v62  ;;  %v5245_v12 = vunpack.c.h.s8.bf16 %v4997_v62 }
 0x879   :  { %5471 = vmatprep.subr.bf16.mxu0 %v5149_v50  ;;  %5501 = vmatprep.mubr.bf16.mxu0 %v10723_v41  ;;  %v4999_v50 = vld [vmem:[#allocation2 + $0x7b8] sm:$0xff] }
 0x87a   :  { %5583 = vmatprep.mubr.bf16.mxu1 %v10723_v41  ;;  %v4966_v41 = vld [vmem:[#allocation2 + $0x6b0] sm:$0xff] }
 0x87b   :  { %5554 = vmatpush1.bf16.msra.mxu1 %v5150_v4  ;;  %v5174_v45 = vunpack.c.l.s8.bf16 %v4966_v41  ;;  %v5182_v47 = vunpack.c.h.s8.bf16 %v4966_v41  ;;  %v4996_v4 = vld [vmem:[#allocation2 + $0x7a0] sm:$0xff] }
 0x87c   :  { %5472 = vmatpush1.bf16.msra.mxu0 %v5148_v59  ;;  %5555 = vmatprep.subr.bf16.mxu1 %v5159_v48  ;;  %v5239_v59 = vunpack.c.l.s8.bf16 %v4999_v50  ;;  %v5236_v48 = vunpack.c.l.s8.bf16 %v4996_v4 }
 0x87d   :  { %5473 = vmatprep.subr.bf16.mxu0 %v5157_v14  ;;  %v4998_v14 = vld [vmem:[#allocation2 + $0x7b0] sm:$0xff] }
 0x87e   :  { %v5238_v57 = vunpack.c.l.s8.bf16 %v4998_v14  ;;  %v5246_v15 = vunpack.c.h.s8.bf16 %v4998_v14 }
 0x87f   :  { %5556 = vmatpush1.bf16.msra.mxu1 %v5158_v53  ;;  %v5005_v53 = vld [vmem:[#allocation2 + $0x7e8] sm:$0xff] }
 0x880   :  { %5474 = vmatpush1.bf16.msra.mxu0 %v5156_v24  ;;  %5557 = vmatprep.subr.bf16.mxu1 %v5167_v1  ;;  %v5247_v24 = vunpack.c.h.s8.bf16 %v4999_v50  ;;  %v5244_v1 = vunpack.c.h.s8.bf16 %v4996_v4  ;;  %v5253_v55 = vunpack.c.l.s8.bf16 %v5005_v53  ;;  %v5261_v41 = vunpack.c.h.s8.bf16 %v5005_v53 }
 0x881   :  { %5475 = vmatprep.subr.bf16.mxu0 %v5165_v37  ;;  %v5007_v37 = vld [vmem:[#allocation2 + $0x7f8] sm:$0xff] }
 0x883   :  { %5558 = vmatpush1.bf16.msra.mxu1 %v5166_v40  ;;  %v5004_v40 = vld [vmem:[#allocation2 + $0x7e0] sm:$0xff] }
 0x884   :  { %5476 = vmatpush1.bf16.msra.mxu0 %v5164_v29  ;;  %5559 = vmatprep.subr.bf16.mxu1 %v5175_v21  ;;  %v5255_v29 = vunpack.c.l.s8.bf16 %v5007_v37  ;;  %v5252_v21 = vunpack.c.l.s8.bf16 %v5004_v40 }
 0x885   :  { %5477 = vmatprep.subr.bf16.mxu0 %v5173_v30  ;;  %v5006_v30 = vld [vmem:[#allocation2 + $0x7f0] sm:$0xff] }
 0x886   :  { %v5254_v43 = vunpack.c.l.s8.bf16 %v5006_v30  ;;  %v5262_v61 = vunpack.c.h.s8.bf16 %v5006_v30 }
 0x887   :  { %5560 = vmatpush1.bf16.msra.mxu1 %v5174_v45  ;;  %v5717_v45 = vld [vmem:[#allocation14 + $0x8] sm:$0xff] }
 0x888   :  { %5478 = vmatpush1.bf16.msra.mxu0 %v5172_v54  ;;  %5561 = vmatprep.subr.bf16.mxu1 %v5183_v6  ;;  %v5263_v54 = vunpack.c.h.s8.bf16 %v5007_v37  ;;  %v5260_v6 = vunpack.c.h.s8.bf16 %v5004_v40  ;;  %v5847_v38 = vunpack.c.l.s8.bf16 %v5717_v45  ;;  %v5851_v56 = vunpack.c.h.s8.bf16 %v5717_v45 }
 0x889   :  { %5479 = vmatprep.subr.bf16.mxu0 %v5181_v44  ;;  %v5719_v44 = vld [vmem:[#allocation14 + $0x18] sm:$0xff] }
 0x88b   :  { %5562 = vmatpush1.bf16.msra.mxu1 %v5182_v47  ;;  %v5716_v47 = vld [vmem:[#allocation14] sm:$0xff] }
 0x88c   :  { %5480 = vmatpush1.bf16.msra.mxu0 %v5180_v39  ;;  %5563 = vmatprep.subr.bf16.mxu1 %v5191_v10  ;;  %v5849_v39 = vunpack.c.l.s8.bf16 %v5719_v44  ;;  %v5846_v10 = vunpack.c.l.s8.bf16 %v5716_v47 }
 0x88d   :  { %5481 = vmatprep.subr.bf16.mxu0 %v5189_v13  ;;  %v5718_v13 = vld [vmem:[#allocation14 + $0x10] sm:$0xff] }
 0x88e   :  { %v5848_v34 = vunpack.c.l.s8.bf16 %v5718_v13  ;;  %v5852_v22 = vunpack.c.h.s8.bf16 %v5718_v13 }
 0x88f   :  { %5564 = vmatpush1.bf16.msra.mxu1 %v5190_v28  ;;  %v5721_v28 = vld [vmem:[#allocation14 + $0x28] sm:$0xff] }
 0x890   :  { %5482 = vmatpush1.bf16.msra.mxu0 %v5188_v31  ;;  %5565 = vmatprep.subr.bf16.mxu1 %v5199_v19  ;;  %v5853_v31 = vunpack.c.h.s8.bf16 %v5719_v44  ;;  %v5850_v19 = vunpack.c.h.s8.bf16 %v5716_v47  ;;  %v5855_v7 = vunpack.c.l.s8.bf16 %v5721_v28  ;;  %v5859_v17 = vunpack.c.h.s8.bf16 %v5721_v28 }
 0x891   :  { %5483 = vmatprep.subr.bf16.mxu0 %v5197_v9  ;;  %v5723_v9 = vld [vmem:[#allocation14 + $0x38] sm:$0xff] }
 0x893   :  { %5566 = vmatpush1.bf16.msra.mxu1 %v5198_v16  ;;  %v5720_v16 = vld [vmem:[#allocation14 + $0x20] sm:$0xff] }
 0x894   :  { %5484 = vmatpush1.bf16.msra.mxu0 %v5196_v36  ;;  %5567 = vmatprep.subr.bf16.mxu1 %v5207_v42  ;;  %v5857_v36 = vunpack.c.l.s8.bf16 %v5723_v9  ;;  %v5854_v42 = vunpack.c.l.s8.bf16 %v5720_v16 }
 0x895   :  { %5485 = vmatprep.subr.bf16.mxu0 %v5205_v26  ;;  %v5722_v26 = vld [vmem:[#allocation14 + $0x30] sm:$0xff] }
 0x896   :  { %v5856_v46 = vunpack.c.l.s8.bf16 %v5722_v26 }
 0x897   :  { %5568 = vmatpush1.bf16.msra.mxu1 %v5206_v33  ;;  %v5725_v33 = vld [vmem:[#allocation14 + $0x48] sm:$0xff] }
 0x898   :  { %5486 = vmatpush1.bf16.msra.mxu0 %v5204_v2  ;;  %5569 = vmatprep.subr.bf16.mxu1 %v5215_v18  ;;  %v5861_v2 = vunpack.c.h.s8.bf16 %v5723_v9  ;;  %v5860_v18 = vunpack.c.h.s8.bf16 %v5722_v26  ;;  %v5863_v8 = vunpack.c.l.s8.bf16 %v5725_v33  ;;  %v5867_v49 = vunpack.c.h.s8.bf16 %v5725_v33 }
 0x899   :  { %5487 = vmatprep.subr.bf16.mxu0 %v5213_v20  ;;  %v5858_v20 = vunpack.c.h.s8.bf16 %v5720_v16 }
 0x89b   :  { %5570 = vmatpush1.bf16.msra.mxu1 %v5214_v23  ;;  %v5726_v23 = vld [vmem:[#allocation14 + $0x50] sm:$0xff] }
 0x89c   :  { %5488 = vmatpush1.bf16.msra.mxu0 %v5212_v63  ;;  %5571 = vmatprep.subr.bf16.mxu1 %v5223_v27  ;;  %v5724_v63 = vld [vmem:[#allocation14 + $0x40] sm:$0xff]  ;;  %v5864_v27 = vunpack.c.l.s8.bf16 %v5726_v23 }
 0x89d   :  { %5489 = vmatprep.subr.bf16.mxu0 %v5221_v51  ;;  %v5862_v51 = vunpack.c.l.s8.bf16 %v5724_v63 }
 0x89f   :  { %5572 = vmatpush1.bf16.msra.mxu1 %v5222_v11  ;;  %v5731_v11 = vld [vmem:[#allocation14 + $0x78] sm:$0xff] }
 0x8a0   :  { %5490 = vmatpush1.bf16.msra.mxu0 %v5220_v5  ;;  %5573 = vmatprep.subr.bf16.mxu1 %v5231_v0  ;;  %v5729_v5 = vld [vmem:[#allocation14 + $0x68] sm:$0xff]  ;;  %v5868_v0 = vunpack.c.h.s8.bf16 %v5726_v23  ;;  %v5873_v50 = vunpack.c.l.s8.bf16 %v5731_v11  ;;  %v5877_v14 = vunpack.c.h.s8.bf16 %v5731_v11 }
 0x8a1   :  { %5491 = vmatprep.subr.bf16.mxu0 %v5229_v3  ;;  %v5866_v3 = vunpack.c.h.s8.bf16 %v5724_v63  ;;  %v5871_v62 = vunpack.c.l.s8.bf16 %v5729_v5  ;;  %v5875_v4 = vunpack.c.h.s8.bf16 %v5729_v5 }
 0x8a3   :  { %5574 = vmatpush1.bf16.msra.mxu1 %v5230_v52  ;;  %v5730_v52 = vld [vmem:[#allocation14 + $0x70] sm:$0xff] }
 0x8a4   :  { %5492 = vmatpush1.bf16.msra.mxu0 %v5228_v58  ;;  %5575 = vmatprep.subr.bf16.mxu1 %v5239_v59  ;;  %v5728_v58 = vld [vmem:[#allocation14 + $0x60] sm:$0xff]  ;;  %v5872_v59 = vunpack.c.l.s8.bf16 %v5730_v52 }
 0x8a5   :  { %5493 = vmatprep.subr.bf16.mxu0 %v5237_v60  ;;  %v5870_v60 = vunpack.c.l.s8.bf16 %v5728_v58 }
 0x8a7   :  { %5576 = vmatpush1.bf16.msra.mxu1 %v5238_v57  ;;  %v5735_v57 = vld [vmem:[#allocation14 + $0x98] sm:$0xff] }
 0x8a8   :  { %5494 = vmatpush1.bf16.msra.mxu0 %v5236_v48  ;;  %5577 = vmatprep.subr.bf16.mxu1 %v5247_v24  ;;  %v5733_v48 = vld [vmem:[#allocation14 + $0x88] sm:$0xff]  ;;  %v5876_v24 = vunpack.c.h.s8.bf16 %v5730_v52  ;;  %v5881_v37 = vunpack.c.l.s8.bf16 %v5735_v57  ;;  %v5885_v30 = vunpack.c.h.s8.bf16 %v5735_v57 }
 0x8a9   :  { %5495 = vmatprep.subr.bf16.mxu0 %v5245_v12  ;;  %v5874_v12 = vunpack.c.h.s8.bf16 %v5728_v58  ;;  %v5879_v53 = vunpack.c.l.s8.bf16 %v5733_v48  ;;  %v5883_v40 = vunpack.c.h.s8.bf16 %v5733_v48  ;;  %v10726_v58 = vld [vmem:[#allocation55_spill] sm:$0xff] }
 0x8ab   :  { %5578 = vmatpush1.bf16.msra.mxu1 %v5246_v15  ;;  %v5734_v15 = vld [vmem:[#allocation14 + $0x90] sm:$0xff] }
 0x8ac   :  { %5496 = vmatpush1.bf16.msra.mxu0 %v5244_v1  ;;  %5579 = vmatprep.subr.bf16.mxu1 %v5255_v29  ;;  %v5732_v1 = vld [vmem:[#allocation14 + $0x80] sm:$0xff]  ;;  %v5880_v29 = vunpack.c.l.s8.bf16 %v5734_v15 }
 0x8ad   :  { %5497 = vmatprep.subr.bf16.mxu0 %v5253_v55  ;;  %v5878_v55 = vunpack.c.l.s8.bf16 %v5732_v1 }
 0x8af   :  { %5580 = vmatpush1.bf16.msra.mxu1 %v5254_v43  ;;  %v5739_v43 = vld [vmem:[#allocation14 + $0xb8] sm:$0xff] }
 0x8b0   :  { %5498 = vmatpush1.bf16.msra.mxu0 %v5252_v21  ;;  %5581 = vmatprep.subr.bf16.mxu1 %v5263_v54  ;;  %v5737_v21 = vld [vmem:[#allocation14 + $0xa8] sm:$0xff]  ;;  %v5884_v54 = vunpack.c.h.s8.bf16 %v5734_v15  ;;  %v5889_v44 = vunpack.c.l.s8.bf16 %v5739_v43  ;;  %v5893_v13 = vunpack.c.h.s8.bf16 %v5739_v43 }
 0x8b1   :  { %5499 = vmatprep.subr.bf16.mxu0 %v5261_v41  ;;  %v5882_v41 = vunpack.c.h.s8.bf16 %v5732_v1  ;;  %v5887_v45 = vunpack.c.l.s8.bf16 %v5737_v21  ;;  %v5891_v47 = vunpack.c.h.s8.bf16 %v5737_v21 }
 0x8b3   :  { %5582 = vmatpush1.bf16.msra.mxu1 %v5262_v61  ;;  %v5738_v61 = vld [vmem:[#allocation14 + $0xb0] sm:$0xff] }
 0x8b4   :  { %5500 = vmatpush1.bf16.msra.mxu0 %v5260_v6  ;;  %6266 = vmatprep.subr.bf16.mxu1 %v5849_v39  ;;  %v5736_v6 = vld [vmem:[#allocation14 + $0xa0] sm:$0xff]  ;;  %v5888_v39 = vunpack.c.l.s8.bf16 %v5738_v61 }
 0x8b5   :  { %6102 = vmatprep.subr.bf16.mxu0 %v5847_v38  ;;  %v5886_v38 = vunpack.c.l.s8.bf16 %v5736_v6 }
 0x8b6   :  { %5584 = vmatmul.mubr.bf16.vlgmr.msra.gmra.mrb[32].mxu1 %v10724_v25 }
 0x8b7   :  { %5502 = vmatmul.mubr.bf16.vlgmr.msra.gmra.mrb[24].mxu0 %v10724_v25  ;;  %6267 = vmatpush1.bf16.msra.mxu1 %v5848_v34  ;;  %v5727_v25 = vld [vmem:[#allocation14 + $0x58] sm:$0xff] }
 0x8b8   :  { %6103 = vmatpush1.bf16.msra.mxu0 %v5846_v10  ;;  %6268 = vmatprep.subr.bf16.mxu1 %v5853_v31  ;;  %v5865_v35 = vunpack.c.l.s8.bf16 %v5727_v25  ;;  %v5869_v32 = vunpack.c.h.s8.bf16 %v5727_v25  ;;  %v5741_v10 = vld [vmem:[#allocation14 + $0xc8] sm:$0xff]  ;;  %v5743_v34 = vld [vmem:[#allocation14 + $0xd8] sm:$0xff]  ;;  %v5892_v31 = vunpack.c.h.s8.bf16 %v5738_v61 }
 0x8b9   :  { %6104 = vmatprep.subr.bf16.mxu0 %v5851_v56  ;;  %v5890_v56 = vunpack.c.h.s8.bf16 %v5736_v6  ;;  %v5895_v28 = vunpack.c.l.s8.bf16 %v5741_v10  ;;  %v5897_v9 = vunpack.c.l.s8.bf16 %v5743_v34  ;;  %v5899_v16 = vunpack.c.h.s8.bf16 %v5741_v10 }
 0x8ba   :  { %v5901_v26 = vunpack.c.h.s8.bf16 %v5743_v34 }
 0x8bb   :  { %6269 = vmatpush1.bf16.msra.mxu1 %v5852_v22  ;;  %v5742_v22 = vld [vmem:[#allocation14 + $0xd0] sm:$0xff] }
 0x8bc   :  { %6105 = vmatpush1.bf16.msra.mxu0 %v5850_v19  ;;  %6270 = vmatprep.subr.bf16.mxu1 %v5857_v36  ;;  %v5740_v19 = vld [vmem:[#allocation14 + $0xc0] sm:$0xff]  ;;  %v5896_v36 = vunpack.c.l.s8.bf16 %v5742_v22 }
 0x8bd   :  { %6106 = vmatprep.subr.bf16.mxu0 %v5855_v7  ;;  %v5894_v7 = vunpack.c.l.s8.bf16 %v5740_v19 }
 0x8bf   :  { %6271 = vmatpush1.bf16.msra.mxu1 %v5856_v46  ;;  %v5747_v46 = vld [vmem:[#allocation14 + $0xf8] sm:$0xff] }
 0x8c0   :  { %6107 = vmatpush1.bf16.msra.mxu0 %v5854_v42  ;;  %6272 = vmatprep.subr.bf16.mxu1 %v5861_v2  ;;  %v5745_v42 = vld [vmem:[#allocation14 + $0xe8] sm:$0xff]  ;;  %v5900_v2 = vunpack.c.h.s8.bf16 %v5742_v22  ;;  %v5905_v25 = vunpack.c.l.s8.bf16 %v5747_v46  ;;  %v5909_v23 = vunpack.c.h.s8.bf16 %v5747_v46 }
 0x8c1   :  { %6108 = vmatprep.subr.bf16.mxu0 %v5859_v17  ;;  %v5898_v17 = vunpack.c.h.s8.bf16 %v5740_v19  ;;  %v5903_v33 = vunpack.c.l.s8.bf16 %v5745_v42  ;;  %v5907_v63 = vunpack.c.h.s8.bf16 %v5745_v42 }
 0x8c3   :  { %6273 = vmatpush1.bf16.msra.mxu1 %v5860_v18  ;;  %v5746_v18 = vld [vmem:[#allocation14 + $0xf0] sm:$0xff] }
 0x8c4   :  { %6109 = vmatpush1.bf16.msra.mxu0 %v5858_v20  ;;  %6274 = vmatprep.subr.bf16.mxu1 %v5865_v35  ;;  %v5744_v20 = vld [vmem:[#allocation14 + $0xe0] sm:$0xff]  ;;  %v5904_v35 = vunpack.c.l.s8.bf16 %v5746_v18 }
 0x8c5   :  { %6110 = vmatprep.subr.bf16.mxu0 %v5863_v8  ;;  %v5902_v8 = vunpack.c.l.s8.bf16 %v5744_v20 }
 0x8c7   :  { %6275 = vmatpush1.bf16.msra.mxu1 %v5864_v27  ;;  %v9886_v27 = vld [vmem:[#allocation14 + $0x118] sm:$0xff] }
 0x8c8   :  { %6111 = vmatpush1.bf16.msra.mxu0 %v5862_v51  ;;  %6276 = vmatprep.subr.bf16.mxu1 %v5869_v32  ;;  %v9884_v51 = vld [vmem:[#allocation14 + $0x108] sm:$0xff]  ;;  %v5908_v32 = vunpack.c.h.s8.bf16 %v5746_v18  ;;  %v5913_v11 = vunpack.c.l.s8.bf16 %v9886_v27  ;;  %v5917_v34 = vunpack.c.h.s8.bf16 %v9886_v27 }
 0x8c9   :  { %6112 = vmatprep.subr.bf16.mxu0 %v5867_v49  ;;  %v5906_v49 = vunpack.c.h.s8.bf16 %v5744_v20  ;;  %v5911_v5 = vunpack.c.l.s8.bf16 %v9884_v51  ;;  %v5915_v10 = vunpack.c.h.s8.bf16 %v9884_v51 }
 0x8cb   :  { %6277 = vmatpush1.bf16.msra.mxu1 %v5868_v0  ;;  %v9892_v0 = vld [vmem:[#allocation12] sm:$0xff] }
 0x8cc   :  { %6113 = vmatpush1.bf16.msra.mxu0 %v5866_v3  ;;  %6278 = vmatprep.subr.bf16.mxu1 %v5873_v50  ;;  %v9890_v3 = vld [vmem:[#allocation11] sm:$0xff]  ;;  %v5659_v57 = vrot.slane %v9892_v0, %v10726_v58 }
 0x8cd   :  { %6114 = vmatprep.subr.bf16.mxu0 %v5871_v62  ;;  %v10725_v62 = vld [vmem:[#allocation54_spill] sm:$0xff]  ;;  %v5609_v52 = vrot.slane %v9890_v3, %v10726_v58 }
 0x8ce   :  { %v5605_v50 = vrot.slane %v9890_v3, %v10725_v62 }
 0x8cf   :  { %6279 = vmatpush1.bf16.msra.mxu1 %v5872_v59 }
 0x8d0   :  { %6115 = vmatpush1.bf16.msra.mxu0 %v5870_v60  ;;  %6280 = vmatprep.subr.bf16.mxu1 %v5877_v14  ;;  %v10727_v60 = vld [vmem:[#allocation61_spill] sm:$0xff] }
 0x8d1   :  { %6116 = vmatprep.subr.bf16.mxu0 %v5875_v4  ;;  %v5617_v59 = vrot.slane %v9890_v3, %v10727_v60  ;;  %v5655_v4 = vrot.slane %v9892_v0, %v10725_v62 }
 0x8d3   :  { %6281 = vmatpush1.bf16.msra.mxu1 %v5876_v24 }
 0x8d4   :  { %6117 = vmatpush1.bf16.msra.mxu0 %v5874_v12  ;;  %6282 = vmatprep.subr.bf16.mxu1 %v5881_v37  ;;  %v5667_v12 = vrot.slane %v9892_v0, %v10727_v60 }
 0x8d5   :  { %6118 = vmatprep.subr.bf16.mxu0 %v5879_v53 }
 0x8d7   :  { %6283 = vmatpush1.bf16.msra.mxu1 %v5880_v29 }
 0x8d8   :  { %6119 = vmatpush1.bf16.msra.mxu0 %v5878_v55  ;;  %6284 = vmatprep.subr.bf16.mxu1 %v5885_v30 }
 0x8d9   :  { %6120 = vmatprep.subr.bf16.mxu0 %v5883_v40 }
 0x8db   :  { %6285 = vmatpush1.bf16.msra.mxu1 %v5884_v54 }
 0x8dc   :  { %6121 = vmatpush1.bf16.msra.mxu0 %v5882_v41  ;;  %6286 = vmatprep.subr.bf16.mxu1 %v5889_v44  ;;  %v5750_v44 = vld [vmem:[#allocation14 + $0x110] sm:$0xff] }
 0x8dd   :  { %6122 = vmatprep.subr.bf16.mxu0 %v5887_v45  ;;  %v5748_v45 = vld [vmem:[#allocation14 + $0x100] sm:$0xff]  ;;  %v5916_v19 = vunpack.c.h.s8.bf16 %v5750_v44 }
 0x8df   :  { %6287 = vmatpush1.bf16.msra.mxu1 %v5888_v39  ;;  %v5910_v39 = vunpack.c.l.s8.bf16 %v5748_v45 }
 0x8e0   :  { %6123 = vmatpush1.bf16.msra.mxu0 %v5886_v38  ;;  %6288 = vmatprep.subr.bf16.mxu1 %v5893_v13 }
 0x8e1   :  { %6124 = vmatprep.subr.bf16.mxu0 %v5891_v47  ;;  %v5912_v47 = vunpack.c.l.s8.bf16 %v5750_v44  ;;  %v5769_v44 = vld [vmem:[#allocation14 + $0x1a8] sm:$0xff] }
 0x8e3   :  { %6289 = vmatpush1.bf16.msra.mxu1 %v5892_v31  ;;  %v5755_v31 = vld [vmem:[#allocation14 + $0x138] sm:$0xff] }
 0x8e4   :  { %6125 = vmatpush1.bf16.msra.mxu0 %v5890_v56  ;;  %6290 = vmatprep.subr.bf16.mxu1 %v5897_v9  ;;  %v5753_v56 = vld [vmem:[#allocation14 + $0x128] sm:$0xff]  ;;  %v5914_v9 = vunpack.c.h.s8.bf16 %v5748_v45 }
 0x8e5   :  { %6126 = vmatprep.subr.bf16.mxu0 %v5895_v28  ;;  %v5919_v22 = vunpack.c.l.s8.bf16 %v5753_v56  ;;  %v5923_v46 = vunpack.c.h.s8.bf16 %v5753_v56 }
 0x8e7   :  { %6291 = vmatpush1.bf16.msra.mxu1 %v5896_v36  ;;  %v5752_v36 = vld [vmem:[#allocation14 + $0x120] sm:$0xff] }
 0x8e8   :  { %6127 = vmatpush1.bf16.msra.mxu0 %v5894_v7  ;;  %6292 = vmatprep.subr.bf16.mxu1 %v5901_v26  ;;  %v5921_v7 = vunpack.c.l.s8.bf16 %v5755_v31  ;;  %v5918_v26 = vunpack.c.l.s8.bf16 %v5752_v36 }
 0x8e9   :  { %6128 = vmatprep.subr.bf16.mxu0 %v5899_v16  ;;  %v5754_v16 = vld [vmem:[#allocation14 + $0x130] sm:$0xff] }
 0x8ea   :  { %v5920_v42 = vunpack.c.l.s8.bf16 %v5754_v16  ;;  %v5924_v20 = vunpack.c.h.s8.bf16 %v5754_v16 }
 0x8eb   :  { %6293 = vmatpush1.bf16.msra.mxu1 %v5900_v2  ;;  %v5757_v2 = vld [vmem:[#allocation14 + $0x148] sm:$0xff] }
 0x8ec   :  { %6129 = vmatpush1.bf16.msra.mxu0 %v5898_v17  ;;  %6294 = vmatprep.subr.bf16.mxu1 %v5905_v25  ;;  %v5925_v17 = vunpack.c.h.s8.bf16 %v5755_v31  ;;  %v5922_v25 = vunpack.c.h.s8.bf16 %v5752_v36  ;;  %v5927_v18 = vunpack.c.l.s8.bf16 %v5757_v2  ;;  %v5931_v27 = vunpack.c.h.s8.bf16 %v5757_v2  ;;  %v10728_v2 = vld [vmem:[#allocation60_spill] sm:$0xff] }
 0x8ed   :  { %6130 = vmatprep.subr.bf16.mxu0 %v5903_v33  ;;  %v5759_v33 = vld [vmem:[#allocation14 + $0x158] sm:$0xff]  ;;  %v5955_v31 = vunpack.c.h.s8.bf16 %v5769_v44 }
 0x8ef   :  { %6295 = vmatpush1.bf16.msra.mxu1 %v5904_v35  ;;  %v5756_v35 = vld [vmem:[#allocation14 + $0x140] sm:$0xff] }
 0x8f0   :  { %6131 = vmatpush1.bf16.msra.mxu0 %v5902_v8  ;;  %6296 = vmatprep.subr.bf16.mxu1 %v5909_v23  ;;  %v5929_v8 = vunpack.c.l.s8.bf16 %v5759_v33  ;;  %v5926_v23 = vunpack.c.l.s8.bf16 %v5756_v35 }
 0x8f1   :  { %6132 = vmatprep.subr.bf16.mxu0 %v5907_v63  ;;  %v5758_v63 = vld [vmem:[#allocation14 + $0x150] sm:$0xff] }
 0x8f2   :  { %v5928_v51 = vunpack.c.l.s8.bf16 %v5758_v63 }
 0x8f3   :  { %6297 = vmatpush1.bf16.msra.mxu1 %v5908_v32  ;;  %v5761_v32 = vld [vmem:[#allocation14 + $0x168] sm:$0xff] }
 0x8f4   :  { %6133 = vmatpush1.bf16.msra.mxu0 %v5906_v49  ;;  %6307 = vmatprep.subr.bf16.mxu1 %v5913_v11  ;;  %v5933_v49 = vunpack.c.h.s8.bf16 %v5759_v33  ;;  %v5930_v11 = vunpack.c.h.s8.bf16 %v5756_v35  ;;  %v5613_v33 = vrot.slane %v9890_v3, %v10728_v2 }
 0x8f5   :  { %6143 = vmatprep.subr.bf16.mxu0 %v5911_v5  ;;  %v5763_v5 = vld [vmem:[#allocation14 + $0x178] sm:$0xff] }
 0x909   :  { %v9902_v48 = vpop.f32.mrb[28].mxu1 }
 0x90a   :  { %v5339_v14 = vpop.f32.mrb[20].mxu0  ;;  %v5423_v37 = vpop.f32.mrb[29].mxu1 }
 0x90b   :  { %v5642_v24 = vmul.f32 %v5605_v50, %v5339_v14  ;;  %v5341_v53 = vpop.f32.mrb[21].mxu0  ;;  %v5645_v15 = vmul.f32 %v5617_v59, %v5423_v37  ;;  %v5425_v29 = vpop.f32.mrb[30].mxu1  ;;  %v5932_v50 = vunpack.c.h.s8.bf16 %v5758_v63  ;;  %v5937_v59 = vunpack.c.l.s8.bf16 %v5763_v5  ;;  %v5762_v14 = vld [vmem:[#allocation14 + $0x170] sm:$0xff]  ;;  %v5765_v37 = vld [vmem:[#allocation14 + $0x188] sm:$0xff] }
 0x90c   :  { %v5643_v1 = vmul.f32 %v5609_v52, %v5341_v53  ;;  %v5343_v55 = vpop.f32.mrb[22].mxu0  ;;  %v5426_v21 = vpop.f32.mrb[31].mxu1  ;;  %v5935_v52 = vunpack.c.l.s8.bf16 %v5761_v32  ;;  %v5941_v53 = vunpack.c.h.s8.bf16 %v5763_v5  ;;  %v5943_v29 = vunpack.c.l.s8.bf16 %v5765_v37  ;;  %v5778_v5 = vld [vmem:[#allocation14 + $0x1f0] sm:$0xff] }
 0x90d   :  { %v5692_v40 = vadd.f32 %v5655_v4, %v5642_v24  ;;  %v5344_v30 = vpop.f32.mrb[23].mxu0  ;;  %v5695_v41 = vadd.f32 %v5667_v12, %v5645_v15  ;;  %v5760_v4 = vld [vmem:[#allocation14 + $0x160] sm:$0xff]  ;;  %v5936_v12 = vunpack.c.l.s8.bf16 %v5762_v14  ;;  %v5939_v24 = vunpack.c.h.s8.bf16 %v5761_v32  ;;  %v5766_v21 = vld [vmem:[#allocation14 + $0x190] sm:$0xff] }
 0x90e   :  { %v5693_v43 = vadd.f32 %v5659_v57, %v5643_v1  ;;  %v5934_v57 = vunpack.c.l.s8.bf16 %v5760_v4  ;;  %v5767_v1 = vld [vmem:[#allocation14 + $0x198] sm:$0xff]  ;;  %v5938_v15 = vunpack.c.h.s8.bf16 %v5760_v4  ;;  %v5940_v55 = vunpack.c.h.s8.bf16 %v5762_v14  ;;  %v5764_v30 = vld [vmem:[#allocation14 + $0x180] sm:$0xff]  ;;  %v5781_v14 = vld [vmem:[#allocation14 + $0x208] sm:$0xff] }
 0x90f   :  { %v5700_v54 = vmax.f32 %v5692_v40, 0.0  ;;  %v5703_v61 = vmax.f32 %v5695_v41, 0.0  ;;  %v5945_v40 = vunpack.c.l.s8.bf16 %v5767_v1  ;;  %v5944_v41 = vunpack.c.l.s8.bf16 %v5766_v21  ;;  %v5776_v32 = vld [vmem:[#allocation14 + $0x1e0] sm:$0xff] }
 0x910   :  { %v5701_v6 = vmax.f32 %v5693_v43, 0.0  ;;  %v5942_v43 = vunpack.c.l.s8.bf16 %v5764_v30  ;;  %v5949_v45 = vunpack.c.h.s8.bf16 %v5767_v1  ;;  %v5780_v1 = vld [vmem:[#allocation14 + $0x200] sm:$0xff] }
 0x911   :  { %v5708_v13 = vpack.c.bf16 %v5700_v54, %v5700_v54  ;;  %v5711_v28 = vpack.c.bf16 %v5703_v61, %v5703_v61  ;;  %v5947_v54 = vunpack.c.h.s8.bf16 %v5765_v37  ;;  %v5946_v61 = vunpack.c.h.s8.bf16 %v5764_v30 }
 0x912   :  { %v5709_v38 = vpack.c.bf16 %v5701_v6, %v5701_v6  ;;  %v5771_v6 = vld [vmem:[#allocation14 + $0x1b8] sm:$0xff]  ;;  %v5979_v30 = vunpack.c.h.s8.bf16 %v5781_v14 }
 0x914   :  { %6134 = vmatprep.mubr.bf16.mxu0 %v5709_v38  ;;  %6298 = vmatprep.mubr.bf16.mxu1 %v5709_v38  ;;  %v5948_v38 = vunpack.c.h.s8.bf16 %v5766_v21 }
 0x915   :  { %6135 = vmatmul.mubr.bf16.vlgmr.msra.gmra.mrb[28].mxu0 %v5708_v13  ;;  %6299 = vmatmul.mubr.bf16.vlgmr.msra.gmra.mrb[36].mxu1 %v5708_v13  ;;  %v5768_v13 = vld [vmem:[#allocation14 + $0x1a0] sm:$0xff] }
 0x916   :  { %6144 = vmatpush1.bf16.msra.mxu0 %v5910_v39  ;;  %6308 = vmatpush1.bf16.msra.mxu1 %v5912_v47  ;;  %v5951_v39 = vunpack.c.l.s8.bf16 %v5769_v44  ;;  %v5953_v47 = vunpack.c.l.s8.bf16 %v5771_v6 }
 0x917   :  { %6175 = vmatprep.mubr.bf16.mxu0 %v5711_v28  ;;  %6339 = vmatprep.mubr.bf16.mxu1 %v5711_v28  ;;  %v5957_v28 = vunpack.c.h.s8.bf16 %v5771_v6 }
 0x918   :  { %6145 = vmatprep.subr.bf16.mxu0 %v5915_v10  ;;  %6309 = vmatprep.subr.bf16.mxu1 %v5917_v34  ;;  %v5770_v10 = vld [vmem:[#allocation14 + $0x1b0] sm:$0xff]  ;;  %v5950_v34 = vunpack.c.l.s8.bf16 %v5768_v13 }
 0x919   :  { %v5952_v56 = vunpack.c.l.s8.bf16 %v5770_v10 }
 0x91a   :  { %6146 = vmatpush1.bf16.msra.mxu0 %v5914_v9  ;;  %6310 = vmatpush1.bf16.msra.mxu1 %v5916_v19  ;;  %v5773_v9 = vld [vmem:[#allocation14 + $0x1c8] sm:$0xff]  ;;  %v5775_v19 = vld [vmem:[#allocation14 + $0x1d8] sm:$0xff] }
 0x91b   :  { %6147 = vmatprep.subr.bf16.mxu0 %v5919_v22  ;;  %6311 = vmatprep.subr.bf16.mxu1 %v5921_v7  ;;  %v5954_v22 = vunpack.c.h.s8.bf16 %v5768_v13  ;;  %v5956_v7 = vunpack.c.h.s8.bf16 %v5770_v10  ;;  %v5959_v36 = vunpack.c.l.s8.bf16 %v5773_v9  ;;  %v5961_v16 = vunpack.c.l.s8.bf16 %v5775_v19 }
 0x91e   :  { %6148 = vmatpush1.bf16.msra.mxu0 %v5918_v26  ;;  %6312 = vmatpush1.bf16.msra.mxu1 %v5920_v42  ;;  %v5772_v26 = vld [vmem:[#allocation14 + $0x1c0] sm:$0xff]  ;;  %v5774_v42 = vld [vmem:[#allocation14 + $0x1d0] sm:$0xff] }
 0x91f   :  { %6149 = vmatprep.subr.bf16.mxu0 %v5923_v46  ;;  %6313 = vmatprep.subr.bf16.mxu1 %v5925_v17  ;;  %v5958_v46 = vunpack.c.l.s8.bf16 %v5772_v26  ;;  %v5960_v17 = vunpack.c.l.s8.bf16 %v5774_v42  ;;  %v5962_v35 = vunpack.c.h.s8.bf16 %v5772_v26  ;;  %v5964_v63 = vunpack.c.h.s8.bf16 %v5774_v42 }
 0x922   :  { %6150 = vmatpush1.bf16.msra.mxu0 %v5922_v25  ;;  %6314 = vmatpush1.bf16.msra.mxu1 %v5924_v20  ;;  %v5963_v25 = vunpack.c.h.s8.bf16 %v5773_v9  ;;  %v5965_v20 = vunpack.c.h.s8.bf16 %v5775_v19 }
 0x923   :  { %6151 = vmatprep.subr.bf16.mxu0 %v5927_v18  ;;  %6315 = vmatprep.subr.bf16.mxu1 %v5929_v8  ;;  %v5777_v18 = vld [vmem:[#allocation14 + $0x1e8] sm:$0xff]  ;;  %v5779_v8 = vld [vmem:[#allocation14 + $0x1f8] sm:$0xff] }
 0x924   :  { %v5973_v4 = vunpack.c.h.s8.bf16 %v5779_v8 }
 0x926   :  { %6152 = vmatpush1.bf16.msra.mxu0 %v5926_v23  ;;  %6316 = vmatpush1.bf16.msra.mxu1 %v5928_v51  ;;  %v5644_v23 = vmul.f32 %v5613_v33, %v9902_v48  ;;  %v5663_v51 = vrot.slane %v9892_v0, %v10728_v2  ;;  %v5783_v48 = vld [vmem:[#allocation14 + $0x218] sm:$0xff] }
 0x927   :  { %6153 = vmatprep.subr.bf16.mxu0 %v5931_v27  ;;  %6317 = vmatprep.subr.bf16.mxu1 %v5933_v49  ;;  %v5967_v27 = vunpack.c.l.s8.bf16 %v5777_v18  ;;  %v5969_v49 = vunpack.c.l.s8.bf16 %v5779_v8  ;;  %v5977_v37 = vunpack.c.l.s8.bf16 %v5783_v48  ;;  %v5981_v21 = vunpack.c.h.s8.bf16 %v5783_v48  ;;  %v5792_v8 = vld [vmem:[#allocation14 + $0x260] sm:$0xff] }
 0x92a   :  { %6154 = vmatpush1.bf16.msra.mxu0 %v5930_v11  ;;  %6318 = vmatpush1.bf16.msra.mxu1 %v5932_v50  ;;  %v5966_v11 = vunpack.c.l.s8.bf16 %v5776_v32  ;;  %v5968_v50 = vunpack.c.l.s8.bf16 %v5778_v5 }
 0x92b   :  { %6155 = vmatprep.subr.bf16.mxu0 %v5935_v52  ;;  %6319 = vmatprep.subr.bf16.mxu1 %v5937_v59  ;;  %v5694_v52 = vadd.f32 %v5663_v51, %v5644_v23  ;;  %v5971_v59 = vunpack.c.h.s8.bf16 %v5777_v18 }
 0x92e   :  { %6156 = vmatpush1.bf16.msra.mxu0 %v5934_v57  ;;  %6320 = vmatpush1.bf16.msra.mxu1 %v5936_v12  ;;  %v5970_v57 = vunpack.c.h.s8.bf16 %v5776_v32  ;;  %v5972_v12 = vunpack.c.h.s8.bf16 %v5778_v5  ;;  %v5799_v32 = vld [vmem:[#allocation14 + $0x298] sm:$0xff]  ;;  %v6002_v5 = vunpack.c.h.s8.bf16 %v5792_v8 }
 0x92f   :  { %6157 = vmatprep.subr.bf16.mxu0 %v5939_v24  ;;  %6321 = vmatprep.subr.bf16.mxu1 %v5941_v53  ;;  %v5702_v24 = vmax.f32 %v5694_v52, 0.0  ;;  %v5975_v53 = vunpack.c.l.s8.bf16 %v5781_v14  ;;  %v6009_v52 = vunpack.c.l.s8.bf16 %v5799_v32 }
 0x932   :  { %6158 = vmatpush1.bf16.msra.mxu0 %v5938_v15  ;;  %6322 = vmatpush1.bf16.msra.mxu1 %v5940_v55  ;;  %v5782_v15 = vld [vmem:[#allocation14 + $0x210] sm:$0xff]  ;;  %v5974_v55 = vunpack.c.l.s8.bf16 %v5780_v1 }
 0x933   :  { %6159 = vmatprep.subr.bf16.mxu0 %v5943_v29  ;;  %6323 = vmatprep.subr.bf16.mxu1 %v5945_v40  ;;  %v5976_v29 = vunpack.c.l.s8.bf16 %v5782_v15  ;;  %v5710_v40 = vpack.c.bf16 %v5702_v24, %v5702_v24  ;;  %v5801_v24 = vld [vmem:[#allocation14 + $0x2a8] sm:$0xff] }
 0x936   :  { %6160 = vmatpush1.bf16.msra.mxu0 %v5942_v43  ;;  %6324 = vmatpush1.bf16.msra.mxu1 %v5944_v41  ;;  %v5785_v43 = vld [vmem:[#allocation14 + $0x228] sm:$0xff]  ;;  %v5787_v41 = vld [vmem:[#allocation14 + $0x238] sm:$0xff] }
 0x937   :  { %6161 = vmatprep.subr.bf16.mxu0 %v5947_v54  ;;  %6325 = vmatprep.subr.bf16.mxu1 %v5949_v45  ;;  %v5978_v54 = vunpack.c.h.s8.bf16 %v5780_v1  ;;  %v5980_v45 = vunpack.c.h.s8.bf16 %v5782_v15  ;;  %v5983_v44 = vunpack.c.l.s8.bf16 %v5785_v43  ;;  %v5985_v6 = vunpack.c.l.s8.bf16 %v5787_v41 }
 0x938   :  { %v5987_v13 = vunpack.c.h.s8.bf16 %v5785_v43  ;;  %v5989_v10 = vunpack.c.h.s8.bf16 %v5787_v41  ;;  %v6015_v15 = vunpack.c.l.s8.bf16 %v5801_v24  ;;  %v6019_v43 = vunpack.c.h.s8.bf16 %v5801_v24 }
 0x93a   :  { %6162 = vmatpush1.bf16.msra.mxu0 %v5946_v61  ;;  %6326 = vmatpush1.bf16.msra.mxu1 %v5948_v38  ;;  %v5784_v61 = vld [vmem:[#allocation14 + $0x220] sm:$0xff]  ;;  %v5786_v38 = vld [vmem:[#allocation14 + $0x230] sm:$0xff] }
 0x93b   :  { %6163 = vmatprep.subr.bf16.mxu0 %v5951_v39  ;;  %6327 = vmatprep.subr.bf16.mxu1 %v5953_v47  ;;  %v5982_v39 = vunpack.c.l.s8.bf16 %v5784_v61  ;;  %v5984_v47 = vunpack.c.l.s8.bf16 %v5786_v38 }
 0x93e   :  { %6164 = vmatpush1.bf16.msra.mxu0 %v5950_v34  ;;  %6328 = vmatpush1.bf16.msra.mxu1 %v5952_v56  ;;  %v5789_v34 = vld [vmem:[#allocation14 + $0x248] sm:$0xff]  ;;  %v5791_v56 = vld [vmem:[#allocation14 + $0x258] sm:$0xff] }
 0x93f   :  { %6165 = vmatprep.subr.bf16.mxu0 %v5955_v31  ;;  %6329 = vmatprep.subr.bf16.mxu1 %v5957_v28  ;;  %v5986_v31 = vunpack.c.h.s8.bf16 %v5784_v61  ;;  %v5988_v28 = vunpack.c.h.s8.bf16 %v5786_v38  ;;  %v5991_v9 = vunpack.c.l.s8.bf16 %v5789_v34  ;;  %v5993_v19 = vunpack.c.l.s8.bf16 %v5791_v56 }
 0x940   :  { %v5995_v26 = vunpack.c.h.s8.bf16 %v5789_v34  ;;  %v5997_v42 = vunpack.c.h.s8.bf16 %v5791_v56 }
 0x942   :  { %6166 = vmatpush1.bf16.msra.mxu0 %v5954_v22  ;;  %6330 = vmatpush1.bf16.msra.mxu1 %v5956_v7  ;;  %v5788_v22 = vld [vmem:[#allocation14 + $0x240] sm:$0xff]  ;;  %v5790_v7 = vld [vmem:[#allocation14 + $0x250] sm:$0xff] }
 0x943   :  { %6167 = vmatprep.subr.bf16.mxu0 %v5959_v36  ;;  %6331 = vmatprep.subr.bf16.mxu1 %v5961_v16  ;;  %v5990_v36 = vunpack.c.l.s8.bf16 %v5788_v22  ;;  %v5992_v16 = vunpack.c.l.s8.bf16 %v5790_v7  ;;  %v5994_v33 = vunpack.c.h.s8.bf16 %v5788_v22  ;;  %v10729_v22 = vld [vmem:[#allocation56_spill] sm:$0xff] }
 0x946   :  { %6168 = vmatpush1.bf16.msra.mxu0 %v5958_v46  ;;  %6332 = vmatpush1.bf16.msra.mxu1 %v5960_v17  ;;  %v5793_v46 = vld [vmem:[#allocation14 + $0x268] sm:$0xff]  ;;  %v5795_v17 = vld [vmem:[#allocation14 + $0x278] sm:$0xff] }
 0x947   :  { %6169 = vmatprep.subr.bf16.mxu0 %v5963_v25  ;;  %6333 = vmatprep.subr.bf16.mxu1 %v5965_v20  ;;  %v5996_v25 = vunpack.c.h.s8.bf16 %v5790_v7  ;;  %v5999_v20 = vunpack.c.l.s8.bf16 %v5793_v46  ;;  %v6001_v18 = vunpack.c.l.s8.bf16 %v5795_v17  ;;  %v6003_v51 = vunpack.c.h.s8.bf16 %v5793_v46  ;;  %v10730_v46 = vld [vmem:[#allocation57_spill] sm:$0xff] }
 0x948   :  { %v5621_v7 = vrot.slane %v9890_v3, %v10729_v22 }
 0x94a   :  { %6170 = vmatpush1.bf16.msra.mxu0 %v5962_v35  ;;  %6334 = vmatpush1.bf16.msra.mxu1 %v5964_v63  ;;  %v5794_v35 = vld [vmem:[#allocation14 + $0x270] sm:$0xff]  ;;  %v5998_v63 = vunpack.c.l.s8.bf16 %v5792_v8 }
 0x94b   :  { %6171 = vmatprep.subr.bf16.mxu0 %v5967_v27  ;;  %6335 = vmatprep.subr.bf16.mxu1 %v5969_v49  ;;  %v6000_v23 = vunpack.c.l.s8.bf16 %v5794_v35  ;;  %v6005_v27 = vunpack.c.h.s8.bf16 %v5795_v17  ;;  %v5797_v49 = vld [vmem:[#allocation14 + $0x288] sm:$0xff]  ;;  %v5625_v17 = vrot.slane %v9890_v3, %v10730_v46 }
 0x94e   :  { %6172 = vmatpush1.bf16.msra.mxu0 %v5966_v11  ;;  %6336 = vmatpush1.bf16.msra.mxu1 %v5968_v50  ;;  %v6004_v11 = vunpack.c.h.s8.bf16 %v5794_v35  ;;  %v6007_v50 = vunpack.c.l.s8.bf16 %v5797_v49  ;;  %v5675_v35 = vrot.slane %v9892_v0, %v10730_v46 }
 0x94f   :  { %6173 = vmatprep.subr.bf16.mxu0 %v5971_v59  ;;  %6337 = vmatprep.subr.bf16.mxu1 %v5973_v4  ;;  %v5796_v59 = vld [vmem:[#allocation14 + $0x280] sm:$0xff]  ;;  %v5798_v4 = vld [vmem:[#allocation14 + $0x290] sm:$0xff] }
 0x950   :  { %v6006_v14 = vunpack.c.l.s8.bf16 %v5796_v59  ;;  %v6008_v48 = vunpack.c.l.s8.bf16 %v5798_v4  ;;  %v6012_v1 = vunpack.c.h.s8.bf16 %v5798_v4  ;;  %v5813_v4 = vld [vmem:[#allocation14 + $0x308] sm:$0xff] }
 0x952   :  { %6174 = vmatpush1.bf16.msra.mxu0 %v5970_v57  ;;  %6338 = vmatpush1.bf16.msra.mxu1 %v5972_v12  ;;  %v6011_v57 = vunpack.c.h.s8.bf16 %v5797_v49  ;;  %v6013_v12 = vunpack.c.h.s8.bf16 %v5799_v32 }
 0x953   :  { %6184 = vmatprep.subr.bf16.mxu0 %v5975_v53  ;;  %6348 = vmatprep.subr.bf16.mxu1 %v5977_v37  ;;  %v5803_v53 = vld [vmem:[#allocation14 + $0x2b8] sm:$0xff]  ;;  %v6010_v37 = vunpack.c.h.s8.bf16 %v5796_v59 }
 0x954   :  { %v6021_v41 = vunpack.c.h.s8.bf16 %v5803_v53 }
 0x955   :  { %6176 = vmatmul.mubr.bf16.vlgmr.msra.gmra.mrb[28].mxu0 %v5710_v40  ;;  %6340 = vmatmul.mubr.bf16.vlgmr.msra.gmra.mrb[36].mxu1 %v5710_v40  ;;  %v5802_v40 = vld [vmem:[#allocation14 + $0x2b0] sm:$0xff] }
 0x956   :  { %6185 = vmatpush1.bf16.msra.mxu0 %v5974_v55  ;;  %6349 = vmatpush1.bf16.msra.mxu1 %v5976_v29  ;;  %v6017_v55 = vunpack.c.l.s8.bf16 %v5803_v53  ;;  %v5800_v29 = vld [vmem:[#allocation14 + $0x2a0] sm:$0xff] }
 0x957   :  { %6186 = vmatprep.subr.bf16.mxu0 %v5979_v30  ;;  %6350 = vmatprep.subr.bf16.mxu1 %v5981_v21  ;;  %v6014_v30 = vunpack.c.l.s8.bf16 %v5800_v29  ;;  %v6016_v21 = vunpack.c.l.s8.bf16 %v5802_v40 }
 0x95a   :  { %6187 = vmatpush1.bf16.msra.mxu0 %v5978_v54  ;;  %6351 = vmatpush1.bf16.msra.mxu1 %v5980_v45  ;;  %v5805_v54 = vld [vmem:[#allocation14 + $0x2c8] sm:$0xff]  ;;  %v5807_v45 = vld [vmem:[#allocation14 + $0x2d8] sm:$0xff] }
 0x95b   :  { %6188 = vmatprep.subr.bf16.mxu0 %v5983_v44  ;;  %6352 = vmatprep.subr.bf16.mxu1 %v5985_v6  ;;  %v6018_v44 = vunpack.c.h.s8.bf16 %v5800_v29  ;;  %v6020_v6 = vunpack.c.h.s8.bf16 %v5802_v40  ;;  %v6023_v61 = vunpack.c.l.s8.bf16 %v5805_v54  ;;  %v6025_v38 = vunpack.c.l.s8.bf16 %v5807_v45  ;;  %v5812_v29 = vld [vmem:[#allocation14 + $0x300] sm:$0xff]  ;;  %v5814_v40 = vld [vmem:[#allocation14 + $0x310] sm:$0xff] }
 0x95c   :  { %v6027_v34 = vunpack.c.h.s8.bf16 %v5805_v54  ;;  %v6029_v56 = vunpack.c.h.s8.bf16 %v5807_v45  ;;  %v6040_v54 = vunpack.c.l.s8.bf16 %v5814_v40 }
 0x95e   :  { %6189 = vmatpush1.bf16.msra.mxu0 %v5982_v39  ;;  %6353 = vmatpush1.bf16.msra.mxu1 %v5984_v47  ;;  %v5804_v39 = vld [vmem:[#allocation14 + $0x2c0] sm:$0xff]  ;;  %v5806_v47 = vld [vmem:[#allocation14 + $0x2d0] sm:$0xff] }
 0x95f   :  { %6190 = vmatprep.subr.bf16.mxu0 %v5987_v13  ;;  %6354 = vmatprep.subr.bf16.mxu1 %v5989_v10  ;;  %v6022_v13 = vunpack.c.l.s8.bf16 %v5804_v39  ;;  %v6024_v10 = vunpack.c.l.s8.bf16 %v5806_v47 }
 0x962   :  { %6191 = vmatpush1.bf16.msra.mxu0 %v5986_v31  ;;  %6355 = vmatpush1.bf16.msra.mxu1 %v5988_v28  ;;  %v5809_v31 = vld [vmem:[#allocation14 + $0x2e8] sm:$0xff]  ;;  %v5811_v28 = vld [vmem:[#allocation14 + $0x2f8] sm:$0xff] }
 0x963   :  { %6192 = vmatprep.subr.bf16.mxu0 %v5991_v9  ;;  %6356 = vmatprep.subr.bf16.mxu1 %v5993_v19  ;;  %v6026_v9 = vunpack.c.h.s8.bf16 %v5804_v39  ;;  %v6028_v19 = vunpack.c.h.s8.bf16 %v5806_v47  ;;  %v6042_v47 = vunpack.c.h.s8.bf16 %v5812_v29 }
 0x966   :  { %6193 = vmatpush1.bf16.msra.mxu0 %v5990_v36  ;;  %6357 = vmatpush1.bf16.msra.mxu1 %v5992_v16  ;;  %v6031_v36 = vunpack.c.l.s8.bf16 %v5809_v31  ;;  %v6033_v16 = vunpack.c.l.s8.bf16 %v5811_v28 }
 0x967   :  { %6194 = vmatprep.subr.bf16.mxu0 %v5995_v26  ;;  %6358 = vmatprep.subr.bf16.mxu1 %v5997_v42  ;;  %v5808_v26 = vld [vmem:[#allocation14 + $0x2e0] sm:$0xff]  ;;  %v5810_v42 = vld [vmem:[#allocation14 + $0x2f0] sm:$0xff] }
 0x968   :  { %v6034_v53 = vunpack.c.h.s8.bf16 %v5808_v26 }
 0x96a   :  { %6195 = vmatpush1.bf16.msra.mxu0 %v5994_v33  ;;  %6359 = vmatpush1.bf16.msra.mxu1 %v5996_v25  ;;  %v10731_v33 = vld [vmem:[#allocation65_spill] sm:$0xff] }
 0x96b   :  { %6196 = vmatprep.subr.bf16.mxu0 %v5999_v20  ;;  %6360 = vmatprep.subr.bf16.mxu1 %v6001_v18  ;;  %v5633_v25 = vrot.slane %v9890_v3, %v10731_v33  ;;  %v5671_v20 = vrot.slane %v9892_v0, %v10729_v22  ;;  %v6035_v3 = vunpack.c.h.s8.bf16 %v5809_v31  ;;  %v5818_v31 = vld [vmem:[#allocation14 + $0x330] sm:$0xff] }
 0x96e   :  { %6197 = vmatpush1.bf16.msra.mxu0 %v5998_v63  ;;  %6361 = vmatpush1.bf16.msra.mxu1 %v6000_v23  ;;  %v5683_v63 = vrot.slane %v9892_v0, %v10731_v33  ;;  %v6030_v23 = vunpack.c.l.s8.bf16 %v5808_v26  ;;  %v6052_v26 = vunpack.c.h.s8.bf16 %v5818_v31  ;;  %v5822_v33 = vld [vmem:[#allocation14 + $0x350] sm:$0xff] }
 0x96f   :  { %6198 = vmatprep.subr.bf16.mxu0 %v6003_v51  ;;  %6362 = vmatprep.subr.bf16.mxu1 %v6005_v27  ;;  %v6032_v51 = vunpack.c.l.s8.bf16 %v5810_v42 }
 0x972   :  { %6199 = vmatpush1.bf16.msra.mxu0 %v6002_v5  ;;  %6363 = vmatpush1.bf16.msra.mxu1 %v6004_v11  ;;  %v6037_v5 = vunpack.c.h.s8.bf16 %v5811_v28 }
 0x973   :  { %6200 = vmatprep.subr.bf16.mxu0 %v6007_v50  ;;  %6364 = vmatprep.subr.bf16.mxu1 %v6009_v52 }
 0x976   :  { %6201 = vmatpush1.bf16.msra.mxu0 %v6006_v14  ;;  %6365 = vmatpush1.bf16.msra.mxu1 %v6008_v48  ;;  %v5815_v14 = vld [vmem:[#allocation14 + $0x318] sm:$0xff] }
 0x977   :  { %6202 = vmatprep.subr.bf16.mxu0 %v6011_v57  ;;  %6366 = vmatprep.subr.bf16.mxu1 %v6013_v12 }
 0x97a   :  { %6203 = vmatpush1.bf16.msra.mxu0 %v6010_v37  ;;  %6367 = vmatpush1.bf16.msra.mxu1 %v6012_v1  ;;  %v6036_v37 = vunpack.c.h.s8.bf16 %v5810_v42 }
 0x97b   :  { %6204 = vmatprep.subr.bf16.mxu0 %v6015_v15  ;;  %6368 = vmatprep.subr.bf16.mxu1 %v6017_v55  ;;  %v6039_v15 = vunpack.c.l.s8.bf16 %v5813_v4  ;;  %v6041_v55 = vunpack.c.l.s8.bf16 %v5815_v14 }
 0x97e   :  { %6205 = vmatpush1.bf16.msra.mxu0 %v6014_v30  ;;  %6369 = vmatpush1.bf16.msra.mxu1 %v6016_v21 }
 0x97f   :  { %6206 = vmatprep.subr.bf16.mxu0 %v6019_v43  ;;  %6370 = vmatprep.subr.bf16.mxu1 %v6021_v41  ;;  %v6038_v41 = vunpack.c.l.s8.bf16 %v5812_v29  ;;  %v5833_v29 = vld [vmem:[#allocation14 + $0x3a8] sm:$0xff] }
 0x982   :  { %6207 = vmatpush1.bf16.msra.mxu0 %v6018_v44  ;;  %6371 = vmatpush1.bf16.msra.mxu1 %v6020_v6  ;;  %v6043_v44 = vunpack.c.h.s8.bf16 %v5813_v4  ;;  %v6045_v6 = vunpack.c.h.s8.bf16 %v5815_v14  ;;  %v5829_v4 = vld [vmem:[#allocation14 + $0x388] sm:$0xff]  ;;  %v5831_v14 = vld [vmem:[#allocation14 + $0x398] sm:$0xff] }
 0x983   :  { %6208 = vmatprep.subr.bf16.mxu0 %v6023_v61  ;;  %6372 = vmatprep.subr.bf16.mxu1 %v6025_v38  ;;  %v5817_v61 = vld [vmem:[#allocation14 + $0x328] sm:$0xff]  ;;  %v5819_v38 = vld [vmem:[#allocation14 + $0x338] sm:$0xff] }
 0x984   :  { %v6053_v22 = vunpack.c.h.s8.bf16 %v5819_v38 }
 0x986   :  { %6209 = vmatpush1.bf16.msra.mxu0 %v6022_v13  ;;  %6373 = vmatpush1.bf16.msra.mxu1 %v6024_v10  ;;  %v6044_v13 = vunpack.c.h.s8.bf16 %v5814_v40  ;;  %v6047_v10 = vunpack.c.l.s8.bf16 %v5817_v61  ;;  %v5835_v40 = vld [vmem:[#allocation14 + $0x3b8] sm:$0xff] }
 0x987   :  { %6210 = vmatprep.subr.bf16.mxu0 %v6027_v34  ;;  %6374 = vmatprep.subr.bf16.mxu1 %v6029_v56  ;;  %v6049_v34 = vunpack.c.l.s8.bf16 %v5819_v38  ;;  %v5816_v56 = vld [vmem:[#allocation14 + $0x320] sm:$0xff]  ;;  %v6085_v38 = vunpack.c.h.s8.bf16 %v5835_v40 }
 0x988   :  { %v6046_v28 = vunpack.c.l.s8.bf16 %v5816_v56 }
 0x989   :  { %v9923_v8 = vpop.f32.mrb[32].mxu1 }
 0x98a   :  { %6211 = vmatpush1.bf16.msra.mxu0 %v6026_v9  ;;  %6375 = vmatpush1.bf16.msra.mxu1 %v6028_v19  ;;  %v5503_v18 = vpop.f32.mrb[24].mxu0  ;;  %v5587_v32 = vpop.f32.mrb[33].mxu1  ;;  %v6048_v9 = vunpack.c.l.s8.bf16 %v5818_v31  ;;  %v6051_v19 = vunpack.c.h.s8.bf16 %v5817_v61  ;;  %v6083_v61 = vunpack.c.h.s8.bf16 %v5833_v29  ;;  %v5836_v31 = vld [vmem:[#allocation14 + $0x3c0] sm:$0xff] }
 0x98b   :  { %v5646_v27 = vmul.f32 %v5621_v7, %v5503_v18  ;;  %v5505_v49 = vpop.f32.mrb[25].mxu0  ;;  %6212 = vmatprep.subr.bf16.mxu0 %v6031_v36  ;;  %6376 = vmatprep.subr.bf16.mxu1 %v6033_v16  ;;  %v5649_v50 = vmul.f32 %v5633_v25, %v5587_v32  ;;  %v5589_v59 = vpop.f32.mrb[34].mxu1  ;;  %v5821_v7 = vld [vmem:[#allocation14 + $0x348] sm:$0xff]  ;;  %v5823_v36 = vld [vmem:[#allocation14 + $0x358] sm:$0xff]  ;;  %v6050_v16 = vunpack.c.h.s8.bf16 %v5816_v56 }
 0x98c   :  { %v5647_v11 = vmul.f32 %v5625_v17, %v5505_v49  ;;  %v5507_v52 = vpop.f32.mrb[26].mxu0  ;;  %v5590_v12 = vpop.f32.mrb[35].mxu1  ;;  %v6055_v42 = vunpack.c.l.s8.bf16 %v5821_v7  ;;  %v6057_v46 = vunpack.c.l.s8.bf16 %v5823_v36  ;;  %v5820_v17 = vld [vmem:[#allocation14 + $0x340] sm:$0xff]  ;;  %v6059_v18 = vunpack.c.h.s8.bf16 %v5821_v7 }
 0x98d   :  { %v5696_v48 = vadd.f32 %v5671_v20, %v5646_v27  ;;  %v5508_v57 = vpop.f32.mrb[27].mxu0  ;;  %v5699_v0 = vadd.f32 %v5683_v63, %v5649_v50  ;;  %v6054_v25 = vunpack.c.l.s8.bf16 %v5820_v17  ;;  %v6056_v20 = vunpack.c.l.s8.bf16 %v5822_v33  ;;  %v5825_v63 = vld [vmem:[#allocation14 + $0x368] sm:$0xff]  ;;  %v10732_v7 = vld [vmem:[#allocation64_spill] sm:$0xff] }
 0x98e   :  { %v5697_v24 = vadd.f32 %v5675_v35, %v5647_v11  ;;  %6213 = vmatpush1.bf16.msra.mxu0 %v6030_v23  ;;  %6377 = vmatpush1.bf16.msra.mxu1 %v6032_v51  ;;  %v6061_v35 = vunpack.c.h.s8.bf16 %v5823_v36  ;;  %v5827_v23 = vld [vmem:[#allocation14 + $0x378] sm:$0xff]  ;;  %v6058_v51 = vunpack.c.h.s8.bf16 %v5820_v17  ;;  %v6060_v27 = vunpack.c.h.s8.bf16 %v5822_v33 }
 0x98f   :  { %v5704_v1 = vmax.f32 %v5696_v48, 0.0  ;;  %6214 = vmatprep.subr.bf16.mxu0 %v6035_v3  ;;  %6378 = vmatprep.subr.bf16.mxu1 %v6037_v5  ;;  %v5707_v21 = vmax.f32 %v5699_v0, 0.0  ;;  %v6063_v49 = vunpack.c.l.s8.bf16 %v5825_v63  ;;  %v6065_v32 = vunpack.c.l.s8.bf16 %v5827_v23  ;;  %v5824_v3 = vld [vmem:[#allocation14 + $0x360] sm:$0xff]  ;;  %v5826_v5 = vld [vmem:[#allocation14 + $0x370] sm:$0xff] }
 0x990   :  { %v5705_v30 = vmax.f32 %v5697_v24, 0.0  ;;  %v6062_v11 = vunpack.c.l.s8.bf16 %v5824_v3  ;;  %v6064_v50 = vunpack.c.l.s8.bf16 %v5826_v5  ;;  %v6067_v52 = vunpack.c.h.s8.bf16 %v5825_v63  ;;  %v5828_v0 = vld [vmem:[#allocation14 + $0x380] sm:$0xff] }
 0x991   :  { %v5712_v45 = vpack.c.bf16 %v5704_v1, %v5704_v1  ;;  %v5715_v39 = vpack.c.bf16 %v5707_v21, %v5707_v21  ;;  %v6069_v59 = vunpack.c.h.s8.bf16 %v5827_v23  ;;  %v6066_v48 = vunpack.c.h.s8.bf16 %v5824_v3  ;;  %v5840_v23 = vld [vmem:[#allocation14 + $0x3e0] sm:$0xff] }
 0x992   :  { %v5713_v43 = vpack.c.bf16 %v5705_v30, %v5705_v30  ;;  %6215 = vmatpush1.bf16.msra.mxu0 %v6034_v53  ;;  %6379 = vmatpush1.bf16.msra.mxu1 %v6036_v37  ;;  %v6068_v57 = vunpack.c.h.s8.bf16 %v5826_v5  ;;  %v6071_v12 = vunpack.c.l.s8.bf16 %v5829_v4  ;;  %v6073_v24 = vunpack.c.l.s8.bf16 %v5831_v14  ;;  %v5830_v53 = vld [vmem:[#allocation14 + $0x390] sm:$0xff] }
 0x993   :  { %6225 = vmatprep.subr.bf16.mxu0 %v6039_v15  ;;  %6389 = vmatprep.subr.bf16.mxu1 %v6041_v55  ;;  %v6070_v37 = vunpack.c.l.s8.bf16 %v5828_v0  ;;  %v6072_v1 = vunpack.c.l.s8.bf16 %v5830_v53  ;;  %v6075_v15 = vunpack.c.h.s8.bf16 %v5829_v4  ;;  %v6077_v55 = vunpack.c.h.s8.bf16 %v5831_v14 }
 0x994   :  { %6216 = vmatprep.mubr.bf16.mxu0 %v5713_v43  ;;  %6380 = vmatprep.mubr.bf16.mxu1 %v5713_v43  ;;  %v6074_v30 = vunpack.c.h.s8.bf16 %v5828_v0  ;;  %v6076_v21 = vunpack.c.h.s8.bf16 %v5830_v53  ;;  %v6079_v43 = vunpack.c.l.s8.bf16 %v5833_v29  ;;  %v6090_v17 = vunpack.c.h.s8.bf16 %v5836_v31 }
 0x995   :  { %6217 = vmatmul.mubr.bf16.vlgmr.msra.gmra.mrb[28].mxu0 %v5712_v45  ;;  %6381 = vmatmul.mubr.bf16.vlgmr.msra.gmra.mrb[36].mxu1 %v5712_v45  ;;  %v5834_v45 = vld [vmem:[#allocation14 + $0x3b0] sm:$0xff] }
 0x996   :  { %6226 = vmatpush1.bf16.msra.mxu0 %v6038_v41  ;;  %6390 = vmatpush1.bf16.msra.mxu1 %v6040_v54  ;;  %v6081_v41 = vunpack.c.l.s8.bf16 %v5835_v40  ;;  %v5832_v54 = vld [vmem:[#allocation14 + $0x3a0] sm:$0xff] }
 0x997   :  { %6257 = vmatprep.mubr.bf16.mxu0 %v5715_v39  ;;  %6421 = vmatprep.mubr.bf16.mxu1 %v5715_v39  ;;  %v5837_v39 = vld [vmem:[#allocation14 + $0x3c8] sm:$0xff] }
 0x998   :  { %6227 = vmatprep.subr.bf16.mxu0 %v6043_v44  ;;  %6391 = vmatprep.subr.bf16.mxu1 %v6045_v6  ;;  %v6078_v44 = vunpack.c.l.s8.bf16 %v5832_v54  ;;  %v6080_v6 = vunpack.c.l.s8.bf16 %v5834_v45 }
 0x99a   :  { %6228 = vmatpush1.bf16.msra.mxu0 %v6042_v47  ;;  %6392 = vmatpush1.bf16.msra.mxu1 %v6044_v13  ;;  %v5839_v47 = vld [vmem:[#allocation14 + $0x3d8] sm:$0xff]  ;;  %v6082_v13 = vunpack.c.h.s8.bf16 %v5832_v54 }
 0x99b   :  { %6229 = vmatprep.subr.bf16.mxu0 %v6047_v10  ;;  %6393 = vmatprep.subr.bf16.mxu1 %v6049_v34  ;;  %v6084_v10 = vunpack.c.h.s8.bf16 %v5834_v45  ;;  %v6087_v34 = vunpack.c.l.s8.bf16 %v5837_v39  ;;  %v6089_v56 = vunpack.c.l.s8.bf16 %v5839_v47 }
 0x99e   :  { %6230 = vmatpush1.bf16.msra.mxu0 %v6046_v28  ;;  %6394 = vmatpush1.bf16.msra.mxu1 %v6048_v9  ;;  %v5838_v28 = vld [vmem:[#allocation14 + $0x3d0] sm:$0xff]  ;;  %v6086_v9 = vunpack.c.l.s8.bf16 %v5836_v31 }
 0x99f   :  { %6231 = vmatprep.subr.bf16.mxu0 %v6051_v19  ;;  %6395 = vmatprep.subr.bf16.mxu1 %v6053_v22  ;;  %v6088_v19 = vunpack.c.l.s8.bf16 %v5838_v28  ;;  %v7117_v22 = vld [vmem:[#allocation11] sm:$0xff]  ;;  %v6092_v33 = vunpack.c.h.s8.bf16 %v5838_v28 }
 0x9a0   :  { %v5629_v36 = vrot.slane %v7117_v22, %v10732_v7 }
 0x9a2   :  { %6232 = vmatpush1.bf16.msra.mxu0 %v6050_v16  ;;  %6396 = vmatpush1.bf16.msra.mxu1 %v6052_v26  ;;  %v6091_v16 = vunpack.c.h.s8.bf16 %v5837_v39  ;;  %v6093_v26 = vunpack.c.h.s8.bf16 %v5839_v47 }
 0x9a3   :  { %6233 = vmatprep.subr.bf16.mxu0 %v6055_v42  ;;  %6397 = vmatprep.subr.bf16.mxu1 %v6057_v46  ;;  %v5841_v42 = vld [vmem:[#allocation14 + $0x3e8] sm:$0xff]  ;;  %v5843_v46 = vld [vmem:[#allocation14 + $0x3f8] sm:$0xff] }
 0x9a4   :  { %v6097_v63 = vunpack.c.l.s8.bf16 %v5843_v46  ;;  %v6099_v3 = vunpack.c.h.s8.bf16 %v5841_v42  ;;  %v6101_v5 = vunpack.c.h.s8.bf16 %v5843_v46  ;;  %v6499_v46 = vld [vmem:[#allocation18 + $0x58] sm:$0xff] }
 0x9a6   :  { %6234 = vmatpush1.bf16.msra.mxu0 %v6054_v25  ;;  %6398 = vmatpush1.bf16.msra.mxu1 %v6056_v20  ;;  %v5648_v25 = vmul.f32 %v5629_v36, %v9923_v8  ;;  %v7118_v20 = vld [vmem:[#allocation12] sm:$0xff]  ;;  %v6500_v8 = vld [vmem:[#allocation18 + $0x60] sm:$0xff]  ;;  %v6503_v36 = vld [vmem:[#allocation18 + $0x78] sm:$0xff] }
 0x9a7   :  { %6235 = vmatprep.subr.bf16.mxu0 %v6059_v18  ;;  %6399 = vmatprep.subr.bf16.mxu1 %v6061_v35  ;;  %v5679_v18 = vrot.slane %v7118_v20, %v10732_v7  ;;  %v6095_v35 = vunpack.c.l.s8.bf16 %v5841_v42  ;;  %v6530_v14 = vunpack.c.l.s8.bf16 %v6500_v8  ;;  %v6495_v7 = vld [vmem:[#allocation18 + $0x38] sm:$0xff]  ;;  %v6537_v20 = vunpack.c.h.s8.bf16 %v6503_v36 }
 0x9a8   :  { %v6491_v42 = vld [vmem:[#allocation18 + $0x18] sm:$0xff] }
 0x9aa   :  { %6236 = vmatpush1.bf16.msra.mxu0 %v6058_v51  ;;  %6400 = vmatpush1.bf16.msra.mxu1 %v6060_v27  ;;  %v5842_v51 = vld [vmem:[#allocation14 + $0x3f0] sm:$0xff]  ;;  %v6094_v27 = vunpack.c.l.s8.bf16 %v5840_v23 }
 0x9ab   :  { %6237 = vmatprep.subr.bf16.mxu0 %v6063_v49  ;;  %6401 = vmatprep.subr.bf16.mxu1 %v6065_v32  ;;  %v6096_v49 = vunpack.c.l.s8.bf16 %v5842_v51  ;;  %v5698_v32 = vadd.f32 %v5679_v18, %v5648_v25  ;;  %v6521_v25 = vunpack.c.h.s8.bf16 %v6495_v7  ;;  %v6513_v18 = vunpack.c.h.s8.bf16 %v6491_v42 }
 0x9ae   :  { %6238 = vmatpush1.bf16.msra.mxu0 %v6062_v11  ;;  %6402 = vmatpush1.bf16.msra.mxu1 %v6064_v50  ;;  %v6492_v11 = vld [vmem:[#allocation18 + $0x20] sm:$0xff]  ;;  %v6098_v50 = vunpack.c.h.s8.bf16 %v5840_v23  ;;  %v5844_v23 = vld [vmem:[#allocation15] sm:$0xf] }
 0x9af   :  { %6239 = vmatprep.subr.bf16.mxu0 %v6067_v52  ;;  %6403 = vmatprep.subr.bf16.mxu1 %v6069_v59  ;;  %v6100_v52 = vunpack.c.h.s8.bf16 %v5842_v51  ;;  %v5706_v59 = vmax.f32 %v5698_v32, 0.0  ;;  %v6514_v4 = vunpack.c.l.s8.bf16 %v6492_v11  ;;  %v6515_v53 = vunpack.c.h.s8.bf16 %v6492_v11  ;;  %v5845_v51 = vld [vmem:[#allocation17] sm:$0xf] }
 0x9b0   :  { %v6438_v32 = vrot.slane %v5844_v23, %v10726_v58  ;;  %v6467_v11 = vrot.slane %v5845_v51, %v10728_v2 }
 0x9b1   :  { %v5714_v0 = vpack.c.bf16 %v5706_v59, %v5706_v59  ;;  %v6471_v59 = vrot.slane %v5845_v51, %v10727_v60 }
 0x9b2   :  { %6240 = vmatpush1.bf16.msra.mxu0 %v6066_v48  ;;  %6404 = vmatpush1.bf16.msra.mxu1 %v6068_v57  ;;  %v6488_v48 = vld [vmem:[#allocation18] sm:$0xff] }
 0x9b3   :  { %6241 = vmatprep.subr.bf16.mxu0 %v6071_v12  ;;  %6405 = vmatprep.subr.bf16.mxu1 %v6073_v24  ;;  %v6496_v57 = vld [vmem:[#allocation18 + $0x40] sm:$0xff]  ;;  %v6506_v12 = vunpack.c.l.s8.bf16 %v6488_v48 }
 0x9b4   :  { %v6522_v24 = vunpack.c.l.s8.bf16 %v6496_v57  ;;  %v6523_v29 = vunpack.c.h.s8.bf16 %v6496_v57 }
 0x9b6   :  { %6242 = vmatpush1.bf16.msra.mxu0 %v6070_v37  ;;  %6406 = vmatpush1.bf16.msra.mxu1 %v6072_v1  ;;  %v6531_v37 = vunpack.c.h.s8.bf16 %v6500_v8  ;;  %v6493_v1 = vld [vmem:[#allocation18 + $0x28] sm:$0xff] }
 0x9b7   :  { %6243 = vmatprep.subr.bf16.mxu0 %v6075_v15  ;;  %6407 = vmatprep.subr.bf16.mxu1 %v6077_v55  ;;  %v6501_v15 = vld [vmem:[#allocation18 + $0x68] sm:$0xff]  ;;  %v6507_v55 = vunpack.c.h.s8.bf16 %v6488_v48  ;;  %v6516_v40 = vunpack.c.l.s8.bf16 %v6493_v1  ;;  %v6517_v45 = vunpack.c.h.s8.bf16 %v6493_v1 }
 0x9ba   :  { %6244 = vmatpush1.bf16.msra.mxu0 %v6074_v30  ;;  %6408 = vmatpush1.bf16.msra.mxu1 %v6076_v21  ;;  %v6532_v30 = vunpack.c.l.s8.bf16 %v6501_v15  ;;  %v6489_v21 = vld [vmem:[#allocation18 + $0x8] sm:$0xff] }
 0x9bb   :  { %6245 = vmatprep.subr.bf16.mxu0 %v6079_v43  ;;  %6409 = vmatprep.subr.bf16.mxu1 %v6081_v41  ;;  %v6497_v43 = vld [vmem:[#allocation18 + $0x48] sm:$0xff]  ;;  %v6508_v41 = vunpack.c.l.s8.bf16 %v6489_v21 }
 0x9bc   :  { %v6524_v54 = vunpack.c.l.s8.bf16 %v6497_v43  ;;  %v6525_v39 = vunpack.c.h.s8.bf16 %v6497_v43  ;;  %v7105_v43 = vld [vmem:[#allocation23] sm:$0xff]  }
 0x9be   :  { %6246 = vmatpush1.bf16.msra.mxu0 %v6078_v44  ;;  %6410 = vmatpush1.bf16.msra.mxu1 %v6080_v6  ;;  %v6533_v44 = vunpack.c.h.s8.bf16 %v6501_v15  ;;  %v6494_v6 = vld [vmem:[#allocation18 + $0x30] sm:$0xff] }
 0x9bf   :  { %6247 = vmatprep.subr.bf16.mxu0 %v6083_v61  ;;  %6411 = vmatprep.subr.bf16.mxu1 %v6085_v38  ;;  %v6502_v61 = vld [vmem:[#allocation18 + $0x70] sm:$0xff]  ;;  %v6509_v38 = vunpack.c.h.s8.bf16 %v6489_v21  ;;  %v6518_v47 = vunpack.c.l.s8.bf16 %v6494_v6  ;;  %v6519_v28 = vunpack.c.h.s8.bf16 %v6494_v6  ;;  %v7108_v6 = vld [vmem:[#allocation23 + $0x18] sm:$0xff]  }
 0x9c2   :  { %6248 = vmatpush1.bf16.msra.mxu0 %v6082_v13  ;;  %6412 = vmatpush1.bf16.msra.mxu1 %v6084_v10  ;;  %v6534_v13 = vunpack.c.l.s8.bf16 %v6502_v61  ;;  %v6490_v10 = vld [vmem:[#allocation18 + $0x10] sm:$0xff] }
 0x9c3   :  { %6249 = vmatprep.subr.bf16.mxu0 %v6087_v34  ;;  %6413 = vmatprep.subr.bf16.mxu1 %v6089_v56  ;;  %v6498_v34 = vld [vmem:[#allocation18 + $0x50] sm:$0xff]  ;;  %v6510_v56 = vunpack.c.l.s8.bf16 %v6490_v10 }
 0x9c4   :  { %v6526_v31 = vunpack.c.l.s8.bf16 %v6498_v34  ;;  %v6527_v22 = vunpack.c.h.s8.bf16 %v6498_v34 }
 0x9c6   :  { %6250 = vmatpush1.bf16.msra.mxu0 %v6086_v9  ;;  %6414 = vmatpush1.bf16.msra.mxu1 %v6088_v19  ;;  %v6535_v9 = vunpack.c.h.s8.bf16 %v6502_v61  ;;  %v6511_v19 = vunpack.c.h.s8.bf16 %v6490_v10  ;;  %v7109_v61 = vld [vmem:[#allocation23 + $0x20] sm:$0xff]  }
 0x9c7   :  { %6251 = vmatprep.subr.bf16.mxu0 %v6091_v16  ;;  %6415 = vmatprep.subr.bf16.mxu1 %v6093_v26  ;;  %v6520_v16 = vunpack.c.l.s8.bf16 %v6495_v7  ;;  %v6536_v26 = vunpack.c.l.s8.bf16 %v6503_v36 }
 0x9ca   :  { %6252 = vmatpush1.bf16.msra.mxu0 %v6090_v17  ;;  %6416 = vmatpush1.bf16.msra.mxu1 %v6092_v33  ;;  %v6512_v17 = vunpack.c.l.s8.bf16 %v6491_v42  ;;  %v6528_v33 = vunpack.c.l.s8.bf16 %v6499_v46 }
 0x9cb   :  { %6253 = vmatprep.subr.bf16.mxu0 %v6095_v35  ;;  %6417 = vmatprep.subr.bf16.mxu1 %v6097_v63  ;;  %v6529_v35 = vunpack.c.h.s8.bf16 %v6499_v46  ;;  %v7627_v63 = vmov 0.0  }
 0x9ce   :  { %6254 = vmatpush1.bf16.msra.mxu0 %v6094_v27  ;;  %6418 = vmatpush1.bf16.msra.mxu1 %v6096_v49  ;;  %v6434_v27 = vrot.slane %v5844_v23, %v10725_v62  ;;  %v6442_v49 = vrot.slane %v5844_v23, %v10728_v2 }
 0x9cf   :  { %6255 = vmatprep.subr.bf16.mxu0 %v6099_v3  ;;  %6419 = vmatprep.subr.bf16.mxu1 %v6101_v5  ;;  %v6446_v3 = vrot.slane %v5844_v23, %v10727_v60  ;;  %v6459_v5 = vrot.slane %v5845_v51, %v10725_v62 }
 0x9d2   :  { %6256 = vmatpush1.bf16.msra.mxu0 %v6098_v50  ;;  %6420 = vmatpush1.bf16.msra.mxu1 %v6100_v52  ;;  %v6463_v52 = vrot.slane %v5845_v51, %v10726_v58 }
 0x9d3   :  { %6805 = vmatprep.subr.bf16.mxu0 %v6514_v4  ;;  %6827 = vmatprep.subr.bf16.mxu1 %v6530_v14 }
 0x9d5   :  { %6258 = vmatmul.mubr.bf16.vlgmr.msra.gmra.mrb[28].mxu0 %v5714_v0  ;;  %6422 = vmatmul.mubr.bf16.vlgmr.msra.gmra.mrb[36].mxu1 %v5714_v0 }
 0x9d6   :  { %6806 = vmatpush3.bf16.msra.mxu0 %v6506_v12  ;;  %6828 = vmatpush3.bf16.msra.mxu1 %v6522_v24 }
 0x9d7   :  { %6807 = vmatprep.subr.bf16.mxu0 %v6515_v53  ;;  %6829 = vmatprep.subr.bf16.mxu1 %v6531_v37 }
 0x9da   :  { %6808 = vmatpush3.bf16.msra.mxu0 %v6507_v55  ;;  %6830 = vmatpush3.bf16.msra.mxu1 %v6523_v29 }
 0x9db   :  { %6809 = vmatprep.subr.bf16.mxu0 %v6516_v40  ;;  %6831 = vmatprep.subr.bf16.mxu1 %v6532_v30 }
 0x9de   :  { %6810 = vmatpush3.bf16.msra.mxu0 %v6508_v41  ;;  %6832 = vmatpush3.bf16.msra.mxu1 %v6524_v54 }
 0x9df   :  { %6811 = vmatprep.subr.bf16.mxu0 %v6517_v45  ;;  %6833 = vmatprep.subr.bf16.mxu1 %v6533_v44  ;;  %v7106_v45 = vld [vmem:[#allocation23 + $0x8] sm:$0xff]   ;;  %v7107_v44 = vld [vmem:[#allocation23 + $0x10] sm:$0xff]  }
 0x9e2   :  { %6812 = vmatpush3.bf16.msra.mxu0 %v6509_v38  ;;  %6834 = vmatpush3.bf16.msra.mxu1 %v6525_v39  ;;  %v7110_v38 = vld [vmem:[#allocation23 + $0x28] sm:$0xff]   ;;  %v7111_v39 = vld [vmem:[#allocation23 + $0x30] sm:$0xff]  }
 0x9e3   :  { %6813 = vmatprep.subr.bf16.mxu0 %v6518_v47  ;;  %6835 = vmatprep.subr.bf16.mxu1 %v6534_v13  ;;  %v7112_v47 = vld [vmem:[#allocation23 + $0x38] sm:$0xff]  }
 0x9e6   :  { %6814 = vmatpush3.bf16.msra.mxu0 %v6510_v56  ;;  %6836 = vmatpush3.bf16.msra.mxu1 %v6526_v31 }
 0x9e7   :  { %6815 = vmatprep.subr.bf16.mxu0 %v6519_v28  ;;  %6837 = vmatprep.subr.bf16.mxu1 %v6535_v9 }
 0x9ea   :  { %6816 = vmatpush3.bf16.msra.mxu0 %v6511_v19  ;;  %6838 = vmatpush3.bf16.msra.mxu1 %v6527_v22  ;;  %v6792_v22 = vld [vmem:[#allocation20] ss:$0 sm:$0xff] }
 0x9eb   :  { %6817 = vmatprep.subr.bf16.mxu0 %v6520_v16  ;;  %6839 = vmatprep.subr.bf16.mxu1 %v6536_v26  ;;  %v6793_v26 = vld [vmem:[#allocation21] ss:$0 sm:$0xff] }
 0x9ee   :  { %6818 = vmatpush3.bf16.msra.mxu0 %v6512_v17  ;;  %6840 = vmatpush3.bf16.msra.mxu1 %v6528_v33 }
 0x9ef   :  { %6819 = vmatprep.subr.bf16.mxu0 %v6521_v25  ;;  %6841 = vmatprep.subr.bf16.mxu1 %v6537_v20  ;;  %v6794_v25 = vld [vmem:[#allocation24] ss:$0 sm:$0xff] }
 0x9f2   :  { %6820 = vmatpush3.bf16.msra.mxu0 %v6513_v18  ;;  %6842 = vmatpush3.bf16.msra.mxu1 %v6529_v35 }
 0x9f3   :  { %6858 = vmatprep.subr.bf16.mxu0 %v7627_v63 }
 0xaa8   :  { %v6259_v8 = vpop.f32.mrb[28].mxu0  ;;  %v6423_v50 = vpop.f32.mrb[36].mxu1 }
 0xaa9   :  { %v6451_v4 = vmul.f32 %v6434_v27, %v6259_v8  ;;  %v6453_v14 = vmul.f32 %v6442_v49, %v6423_v50  ;;  %v6261_v48 = vpop.f32.mrb[29].mxu0  ;;  %v6425_v57 = vpop.f32.mrb[37].mxu1 }
 0xaaa   :  { %v6452_v12 = vmul.f32 %v6438_v32, %v6261_v48  ;;  %v6454_v24 = vmul.f32 %v6446_v3, %v6425_v57  ;;  %v6263_v0 = vpop.f32.mrb[30].mxu0  ;;  %v6427_v53 = vpop.f32.mrb[38].mxu1 }
 0xaab   :  { %v6476_v37 = vadd.f32 %v6459_v5, %v6451_v4  ;;  %v6478_v1 = vadd.f32 %v6467_v11, %v6453_v14  ;;  %v6264_v15 = vpop.f32.mrb[31].mxu0  ;;  %v6428_v62 = vpop.f32.mrb[39].mxu1 }
 0xaac   :  { %v6477_v55 = vadd.f32 %v6463_v52, %v6452_v12  ;;  %v6479_v2 = vadd.f32 %v6471_v59, %v6454_v24 }
 0xaad   :  { %v6480_v29 = vmax.f32 %v6476_v37, 0.0  ;;  %v6482_v40 = vmax.f32 %v6478_v1, 0.0 }
 0xaae   :  { %v6481_v30 = vmax.f32 %v6477_v55, 0.0  ;;  %v6483_v58 = vmax.f32 %v6479_v2, 0.0 }
 0xaaf   :  { %v6484_v41 = vpack.c.bf16 %v6480_v29, %v6480_v29  ;;  %v6486_v54 = vpack.c.bf16 %v6482_v40, %v6482_v40 }
 0xab0   :  { %v6485_v21 = vpack.c.bf16 %v6481_v30, %v6481_v30  ;;  %v6487_v60 = vpack.c.bf16 %v6483_v58, %v6483_v58 }
 0xab2   :  { %6570 = vmatprep.mubr.bf16.mxu0 %v6485_v21  ;;  %6610 = vmatprep.mubr.bf16.mxu1 %v6487_v60 }
 0xab3   :  { %6571 = vmatmul.mubr.bf16.vlgmr.msra.gmra.mrb[32].mxu0 %v6484_v41  ;;  %6611 = vmatmul.mubr.bf16.vlgmr.msra.gmra.mrb[40].mxu1 %v6486_v54 }
 0xab4   :  { %6859 = vmatpush3.bf16.msra.mxu0 %v7105_v43  ;;  %6874 = vmatprep.mubr.msk.bf16.mxu0 %vm7628_vm1, %v7627_v63 }
 0xab5   :  { %6860 = vmatprep.subr.bf16.mxu0 %v7627_v63 }
 0xab8   :  { %6861 = vmatpush3.bf16.msra.mxu0 %v7106_v45 }
 0xab9   :  { %6862 = vmatprep.subr.bf16.mxu0 %v7627_v63 }
 0xabc   :  { %6863 = vmatpush3.bf16.msra.mxu0 %v7107_v44 }
 0xabd   :  { %6864 = vmatprep.subr.bf16.mxu0 %v7627_v63 }
 0xac0   :  { %6865 = vmatpush3.bf16.msra.mxu0 %v7108_v6 }
 0xac1   :  { %6866 = vmatprep.subr.bf16.mxu0 %v7627_v63 }
 0xac4   :  { %6867 = vmatpush3.bf16.msra.mxu0 %v7109_v61 }
 0xac5   :  { %6868 = vmatprep.subr.bf16.mxu0 %v7627_v63 }
 0xac8   :  { %6869 = vmatpush3.bf16.msra.mxu0 %v7110_v38 }
 0xac9   :  { %6870 = vmatprep.subr.bf16.mxu0 %v7627_v63 }
 0xacc   :  { %6871 = vmatpush3.bf16.msra.mxu0 %v7111_v39 }
 0xacd   :  { %6872 = vmatprep.subr.bf16.mxu0 %v7627_v63 }
 0xad0   :  { %6873 = vmatpush3.bf16.msra.mxu0 %v7112_v47 }
 0xb86   :  { %v6821_v13 = vpop.f32.mrb[32].mxu0  ;;  %v6843_v10 = vpop.f32.mrb[40].mxu1 }
 0xb87   :  { %v6822_v34 = vpop.f32.mrb[33].mxu0  ;;  %v6844_v56 = vpop.f32.mrb[41].mxu1 }
 0xb88   :  { %v6823_v31 = vadd.f32 %v6822_v34, %v6821_v13  ;;  %v6845_v28 = vadd.f32 %v6844_v56, %v6843_v10  ;;  %v6824_v9 = vpop.f32.mrb[34].mxu0  ;;  %v6846_v19 = vpop.f32.mrb[42].mxu1 }
 0xb89   :  { %v6825_v7 = vpop.f32.mrb[35].mxu0  ;;  %v6847_v36 = vpop.f32.mrb[43].mxu1 }
 0xb8a   :  { %v6613_v16 = vadd.f32 %v6845_v28, %v6823_v31 }
 0xb8c   :  { %v6624_v42 = vmul.f32 %v6792_v22, %v6613_v16 }
 0xb8e   :  { %v6631_v46 = vadd.f32 %v6793_v26, %v6624_v42 }
 0xb90   :  { %v6632_v17 = vmax.f32 %v6631_v46, 0.0 }
 0xb92   :  { %v6633_v33 = vpack.c.bf16 %v6632_v17, %v6632_v17 }
 0xb94   :  { %6875 = vmatmul.mubr.bf16.vlgmr.msra.gmra.mrb[36].mxu0 %v6633_v33 }
 0xc67   :  { %v6739_v20 = vpop.f32.mrb[36].mxu0 }
 0xc68   :  { %v6740_v18 = vadd.f32 %v6794_v25, %v6739_v20  ;;  %v6876_v35 = vpop.f32.mrb[37].mxu0 }
 0xc69   :  { %v6742_v63 = vpop.f32.mrb[38].mxu0 }
 0xc6a   :  { %6745 = vmax.xlane.f32.xlu0 %v6740_v18  ;;  %v6877_v23 = vpop.f32.mrb[39].mxu0 }
 0xcf7   :  { %v6746_v51 = vpop.xlane.xlu0 %6745 }
 0xcf8   :  { %v6747_v27 = vsub.f32 %v6740_v18, %v6746_v51 }
 0xcfa   :  { %v6748_v49 = vmul.f32 1.442695, %v6747_v27 }
 0xcfc   :  { %7113 = vpow2.f32 %v6748_v49 }
 0xd06   :  { %v7114_v32 = vpop.eup %7113 }
 0xd07   :  { %6750 = vadd.xlane.f32.xlu0 %v7114_v32 }
 0xd94   :  { %v6751_v3 = vpop.xlane.xlu0 %6750 }
 0xd95   :  { %7115 = vrcp.f32 %v6751_v3 }
 0xd9f   :  { %v7116_v5 = vpop.eup %7115 }
 0xda0   :  { %v6753_v11 = vmul.f32 %v7116_v5, %v7114_v32 }
 0xda2   :  { %6754 = vst [vmem:[%s10733_s16] sm:$0xff] %v6753_v11 }
 0xda3   :  { %6759 = vsyncpa [#allocation5], 1 }
 0xda4   :  { %6760 = vsyncpa [#allocation7], 1 }
 0xda5   :  { %6761 = vsyncpa [#allocation10], 1 }
 0xda6   :  { %6762 = vsyncpa [#allocation13], 1 }
 0xda7   :  { %6763 = vsyncpa [#allocation16], 1 }
 0xda8   :  { %6764 = vsyncpa [#allocation19], 1 }
 0xda9   :  { %6765 = vsyncpa [#allocation22], 1 }
 0xdaa   :  { %6766 = vsyncpa [#allocation25], 1 }
 0xdab   :  { %6767 = vsyncmov [#allocation3] }
 0xdae   :  { %s6768_s7 = vpop.sfrf %6767 }
 0xdaf   :  { %p6803_p7 = scmp.ne.s32.totalorder %s6768_s7, 0 }
 0xdb1   :  { %6772 = shalt.err (%p6803_p7)  }
 0xdb2   :  { %6774 = vsyncmov [#allocation3 + $0x1] }
 0xdb5   :  { %s6775_s6 = vpop.sfrf %6774 }
 0xdb6   :  { %p6804_p10 = scmp.ne.s32.totalorder %s6775_s6, 0 }
 0xdb8   :  { %6779 = shalt.err (%p6804_p10)  }

</bundles_post_ra>
